<compile_context>
chip_gen: v7x
topology: tpu7x:2x2x1
jax: 0.10.0
libtpu: 0.0.40
codegen_flags: <defaults>
</compile_context>

<pallas_src>
import functools
import math

import jax
import jax.numpy as jnp
from jax import lax
from jax.experimental import pallas as pl
from jax.experimental.pallas import tpu as pltpu


BANDS = ((0.0, 0.1), (0.1, 0.25), (0.25, 0.5), (0.5, 0.75), (0.75, 1.0))

# (kh, kw, sh, sw, ph, pw) for the 5 per-band conv layers and conv_post.
LAYER_CFGS = (
    (3, 9, 1, 1, 1, 4),
    (3, 9, 1, 2, 1, 4),
    (3, 9, 1, 2, 1, 4),
    (3, 9, 1, 2, 1, 4),
    (3, 3, 1, 1, 1, 1),
)
POST_CFG = (3, 3, 1, 1, 1, 1)

_VMEM_LIMIT = 48 * 1024 * 1024


def _round_up(x, m):
    return ((x + m - 1) // m) * m


# ----------------------------------------------------------------------------
# Pallas kernels
# ----------------------------------------------------------------------------
def _conv_tap_kernel(rows_ref, w_ref, b_ref, o_ref, *, kw, sw, negative_slope):
    """One grid step = one (batch, band): whole-band conv via kw accumulating dots.

    rows_ref: (sw, kh*C_in, N+128) bf16  kh-expanded, stride-deinterleaved,
              (Ho, Wq)-flattened activation rows (flattened spatial on lanes).
    w_ref:    (kw, C_out, kh*C_in) bf16  per-kw-tap weight matrices.
    b_ref:    (C_out, 1) f32
    o_ref:    (C_out, N) bf16, N a multiple of 128 -> lane-dense stores.
    """
    n_out = o_ref.shape[-1]
    acc = None
    for j in range(kw):                       # static, unrolled
        parity, off = j % sw, j // sw
        x = rows_ref[parity, :, off:off + n_out]      # contiguous lane slice
        part = jnp.dot(w_ref[j], x, preferred_element_type=jnp.float32)
        acc = part if acc is None else acc + part
    acc = acc + b_ref[...]
    if negative_slope is not None:
        acc = jnp.where(acc >= 0.0, acc, negative_slope * acc)
    o_ref[...] = acc.astype(o_ref.dtype)


def _dft_kernel(fr_ref, basis_ref, o_ref):
    # fr_ref: (TM, n_fft) bf16 frames; basis_ref: (n_fft, F2) bf16 = [win*cos | -win*sin]
    # o_ref: (TM, F2) bf16 -- single fused matmul, lane-dense output.
    o_ref[...] = jnp.dot(fr_ref[...], basis_ref[...],
                         preferred_element_type=jnp.float32).astype(o_ref.dtype)


# ----------------------------------------------------------------------------
# Conv2d (+bias, optional leaky_relu) for all bands of one layer in ONE call
# ----------------------------------------------------------------------------
def conv2d_multiband(x_list, w_stack, b_stack, cfg, negative_slope):
    """Same Conv2d cfg (stride 1 in H) with per-band weights applied to every
    band in x_list (NCHW, different widths), fused into a single pallas_call.

    x_list:  list of (B, C_in, H, W_g)
    w_stack: (G, C_out, C_in, kh, kw)   (PyTorch OIHW per band)
    b_stack: (G, C_out)
    returns: list of (B, C_out, Ho, Wo_g) bf16
    """
    kh, kw, sh, sw, ph, pw = cfg
    assert sh == 1
    G = len(x_list)
    B, C_in, H, _ = x_list[0].shape
    C_out = w_stack.shape[1]
    Ho = H + 2 * ph - kh + 1
    khc = kh * C_in

    rows_list, meta = [], []
    for x in x_list:
        W = x.shape[3]
        Wo = (W + 2 * pw - kw) // sw + 1
        W_pad = _round_up(W + 2 * pw, sw)
        Wq = W_pad // sw
        xb = x.astype(jnp.bfloat16)                       # cast BEFORE pad/expansion
        xp = jnp.pad(xb, ((0, 0), (0, 0), (ph, ph), (pw, W_pad - W - pw)))
        # kh shifted copies stacked on channels: rows[b, i*C+c, h, w] = xp[b, c, h+i, w]
        rows = jnp.concatenate([xp[:, :, i:i + Ho, :] for i in range(kh)], axis=1)
        # deinterleave W by stride parity so each kw tap is a contiguous lane slice
        rows = rows.reshape(B, khc, Ho, Wq, sw)
        rows = jnp.moveaxis(rows, -1, 1).reshape(B, sw, khc, Ho * Wq)
        rows_list.append(rows)
        meta.append((Wq, Wo))

    N = _round_up(max(r.shape[-1] for r in rows_list), 128)   # lane-dense output width
    Ltot = N + 128                                            # headroom for tap offsets
    rows_all = jnp.stack(
        [jnp.pad(r, ((0, 0), (0, 0), (0, 0), (0, Ltot - r.shape[-1])))
         for r in rows_list], axis=1)                         # (B, G, sw, khc, Ltot)

    # per-kw-tap weights: taps[g, j, co, i*C+c] = w[g, co, c, i, j]
    w_taps = jnp.transpose(w_stack, (0, 4, 1, 3, 2)).reshape(G, kw, C_out, khc)
    w_taps = w_taps.astype(jnp.bfloat16)
    b2 = b_stack.reshape(G, C_out, 1).astype(jnp.float32)

    out = pl.pallas_call(
        functools.partial(_conv_tap_kernel, kw=kw, sw=sw,
                          negative_slope=negative_slope),
        out_shape=jax.ShapeDtypeStruct((B, G, C_out, N), jnp.bfloat16),
        grid=(B, G),
        in_specs=[
            pl.BlockSpec((None, None, sw, khc, Ltot), lambda b, g: (b, g, 0, 0, 0)),
            pl.BlockSpec((None, kw, C_out, khc), lambda b, g: (g, 0, 0, 0)),
            pl.BlockSpec((None, C_out, 1), lambda b, g: (g, 0, 0)),
        ],
        out_specs=pl.BlockSpec((None, None, C_out, N), lambda b, g: (b, g, 0, 0)),
        compiler_params=pltpu.CompilerParams(
            dimension_semantics=("parallel", "parallel"),
            vmem_limit_bytes=_VMEM_LIMIT),
    )(rows_all, w_taps, b2)

    res = []
    for g, (Wq, Wo) in enumerate(meta):
        o = out[:, g, :, :Ho * Wq].reshape(B, C_out, Ho, Wq)[..., :Wo]
        res.append(o)
    return res


# ----------------------------------------------------------------------------
# Spectrogram: normalization + framing (glue) and fused windowed-DFT matmul
# ----------------------------------------------------------------------------
def spectrogram_pallas(x, n_fft, hop):
    """x: (B, T) -> (B, 2, n_frames, n_fft//2+1) bf16.

    Matches torch view_as_real(stft).permute(0,3,2,1) with centered,
    reflect-padded, periodic-Hann STFT (power=None, normalized=False).
    Hann window folded into a single [cos | -sin] basis -> one matmul."""
    x = x - jnp.mean(x, axis=-1, keepdims=True)
    x = 0.8 * x / (jnp.max(jnp.abs(x), axis=-1, keepdims=True) + 1e-9)
    pad = n_fft // 2
    xp = jnp.pad(x, ((0, 0), (pad, pad)), mode="reflect")
    B = xp.shape[0]
    n_frames = (xp.shape[-1] - n_fft) // hop + 1
    idx = jnp.arange(n_frames)[:, None] * hop + jnp.arange(n_fft)[None, :]
    frames = xp[:, idx].astype(jnp.bfloat16)                 # (B, NF, n_fft)

    n = jnp.arange(n_fft, dtype=jnp.float32)
    win = 0.5 - 0.5 * jnp.cos(2.0 * jnp.pi * n / n_fft)      # periodic Hann
    F = n_fft // 2 + 1
    k = jnp.arange(F, dtype=jnp.float32)
    ang = 2.0 * jnp.pi * n[:, None] * k[None, :] / n_fft
    basis = jnp.concatenate([win[:, None] * jnp.cos(ang),
                             -win[:, None] * jnp.sin(ang)], axis=1)   # (n_fft, 2F)
    F2 = _round_up(2 * F, 128)
    basis = jnp.pad(basis, ((0, 0), (0, F2 - 2 * F))).astype(jnp.bfloat16)

    NF128 = _round_up(n_frames, 128)
    TM = min(1024, NF128)
    NF_pad = _round_up(n_frames, TM)
    frames = jnp.pad(frames, ((0, 0), (0, NF_pad - n_frames), (0, 0)))

    out = pl.pallas_call(
        _dft_kernel,
        out_shape=jax.ShapeDtypeStruct((B, NF_pad, F2), jnp.bfloat16),
        grid=(B, NF_pad // TM),
        in_specs=[
            pl.BlockSpec((None, TM, n_fft), lambda b, m: (b, m, 0)),
            pl.BlockSpec((n_fft, F2), lambda b, m: (0, 0)),
        ],
        out_specs=pl.BlockSpec((None, TM, F2), lambda b, m: (b, m, 0)),
        compiler_params=pltpu.CompilerParams(
            dimension_semantics=("parallel", "parallel"),
            vmem_limit_bytes=_VMEM_LIMIT),
    )(frames, basis)

    out = out[:, :n_frames, :]
    return jnp.stack([out[..., :F], out[..., F:2 * F]], axis=1)   # (B, 2, NF, F)


# ----------------------------------------------------------------------------
# Parameters (weight_norm at init is the identity reparameterisation)
# ----------------------------------------------------------------------------
def init_params(key, channels=32, n_bands=len(BANDS)):
    def conv_init(k, cin, cout, kh, kw):
        k1, k2 = jax.random.split(k)
        w = jax.random.normal(k1, (cout, cin, kh, kw), jnp.float32) / math.sqrt(cin * kh * kw)
        b = jax.random.normal(k2, (cout,), jnp.float32) * 0.01
        return w, b

    chans = [2] + [channels] * 5
    band_params = []
    for _ in range(n_bands):
        stack = []
        for li, cfg in enumerate(LAYER_CFGS):
            key, sub = jax.random.split(key)
            stack.append(conv_init(sub, chans[li], chans[li + 1], cfg[0], cfg[1]))
        band_params.append(stack)
    key, sub = jax.random.split(key)
    post = conv_init(sub, channels, 1, POST_CFG[0], POST_CFG[1])
    return {"bands": band_params, "post": post}


# ----------------------------------------------------------------------------
# Forward pass (matches DiscriminatorB.forward, incl. fmap ordering)
# ----------------------------------------------------------------------------
def discriminator_b_forward(x, params, window_length, hop_factor=0.25):
    # x: (B, 1, T)
    hop = int(window_length * hop_factor)
    spec = spectrogram_pallas(x[:, 0, :], window_length, hop)   # (B, 2, NF, F)
    n_bins = window_length // 2 + 1
    band_idx = [(int(b0 * n_bins), int(b1 * n_bins)) for b0, b1 in BANDS]
    bands = [spec[..., lo:hi] for lo, hi in band_idx]
    n_bands = len(bands)

    fmaps_per_band = [[] for _ in range(n_bands)]
    for li, cfg in enumerate(LAYER_CFGS):
        w_stack = jnp.stack([params["bands"][g][li][0] for g in range(n_bands)])
        b_stack = jnp.stack([params["bands"][g][li][1] for g in range(n_bands)])
        bands = conv2d_multiband(bands, w_stack, b_stack, cfg, negative_slope=0.1)
        if li > 0:
            for g in range(n_bands):
                fmaps_per_band[g].append(bands[g])

    fmap = [t for per_band in fmaps_per_band for t in per_band]  # band-major (torch order)
    xcat = jnp.concatenate(bands, axis=-1)                       # cat along freq (last dim)
    w, b = params["post"]
    xo = conv2d_multiband([xcat], w[None], b[None], POST_CFG, negative_slope=None)[0]
    fmap.append(xo)
    return xo, fmap


# ----------------------------------------------------------------------------
# Pure-JAX reference (rfft + lax.conv) for correctness checking.  Operands and
# activations are rounded through bf16 like the Pallas path.
# ----------------------------------------------------------------------------
def _reference_forward(x, params, window_length, hop_factor=0.25):
    def r(v):
        return v.astype(jnp.bfloat16).astype(jnp.float32)

    hop = int(window_length * hop_factor)
    xs = x[:, 0, :]
    xs = xs - jnp.mean(xs, axis=-1, keepdims=True)
    xs = 0.8 * xs / (jnp.max(jnp.abs(xs), axis=-1, keepdims=True) + 1e-9)
    pad = window_length // 2
    xp = jnp.pad(xs, ((0, 0), (pad, pad)), mode="reflect")
    n_frames = (xp.shape[-1] - window_length) // hop + 1
    n = jnp.arange(window_length)
    idx = jnp.arange(n_frames)[:, None] * hop + n[None, :]
    win = 0.5 - 0.5 * jnp.cos(2.0 * jnp.pi * n / window_length)
    frames = xp[:, idx] * win[None, None, :]
    sp = jnp.fft.rfft(frames, axis=-1)                        # (B, NF, F)
    spec = jnp.stack([sp.real, sp.imag], axis=1).astype(jnp.float32)

    def conv(v, w, b, cfg, slope):
        kh, kw, sh, sw, ph, pw = cfg
        y = lax.conv_general_dilated(
            r(v), r(w), window_strides=(sh, sw),
            padding=((ph, ph), (pw, pw)),
            dimension_numbers=("NCHW", "OIHW", "NCHW"),
            precision=lax.Precision.HIGHEST)
        y = y + b[None, :, None, None]
        if slope is not None:
            y = jnp.where(y >= 0.0, y, slope * y)
        return r(y)

    n_bins = window_length // 2 + 1
    band_idx = [(int(b0 * n_bins), int(b1 * n_bins)) for b0, b1 in BANDS]
    fmap, outs = [], []
    for (lo, hi), stack in zip(band_idx, params["bands"]):
        band = spec[..., lo:hi]
        for i, ((w, b), cfg) in enumerate(zip(stack, LAYER_CFGS)):
            band = conv(band, w, b, cfg, 0.1)
            if i > 0:
                fmap.append(band)
        outs.append(band)
    xcat = jnp.concatenate(outs, axis=-1)
    w, b = params["post"]
    xo = conv(xcat, w, b, POST_CFG, None)
    fmap.append(xo)
    return xo, fmap


if __name__ == "__main__":
    key = jax.random.PRNGKey(0)
    k_x, k_p = jax.random.split(key)

    B, T = 2, 1024
    window_length = 64          # small test size -> 33 freq bins, 65 frames
    channels = 32

    x = jax.random.normal(k_x, (B, 1, T), jnp.float32)
    params = init_params(k_p, channels=channels)

    fwd = jax.jit(functools.partial(discriminator_b_forward,
                                    window_length=window_length))
    out, fmap = fwd(x, params)
    out = jax.block_until_ready(out)
    fmap = [jax.block_until_ready(f) for f in fmap]

    # sanity check against the pure-JAX reference (loose tol: bf16 MXU path)
    ref_out, ref_fmap = _reference_forward(x, params, window_length)
    assert out.shape == ref_out.shape, (out.shape, ref_out.shape)
    assert len(fmap) == len(ref_fmap) == 21, (len(fmap), len(ref_fmap))
    assert bool(jnp.allclose(out.astype(jnp.float32), ref_out, rtol=1e-1, atol=1e-1))
    for f, rf in zip(fmap, ref_fmap):
        assert f.shape == rf.shape, (f.shape, rf.shape)
        assert bool(jnp.allclose(f.astype(jnp.float32), rf, rtol=1e-1, atol=1e-1))

    print("KERNEL_OK")
</pallas_src>

<mosaic_0001>
module attributes {stable_mosaic.version = 11 : i64} {
  func.func @_dft_kernel(%arg0: i32, %arg1: i32, %arg2: memref<1x128x64xbf16, #tpu.memory_space<vmem>>, %arg3: memref<64x128xbf16, #tpu.memory_space<vmem>>, %arg4: memref<1x128x128xbf16, #tpu.memory_space<vmem>>) attributes {dimension_semantics = [#tpu.dimension_semantics<parallel>, #tpu.dimension_semantics<parallel>], iteration_bounds = array<i64: 2, 1>, scalar_prefetch = 0 : i64, scratch_operands = 0 : i64, tpu.core_type = #tpu.core_type<tc>, window_params = [{transform_indices = @transform_0, window_bounds = array<i64: 1, 128, 64>}, {pipeline_mode = #tpu.pipeline_mode<synchronous>, transform_indices = @transform_1, window_bounds = array<i64: 64, 128>}, {transform_indices = @transform_2, window_bounds = array<i64: 1, 128, 128>}]} {
    %c0 = arith.constant 0 : index
    %c0_0 = arith.constant 0 : index
    %c0_1 = arith.constant 0 : index
    %0 = vector.load %arg2[%c0, %c0_0, %c0_1] : memref<1x128x64xbf16, #tpu.memory_space<vmem>>, vector<1x128x64xbf16>
    %1 = vector.shape_cast %0 : vector<1x128x64xbf16> to vector<128x64xbf16>
    %c0_2 = arith.constant 0 : index
    %c0_3 = arith.constant 0 : index
    %2 = vector.load %arg3[%c0_2, %c0_3] : memref<64x128xbf16, #tpu.memory_space<vmem>>, vector<64x128xbf16>
    %cst = arith.constant dense<0.000000e+00> : vector<128x128xf32>
    %3 = tpu.matmul %1, %2, %cst {dimension_numbers = #tpu.dot_dimension_numbers<[1], [0], [0], [1], [0, 0, 1, 1], [], []>} : vector<128x64xbf16>, vector<64x128xbf16>, vector<128x128xf32> -> vector<128x128xf32>
    %4 = arith.truncf %3 : vector<128x128xf32> to vector<128x128xbf16>
    %c0_4 = arith.constant 0 : index
    %c0_5 = arith.constant 0 : index
    %c0_6 = arith.constant 0 : index
    %5 = vector.load %arg4[%c0_4, %c0_5, %c0_6] : memref<1x128x128xbf16, #tpu.memory_space<vmem>>, vector<1x128x128xbf16>
    %6 = vector.shape_cast %5 : vector<1x128x128xbf16> to vector<128x128xbf16>
    %7 = vector.shape_cast %4 : vector<128x128xbf16> to vector<1x128x128xbf16>
    tpu.vector_store %arg4[%c0_4, %c0_5, %c0_6], %7 {strides = array<i32>} : memref<1x128x128xbf16, #tpu.memory_space<vmem>>, vector<1x128x128xbf16>,
    return
  }
  func.func @transform_0(%arg0: i32, %arg1: i32) -> (i32, i32, i32) {
    %c0_i32 = arith.constant 0 : i32
    %c0_i32_0 = arith.constant 0 : i32
    return %arg0, %arg1, %c0_i32 : i32, i32, i32
  }
  func.func @transform_1(%arg0: i32, %arg1: i32) -> (i32, i32) {
    %c0_i32 = arith.constant 0 : i32
    %c0_i32_0 = arith.constant 0 : i32
    %c0_i32_1 = arith.constant 0 : i32
    return %c0_i32, %c0_i32_0 : i32, i32
  }
  func.func @transform_2(%arg0: i32, %arg1: i32) -> (i32, i32, i32) {
    %c0_i32 = arith.constant 0 : i32
    %c0_i32_0 = arith.constant 0 : i32
    return %arg0, %arg1, %c0_i32 : i32, i32, i32
  }
}

module attributes {stable_mosaic.version = 11 : i64} {
  func.func @_conv_tap_kernel(%arg0: i32, %arg1: i32, %arg2: memref<1x1x1x6x1280xbf16, #tpu.memory_space<vmem>>, %arg3: memref<1x9x32x6xbf16, #tpu.memory_space<vmem>>, %arg4: memref<1x32x1xf32, #tpu.memory_space<vmem>>, %arg5: memref<1x1x32x1152xbf16, #tpu.memory_space<vmem>>) attributes {dimension_semantics = [#tpu.dimension_semantics<parallel>, #tpu.dimension_semantics<parallel>], iteration_bounds = array<i64: 2, 5>, scalar_prefetch = 0 : i64, scratch_operands = 0 : i64, tpu.core_type = #tpu.core_type<tc>, window_params = [{transform_indices = @transform_0, window_bounds = array<i64: 1, 1, 1, 6, 1280>}, {transform_indices = @transform_1, window_bounds = array<i64: 1, 9, 32, 6>}, {transform_indices = @transform_2, window_bounds = array<i64: 1, 32, 1>}, {transform_indices = @transform_3, window_bounds = array<i64: 1, 1, 32, 1152>}]} {
    %c0 = arith.constant 0 : index
    %c0_0 = arith.constant 0 : index
    %c0_1 = arith.constant 0 : index
    %c0_2 = arith.constant 0 : index
    %c0_3 = arith.constant 0 : index
    %0 = vector.load %arg2[%c0, %c0_0, %c0_1, %c0_2, %c0_3] : memref<1x1x1x6x1280xbf16, #tpu.memory_space<vmem>>, vector<1x1x1x6x1152xbf16>
    %1 = vector.shape_cast %0 : vector<1x1x1x6x1152xbf16> to vector<6x1152xbf16>
    %c0_4 = arith.constant 0 : index
    %c0_5 = arith.constant 0 : index
    %c0_6 = arith.constant 0 : index
    %c0_7 = arith.constant 0 : index
    %2 = vector.load %arg3[%c0_4, %c0_5, %c0_6, %c0_7] : memref<1x9x32x6xbf16, #tpu.memory_space<vmem>>, vector<1x1x32x6xbf16>
    %3 = vector.shape_cast %2 : vector<1x1x32x6xbf16> to vector<32x6xbf16>
    %cst = arith.constant dense<0.000000e+00> : vector<32x1152xf32>
    %4 = tpu.matmul %3, %1, %cst {dimension_numbers = #tpu.dot_dimension_numbers<[1], [0], [0], [1], [0, 0, 1, 1], [], []>} : vector<32x6xbf16>, vector<6x1152xbf16>, vector<32x1152xf32> -> vector<32x1152xf32>
    %c0_8 = arith.constant 0 : index
    %c0_9 = arith.constant 0 : index
    %c0_10 = arith.constant 0 : index
    %c0_11 = arith.constant 0 : index
    %c1 = arith.constant 1 : index
    %5 = vector.load %arg2[%c0_8, %c0_9, %c0_10, %c0_11, %c1] : memref<1x1x1x6x1280xbf16, #tpu.memory_space<vmem>>, vector<1x1x1x6x1152xbf16>
    %6 = vector.shape_cast %5 : vector<1x1x1x6x1152xbf16> to vector<6x1152xbf16>
    %c0_12 = arith.constant 0 : index
    %c1_13 = arith.constant 1 : index
    %c0_14 = arith.constant 0 : index
    %c0_15 = arith.constant 0 : index
    %7 = vector.load %arg3[%c0_12, %c1_13, %c0_14, %c0_15] : memref<1x9x32x6xbf16, #tpu.memory_space<vmem>>, vector<1x1x32x6xbf16>
    %8 = vector.shape_cast %7 : vector<1x1x32x6xbf16> to vector<32x6xbf16>
    %cst_16 = arith.constant dense<0.000000e+00> : vector<32x1152xf32>
    %9 = tpu.matmul %8, %6, %cst_16 {dimension_numbers = #tpu.dot_dimension_numbers<[1], [0], [0], [1], [0, 0, 1, 1], [], []>} : vector<32x6xbf16>, vector<6x1152xbf16>, vector<32x1152xf32> -> vector<32x1152xf32>
    %10 = arith.addf %4, %9 : vector<32x1152xf32>
    %c0_17 = arith.constant 0 : index
    %c0_18 = arith.constant 0 : index
    %c0_19 = arith.constant 0 : index
    %c0_20 = arith.constant 0 : index
    %c2 = arith.constant 2 : index
    %11 = vector.load %arg2[%c0_17, %c0_18, %c0_19, %c0_20, %c2] : memref<1x1x1x6x1280xbf16, #tpu.memory_space<vmem>>, vector<1x1x1x6x1152xbf16>
    %12 = vector.shape_cast %11 : vector<1x1x1x6x1152xbf16> to vector<6x1152xbf16>
    %c0_21 = arith.constant 0 : index
    %c2_22 = arith.constant 2 : index
    %c0_23 = arith.constant 0 : index
    %c0_24 = arith.constant 0 : index
    %13 = vector.load %arg3[%c0_21, %c2_22, %c0_23, %c0_24] : memref<1x9x32x6xbf16, #tpu.memory_space<vmem>>, vector<1x1x32x6xbf16>
    %14 = vector.shape_cast %13 : vector<1x1x32x6xbf16> to vector<32x6xbf16>
    %cst_25 = arith.constant dense<0.000000e+00> : vector<32x1152xf32>
    %15 = tpu.matmul %14, %12, %cst_25 {dimension_numbers = #tpu.dot_dimension_numbers<[1], [0], [0], [1], [0, 0, 1, 1], [], []>} : vector<32x6xbf16>, vector<6x1152xbf16>, vector<32x1152xf32> -> vector<32x1152xf32>
    %16 = arith.addf %10, %15 : vector<32x1152xf32>
    %c0_26 = arith.constant 0 : index
    %c0_27 = arith.constant 0 : index
    %c0_28 = arith.constant 0 : index
    %c0_29 = arith.constant 0 : index
    %c3 = arith.constant 3 : index
    %17 = vector.load %arg2[%c0_26, %c0_27, %c0_28, %c0_29, %c3] : memref<1x1x1x6x1280xbf16, #tpu.memory_space<vmem>>, vector<1x1x1x6x1152xbf16>
    %18 = vector.shape_cast %17 : vector<1x1x1x6x1152xbf16> to vector<6x1152xbf16>
    %c0_30 = arith.constant 0 : index
    %c3_31 = arith.constant 3 : index
    %c0_32 = arith.constant 0 : index
    %c0_33 = arith.constant 0 : index
    %19 = vector.load %arg3[%c0_30, %c3_31, %c0_32, %c0_33] : memref<1x9x32x6xbf16, #tpu.memory_space<vmem>>, vector<1x1x32x6xbf16>
    %20 = vector.shape_cast %19 : vector<1x1x32x6xbf16> to vector<32x6xbf16>
    %cst_34 = arith.constant dense<0.000000e+00> : vector<32x1152xf32>
    %21 = tpu.matmul %20, %18, %cst_34 {dimension_numbers = #tpu.dot_dimension_numbers<[1], [0], [0], [1], [0, 0, 1, 1], [], []>} : vector<32x6xbf16>, vector<6x1152xbf16>, vector<32x1152xf32> -> vector<32x1152xf32>
    %22 = arith.addf %16, %21 : vector<32x1152xf32>
    %c0_35 = arith.constant 0 : index
    %c0_36 = arith.constant 0 : index
    %c0_37 = arith.constant 0 : index
    %c0_38 = arith.constant 0 : index
    %c4 = arith.constant 4 : index
    %23 = vector.load %arg2[%c0_35, %c0_36, %c0_37, %c0_38, %c4] : memref<1x1x1x6x1280xbf16, #tpu.memory_space<vmem>>, vector<1x1x1x6x1152xbf16>
    %24 = vector.shape_cast %23 : vector<1x1x1x6x1152xbf16> to vector<6x1152xbf16>
    %c0_39 = arith.constant 0 : index
    %c4_40 = arith.constant 4 : index
    %c0_41 = arith.constant 0 : index
    %c0_42 = arith.constant 0 : index
    %25 = vector.load %arg3[%c0_39, %c4_40, %c0_41, %c0_42] : memref<1x9x32x6xbf16, #tpu.memory_space<vmem>>, vector<1x1x32x6xbf16>
    %26 = vector.shape_cast %25 : vector<1x1x32x6xbf16> to vector<32x6xbf16>
    %cst_43 = arith.constant dense<0.000000e+00> : vector<32x1152xf32>
    %27 = tpu.matmul %26, %24, %cst_43 {dimension_numbers = #tpu.dot_dimension_numbers<[1], [0], [0], [1], [0, 0, 1, 1], [], []>} : vector<32x6xbf16>, vector<6x1152xbf16>, vector<32x1152xf32> -> vector<32x1152xf32>
    %28 = arith.addf %22, %27 : vector<32x1152xf32>
    %c0_44 = arith.constant 0 : index
    %c0_45 = arith.constant 0 : index
    %c0_46 = arith.constant 0 : index
    %c0_47 = arith.constant 0 : index
    %c5 = arith.constant 5 : index
    %29 = vector.load %arg2[%c0_44, %c0_45, %c0_46, %c0_47, %c5] : memref<1x1x1x6x1280xbf16, #tpu.memory_space<vmem>>, vector<1x1x1x6x1152xbf16>
    %30 = vector.shape_cast %29 : vector<1x1x1x6x1152xbf16> to vector<6x1152xbf16>
    %c0_48 = arith.constant 0 : index
    %c5_49 = arith.constant 5 : index
    %c0_50 = arith.constant 0 : index
    %c0_51 = arith.constant 0 : index
    %31 = vector.load %arg3[%c0_48, %c5_49, %c0_50, %c0_51] : memref<1x9x32x6xbf16, #tpu.memory_space<vmem>>, vector<1x1x32x6xbf16>
    %32 = vector.shape_cast %31 : vector<1x1x32x6xbf16> to vector<32x6xbf16>
    %cst_52 = arith.constant dense<0.000000e+00> : vector<32x1152xf32>
    %33 = tpu.matmul %32, %30, %cst_52 {dimension_numbers = #tpu.dot_dimension_numbers<[1], [0], [0], [1], [0, 0, 1, 1], [], []>} : vector<32x6xbf16>, vector<6x1152xbf16>, vector<32x1152xf32> -> vector<32x1152xf32>
    %34 = arith.addf %28, %33 : vector<32x1152xf32>
    %c0_53 = arith.constant 0 : index
    %c0_54 = arith.constant 0 : index
    %c0_55 = arith.constant 0 : index
    %c0_56 = arith.constant 0 : index
    %c6 = arith.constant 6 : index
    %35 = vector.load %arg2[%c0_53, %c0_54, %c0_55, %c0_56, %c6] : memref<1x1x1x6x1280xbf16, #tpu.memory_space<vmem>>, vector<1x1x1x6x1152xbf16>
    %36 = vector.shape_cast %35 : vector<1x1x1x6x1152xbf16> to vector<6x1152xbf16>
    %c0_57 = arith.constant 0 : index
    %c6_58 = arith.constant 6 : index
    %c0_59 = arith.constant 0 : index
    %c0_60 = arith.constant 0 : index
    %37 = vector.load %arg3[%c0_57, %c6_58, %c0_59, %c0_60] : memref<1x9x32x6xbf16, #tpu.memory_space<vmem>>, vector<1x1x32x6xbf16>
    %38 = vector.shape_cast %37 : vector<1x1x32x6xbf16> to vector<32x6xbf16>
    %cst_61 = arith.constant dense<0.000000e+00> : vector<32x1152xf32>
    %39 = tpu.matmul %38, %36, %cst_61 {dimension_numbers = #tpu.dot_dimension_numbers<[1], [0], [0], [1], [0, 0, 1, 1], [], []>} : vector<32x6xbf16>, vector<6x1152xbf16>, vector<32x1152xf32> -> vector<32x1152xf32>
    %40 = arith.addf %34, %39 : vector<32x1152xf32>
    %c0_62 = arith.constant 0 : index
    %c0_63 = arith.constant 0 : index
    %c0_64 = arith.constant 0 : index
    %c0_65 = arith.constant 0 : index
    %c7 = arith.constant 7 : index
    %41 = vector.load %arg2[%c0_62, %c0_63, %c0_64, %c0_65, %c7] : memref<1x1x1x6x1280xbf16, #tpu.memory_space<vmem>>, vector<1x1x1x6x1152xbf16>
    %42 = vector.shape_cast %41 : vector<1x1x1x6x1152xbf16> to vector<6x1152xbf16>
    %c0_66 = arith.constant 0 : index
    %c7_67 = arith.constant 7 : index
    %c0_68 = arith.constant 0 : index
    %c0_69 = arith.constant 0 : index
    %43 = vector.load %arg3[%c0_66, %c7_67, %c0_68, %c0_69] : memref<1x9x32x6xbf16, #tpu.memory_space<vmem>>, vector<1x1x32x6xbf16>
    %44 = vector.shape_cast %43 : vector<1x1x32x6xbf16> to vector<32x6xbf16>
    %cst_70 = arith.constant dense<0.000000e+00> : vector<32x1152xf32>
    %45 = tpu.matmul %44, %42, %cst_70 {dimension_numbers = #tpu.dot_dimension_numbers<[1], [0], [0], [1], [0, 0, 1, 1], [], []>} : vector<32x6xbf16>, vector<6x1152xbf16>, vector<32x1152xf32> -> vector<32x1152xf32>
    %46 = arith.addf %40, %45 : vector<32x1152xf32>
    %c0_71 = arith.constant 0 : index
    %c0_72 = arith.constant 0 : index
    %c0_73 = arith.constant 0 : index
    %c0_74 = arith.constant 0 : index
    %c8 = arith.constant 8 : index
    %47 = vector.load %arg2[%c0_71, %c0_72, %c0_73, %c0_74, %c8] : memref<1x1x1x6x1280xbf16, #tpu.memory_space<vmem>>, vector<1x1x1x6x1152xbf16>
    %48 = vector.shape_cast %47 : vector<1x1x1x6x1152xbf16> to vector<6x1152xbf16>
    %c0_75 = arith.constant 0 : index
    %c8_76 = arith.constant 8 : index
    %c0_77 = arith.constant 0 : index
    %c0_78 = arith.constant 0 : index
    %49 = vector.load %arg3[%c0_75, %c8_76, %c0_77, %c0_78] : memref<1x9x32x6xbf16, #tpu.memory_space<vmem>>, vector<1x1x32x6xbf16>
    %50 = vector.shape_cast %49 : vector<1x1x32x6xbf16> to vector<32x6xbf16>
    %cst_79 = arith.constant dense<0.000000e+00> : vector<32x1152xf32>
    %51 = tpu.matmul %50, %48, %cst_79 {dimension_numbers = #tpu.dot_dimension_numbers<[1], [0], [0], [1], [0, 0, 1, 1], [], []>} : vector<32x6xbf16>, vector<6x1152xbf16>, vector<32x1152xf32> -> vector<32x1152xf32>
    %52 = arith.addf %46, %51 : vector<32x1152xf32>
    %c0_80 = arith.constant 0 : index
    %c0_81 = arith.constant 0 : index
    %c0_82 = arith.constant 0 : index
    %53 = vector.load %arg4[%c0_80, %c0_81, %c0_82] : memref<1x32x1xf32, #tpu.memory_space<vmem>>, vector<1x32x1xf32>
    %54 = vector.shape_cast %53 : vector<1x32x1xf32> to vector<32x1xf32>
    %55 = vector.broadcast %54 : vector<32x1xf32> to vector<32x1152xf32>
    %56 = arith.addf %52, %55 : vector<32x1152xf32>
    %cst_83 = arith.constant 0.000000e+00 : f32
    %57 = vector.broadcast %cst_83 : f32 to vector<32x1152xf32>
    %58 = arith.cmpf oge, %56, %57 : vector<32x1152xf32>
    %cst_84 = arith.constant 1.000000e-01 : f32
    %59 = vector.broadcast %cst_84 : f32 to vector<32x1152xf32>
    %60 = arith.mulf %59, %56 : vector<32x1152xf32>
    %61 = arith.select %58, %56, %60 : vector<32x1152xi1>, vector<32x1152xf32>
    %62 = arith.truncf %61 : vector<32x1152xf32> to vector<32x1152xbf16>
    %c0_85 = arith.constant 0 : index
    %c0_86 = arith.constant 0 : index
    %c0_87 = arith.constant 0 : index
    %c0_88 = arith.constant 0 : index
    %63 = vector.load %arg5[%c0_85, %c0_86, %c0_87, %c0_88] : memref<1x1x32x1152xbf16, #tpu.memory_space<vmem>>, vector<1x1x32x1152xbf16>
    %64 = vector.shape_cast %63 : vector<1x1x32x1152xbf16> to vector<32x1152xbf16>
    %65 = vector.shape_cast %62 : vector<32x1152xbf16> to vector<1x1x32x1152xbf16>
    tpu.vector_store %arg5[%c0_85, %c0_86, %c0_87, %c0_88], %65 {strides = array<i32>} : memref<1x1x32x1152xbf16, #tpu.memory_space<vmem>>, vector<1x1x32x1152xbf16>,
    return
  }
  func.func @transform_0(%arg0: i32, %arg1: i32) -> (i32, i32, i32, i32, i32) {
    %c0_i32 = arith.constant 0 : i32
    %c0_i32_0 = arith.constant 0 : i32
    %c0_i32_1 = arith.constant 0 : i32
    %c0_i32_2 = arith.constant 0 : i32
    return %arg0, %arg1, %c0_i32, %c0_i32_0, %c0_i32_1 : i32, i32, i32, i32, i32
  }
  func.func @transform_1(%arg0: i32, %arg1: i32) -> (i32, i32, i32, i32) {
    %c0_i32 = arith.constant 0 : i32
    %c0_i32_0 = arith.constant 0 : i32
    %c0_i32_1 = arith.constant 0 : i32
    %c0_i32_2 = arith.constant 0 : i32
    return %arg1, %c0_i32, %c0_i32_0, %c0_i32_1 : i32, i32, i32, i32
  }
  func.func @transform_2(%arg0: i32, %arg1: i32) -> (i32, i32, i32) {
    %c0_i32 = arith.constant 0 : i32
    %c0_i32_0 = arith.constant 0 : i32
    %c0_i32_1 = arith.constant 0 : i32
    return %arg1, %c0_i32, %c0_i32_0 : i32, i32, i32
  }
  func.func @transform_3(%arg0: i32, %arg1: i32) -> (i32, i32, i32, i32) {
    %c0_i32 = arith.constant 0 : i32
    %c0_i32_0 = arith.constant 0 : i32
    %c0_i32_1 = arith.constant 0 : i32
    return %arg0, %arg1, %c0_i32, %c0_i32_0 : i32, i32, i32, i32
  }
}

module attributes {stable_mosaic.version = 11 : i64} {
  func.func @_conv_tap_kernel(%arg0: i32, %arg1: i32, %arg2: memref<1x1x2x96x768xbf16, #tpu.memory_space<vmem>>, %arg3: memref<1x9x32x96xbf16, #tpu.memory_space<vmem>>, %arg4: memref<1x32x1xf32, #tpu.memory_space<vmem>>, %arg5: memref<1x1x32x640xbf16, #tpu.memory_space<vmem>>) attributes {dimension_semantics = [#tpu.dimension_semantics<parallel>, #tpu.dimension_semantics<parallel>], iteration_bounds = array<i64: 2, 5>, scalar_prefetch = 0 : i64, scratch_operands = 0 : i64, tpu.core_type = #tpu.core_type<tc>, window_params = [{transform_indices = @transform_0, window_bounds = array<i64: 1, 1, 2, 96, 768>}, {transform_indices = @transform_1, window_bounds = array<i64: 1, 9, 32, 96>}, {transform_indices = @transform_2, window_bounds = array<i64: 1, 32, 1>}, {transform_indices = @transform_3, window_bounds = array<i64: 1, 1, 32, 640>}]} {
    %c0 = arith.constant 0 : index
    %c0_0 = arith.constant 0 : index
    %c0_1 = arith.constant 0 : index
    %c0_2 = arith.constant 0 : index
    %c0_3 = arith.constant 0 : index
    %0 = vector.load %arg2[%c0, %c0_0, %c0_1, %c0_2, %c0_3] : memref<1x1x2x96x768xbf16, #tpu.memory_space<vmem>>, vector<1x1x1x96x640xbf16>
    %1 = vector.shape_cast %0 : vector<1x1x1x96x640xbf16> to vector<96x640xbf16>
    %c0_4 = arith.constant 0 : index
    %c0_5 = arith.constant 0 : index
    %c0_6 = arith.constant 0 : index
    %c0_7 = arith.constant 0 : index
    %2 = vector.load %arg3[%c0_4, %c0_5, %c0_6, %c0_7] : memref<1x9x32x96xbf16, #tpu.memory_space<vmem>>, vector<1x1x32x96xbf16>
    %3 = vector.shape_cast %2 : vector<1x1x32x96xbf16> to vector<32x96xbf16>
    %cst = arith.constant dense<0.000000e+00> : vector<32x640xf32>
    %4 = tpu.matmul %3, %1, %cst {dimension_numbers = #tpu.dot_dimension_numbers<[1], [0], [0], [1], [0, 0, 1, 1], [], []>} : vector<32x96xbf16>, vector<96x640xbf16>, vector<32x640xf32> -> vector<32x640xf32>
    %c0_8 = arith.constant 0 : index
    %c0_9 = arith.constant 0 : index
    %c1 = arith.constant 1 : index
    %c0_10 = arith.constant 0 : index
    %c0_11 = arith.constant 0 : index
    %5 = vector.load %arg2[%c0_8, %c0_9, %c1, %c0_10, %c0_11] : memref<1x1x2x96x768xbf16, #tpu.memory_space<vmem>>, vector<1x1x1x96x640xbf16>
    %6 = vector.shape_cast %5 : vector<1x1x1x96x640xbf16> to vector<96x640xbf16>
    %c0_12 = arith.constant 0 : index
    %c1_13 = arith.constant 1 : index
    %c0_14 = arith.constant 0 : index
    %c0_15 = arith.constant 0 : index
    %7 = vector.load %arg3[%c0_12, %c1_13, %c0_14, %c0_15] : memref<1x9x32x96xbf16, #tpu.memory_space<vmem>>, vector<1x1x32x96xbf16>
    %8 = vector.shape_cast %7 : vector<1x1x32x96xbf16> to vector<32x96xbf16>
    %cst_16 = arith.constant dense<0.000000e+00> : vector<32x640xf32>
    %9 = tpu.matmul %8, %6, %cst_16 {dimension_numbers = #tpu.dot_dimension_numbers<[1], [0], [0], [1], [0, 0, 1, 1], [], []>} : vector<32x96xbf16>, vector<96x640xbf16>, vector<32x640xf32> -> vector<32x640xf32>
    %10 = arith.addf %4, %9 : vector<32x640xf32>
    %c0_17 = arith.constant 0 : index
    %c0_18 = arith.constant 0 : index
    %c0_19 = arith.constant 0 : index
    %c0_20 = arith.constant 0 : index
    %c1_21 = arith.constant 1 : index
    %11 = vector.load %arg2[%c0_17, %c0_18, %c0_19, %c0_20, %c1_21] : memref<1x1x2x96x768xbf16, #tpu.memory_space<vmem>>, vector<1x1x1x96x640xbf16>
    %12 = vector.shape_cast %11 : vector<1x1x1x96x640xbf16> to vector<96x640xbf16>
    %c0_22 = arith.constant 0 : index
    %c2 = arith.constant 2 : index
    %c0_23 = arith.constant 0 : index
    %c0_24 = arith.constant 0 : index
    %13 = vector.load %arg3[%c0_22, %c2, %c0_23, %c0_24] : memref<1x9x32x96xbf16, #tpu.memory_space<vmem>>, vector<1x1x32x96xbf16>
    %14 = vector.shape_cast %13 : vector<1x1x32x96xbf16> to vector<32x96xbf16>
    %cst_25 = arith.constant dense<0.000000e+00> : vector<32x640xf32>
    %15 = tpu.matmul %14, %12, %cst_25 {dimension_numbers = #tpu.dot_dimension_numbers<[1], [0], [0], [1], [0, 0, 1, 1], [], []>} : vector<32x96xbf16>, vector<96x640xbf16>, vector<32x640xf32> -> vector<32x640xf32>
    %16 = arith.addf %10, %15 : vector<32x640xf32>
    %c0_26 = arith.constant 0 : index
    %c0_27 = arith.constant 0 : index
    %c1_28 = arith.constant 1 : index
    %c0_29 = arith.constant 0 : index
    %c1_30 = arith.constant 1 : index
    %17 = vector.load %arg2[%c0_26, %c0_27, %c1_28, %c0_29, %c1_30] : memref<1x1x2x96x768xbf16, #tpu.memory_space<vmem>>, vector<1x1x1x96x640xbf16>
    %18 = vector.shape_cast %17 : vector<1x1x1x96x640xbf16> to vector<96x640xbf16>
    %c0_31 = arith.constant 0 : index
    %c3 = arith.constant 3 : index
    %c0_32 = arith.constant 0 : index
    %c0_33 = arith.constant 0 : index
    %19 = vector.load %arg3[%c0_31, %c3, %c0_32, %c0_33] : memref<1x9x32x96xbf16, #tpu.memory_space<vmem>>, vector<1x1x32x96xbf16>
    %20 = vector.shape_cast %19 : vector<1x1x32x96xbf16> to vector<32x96xbf16>
    %cst_34 = arith.constant dense<0.000000e+00> : vector<32x640xf32>
    %21 = tpu.matmul %20, %18, %cst_34 {dimension_numbers = #tpu.dot_dimension_numbers<[1], [0], [0], [1], [0, 0, 1, 1], [], []>} : vector<32x96xbf16>, vector<96x640xbf16>, vector<32x640xf32> -> vector<32x640xf32>
    %22 = arith.addf %16, %21 : vector<32x640xf32>
    %c0_35 = arith.constant 0 : index
    %c0_36 = arith.constant 0 : index
    %c0_37 = arith.constant 0 : index
    %c0_38 = arith.constant 0 : index
    %c2_39 = arith.constant 2 : index
    %23 = vector.load %arg2[%c0_35, %c0_36, %c0_37, %c0_38, %c2_39] : memref<1x1x2x96x768xbf16, #tpu.memory_space<vmem>>, vector<1x1x1x96x640xbf16>
    %24 = vector.shape_cast %23 : vector<1x1x1x96x640xbf16> to vector<96x640xbf16>
    %c0_40 = arith.constant 0 : index
    %c4 = arith.constant 4 : index
    %c0_41 = arith.constant 0 : index
    %c0_42 = arith.constant 0 : index
    %25 = vector.load %arg3[%c0_40, %c4, %c0_41, %c0_42] : memref<1x9x32x96xbf16, #tpu.memory_space<vmem>>, vector<1x1x32x96xbf16>
    %26 = vector.shape_cast %25 : vector<1x1x32x96xbf16> to vector<32x96xbf16>
    %cst_43 = arith.constant dense<0.000000e+00> : vector<32x640xf32>
    %27 = tpu.matmul %26, %24, %cst_43 {dimension_numbers = #tpu.dot_dimension_numbers<[1], [0], [0], [1], [0, 0, 1, 1], [], []>} : vector<32x96xbf16>, vector<96x640xbf16>, vector<32x640xf32> -> vector<32x640xf32>
    %28 = arith.addf %22, %27 : vector<32x640xf32>
    %c0_44 = arith.constant 0 : index
    %c0_45 = arith.constant 0 : index
    %c1_46 = arith.constant 1 : index
    %c0_47 = arith.constant 0 : index
    %c2_48 = arith.constant 2 : index
    %29 = vector.load %arg2[%c0_44, %c0_45, %c1_46, %c0_47, %c2_48] : memref<1x1x2x96x768xbf16, #tpu.memory_space<vmem>>, vector<1x1x1x96x640xbf16>
    %30 = vector.shape_cast %29 : vector<1x1x1x96x640xbf16> to vector<96x640xbf16>
    %c0_49 = arith.constant 0 : index
    %c5 = arith.constant 5 : index
    %c0_50 = arith.constant 0 : index
    %c0_51 = arith.constant 0 : index
    %31 = vector.load %arg3[%c0_49, %c5, %c0_50, %c0_51] : memref<1x9x32x96xbf16, #tpu.memory_space<vmem>>, vector<1x1x32x96xbf16>
    %32 = vector.shape_cast %31 : vector<1x1x32x96xbf16> to vector<32x96xbf16>
    %cst_52 = arith.constant dense<0.000000e+00> : vector<32x640xf32>
    %33 = tpu.matmul %32, %30, %cst_52 {dimension_numbers = #tpu.dot_dimension_numbers<[1], [0], [0], [1], [0, 0, 1, 1], [], []>} : vector<32x96xbf16>, vector<96x640xbf16>, vector<32x640xf32> -> vector<32x640xf32>
    %34 = arith.addf %28, %33 : vector<32x640xf32>
    %c0_53 = arith.constant 0 : index
    %c0_54 = arith.constant 0 : index
    %c0_55 = arith.constant 0 : index
    %c0_56 = arith.constant 0 : index
    %c3_57 = arith.constant 3 : index
    %35 = vector.load %arg2[%c0_53, %c0_54, %c0_55, %c0_56, %c3_57] : memref<1x1x2x96x768xbf16, #tpu.memory_space<vmem>>, vector<1x1x1x96x640xbf16>
    %36 = vector.shape_cast %35 : vector<1x1x1x96x640xbf16> to vector<96x640xbf16>
    %c0_58 = arith.constant 0 : index
    %c6 = arith.constant 6 : index
    %c0_59 = arith.constant 0 : index
    %c0_60 = arith.constant 0 : index
    %37 = vector.load %arg3[%c0_58, %c6, %c0_59, %c0_60] : memref<1x9x32x96xbf16, #tpu.memory_space<vmem>>, vector<1x1x32x96xbf16>
    %38 = vector.shape_cast %37 : vector<1x1x32x96xbf16> to vector<32x96xbf16>
    %cst_61 = arith.constant dense<0.000000e+00> : vector<32x640xf32>
    %39 = tpu.matmul %38, %36, %cst_61 {dimension_numbers = #tpu.dot_dimension_numbers<[1], [0], [0], [1], [0, 0, 1, 1], [], []>} : vector<32x96xbf16>, vector<96x640xbf16>, vector<32x640xf32> -> vector<32x640xf32>
    %40 = arith.addf %34, %39 : vector<32x640xf32>
    %c0_62 = arith.constant 0 : index
    %c0_63 = arith.constant 0 : index
    %c1_64 = arith.constant 1 : index
    %c0_65 = arith.constant 0 : index
    %c3_66 = arith.constant 3 : index
    %41 = vector.load %arg2[%c0_62, %c0_63, %c1_64, %c0_65, %c3_66] : memref<1x1x2x96x768xbf16, #tpu.memory_space<vmem>>, vector<1x1x1x96x640xbf16>
    %42 = vector.shape_cast %41 : vector<1x1x1x96x640xbf16> to vector<96x640xbf16>
    %c0_67 = arith.constant 0 : index
    %c7 = arith.constant 7 : index
    %c0_68 = arith.constant 0 : index
    %c0_69 = arith.constant 0 : index
    %43 = vector.load %arg3[%c0_67, %c7, %c0_68, %c0_69] : memref<1x9x32x96xbf16, #tpu.memory_space<vmem>>, vector<1x1x32x96xbf16>
    %44 = vector.shape_cast %43 : vector<1x1x32x96xbf16> to vector<32x96xbf16>
    %cst_70 = arith.constant dense<0.000000e+00> : vector<32x640xf32>
    %45 = tpu.matmul %44, %42, %cst_70 {dimension_numbers = #tpu.dot_dimension_numbers<[1], [0], [0], [1], [0, 0, 1, 1], [], []>} : vector<32x96xbf16>, vector<96x640xbf16>, vector<32x640xf32> -> vector<32x640xf32>
    %46 = arith.addf %40, %45 : vector<32x640xf32>
    %c0_71 = arith.constant 0 : index
    %c0_72 = arith.constant 0 : index
    %c0_73 = arith.constant 0 : index
    %c0_74 = arith.constant 0 : index
    %c4_75 = arith.constant 4 : index
    %47 = vector.load %arg2[%c0_71, %c0_72, %c0_73, %c0_74, %c4_75] : memref<1x1x2x96x768xbf16, #tpu.memory_space<vmem>>, vector<1x1x1x96x640xbf16>
    %48 = vector.shape_cast %47 : vector<1x1x1x96x640xbf16> to vector<96x640xbf16>
    %c0_76 = arith.constant 0 : index
    %c8 = arith.constant 8 : index
    %c0_77 = arith.constant 0 : index
    %c0_78 = arith.constant 0 : index
    %49 = vector.load %arg3[%c0_76, %c8, %c0_77, %c0_78] : memref<1x9x32x96xbf16, #tpu.memory_space<vmem>>, vector<1x1x32x96xbf16>
    %50 = vector.shape_cast %49 : vector<1x1x32x96xbf16> to vector<32x96xbf16>
    %cst_79 = arith.constant dense<0.000000e+00> : vector<32x640xf32>
    %51 = tpu.matmul %50, %48, %cst_79 {dimension_numbers = #tpu.dot_dimension_numbers<[1], [0], [0], [1], [0, 0, 1, 1], [], []>} : vector<32x96xbf16>, vector<96x640xbf16>, vector<32x640xf32> -> vector<32x640xf32>
    %52 = arith.addf %46, %51 : vector<32x640xf32>
    %c0_80 = arith.constant 0 : index
    %c0_81 = arith.constant 0 : index
    %c0_82 = arith.constant 0 : index
    %53 = vector.load %arg4[%c0_80, %c0_81, %c0_82] : memref<1x32x1xf32, #tpu.memory_space<vmem>>, vector<1x32x1xf32>
    %54 = vector.shape_cast %53 : vector<1x32x1xf32> to vector<32x1xf32>
    %55 = vector.broadcast %54 : vector<32x1xf32> to vector<32x640xf32>
    %56 = arith.addf %52, %55 : vector<32x640xf32>
    %cst_83 = arith.constant 0.000000e+00 : f32
    %57 = vector.broadcast %cst_83 : f32 to vector<32x640xf32>
    %58 = arith.cmpf oge, %56, %57 : vector<32x640xf32>
    %cst_84 = arith.constant 1.000000e-01 : f32
    %59 = vector.broadcast %cst_84 : f32 to vector<32x640xf32>
    %60 = arith.mulf %59, %56 : vector<32x640xf32>
    %61 = arith.select %58, %56, %60 : vector<32x640xi1>, vector<32x640xf32>
    %62 = arith.truncf %61 : vector<32x640xf32> to vector<32x640xbf16>
    %c0_85 = arith.constant 0 : index
    %c0_86 = arith.constant 0 : index
    %c0_87 = arith.constant 0 : index
    %c0_88 = arith.constant 0 : index
    %63 = vector.load %arg5[%c0_85, %c0_86, %c0_87, %c0_88] : memref<1x1x32x640xbf16, #tpu.memory_space<vmem>>, vector<1x1x32x640xbf16>
    %64 = vector.shape_cast %63 : vector<1x1x32x640xbf16> to vector<32x640xbf16>
    %65 = vector.shape_cast %62 : vector<32x640xbf16> to vector<1x1x32x640xbf16>
    tpu.vector_store %arg5[%c0_85, %c0_86, %c0_87, %c0_88], %65 {strides = array<i32>} : memref<1x1x32x640xbf16, #tpu.memory_space<vmem>>, vector<1x1x32x640xbf16>,
    return
  }
  func.func @transform_0(%arg0: i32, %arg1: i32) -> (i32, i32, i32, i32, i32) {
    %c0_i32 = arith.constant 0 : i32
    %c0_i32_0 = arith.constant 0 : i32
    %c0_i32_1 = arith.constant 0 : i32
    %c0_i32_2 = arith.constant 0 : i32
    return %arg0, %arg1, %c0_i32, %c0_i32_0, %c0_i32_1 : i32, i32, i32, i32, i32
  }
  func.func @transform_1(%arg0: i32, %arg1: i32) -> (i32, i32, i32, i32) {
    %c0_i32 = arith.constant 0 : i32
    %c0_i32_0 = arith.constant 0 : i32
    %c0_i32_1 = arith.constant 0 : i32
    %c0_i32_2 = arith.constant 0 : i32
    return %arg1, %c0_i32, %c0_i32_0, %c0_i32_1 : i32, i32, i32, i32
  }
  func.func @transform_2(%arg0: i32, %arg1: i32) -> (i32, i32, i32) {
    %c0_i32 = arith.constant 0 : i32
    %c0_i32_0 = arith.constant 0 : i32
    %c0_i32_1 = arith.constant 0 : i32
    return %arg1, %c0_i32, %c0_i32_0 : i32, i32, i32
  }
  func.func @transform_3(%arg0: i32, %arg1: i32) -> (i32, i32, i32, i32) {
    %c0_i32 = arith.constant 0 : i32
    %c0_i32_0 = arith.constant 0 : i32
    %c0_i32_1 = arith.constant 0 : i32
    return %arg0, %arg1, %c0_i32, %c0_i32_0 : i32, i32, i32, i32
  }
}

module attributes {stable_mosaic.version = 11 : i64} {
  func.func @_conv_tap_kernel(%arg0: i32, %arg1: i32, %arg2: memref<1x1x2x96x640xbf16, #tpu.memory_space<vmem>>, %arg3: memref<1x9x32x96xbf16, #tpu.memory_space<vmem>>, %arg4: memref<1x32x1xf32, #tpu.memory_space<vmem>>, %arg5: memref<1x1x32x512xbf16, #tpu.memory_space<vmem>>) attributes {dimension_semantics = [#tpu.dimension_semantics<parallel>, #tpu.dimension_semantics<parallel>], iteration_bounds = array<i64: 2, 5>, scalar_prefetch = 0 : i64, scratch_operands = 0 : i64, tpu.core_type = #tpu.core_type<tc>, window_params = [{transform_indices = @transform_0, window_bounds = array<i64: 1, 1, 2, 96, 640>}, {transform_indices = @transform_1, window_bounds = array<i64: 1, 9, 32, 96>}, {transform_indices = @transform_2, window_bounds = array<i64: 1, 32, 1>}, {transform_indices = @transform_3, window_bounds = array<i64: 1, 1, 32, 512>}]} {
    %c0 = arith.constant 0 : index
    %c0_0 = arith.constant 0 : index
    %c0_1 = arith.constant 0 : index
    %c0_2 = arith.constant 0 : index
    %c0_3 = arith.constant 0 : index
    %0 = vector.load %arg2[%c0, %c0_0, %c0_1, %c0_2, %c0_3] : memref<1x1x2x96x640xbf16, #tpu.memory_space<vmem>>, vector<1x1x1x96x512xbf16>
    %1 = vector.shape_cast %0 : vector<1x1x1x96x512xbf16> to vector<96x512xbf16>
    %c0_4 = arith.constant 0 : index
    %c0_5 = arith.constant 0 : index
    %c0_6 = arith.constant 0 : index
    %c0_7 = arith.constant 0 : index
    %2 = vector.load %arg3[%c0_4, %c0_5, %c0_6, %c0_7] : memref<1x9x32x96xbf16, #tpu.memory_space<vmem>>, vector<1x1x32x96xbf16>
    %3 = vector.shape_cast %2 : vector<1x1x32x96xbf16> to vector<32x96xbf16>
    %cst = arith.constant dense<0.000000e+00> : vector<32x512xf32>
    %4 = tpu.matmul %3, %1, %cst {dimension_numbers = #tpu.dot_dimension_numbers<[1], [0], [0], [1], [0, 0, 1, 1], [], []>} : vector<32x96xbf16>, vector<96x512xbf16>, vector<32x512xf32> -> vector<32x512xf32>
    %c0_8 = arith.constant 0 : index
    %c0_9 = arith.constant 0 : index
    %c1 = arith.constant 1 : index
    %c0_10 = arith.constant 0 : index
    %c0_11 = arith.constant 0 : index
    %5 = vector.load %arg2[%c0_8, %c0_9, %c1, %c0_10, %c0_11] : memref<1x1x2x96x640xbf16, #tpu.memory_space<vmem>>, vector<1x1x1x96x512xbf16>
    %6 = vector.shape_cast %5 : vector<1x1x1x96x512xbf16> to vector<96x512xbf16>
    %c0_12 = arith.constant 0 : index
    %c1_13 = arith.constant 1 : index
    %c0_14 = arith.constant 0 : index
    %c0_15 = arith.constant 0 : index
    %7 = vector.load %arg3[%c0_12, %c1_13, %c0_14, %c0_15] : memref<1x9x32x96xbf16, #tpu.memory_space<vmem>>, vector<1x1x32x96xbf16>
    %8 = vector.shape_cast %7 : vector<1x1x32x96xbf16> to vector<32x96xbf16>
    %cst_16 = arith.constant dense<0.000000e+00> : vector<32x512xf32>
    %9 = tpu.matmul %8, %6, %cst_16 {dimension_numbers = #tpu.dot_dimension_numbers<[1], [0], [0], [1], [0, 0, 1, 1], [], []>} : vector<32x96xbf16>, vector<96x512xbf16>, vector<32x512xf32> -> vector<32x512xf32>
    %10 = arith.addf %4, %9 : vector<32x512xf32>
    %c0_17 = arith.constant 0 : index
    %c0_18 = arith.constant 0 : index
    %c0_19 = arith.constant 0 : index
    %c0_20 = arith.constant 0 : index
    %c1_21 = arith.constant 1 : index
    %11 = vector.load %arg2[%c0_17, %c0_18, %c0_19, %c0_20, %c1_21] : memref<1x1x2x96x640xbf16, #tpu.memory_space<vmem>>, vector<1x1x1x96x512xbf16>
    %12 = vector.shape_cast %11 : vector<1x1x1x96x512xbf16> to vector<96x512xbf16>
    %c0_22 = arith.constant 0 : index
    %c2 = arith.constant 2 : index
    %c0_23 = arith.constant 0 : index
    %c0_24 = arith.constant 0 : index
    %13 = vector.load %arg3[%c0_22, %c2, %c0_23, %c0_24] : memref<1x9x32x96xbf16, #tpu.memory_space<vmem>>, vector<1x1x32x96xbf16>
    %14 = vector.shape_cast %13 : vector<1x1x32x96xbf16> to vector<32x96xbf16>
    %cst_25 = arith.constant dense<0.000000e+00> : vector<32x512xf32>
    %15 = tpu.matmul %14, %12, %cst_25 {dimension_numbers = #tpu.dot_dimension_numbers<[1], [0], [0], [1], [0, 0, 1, 1], [], []>} : vector<32x96xbf16>, vector<96x512xbf16>, vector<32x512xf32> -> vector<32x512xf32>
    %16 = arith.addf %10, %15 : vector<32x512xf32>
    %c0_26 = arith.constant 0 : index
    %c0_27 = arith.constant 0 : index
    %c1_28 = arith.constant 1 : index
    %c0_29 = arith.constant 0 : index
    %c1_30 = arith.constant 1 : index
    %17 = vector.load %arg2[%c0_26, %c0_27, %c1_28, %c0_29, %c1_30] : memref<1x1x2x96x640xbf16, #tpu.memory_space<vmem>>, vector<1x1x1x96x512xbf16>
    %18 = vector.shape_cast %17 : vector<1x1x1x96x512xbf16> to vector<96x512xbf16>
    %c0_31 = arith.constant 0 : index
    %c3 = arith.constant 3 : index
    %c0_32 = arith.constant 0 : index
    %c0_33 = arith.constant 0 : index
    %19 = vector.load %arg3[%c0_31, %c3, %c0_32, %c0_33] : memref<1x9x32x96xbf16, #tpu.memory_space<vmem>>, vector<1x1x32x96xbf16>
    %20 = vector.shape_cast %19 : vector<1x1x32x96xbf16> to vector<32x96xbf16>
    %cst_34 = arith.constant dense<0.000000e+00> : vector<32x512xf32>
    %21 = tpu.matmul %20, %18, %cst_34 {dimension_numbers = #tpu.dot_dimension_numbers<[1], [0], [0], [1], [0, 0, 1, 1], [], []>} : vector<32x96xbf16>, vector<96x512xbf16>, vector<32x512xf32> -> vector<32x512xf32>
    %22 = arith.addf %16, %21 : vector<32x512xf32>
    %c0_35 = arith.constant 0 : index
    %c0_36 = arith.constant 0 : index
    %c0_37 = arith.constant 0 : index
    %c0_38 = arith.constant 0 : index
    %c2_39 = arith.constant 2 : index
    %23 = vector.load %arg2[%c0_35, %c0_36, %c0_37, %c0_38, %c2_39] : memref<1x1x2x96x640xbf16, #tpu.memory_space<vmem>>, vector<1x1x1x96x512xbf16>
    %24 = vector.shape_cast %23 : vector<1x1x1x96x512xbf16> to vector<96x512xbf16>
    %c0_40 = arith.constant 0 : index
    %c4 = arith.constant 4 : index
    %c0_41 = arith.constant 0 : index
    %c0_42 = arith.constant 0 : index
    %25 = vector.load %arg3[%c0_40, %c4, %c0_41, %c0_42] : memref<1x9x32x96xbf16, #tpu.memory_space<vmem>>, vector<1x1x32x96xbf16>
    %26 = vector.shape_cast %25 : vector<1x1x32x96xbf16> to vector<32x96xbf16>
    %cst_43 = arith.constant dense<0.000000e+00> : vector<32x512xf32>
    %27 = tpu.matmul %26, %24, %cst_43 {dimension_numbers = #tpu.dot_dimension_numbers<[1], [0], [0], [1], [0, 0, 1, 1], [], []>} : vector<32x96xbf16>, vector<96x512xbf16>, vector<32x512xf32> -> vector<32x512xf32>
    %28 = arith.addf %22, %27 : vector<32x512xf32>
    %c0_44 = arith.constant 0 : index
    %c0_45 = arith.constant 0 : index
    %c1_46 = arith.constant 1 : index
    %c0_47 = arith.constant 0 : index
    %c2_48 = arith.constant 2 : index
    %29 = vector.load %arg2[%c0_44, %c0_45, %c1_46, %c0_47, %c2_48] : memref<1x1x2x96x640xbf16, #tpu.memory_space<vmem>>, vector<1x1x1x96x512xbf16>
    %30 = vector.shape_cast %29 : vector<1x1x1x96x512xbf16> to vector<96x512xbf16>
    %c0_49 = arith.constant 0 : index
    %c5 = arith.constant 5 : index
    %c0_50 = arith.constant 0 : index
    %c0_51 = arith.constant 0 : index
    %31 = vector.load %arg3[%c0_49, %c5, %c0_50, %c0_51] : memref<1x9x32x96xbf16, #tpu.memory_space<vmem>>, vector<1x1x32x96xbf16>
    %32 = vector.shape_cast %31 : vector<1x1x32x96xbf16> to vector<32x96xbf16>
    %cst_52 = arith.constant dense<0.000000e+00> : vector<32x512xf32>
    %33 = tpu.matmul %32, %30, %cst_52 {dimension_numbers = #tpu.dot_dimension_numbers<[1], [0], [0], [1], [0, 0, 1, 1], [], []>} : vector<32x96xbf16>, vector<96x512xbf16>, vector<32x512xf32> -> vector<32x512xf32>
    %34 = arith.addf %28, %33 : vector<32x512xf32>
    %c0_53 = arith.constant 0 : index
    %c0_54 = arith.constant 0 : index
    %c0_55 = arith.constant 0 : index
    %c0_56 = arith.constant 0 : index
    %c3_57 = arith.constant 3 : index
    %35 = vector.load %arg2[%c0_53, %c0_54, %c0_55, %c0_56, %c3_57] : memref<1x1x2x96x640xbf16, #tpu.memory_space<vmem>>, vector<1x1x1x96x512xbf16>
    %36 = vector.shape_cast %35 : vector<1x1x1x96x512xbf16> to vector<96x512xbf16>
    %c0_58 = arith.constant 0 : index
    %c6 = arith.constant 6 : index
    %c0_59 = arith.constant 0 : index
    %c0_60 = arith.constant 0 : index
    %37 = vector.load %arg3[%c0_58, %c6, %c0_59, %c0_60] : memref<1x9x32x96xbf16, #tpu.memory_space<vmem>>, vector<1x1x32x96xbf16>
    %38 = vector.shape_cast %37 : vector<1x1x32x96xbf16> to vector<32x96xbf16>
    %cst_61 = arith.constant dense<0.000000e+00> : vector<32x512xf32>
    %39 = tpu.matmul %38, %36, %cst_61 {dimension_numbers = #tpu.dot_dimension_numbers<[1], [0], [0], [1], [0, 0, 1, 1], [], []>} : vector<32x96xbf16>, vector<96x512xbf16>, vector<32x512xf32> -> vector<32x512xf32>
    %40 = arith.addf %34, %39 : vector<32x512xf32>
    %c0_62 = arith.constant 0 : index
    %c0_63 = arith.constant 0 : index
    %c1_64 = arith.constant 1 : index
    %c0_65 = arith.constant 0 : index
    %c3_66 = arith.constant 3 : index
    %41 = vector.load %arg2[%c0_62, %c0_63, %c1_64, %c0_65, %c3_66] : memref<1x1x2x96x640xbf16, #tpu.memory_space<vmem>>, vector<1x1x1x96x512xbf16>
    %42 = vector.shape_cast %41 : vector<1x1x1x96x512xbf16> to vector<96x512xbf16>
    %c0_67 = arith.constant 0 : index
    %c7 = arith.constant 7 : index
    %c0_68 = arith.constant 0 : index
    %c0_69 = arith.constant 0 : index
    %43 = vector.load %arg3[%c0_67, %c7, %c0_68, %c0_69] : memref<1x9x32x96xbf16, #tpu.memory_space<vmem>>, vector<1x1x32x96xbf16>
    %44 = vector.shape_cast %43 : vector<1x1x32x96xbf16> to vector<32x96xbf16>
    %cst_70 = arith.constant dense<0.000000e+00> : vector<32x512xf32>
    %45 = tpu.matmul %44, %42, %cst_70 {dimension_numbers = #tpu.dot_dimension_numbers<[1], [0], [0], [1], [0, 0, 1, 1], [], []>} : vector<32x96xbf16>, vector<96x512xbf16>, vector<32x512xf32> -> vector<32x512xf32>
    %46 = arith.addf %40, %45 : vector<32x512xf32>
    %c0_71 = arith.constant 0 : index
    %c0_72 = arith.constant 0 : index
    %c0_73 = arith.constant 0 : index
    %c0_74 = arith.constant 0 : index
    %c4_75 = arith.constant 4 : index
    %47 = vector.load %arg2[%c0_71, %c0_72, %c0_73, %c0_74, %c4_75] : memref<1x1x2x96x640xbf16, #tpu.memory_space<vmem>>, vector<1x1x1x96x512xbf16>
    %48 = vector.shape_cast %47 : vector<1x1x1x96x512xbf16> to vector<96x512xbf16>
    %c0_76 = arith.constant 0 : index
    %c8 = arith.constant 8 : index
    %c0_77 = arith.constant 0 : index
    %c0_78 = arith.constant 0 : index
    %49 = vector.load %arg3[%c0_76, %c8, %c0_77, %c0_78] : memref<1x9x32x96xbf16, #tpu.memory_space<vmem>>, vector<1x1x32x96xbf16>
    %50 = vector.shape_cast %49 : vector<1x1x32x96xbf16> to vector<32x96xbf16>
    %cst_79 = arith.constant dense<0.000000e+00> : vector<32x512xf32>
    %51 = tpu.matmul %50, %48, %cst_79 {dimension_numbers = #tpu.dot_dimension_numbers<[1], [0], [0], [1], [0, 0, 1, 1], [], []>} : vector<32x96xbf16>, vector<96x512xbf16>, vector<32x512xf32> -> vector<32x512xf32>
    %52 = arith.addf %46, %51 : vector<32x512xf32>
    %c0_80 = arith.constant 0 : index
    %c0_81 = arith.constant 0 : index
    %c0_82 = arith.constant 0 : index
    %53 = vector.load %arg4[%c0_80, %c0_81, %c0_82] : memref<1x32x1xf32, #tpu.memory_space<vmem>>, vector<1x32x1xf32>
    %54 = vector.shape_cast %53 : vector<1x32x1xf32> to vector<32x1xf32>
    %55 = vector.broadcast %54 : vector<32x1xf32> to vector<32x512xf32>
    %56 = arith.addf %52, %55 : vector<32x512xf32>
    %cst_83 = arith.constant 0.000000e+00 : f32
    %57 = vector.broadcast %cst_83 : f32 to vector<32x512xf32>
    %58 = arith.cmpf oge, %56, %57 : vector<32x512xf32>
    %cst_84 = arith.constant 1.000000e-01 : f32
    %59 = vector.broadcast %cst_84 : f32 to vector<32x512xf32>
    %60 = arith.mulf %59, %56 : vector<32x512xf32>
    %61 = arith.select %58, %56, %60 : vector<32x512xi1>, vector<32x512xf32>
    %62 = arith.truncf %61 : vector<32x512xf32> to vector<32x512xbf16>
    %c0_85 = arith.constant 0 : index
    %c0_86 = arith.constant 0 : index
    %c0_87 = arith.constant 0 : index
    %c0_88 = arith.constant 0 : index
    %63 = vector.load %arg5[%c0_85, %c0_86, %c0_87, %c0_88] : memref<1x1x32x512xbf16, #tpu.memory_space<vmem>>, vector<1x1x32x512xbf16>
    %64 = vector.shape_cast %63 : vector<1x1x32x512xbf16> to vector<32x512xbf16>
    %65 = vector.shape_cast %62 : vector<32x512xbf16> to vector<1x1x32x512xbf16>
    tpu.vector_store %arg5[%c0_85, %c0_86, %c0_87, %c0_88], %65 {strides = array<i32>} : memref<1x1x32x512xbf16, #tpu.memory_space<vmem>>, vector<1x1x32x512xbf16>,
    return
  }
  func.func @transform_0(%arg0: i32, %arg1: i32) -> (i32, i32, i32, i32, i32) {
    %c0_i32 = arith.constant 0 : i32
    %c0_i32_0 = arith.constant 0 : i32
    %c0_i32_1 = arith.constant 0 : i32
    %c0_i32_2 = arith.constant 0 : i32
    return %arg0, %arg1, %c0_i32, %c0_i32_0, %c0_i32_1 : i32, i32, i32, i32, i32
  }
  func.func @transform_1(%arg0: i32, %arg1: i32) -> (i32, i32, i32, i32) {
    %c0_i32 = arith.constant 0 : i32
    %c0_i32_0 = arith.constant 0 : i32
    %c0_i32_1 = arith.constant 0 : i32
    %c0_i32_2 = arith.constant 0 : i32
    return %arg1, %c0_i32, %c0_i32_0, %c0_i32_1 : i32, i32, i32, i32
  }
  func.func @transform_2(%arg0: i32, %arg1: i32) -> (i32, i32, i32) {
    %c0_i32 = arith.constant 0 : i32
    %c0_i32_0 = arith.constant 0 : i32
    %c0_i32_1 = arith.constant 0 : i32
    return %arg1, %c0_i32, %c0_i32_0 : i32, i32, i32
  }
  func.func @transform_3(%arg0: i32, %arg1: i32) -> (i32, i32, i32, i32) {
    %c0_i32 = arith.constant 0 : i32
    %c0_i32_0 = arith.constant 0 : i32
    %c0_i32_1 = arith.constant 0 : i32
    return %arg0, %arg1, %c0_i32, %c0_i32_0 : i32, i32, i32, i32
  }
}

module attributes {stable_mosaic.version = 11 : i64} {
  func.func @_conv_tap_kernel(%arg0: i32, %arg1: i32, %arg2: memref<1x1x1x96x512xbf16, #tpu.memory_space<vmem>>, %arg3: memref<1x3x32x96xbf16, #tpu.memory_space<vmem>>, %arg4: memref<1x32x1xf32, #tpu.memory_space<vmem>>, %arg5: memref<1x1x32x384xbf16, #tpu.memory_space<vmem>>) attributes {dimension_semantics = [#tpu.dimension_semantics<parallel>, #tpu.dimension_semantics<parallel>], iteration_bounds = array<i64: 2, 5>, scalar_prefetch = 0 : i64, scratch_operands = 0 : i64, tpu.core_type = #tpu.core_type<tc>, window_params = [{transform_indices = @transform_0, window_bounds = array<i64: 1, 1, 1, 96, 512>}, {transform_indices = @transform_1, window_bounds = array<i64: 1, 3, 32, 96>}, {transform_indices = @transform_2, window_bounds = array<i64: 1, 32, 1>}, {transform_indices = @transform_3, window_bounds = array<i64: 1, 1, 32, 384>}]} {
    %c0 = arith.constant 0 : index
    %c0_0 = arith.constant 0 : index
    %c0_1 = arith.constant 0 : index
    %c0_2 = arith.constant 0 : index
    %c0_3 = arith.constant 0 : index
    %0 = vector.load %arg2[%c0, %c0_0, %c0_1, %c0_2, %c0_3] : memref<1x1x1x96x512xbf16, #tpu.memory_space<vmem>>, vector<1x1x1x96x384xbf16>
    %1 = vector.shape_cast %0 : vector<1x1x1x96x384xbf16> to vector<96x384xbf16>
    %c0_4 = arith.constant 0 : index
    %c0_5 = arith.constant 0 : index
    %c0_6 = arith.constant 0 : index
    %c0_7 = arith.constant 0 : index
    %2 = vector.load %arg3[%c0_4, %c0_5, %c0_6, %c0_7] : memref<1x3x32x96xbf16, #tpu.memory_space<vmem>>, vector<1x1x32x96xbf16>
    %3 = vector.shape_cast %2 : vector<1x1x32x96xbf16> to vector<32x96xbf16>
    %cst = arith.constant dense<0.000000e+00> : vector<32x384xf32>
    %4 = tpu.matmul %3, %1, %cst {dimension_numbers = #tpu.dot_dimension_numbers<[1], [0], [0], [1], [0, 0, 1, 1], [], []>} : vector<32x96xbf16>, vector<96x384xbf16>, vector<32x384xf32> -> vector<32x384xf32>
    %c0_8 = arith.constant 0 : index
    %c0_9 = arith.constant 0 : index
    %c0_10 = arith.constant 0 : index
    %c0_11 = arith.constant 0 : index
    %c1 = arith.constant 1 : index
    %5 = vector.load %arg2[%c0_8, %c0_9, %c0_10, %c0_11, %c1] : memref<1x1x1x96x512xbf16, #tpu.memory_space<vmem>>, vector<1x1x1x96x384xbf16>
    %6 = vector.shape_cast %5 : vector<1x1x1x96x384xbf16> to vector<96x384xbf16>
    %c0_12 = arith.constant 0 : index
    %c1_13 = arith.constant 1 : index
    %c0_14 = arith.constant 0 : index
    %c0_15 = arith.constant 0 : index
    %7 = vector.load %arg3[%c0_12, %c1_13, %c0_14, %c0_15] : memref<1x3x32x96xbf16, #tpu.memory_space<vmem>>, vector<1x1x32x96xbf16>
    %8 = vector.shape_cast %7 : vector<1x1x32x96xbf16> to vector<32x96xbf16>
    %cst_16 = arith.constant dense<0.000000e+00> : vector<32x384xf32>
    %9 = tpu.matmul %8, %6, %cst_16 {dimension_numbers = #tpu.dot_dimension_numbers<[1], [0], [0], [1], [0, 0, 1, 1], [], []>} : vector<32x96xbf16>, vector<96x384xbf16>, vector<32x384xf32> -> vector<32x384xf32>
    %10 = arith.addf %4, %9 : vector<32x384xf32>
    %c0_17 = arith.constant 0 : index
    %c0_18 = arith.constant 0 : index
    %c0_19 = arith.constant 0 : index
    %c0_20 = arith.constant 0 : index
    %c2 = arith.constant 2 : index
    %11 = vector.load %arg2[%c0_17, %c0_18, %c0_19, %c0_20, %c2] : memref<1x1x1x96x512xbf16, #tpu.memory_space<vmem>>, vector<1x1x1x96x384xbf16>
    %12 = vector.shape_cast %11 : vector<1x1x1x96x384xbf16> to vector<96x384xbf16>
    %c0_21 = arith.constant 0 : index
    %c2_22 = arith.constant 2 : index
    %c0_23 = arith.constant 0 : index
    %c0_24 = arith.constant 0 : index
    %13 = vector.load %arg3[%c0_21, %c2_22, %c0_23, %c0_24] : memref<1x3x32x96xbf16, #tpu.memory_space<vmem>>, vector<1x1x32x96xbf16>
    %14 = vector.shape_cast %13 : vector<1x1x32x96xbf16> to vector<32x96xbf16>
    %cst_25 = arith.constant dense<0.000000e+00> : vector<32x384xf32>
    %15 = tpu.matmul %14, %12, %cst_25 {dimension_numbers = #tpu.dot_dimension_numbers<[1], [0], [0], [1], [0, 0, 1, 1], [], []>} : vector<32x96xbf16>, vector<96x384xbf16>, vector<32x384xf32> -> vector<32x384xf32>
    %16 = arith.addf %10, %15 : vector<32x384xf32>
    %c0_26 = arith.constant 0 : index
    %c0_27 = arith.constant 0 : index
    %c0_28 = arith.constant 0 : index
    %17 = vector.load %arg4[%c0_26, %c0_27, %c0_28] : memref<1x32x1xf32, #tpu.memory_space<vmem>>, vector<1x32x1xf32>
    %18 = vector.shape_cast %17 : vector<1x32x1xf32> to vector<32x1xf32>
    %19 = vector.broadcast %18 : vector<32x1xf32> to vector<32x384xf32>
    %20 = arith.addf %16, %19 : vector<32x384xf32>
    %cst_29 = arith.constant 0.000000e+00 : f32
    %21 = vector.broadcast %cst_29 : f32 to vector<32x384xf32>
    %22 = arith.cmpf oge, %20, %21 : vector<32x384xf32>
    %cst_30 = arith.constant 1.000000e-01 : f32
    %23 = vector.broadcast %cst_30 : f32 to vector<32x384xf32>
    %24 = arith.mulf %23, %20 : vector<32x384xf32>
    %25 = arith.select %22, %20, %24 : vector<32x384xi1>, vector<32x384xf32>
    %26 = arith.truncf %25 : vector<32x384xf32> to vector<32x384xbf16>
    %c0_31 = arith.constant 0 : index
    %c0_32 = arith.constant 0 : index
    %c0_33 = arith.constant 0 : index
    %c0_34 = arith.constant 0 : index
    %27 = vector.load %arg5[%c0_31, %c0_32, %c0_33, %c0_34] : memref<1x1x32x384xbf16, #tpu.memory_space<vmem>>, vector<1x1x32x384xbf16>
    %28 = vector.shape_cast %27 : vector<1x1x32x384xbf16> to vector<32x384xbf16>
    %29 = vector.shape_cast %26 : vector<32x384xbf16> to vector<1x1x32x384xbf16>
    tpu.vector_store %arg5[%c0_31, %c0_32, %c0_33, %c0_34], %29 {strides = array<i32>} : memref<1x1x32x384xbf16, #tpu.memory_space<vmem>>, vector<1x1x32x384xbf16>,
    return
  }
  func.func @transform_0(%arg0: i32, %arg1: i32) -> (i32, i32, i32, i32, i32) {
    %c0_i32 = arith.constant 0 : i32
    %c0_i32_0 = arith.constant 0 : i32
    %c0_i32_1 = arith.constant 0 : i32
    %c0_i32_2 = arith.constant 0 : i32
    return %arg0, %arg1, %c0_i32, %c0_i32_0, %c0_i32_1 : i32, i32, i32, i32, i32
  }
  func.func @transform_1(%arg0: i32, %arg1: i32) -> (i32, i32, i32, i32) {
    %c0_i32 = arith.constant 0 : i32
    %c0_i32_0 = arith.constant 0 : i32
    %c0_i32_1 = arith.constant 0 : i32
    %c0_i32_2 = arith.constant 0 : i32
    return %arg1, %c0_i32, %c0_i32_0, %c0_i32_1 : i32, i32, i32, i32
  }
  func.func @transform_2(%arg0: i32, %arg1: i32) -> (i32, i32, i32) {
    %c0_i32 = arith.constant 0 : i32
    %c0_i32_0 = arith.constant 0 : i32
    %c0_i32_1 = arith.constant 0 : i32
    return %arg1, %c0_i32, %c0_i32_0 : i32, i32, i32
  }
  func.func @transform_3(%arg0: i32, %arg1: i32) -> (i32, i32, i32, i32) {
    %c0_i32 = arith.constant 0 : i32
    %c0_i32_0 = arith.constant 0 : i32
    %c0_i32_1 = arith.constant 0 : i32
    return %arg0, %arg1, %c0_i32, %c0_i32_0 : i32, i32, i32, i32
  }
}

module attributes {stable_mosaic.version = 11 : i64} {
  func.func @_conv_tap_kernel(%arg0: i32, %arg1: i32, %arg2: memref<1x1x1x96x768xbf16, #tpu.memory_space<vmem>>, %arg3: memref<1x3x1x96xbf16, #tpu.memory_space<vmem>>, %arg4: memref<1x1x1xf32, #tpu.memory_space<vmem>>, %arg5: memref<1x1x1x640xbf16, #tpu.memory_space<vmem>>) attributes {dimension_semantics = [#tpu.dimension_semantics<parallel>, #tpu.dimension_semantics<parallel>], iteration_bounds = array<i64: 2, 1>, scalar_prefetch = 0 : i64, scratch_operands = 0 : i64, tpu.core_type = #tpu.core_type<tc>, window_params = [{transform_indices = @transform_0, window_bounds = array<i64: 1, 1, 1, 96, 768>}, {transform_indices = @transform_1, window_bounds = array<i64: 1, 3, 1, 96>}, {transform_indices = @transform_2, window_bounds = array<i64: 1, 1, 1>}, {transform_indices = @transform_3, window_bounds = array<i64: 1, 1, 1, 640>}]} {
    %c0 = arith.constant 0 : index
    %c0_0 = arith.constant 0 : index
    %c0_1 = arith.constant 0 : index
    %c0_2 = arith.constant 0 : index
    %c0_3 = arith.constant 0 : index
    %0 = vector.load %arg2[%c0, %c0_0, %c0_1, %c0_2, %c0_3] : memref<1x1x1x96x768xbf16, #tpu.memory_space<vmem>>, vector<1x1x1x96x640xbf16>
    %1 = vector.shape_cast %0 : vector<1x1x1x96x640xbf16> to vector<96x640xbf16>
    %c0_4 = arith.constant 0 : index
    %c0_5 = arith.constant 0 : index
    %c0_6 = arith.constant 0 : index
    %c0_7 = arith.constant 0 : index
    %2 = vector.load %arg3[%c0_4, %c0_5, %c0_6, %c0_7] : memref<1x3x1x96xbf16, #tpu.memory_space<vmem>>, vector<1x1x1x96xbf16>
    %3 = vector.shape_cast %2 : vector<1x1x1x96xbf16> to vector<1x96xbf16>
    %cst = arith.constant dense<0.000000e+00> : vector<1x640xf32>
    %4 = tpu.matmul %3, %1, %cst {dimension_numbers = #tpu.dot_dimension_numbers<[1], [0], [0], [1], [0, 0, 1, 1], [], []>} : vector<1x96xbf16>, vector<96x640xbf16>, vector<1x640xf32> -> vector<1x640xf32>
    %c0_8 = arith.constant 0 : index
    %c0_9 = arith.constant 0 : index
    %c0_10 = arith.constant 0 : index
    %c0_11 = arith.constant 0 : index
    %c1 = arith.constant 1 : index
    %5 = vector.load %arg2[%c0_8, %c0_9, %c0_10, %c0_11, %c1] : memref<1x1x1x96x768xbf16, #tpu.memory_space<vmem>>, vector<1x1x1x96x640xbf16>
    %6 = vector.shape_cast %5 : vector<1x1x1x96x640xbf16> to vector<96x640xbf16>
    %c0_12 = arith.constant 0 : index
    %c1_13 = arith.constant 1 : index
    %c0_14 = arith.constant 0 : index
    %c0_15 = arith.constant 0 : index
    %7 = vector.load %arg3[%c0_12, %c1_13, %c0_14, %c0_15] : memref<1x3x1x96xbf16, #tpu.memory_space<vmem>>, vector<1x1x1x96xbf16>
    %8 = vector.shape_cast %7 : vector<1x1x1x96xbf16> to vector<1x96xbf16>
    %cst_16 = arith.constant dense<0.000000e+00> : vector<1x640xf32>
    %9 = tpu.matmul %8, %6, %cst_16 {dimension_numbers = #tpu.dot_dimension_numbers<[1], [0], [0], [1], [0, 0, 1, 1], [], []>} : vector<1x96xbf16>, vector<96x640xbf16>, vector<1x640xf32> -> vector<1x640xf32>
    %10 = arith.addf %4, %9 : vector<1x640xf32>
    %c0_17 = arith.constant 0 : index
    %c0_18 = arith.constant 0 : index
    %c0_19 = arith.constant 0 : index
    %c0_20 = arith.constant 0 : index
    %c2 = arith.constant 2 : index
    %11 = vector.load %arg2[%c0_17, %c0_18, %c0_19, %c0_20, %c2] : memref<1x1x1x96x768xbf16, #tpu.memory_space<vmem>>, vector<1x1x1x96x640xbf16>
    %12 = vector.shape_cast %11 : vector<1x1x1x96x640xbf16> to vector<96x640xbf16>
    %c0_21 = arith.constant 0 : index
    %c2_22 = arith.constant 2 : index
    %c0_23 = arith.constant 0 : index
    %c0_24 = arith.constant 0 : index
    %13 = vector.load %arg3[%c0_21, %c2_22, %c0_23, %c0_24] : memref<1x3x1x96xbf16, #tpu.memory_space<vmem>>, vector<1x1x1x96xbf16>
    %14 = vector.shape_cast %13 : vector<1x1x1x96xbf16> to vector<1x96xbf16>
    %cst_25 = arith.constant dense<0.000000e+00> : vector<1x640xf32>
    %15 = tpu.matmul %14, %12, %cst_25 {dimension_numbers = #tpu.dot_dimension_numbers<[1], [0], [0], [1], [0, 0, 1, 1], [], []>} : vector<1x96xbf16>, vector<96x640xbf16>, vector<1x640xf32> -> vector<1x640xf32>
    %16 = arith.addf %10, %15 : vector<1x640xf32>
    %c0_26 = arith.constant 0 : index
    %c0_27 = arith.constant 0 : index
    %c0_28 = arith.constant 0 : index
    %17 = vector.load %arg4[%c0_26, %c0_27, %c0_28] : memref<1x1x1xf32, #tpu.memory_space<vmem>>, vector<1x1x1xf32>
    %18 = vector.shape_cast %17 : vector<1x1x1xf32> to vector<1x1xf32>
    %19 = vector.broadcast %18 : vector<1x1xf32> to vector<1x640xf32>
    %20 = arith.addf %16, %19 : vector<1x640xf32>
    %21 = arith.truncf %20 : vector<1x640xf32> to vector<1x640xbf16>
    %c0_29 = arith.constant 0 : index
    %c0_30 = arith.constant 0 : index
    %c0_31 = arith.constant 0 : index
    %c0_32 = arith.constant 0 : index
    %22 = vector.load %arg5[%c0_29, %c0_30, %c0_31, %c0_32] : memref<1x1x1x640xbf16, #tpu.memory_space<vmem>>, vector<1x1x1x640xbf16>
    %23 = vector.shape_cast %22 : vector<1x1x1x640xbf16> to vector<1x640xbf16>
    %24 = vector.shape_cast %21 : vector<1x640xbf16> to vector<1x1x1x640xbf16>
    tpu.vector_store %arg5[%c0_29, %c0_30, %c0_31, %c0_32], %24 {strides = array<i32>} : memref<1x1x1x640xbf16, #tpu.memory_space<vmem>>, vector<1x1x1x640xbf16>,
    return
  }
  func.func @transform_0(%arg0: i32, %arg1: i32) -> (i32, i32, i32, i32, i32) {
    %c0_i32 = arith.constant 0 : i32
    %c0_i32_0 = arith.constant 0 : i32
    %c0_i32_1 = arith.constant 0 : i32
    %c0_i32_2 = arith.constant 0 : i32
    return %arg0, %arg1, %c0_i32, %c0_i32_0, %c0_i32_1 : i32, i32, i32, i32, i32
  }
  func.func @transform_1(%arg0: i32, %arg1: i32) -> (i32, i32, i32, i32) {
    %c0_i32 = arith.constant 0 : i32
    %c0_i32_0 = arith.constant 0 : i32
    %c0_i32_1 = arith.constant 0 : i32
    %c0_i32_2 = arith.constant 0 : i32
    return %arg1, %c0_i32, %c0_i32_0, %c0_i32_1 : i32, i32, i32, i32
  }
  func.func @transform_2(%arg0: i32, %arg1: i32) -> (i32, i32, i32) {
    %c0_i32 = arith.constant 0 : i32
    %c0_i32_0 = arith.constant 0 : i32
    %c0_i32_1 = arith.constant 0 : i32
    return %arg1, %c0_i32, %c0_i32_0 : i32, i32, i32
  }
  func.func @transform_3(%arg0: i32, %arg1: i32) -> (i32, i32, i32, i32) {
    %c0_i32 = arith.constant 0 : i32
    %c0_i32_0 = arith.constant 0 : i32
    %c0_i32_1 = arith.constant 0 : i32
    return %arg0, %arg1, %c0_i32, %c0_i32_0 : i32, i32, i32, i32
  }
}

</mosaic_0001>

<bundles_post_ra>
// kernel: discriminator_b_forward.7
= control target key start
LH: loop header
LB: loop body
LE: loop exit
PB: predicated region body
PF: predicated region fallthrough
CT: control target
= control target key end

     0   :  { %s792_s9 = smov 0   ;;  %s794_s10 = smov 0   ;;  %s852_s0 = inlined_call_operand.vmem [shape: bf16[2,128,64], index: 0, kind: input, shape index: {}]   ;;  %s853_s1 = inlined_call_operand.vmem [shape: bf16[64,128], index: 1, kind: input, shape index: {}]   ;;  %s854_s2 = inlined_call_operand.vmem [shape: bf16[2,128,128], index: 2, kind: output, shape index: {}]  }
   0x1   :  { %s796_s11 = smov 0  }
   0x2 LB: > { %s24_s12 = sadd.s32 1, %s771_s10  ;;  %p565_p0 = scmp.ge.s32.totalorder %s775_s11, 1  ;;  %s775_s11 = sphi %s796_s11, %s12_s11   ;;  %s771_s10 = sphi %s794_s10, %s856_s10   ;;  %s767_s9 = sphi %s792_s9, %s855_s9  }
   0x3   : > { %p26_p1 = scmp.ge.s32.totalorder %s24_s12, 2  ;;  %p133_p2 = scmp.lt.s32.totalorder %s775_s11, 3 }
   0x5   : > { %s858_s12 = smov (%p26_p1, %s24_s12), 0  ;;  %p134_p3 = pnand %p565_p0, %p133_p2 }
   0x6   : > { %v741_v0 = vld [vmem:[%s853_s1] sm:$0xff] (!%p134_p3)   ;;  %p164_p4 = scmp.lt.s32.totalorder (!%p134_p3), %s767_s9, 1  ;;  %v742_v1 = vld [vmem:[%s853_s1 + $0x8] sm:$0xff] (!%p134_p3)   ;;  %v743_v2 = vld [vmem:[%s853_s1 + $0x10] sm:$0xff] (!%p134_p3)   ;;  %vm272_vm0 = vcmask (!%p134_p3), 523264  }
   0x7   : > { %137 = sbr.rel (%p134_p3) target bundleno = 249 (0xf9), region = 28  ;;  %685 = vmatprep.subr.bf16.mxu0 (!%p134_p3), %v741_v0  ;;  %709 = vmatprep.subr.bf16.mxu1 (!%p134_p3), %v741_v0  ;;  %v744_v5 = vld [vmem:[%s853_s1 + $0x18] sm:$0xff] (!%p134_p3)  }
   0x8   : > { %686 = vmatpush3.bf16.msra.mxu0 (!%p134_p3), %v741_v0  ;;  %713 = vmatpush3.bf16.msra.mxu1 (!%p134_p3), %v741_v0 }
   0x9   : > { %687 = vmatprep.subr.bf16.mxu0 (!%p134_p3), %v742_v1  ;;  %710 = vmatprep.subr.bf16.mxu1 (!%p134_p3), %v742_v1 }
   0xc   : > { %688 = vmatpush3.bf16.msra.mxu0 (!%p134_p3), %v742_v1  ;;  %714 = vmatpush3.bf16.msra.mxu1 (!%p134_p3), %v742_v1 }
   0xd   : > { %689 = vmatprep.subr.bf16.mxu0 (!%p134_p3), %v743_v2  ;;  %711 = vmatprep.subr.bf16.mxu1 (!%p134_p3), %v743_v2 }
   0xe   : > { %s860_s9 = smov (!%p164_p4, %s767_s9), 1 }
   0xf   : > { %s608_s19 = sshll.u32 %s860_s9, 6 }
  0x10   : > { %s171_s22 = scalar_lea.vmem %s852_s0, %s608_s19  ;;  %690 = vmatpush3.bf16.msra.mxu0 %v743_v2  ;;  %715 = vmatpush3.bf16.msra.mxu1 %v743_v2  ;;  %s181_s27 = scalar_lea.vmem %s854_s2, %s608_s19 }
  0x11   : > { %v745_v3 = vld [vmem:[%s171_s22] sm:$0xff]   ;;  %691 = vmatprep.subr.bf16.mxu0 %v744_v5  ;;  %712 = vmatprep.subr.bf16.mxu1 %v744_v5  ;;  %v747_v6 = vld [vmem:[%s171_s22 + $0x8] sm:$0xff]   ;;  %v749_v8 = vld [vmem:[%s171_s22 + $0x10] sm:$0xff]  }
  0x12   : > { %v746_v4 = vld [vmem:[%s171_s22 + $0x20] sm:$0xff]   ;;  %693 = vmatprep.mubr.msk.bf16.mxu0 %vm272_vm0, %v745_v3  ;;  %v748_v7 = vld [vmem:[%s171_s22 + $0x28] sm:$0xff]   ;;  %v750_v9 = vld [vmem:[%s171_s22 + $0x30] sm:$0xff]  }
  0x13   : > { %701 = vmatprep.mubr.msk.bf16.mxu1 %vm272_vm0, %v746_v4  ;;  %v751_v10 = vld [vmem:[%s171_s22 + $0x18] sm:$0xff]  }
  0x14   : > { %692 = vmatpush3.bf16.msra.mxu0 %v744_v5  ;;  %716 = vmatpush3.bf16.msra.mxu1 %v744_v5  ;;  %v752_v11 = vld [vmem:[%s171_s22 + $0x38] sm:$0xff]  }
  0x17   : > { %694 = vmatmul.mubr.msk.bf16.vlgmr.msra.gmra.mrb[0].mxu0 %vm272_vm0, %v747_v6  ;;  %702 = vmatmul.mubr.msk.bf16.vlgmr.msra.gmra.mrb[0].mxu1 %vm272_vm0, %v748_v7 }
  0x18   : > { %697 = vmatprep.mubr.msk.bf16.mxu0 %vm272_vm0, %v749_v8  ;;  %705 = vmatprep.mubr.msk.bf16.mxu1 %vm272_vm0, %v750_v9 }
  0x1f   : > { %698 = vmatmul.mubr.msk.bf16.gmra.mrb[4].mxu0 %vm272_vm0, %v751_v10  ;;  %706 = vmatmul.mubr.msk.bf16.gmra.mrb[4].mxu1 %vm272_vm0, %v752_v11 }
  0xea   : > { %v695_v12 = vpop.f32.mrb[0].mxu0  ;;  %v703_v13 = vpop.f32.mrb[0].mxu1 }
  0xeb   : > { %v331_v14 = vpop.f32.mrb[1].mxu0  ;;  %v363_v15 = vpop.f32.mrb[1].mxu1 }
  0xec   : > { %v696_v16 = vpop.f32.mrb[2].mxu0  ;;  %v704_v17 = vpop.f32.mrb[2].mxu1 }
  0xed   : > { %v634_v18 = vpack.c.bf16 %v696_v16, %v695_v12  ;;  %v654_v19 = vpack.c.bf16 %v704_v17, %v703_v13  ;;  %v334_v20 = vpop.f32.mrb[3].mxu0  ;;  %v366_v21 = vpop.f32.mrb[3].mxu1 }
  0xee   : > { %v629_v22 = vpack.c.bf16 %v334_v20, %v331_v14  ;;  %v649_v23 = vpack.c.bf16 %v366_v21, %v363_v15 }
  0xef   : > { %666 = vst [vmem:[%s181_s27 + $0x8] sm:$0xff] %v634_v18   ;;  %670 = vst [vmem:[%s181_s27 + $0x28] sm:$0xff] %v654_v19  }
  0xf0   : > { %630 = vst [vmem:[%s181_s27] sm:$0xff] %v629_v22   ;;  %669 = vst [vmem:[%s181_s27 + $0x20] sm:$0xff] %v649_v23  }
  0xf2   : > { %v699_v24 = vpop.f32.mrb[4].mxu0  ;;  %v707_v25 = vpop.f32.mrb[4].mxu1 }
  0xf3   : > { %v347_v26 = vpop.f32.mrb[5].mxu0  ;;  %v379_v27 = vpop.f32.mrb[5].mxu1 }
  0xf4   : > { %v700_v28 = vpop.f32.mrb[6].mxu0  ;;  %v708_v29 = vpop.f32.mrb[6].mxu1 }
  0xf5   : > { %v644_v30 = vpack.c.bf16 %v700_v28, %v699_v24  ;;  %v664_v31 = vpack.c.bf16 %v708_v29, %v707_v25  ;;  %v350_v32 = vpop.f32.mrb[7].mxu0  ;;  %v382_v33 = vpop.f32.mrb[7].mxu1 }
  0xf6   : > { %v639_v34 = vpack.c.bf16 %v350_v32, %v347_v26  ;;  %v659_v35 = vpack.c.bf16 %v382_v33, %v379_v27 }
  0xf7   : > { %668 = vst [vmem:[%s181_s27 + $0x18] sm:$0xff] %v644_v30   ;;  %672 = vst [vmem:[%s181_s27 + $0x38] sm:$0xff] %v664_v31  }
  0xf8   : > { %667 = vst [vmem:[%s181_s27 + $0x10] sm:$0xff] %v639_v34   ;;  %671 = vst [vmem:[%s181_s27 + $0x30] sm:$0xff] %v659_v35  }
  0xf9 PF: > { %s12_s11 = sadd.s32 1, %s775_s11   ;;  %s855_s9 = smov %s771_s10 }
  0xfa   : > { %p9_p5 = scmp.ge.s32.totalorder %s12_s11, 4   ;;  %s856_s10 = smov %s858_s12 }
  0xfc   :  { %11 = sbr.rel (!%p9_p5) target bundleno = 2 (0x2), region = 58 }

// kernel: discriminator_b_forward.8
= control target key start
LH: loop header
LB: loop body
LE: loop exit
PB: predicated region body
PF: predicated region fallthrough
CT: control target
= control target key end

     0   :  { %s4747_s12 = smov 0   ;;  %s4749_s13 = smov 0   ;;  %s5519_s0 = inlined_call_operand.vmem [shape: bf16[2,5,1,6,1280], index: 0, kind: input, shape index: {}]   ;;  %s5520_s1 = inlined_call_operand.vmem [shape: bf16[5,9,32,6], index: 1, kind: input, shape index: {}]   ;;  %s5521_s2 = inlined_call_operand.vmem [shape: f32[5,32,1], index: 2, kind: input, shape index: {}]   ;;  %s5522_s3 = inlined_call_operand.vmem [shape: bf16[2,5,32,1152], index: 3, kind: output, shape index: {}]  }
   0x1   :  { %s4751_s14 = smov 0   ;;  %s4753_s15 = smov 0  }
   0x2   :  { %s4755_s16 = smov 0  }
   0x3 LB: > { %s22_s17 = sadd.s32 1, %s4708_s14  ;;  %s25_s18 = sadd.s32 1, %s4712_s15  ;;  %s4716_s16 = sphi %s4755_s16, %s13_s16   ;;  %s4712_s15 = sphi %s4753_s15, %s5526_s15   ;;  %s4708_s14 = sphi %s4751_s14, %s5525_s14   ;;  %s4704_s13 = sphi %s4749_s13, %s5524_s13   ;;  %s4700_s12 = sphi %s4747_s12, %s5523_s12  }
   0x4   : > { %p23_p0 = scmp.ge.s32.totalorder %s22_s17, 5  ;;  %p3979_p1 = scmp.ge.s32.totalorder %s4716_s16, 1 }
   0x5   : > { %p177_p2 = scmp.lt.s32.totalorder %s4716_s16, 11 }
   0x6   : > { %s5528_s17 = smov (%p23_p0, %s22_s17), 0  ;;  %s5530_s18 = smov (!%p23_p0, %s25_s18), %s4712_s15 }
   0x7   : > { %p178_p3 = pnand %p3979_p1, %p177_p2  ;;  %p27_p4 = scmp.ge.s32.totalorder %s5530_s18, 2 }
   0x8   : > { %p219_p5 = scmp.lt.s32.totalorder (!%p178_p3), %s4704_s13, 1  ;;  %p221_p6 = scmp.lt.s32.totalorder (!%p178_p3), %s4700_s12, 4  ;;  %vm328_vm0 = vcmask (!%p178_p3), 48128   ;;  %v4719_v8 = vmov (!%p178_p3), 0   ;;  %vm318_vm1 = vcmask (!%p178_p3), 1039360   ;;  %vm335_vm2 = vcmask (!%p178_p3), 1042432  }
   0x9   : > { %s5532_s18 = smov (%p27_p4, %s5530_s18), 0  ;;  %181 = sbr.rel (%p178_p3) target bundleno = 702 (0x2be), region = 32 }
   0xa   : > { %s4718_s30 = smov (!%p178_p3), 127   ;;  %395 = vmatprep.mubr.bf16.mxu1 (!%p178_p3), %v4719_v8  ;;  %4647 = vset.pattern.permute.xlu0 (!%p178_p3), %v4719_v8  ;;  %s4720_s4 = smov (!%p178_p3), 126   ;;  %vm966_vm3 = vcmask (!%p178_p3), 1031168   ;;  %vm1341_vm4 = vcmask (!%p178_p3), 1022976   ;;  %vm1716_vm5 = vcmask (!%p178_p3), 1014784   ;;  %vm2091_vm6 = vcmask (!%p178_p3), 1006592  }
   0xb   : > { %4648 = vset.pattern.permute.xlu1 (!%p178_p3), %v4719_v8  ;;  %s4721_s5 = smov (!%p178_p3), 125   ;;  %s4722_s6 = smov (!%p178_p3), 124   ;;  %vm2466_vm7 = vcmask (!%p178_p3), 998400   ;;  %vm2841_vm8 = vcmask (!%p178_p3), 990208   ;;  %vm3216_vm9 = vcmask (!%p178_p3), 982016  }
   0xc   : > { %s4723_s7 = smov (!%p178_p3), 123   ;;  %s4724_s8 = smov (!%p178_p3), 122  }
   0xd   : > { %s4725_s9 = smov (!%p178_p3), 121   ;;  %s4726_s10 = smov (!%p178_p3), 120  }
  0x10   : > { %s5534_s13 = smov (!%p219_p5, %s4704_s13), 1  ;;  %s5536_s12 = smov (!%p221_p6, %s4700_s12), 4 }
  0x11   : > { %s4594_s19 = smul.u32 50, %s5534_s13  ;;  %s4194_s11 = sshll.u32 %s5536_s12, 5 }
  0x12   : > { %s4593_s20 = smul.u32 10, %s5536_s12 }
  0x13   : > { %s4595_s21 = smul.u32 144, %s5536_s12 }
  0x14   : > { %s225_s22 = sadd.s32 %s4594_s19, %s4593_s20 }
  0x15   : > { %s3980_s23 = sshll.u32 %s225_s22, 2  ;;  %s4787_s26 = scalar_lea.vmem %s5520_s1, %s4595_s21 }
  0x16   : > { %s4792_s29 = scalar_lea.vmem %s5519_s0, %s3980_s23  ;;  %v4795_v0 = vld [vmem:[%s4787_s26 + $0x10] sm:$0xff]   ;;  %v4895_v24 = vld [vmem:[%s4787_s26 + $0x18] sm:$0xff]   ;;  %v4924_v34 = vld [vmem:[%s4787_s26] sm:$0xff]   ;;  %s237_s21 = scalar_lea.vmem %s5521_s2, %s4194_s11 }
  0x17   : > { %v257_v1 = vld [vmem:[%s4792_s29 + $0x20] sm:$0x77]  ;;  %4244 = vmatprep.mubr.msk.bf16.mxu0 %vm328_vm0, %v4795_v0  ;;  %v249_v5 = vld [vmem:[%s4792_s29 + $0x8] sm:$0x77]  ;;  %v250_v9 = vld [vmem:[%s4792_s29 + $0x10] sm:$0x77] }
  0x18   : > { %v248_v2 = vld [vmem:[%s4792_s29] sm:$0x77]  ;;  %v4799_v3 = vcombine.low %v257_v1, %v257_v1  ;;  %v4807_v6 = vcombine.high %v257_v1, %v257_v1  ;;  %v4817_v10 = vcombine.low %v249_v5, %v249_v5  ;;  %v4820_v11 = vcombine.high %v249_v5, %v249_v5  ;;  %v251_v12 = vld [vmem:[%s4792_s29 + $0x18] sm:$0x77]  ;;  %v4947_v41 = vld [vmem:[%s4787_s26 + $0x8] sm:$0xff]   ;;  %s4596_s22 = smul.u32 36, %s5536_s12 }
  0x19   : > { %v4801_v4 = vcombine.low %v248_v2, %v248_v2  ;;  %v4810_v7 = vcombine.high %v248_v2, %v248_v2  ;;  %v4824_v13 = vcombine.low %v250_v9, %v250_v9  ;;  %v4827_v14 = vcombine.high %v250_v9, %v250_v9  ;;  %v4663_v38 = vld [vmem:[%s4792_s29 + $0x20] ss:$0 sps:$4 sm:$0x77]   ;;  %v5026_v2 = vld [vmem:[%s4787_s26 + $0x28] sm:$0xff]   ;;  %s4597_s23 = smul.u32 180, %s5534_s13 }
  0x1a   : > { %314 = vrot.lane.b32.xlu0 %v4799_v3, %s4718_s30  ;;  %v4830_v15 = vcombine.low %v251_v12, %v251_v12  ;;  %v4836_v16 = vcombine.high %v251_v12, %v251_v12  ;;  %v668_v48 = vsel %vm335_vm2, %v4663_v38, 0  ;;  %v5012_v59 = vld [vmem:[%s4787_s26 + $0x20] sm:$0xff]   ;;  %v650_v1 = vsel %vm335_vm2, %v4817_v10, 0 }
  0x1b   : > { %298 = vrot.lane.b32.xlu1 %v4801_v4, %s4718_s30  ;;  %v644_v27 = vsel %vm335_vm2, %v4801_v4, 0  ;;  %v656_v37 = vsel %vm335_vm2, %v4824_v13, 0  ;;  %s244_s24 = sadd.s32 %s4597_s23, %s4596_s22 }
  0x1c   : > { %s3984_s12 = sshll.u32 %s244_s24, 2 }
  0x1e   : > { %316 = vrot.lane.b32.xlu0 %v4807_v6, %s4718_s30 }
  0x1f   : > { %300 = vrot.lane.b32.xlu1 %v4810_v7, %s4718_s30 }
  0x22   : > { %302 = vrot.lane.b32.xlu0 %v4817_v10, %s4718_s30 }
  0x23   : > { %304 = vrot.lane.b32.xlu1 %v4820_v11, %s4718_s30 }
  0x26   : > { %306 = vrot.lane.b32.xlu0 %v4824_v13, %s4718_s30 }
  0x27   : > { %308 = vrot.lane.b32.xlu1 %v4827_v14, %s4718_s30 }
  0x2a   : > { %310 = vrot.lane.b32.xlu0 %v4830_v15, %s4718_s30 }
  0x2b   : > { %946 = vrot.lane.b32.xlu1 %v4801_v4, %s4720_s4 }
  0x2e   : > { %948 = vrot.lane.b32.xlu0 %v4810_v7, %s4720_s4 }
  0x2f   : > { %950 = vrot.lane.b32.xlu1 %v4817_v10, %s4720_s4 }
  0x32   : > { %312 = vrot.lane.b32.xlu0 %v4836_v16, %s4718_s30 }
  0x33   : > { %954 = vrot.lane.b32.xlu1 %v4824_v13, %s4720_s4 }
  0x36   : > { %956 = vrot.lane.b32.xlu0 %v4827_v14, %s4720_s4 }
  0x37   : > { %958 = vrot.lane.b32.xlu1 %v4830_v15, %s4720_s4 }
  0x3a   : > { %962 = vrot.lane.b32.xlu0 %v4799_v3, %s4720_s4 }
  0x3b   : > { %964 = vrot.lane.b32.xlu1 %v4807_v6, %s4720_s4 }
  0x3e   : > { %1321 = vrot.lane.b32.xlu0 %v4801_v4, %s4721_s5 }
  0x3f   : > { %1323 = vrot.lane.b32.xlu1 %v4810_v7, %s4721_s5 }
  0x42   : > { %1325 = vrot.lane.b32.xlu0 %v4817_v10, %s4721_s5 }
  0x43   : > { %952 = vrot.lane.b32.xlu1 %v4820_v11, %s4720_s4 }
  0x46   : > { %1329 = vrot.lane.b32.xlu0 %v4824_v13, %s4721_s5 }
  0x47   : > { %1331 = vrot.lane.b32.xlu1 %v4827_v14, %s4721_s5 }
  0x4a   : > { %1333 = vrot.lane.b32.xlu0 %v4830_v15, %s4721_s5 }
  0x4b   : > { %960 = vrot.lane.b32.xlu1 %v4836_v16, %s4720_s4 }
  0x4e   : > { %1337 = vrot.lane.b32.xlu0 %v4799_v3, %s4721_s5 }
  0x4f   : > { %1339 = vrot.lane.b32.xlu1 %v4807_v6, %s4721_s5 }
  0x52   : > { %1696 = vrot.lane.b32.xlu0 %v4801_v4, %s4722_s6 }
  0x53   : > { %1698 = vrot.lane.b32.xlu1 %v4810_v7, %s4722_s6 }
  0x56   : > { %1700 = vrot.lane.b32.xlu0 %v4817_v10, %s4722_s6 }
  0x57   : > { %1327 = vrot.lane.b32.xlu1 %v4820_v11, %s4721_s5 }
  0x5a   : > { %1704 = vrot.lane.b32.xlu0 %v4824_v13, %s4722_s6 }
  0x5b   : > { %1706 = vrot.lane.b32.xlu1 %v4827_v14, %s4722_s6 }
  0x5e   : > { %1708 = vrot.lane.b32.xlu0 %v4830_v15, %s4722_s6 }
  0x5f   : > { %1335 = vrot.lane.b32.xlu1 %v4836_v16, %s4721_s5 }
  0x62   : > { %1712 = vrot.lane.b32.xlu0 %v4799_v3, %s4722_s6 }
  0x63   : > { %1714 = vrot.lane.b32.xlu1 %v4807_v6, %s4722_s6 }
  0x66   : > { %1702 = vrot.lane.b32.xlu0 %v4820_v11, %s4722_s6 }
  0x67   : > { %2071 = vrot.lane.b32.xlu1 %v4801_v4, %s4723_s7 }
  0x6a   : > { %2073 = vrot.lane.b32.xlu0 %v4810_v7, %s4723_s7 }
  0x6b   : > { %2075 = vrot.lane.b32.xlu1 %v4817_v10, %s4723_s7 }
  0x6e   : > { %1710 = vrot.lane.b32.xlu0 %v4836_v16, %s4722_s6 }
  0x6f   : > { %2079 = vrot.lane.b32.xlu1 %v4824_v13, %s4723_s7 }
  0x72   : > { %2081 = vrot.lane.b32.xlu0 %v4827_v14, %s4723_s7 }
  0x73   : > { %2083 = vrot.lane.b32.xlu1 %v4830_v15, %s4723_s7 }
  0x76   : > { %2077 = vrot.lane.b32.xlu0 %v4820_v11, %s4723_s7 }
  0x77   : > { %2087 = vrot.lane.b32.xlu1 %v4799_v3, %s4723_s7 }
  0x7a   : > { %2089 = vrot.lane.b32.xlu0 %v4807_v6, %s4723_s7 }
  0x7b   : > { %2446 = vrot.lane.b32.xlu1 %v4801_v4, %s4724_s8 }
  0x7e   : > { %2448 = vrot.lane.b32.xlu0 %v4810_v7, %s4724_s8 }
  0x7f   : > { %2450 = vrot.lane.b32.xlu1 %v4817_v10, %s4724_s8 }
  0x82   : > { %2085 = vrot.lane.b32.xlu0 %v4836_v16, %s4723_s7 }
  0x83   : > { %2454 = vrot.lane.b32.xlu1 %v4824_v13, %s4724_s8 }
  0x86   : > { %2456 = vrot.lane.b32.xlu0 %v4827_v14, %s4724_s8 }
  0x87   : > { %2458 = vrot.lane.b32.xlu1 %v4830_v15, %s4724_s8 }
  0x8a   : > { %2452 = vrot.lane.b32.xlu0 %v4820_v11, %s4724_s8 }
  0x8b   : > { %2462 = vrot.lane.b32.xlu1 %v4799_v3, %s4724_s8 }
  0x8c   : > { %v4885_v17 = vpop.permute.xlu0 %314 }
  0x8d   : > { %v299_v18 = vpop.permute.xlu1 %298 }
  0x8e   : > { %2464 = vrot.lane.b32.xlu0 %v4807_v6, %s4724_s8 }
  0x8f   : > { %2460 = vrot.lane.b32.xlu1 %v4836_v16, %s4724_s8 }
  0x90   : > { %v317_v19 = vpop.permute.xlu0 %316 }
  0x91   : > { %v301_v20 = vpop.permute.xlu1 %300  ;;  %v327_v21 = vsel %vm318_vm1, %v4885_v17, %v317_v19 }
  0x92   : > { %v319_v22 = vsel %vm318_vm1, %v299_v18, %v301_v20  ;;  %4584 = vmatprep.subr.msk.bf16.mxu0 %vm335_vm2, %v327_v21  ;;  %v361_v23 = vsel %vm335_vm2, %v327_v21, 0  ;;  %2821 = vrot.lane.b32.xlu0 %v4801_v4, %s4725_s9  ;;  %v5077_v21 = vld [vmem:[%s4787_s26 + $0x30] sm:$0xff]  }
  0x93   : > { %4243 = vmatpush3.bf16.msra.mxu0 %v361_v23  ;;  %2823 = vrot.lane.b32.xlu1 %v4810_v7, %s4725_s9  ;;  %v337_v26 = vsel %vm335_vm2, %v319_v22, 0 }
  0x94   : > { %v303_v25 = vpop.permute.xlu0 %302  ;;  %4018 = vmatprep.subr.msk.bf16.mxu0 %vm335_vm2, %v4810_v7 }
  0x95   : > { %v305_v28 = vpop.permute.xlu1 %304  ;;  %v320_v29 = vsel %vm318_vm1, %v301_v20, %v303_v25 }
  0x96   : > { %v321_v30 = vsel %vm318_vm1, %v303_v25, %v305_v28  ;;  %4245 = vmatmul.mubr.msk.bf16.vlgmr.msra.gmra.mrb[0].mxu0 %vm328_vm0, %v4895_v24  ;;  %4001 = vmatprep.subr.msk.bf16.mxu1 %vm335_vm2, %v320_v29 }
  0x97   : > { %364 = vmatpush1.bf16.msra.mxu1 %v337_v26  ;;  %671 = vmatpush1.bf16.msra.mxu0 %v644_v27  ;;  %v343_v32 = vsel %vm335_vm2, %v321_v30, 0  ;;  %v5091_v27 = vld [vmem:[%s4787_s26 + $0x38] sm:$0xff]  }
  0x98   : > { %v307_v31 = vpop.permute.xlu0 %306  ;;  %702 = vmatprep.mubr.bf16.mxu0 %v4719_v8  ;;  %4024 = vmatprep.subr.msk.bf16.mxu0 %vm335_vm2, %v4827_v14 }
  0x99   : > { %v322_v33 = vsel %vm318_vm1, %v305_v28, %v307_v31  ;;  %2825 = vrot.lane.b32.xlu0 %v4817_v10, %s4725_s9  ;;  %2827 = vrot.lane.b32.xlu1 %v4820_v11, %s4725_s9  ;;  %v309_v36 = vpop.permute.xlu1 %308 }
  0x9a   : > { %4002 = vmatmul.mubr.msk.bf16.vlgmr.msra.gmra.mrb[0].mxu1 %vm328_vm0, %v4795_v0  ;;  %4004 = vmatprep.subr.msk.bf16.mxu1 %vm335_vm2, %v322_v33  ;;  %v323_v42 = vsel %vm318_vm1, %v307_v31, %v309_v36 }
  0x9b   : > { %417 = vmatpush1.bf16.msra.mxu1 %v343_v32  ;;  %405 = vmatprep.mubr.bf16.mxu1 %v4719_v8  ;;  %v349_v44 = vsel %vm335_vm2, %v323_v42, 0 }
  0x9c   : > { %v311_v35 = vpop.permute.xlu0 %310 }
  0x9d   : > { %v324_v39 = vsel %vm318_vm1, %v309_v36, %v311_v35  ;;  %2829 = vrot.lane.b32.xlu0 %v4824_v13, %s4725_s9  ;;  %2831 = vrot.lane.b32.xlu1 %v4827_v14, %s4725_s9  ;;  %v947_v43 = vpop.permute.xlu1 %946 }
  0x9e   : > { %4019 = vmatmul.mubr.msk.bf16.vlgmr.msra.gmra.mrb[4].mxu0 %vm328_vm0, %v4924_v34  ;;  %4007 = vmatprep.subr.msk.bf16.mxu1 %vm335_vm2, %v324_v39 }
  0x9f   : > { %777 = vmatpush1.bf16.msra.mxu0 %v656_v37  ;;  %712 = vmatprep.mubr.bf16.mxu0 %v4719_v8 }
  0xa0   : > { %4585 = vmatprep.subr.msk.bf16.mxu0 %vm335_vm2, %v4663_v38  ;;  %v949_v40 = vpop.permute.xlu0 %948 }
  0xa1   : > { %2833 = vrot.lane.b32.xlu0 %v4830_v15, %s4725_s9  ;;  %2835 = vrot.lane.b32.xlu1 %v4836_v16, %s4725_s9  ;;  %v4964_v47 = vpop.permute.xlu1 %950  ;;  %v967_v53 = vsel %vm966_vm3, %v947_v43, %v949_v40 }
  0xa2   : > { %4003 = vmatmul.mubr.msk.bf16.gmra.mrb[4].mxu1 %vm328_vm0, %v4895_v24  ;;  %v968_v49 = vsel %vm966_vm3, %v949_v40, %v4964_v47  ;;  %v983_v55 = vsel %vm335_vm2, %v967_v53, 0 }
  0xa3   : > { %448 = vmatprep.mubr.bf16.mxu1 %v4719_v8 }
  0xa4   : > { %v313_v45 = vpop.permute.xlu0 %312 }
  0xa5   : > { %2837 = vrot.lane.b32.xlu0 %v4799_v3, %s4725_s9  ;;  %2839 = vrot.lane.b32.xlu1 %v4807_v6, %s4725_s9  ;;  %v326_v46 = vsel %vm318_vm1, %v313_v45, %v4885_v17  ;;  %v325_v50 = vsel %vm318_vm1, %v311_v35, %v313_v45  ;;  %v955_v51 = vpop.permute.xlu1 %954 }
  0xa6   : > { %4020 = vmatmul.mubr.msk.bf16.gmra.mrb[8].mxu0 %vm328_vm0, %v4947_v41  ;;  %v355_v52 = vsel %vm335_vm2, %v325_v50, 0 }
  0xa7   : > { %808 = vmatprep.mubr.bf16.mxu0 %v4719_v8 }
  0xa8   : > { %v957_v54 = vpop.permute.xlu0 %956 }
  0xa9   : > { %3196 = vrot.lane.b32.xlu0 %v4801_v4, %s4726_s10  ;;  %3198 = vrot.lane.b32.xlu1 %v4810_v7, %s4726_s10  ;;  %v4996_v56 = vpop.permute.xlu1 %958  ;;  %v971_v58 = vsel %vm966_vm3, %v955_v51, %v957_v54  ;;  %v662_v7 = vsel %vm335_vm2, %v4830_v15, 0 }
  0xaa   : > { %4005 = vmatmul.mubr.msk.bf16.vlgmr.msra.gmra.mrb[8].mxu1 %vm328_vm0, %v4795_v0  ;;  %v972_v57 = vsel %vm966_vm3, %v957_v54, %v4996_v56  ;;  %v995_v61 = vsel %vm335_vm2, %v971_v58, 0 }
  0xab   : > { %470 = vmatpush1.bf16.msra.mxu1 %v349_v44  ;;  %458 = vmatprep.mubr.bf16.mxu1 %v4719_v8 }
  0xac   : > { %4010 = vmatprep.subr.msk.bf16.mxu1 %vm335_vm2, %v326_v46  ;;  %v963_v62 = vpop.permute.xlu0 %962 }
  0xad   : > { %3200 = vrot.lane.b32.xlu0 %v4817_v10, %s4726_s10  ;;  %3202 = vrot.lane.b32.xlu1 %v4820_v11, %s4726_s10  ;;  %v965_v60 = vpop.permute.xlu1 %964 }
  0xae   : > { %4025 = vmatmul.mubr.msk.bf16.vlgmr.msra.gmra.mrb[12].mxu0 %vm328_vm0, %v4924_v34  ;;  %v975_v63 = vsel %vm966_vm3, %v963_v62, %v965_v60 }
  0xaf   : > { %4249 = vmatpush3.bf16.msra.mxu0 %v668_v48  ;;  %818 = vmatprep.mubr.bf16.mxu0 %v4719_v8  ;;  %v1007_v5 = vsel %vm335_vm2, %v975_v63, 0 }
  0xb0   : > { %4038 = vmatprep.subr.msk.bf16.mxu0 %vm335_vm2, %v968_v49  ;;  %v5137_v49 = vld [vmem:[%s4787_s26 + $0x40] sm:$0xff]  }
  0xb1   : > { %3204 = vrot.lane.b32.xlu0 %v4824_v13, %s4726_s10  ;;  %3206 = vrot.lane.b32.xlu1 %v4827_v14, %s4726_s10 }
  0xb2   : > { %4006 = vmatmul.mubr.msk.bf16.gmra.mrb[12].mxu1 %vm328_vm0, %v4895_v24 }
  0xb3   : > { %501 = vmatprep.mubr.bf16.mxu1 %v4719_v8 }
  0xb5   : > { %3208 = vrot.lane.b32.xlu0 %v4830_v15, %s4726_s10  ;;  %3210 = vrot.lane.b32.xlu1 %v4836_v16, %s4726_s10 }
  0xb6   : > { %4026 = vmatmul.mubr.msk.bf16.gmra.mrb[16].mxu0 %vm328_vm0, %v4947_v41 }
  0xb7   : > { %4250 = vmatprep.mubr.msk.bf16.mxu0 %vm328_vm0, %v4924_v34 }
  0xb9   : > { %3212 = vrot.lane.b32.xlu0 %v4799_v3, %s4726_s10  ;;  %3214 = vrot.lane.b32.xlu1 %v4807_v6, %s4726_s10  ;;  %v1322_v3 = vpop.permute.xlu0 %1321 }
  0xba   : > { %4008 = vmatmul.mubr.msk.bf16.vlgmr.msra.gmra.mrb[16].mxu1 %vm328_vm0, %v4795_v0 }
  0xbb   : > { %523 = vmatpush1.bf16.msra.mxu1 %v355_v52  ;;  %511 = vmatprep.mubr.bf16.mxu1 %v4719_v8 }
  0xbc   : > { %4021 = vmatprep.subr.msk.bf16.mxu1 %vm335_vm2, %v4820_v11 }
  0xbd   : > { %v5036_v4 = vpop.permute.xlu0 %1325 }
  0xbe   : > { %4251 = vmatmul.mubr.msk.bf16.vlgmr.msra.gmra.mrb[0].mxu0 %vm328_vm0, %v4947_v41 }
  0xbf   : > { %1010 = vmatpush1.bf16.msra.mxu0 %v983_v55  ;;  %1041 = vmatprep.mubr.bf16.mxu0 %v4719_v8 }
  0xc0   : > { %4044 = vmatprep.subr.msk.bf16.mxu0 %vm335_vm2, %v972_v57  ;;  %v5153_v57 = vld [vmem:[%s4787_s26 + $0x48] sm:$0xff]  }
  0xc1   : > { %v1330_v11 = vpop.permute.xlu0 %1329 }
  0xc2   : > { %4009 = vmatmul.mubr.msk.bf16.gmra.mrb[20].mxu1 %vm328_vm0, %v4895_v24 }
  0xc3   : > { %554 = vmatprep.mubr.bf16.mxu1 %v4719_v8 }
  0xc5   : > { %v5060_v14 = vpop.permute.xlu0 %1333 }
  0xc6   : > { %4039 = vmatmul.mubr.msk.bf16.vlgmr.msra.gmra.mrb[4].mxu0 %vm328_vm0, %v5012_v59 }
  0xc7   : > { %1116 = vmatpush1.bf16.msra.mxu0 %v995_v61  ;;  %1051 = vmatprep.mubr.bf16.mxu0 %v4719_v8 }
  0xc8   : > { %4586 = vmatprep.subr.msk.bf16.mxu0 %vm335_vm2, %v975_v63 }
  0xc9   : > { %v1338_v25 = vpop.permute.xlu0 %1337 }
  0xca   : > { %4011 = vmatmul.mubr.msk.bf16.vlgmr.msra.gmra.mrb[24].mxu1 %vm328_vm0, %v4795_v0  ;;  %v1324_v0 = vpop.permute.xlu1 %1323 }
  0xcb   : > { %724 = vmatpush1.bf16.msra.mxu1 %v650_v1  ;;  %564 = vmatprep.mubr.bf16.mxu1 %v4719_v8  ;;  %v1343_v6 = vsel %vm1341_vm4, %v1324_v0, %v5036_v4  ;;  %v1342_v12 = vsel %vm1341_vm4, %v1322_v3, %v1324_v0 }
  0xcc   : > { %4027 = vmatprep.subr.msk.bf16.mxu1 %vm335_vm2, %v4836_v16  ;;  %v1358_v15 = vsel %vm335_vm2, %v1342_v12, 0 }
  0xcd   : > { %v1697_v29 = vpop.permute.xlu0 %1696 }
  0xce   : > { %4040 = vmatmul.mubr.msk.bf16.gmra.mrb[8].mxu0 %vm328_vm0, %v5026_v2  ;;  %v953_v9 = vpop.permute.xlu1 %952 }
  0xcf   : > { %1147 = vmatprep.mubr.bf16.mxu0 %v4719_v8  ;;  %v970_v10 = vsel %vm966_vm3, %v953_v9, %v955_v51  ;;  %v969_v17 = vsel %vm966_vm3, %v4964_v47, %v953_v9 }
  0xd0   : > { %v989_v20 = vsel %vm335_vm2, %v969_v17, 0 }
  0xd1   : > { %v1701_v35 = vpop.permute.xlu0 %1700 }
  0xd2   : > { %4012 = vmatmul.mubr.msk.bf16.gmra.mrb[28].mxu1 %vm328_vm0, %v4895_v24  ;;  %v1332_v13 = vpop.permute.xlu1 %1331 }
  0xd3   : > { %755 = vmatprep.mubr.bf16.mxu1 %v4719_v8  ;;  %v1347_v16 = vsel %vm1341_vm4, %v1332_v13, %v5060_v14  ;;  %v1346_v19 = vsel %vm1341_vm4, %v1330_v11, %v1332_v13 }
  0xd4   : > { %v1370_v24 = vsel %vm335_vm2, %v1346_v19, 0 }
  0xd5   : > { %v1705_v38 = vpop.permute.xlu0 %1704 }
  0xd6   : > { %4045 = vmatmul.mubr.msk.bf16.vlgmr.msra.gmra.mrb[12].mxu0 %vm328_vm0, %v5012_v59  ;;  %v961_v18 = vpop.permute.xlu1 %960 }
  0xd7   : > { %4255 = vmatpush3.bf16.msra.mxu0 %v1007_v5  ;;  %1157 = vmatprep.mubr.bf16.mxu0 %v4719_v8  ;;  %v974_v22 = vsel %vm966_vm3, %v961_v18, %v963_v62  ;;  %v973_v30 = vsel %vm966_vm3, %v4996_v56, %v961_v18 }
  0xd8   : > { %4058 = vmatprep.subr.msk.bf16.mxu0 %vm335_vm2, %v1343_v6  ;;  %v1001_v31 = vsel %vm335_vm2, %v973_v30, 0 }
  0xd9   : > { %v1709_v45 = vpop.permute.xlu0 %1708 }
  0xda   : > { %4022 = vmatmul.mubr.msk.bf16.vlgmr.msra.gmra.mrb[8].mxu1 %vm328_vm0, %v4924_v34  ;;  %v1340_v23 = vpop.permute.xlu1 %1339 }
  0xdb   : > { %830 = vmatpush1.bf16.msra.mxu1 %v662_v7  ;;  %765 = vmatprep.mubr.bf16.mxu1 %v4719_v8  ;;  %v1350_v26 = vsel %vm1341_vm4, %v1338_v25, %v1340_v23 }
  0xdc   : > { %4041 = vmatprep.subr.msk.bf16.mxu1 %vm335_vm2, %v970_v10 }
  0xdd   : > { %v1713_v48 = vpop.permute.xlu0 %1712 }
  0xde   : > { %4046 = vmatmul.mubr.msk.bf16.gmra.mrb[16].mxu0 %vm328_vm0, %v5026_v2  ;;  %v1699_v28 = vpop.permute.xlu1 %1698 }
  0xdf   : > { %4256 = vmatprep.mubr.msk.bf16.mxu0 %vm328_vm0, %v5012_v59  ;;  %v1718_v36 = vsel %vm1716_vm5, %v1699_v28, %v1701_v35  ;;  %v1717_v42 = vsel %vm1716_vm5, %v1697_v29, %v1699_v28 }
  0xe0   : > { %v1733_v44 = vsel %vm335_vm2, %v1717_v42, 0 }
  0xe1   : > { %v1703_v54 = vpop.permute.xlu0 %1702 }
  0xe2   : > { %4023 = vmatmul.mubr.msk.bf16.gmra.mrb[12].mxu1 %vm328_vm0, %v4947_v41  ;;  %v1328_v32 = vpop.permute.xlu1 %1327  ;;  %v1720_v55 = vsel %vm1716_vm5, %v1703_v54, %v1705_v38  ;;  %v1719_v63 = vsel %vm1716_vm5, %v1701_v35, %v1703_v54  ;;  %v3557_v35 = vld [vmem:[%s237_s21 + $0x8] sm:$0xff] }
  0xe3   : > { %861 = vmatprep.mubr.bf16.mxu1 %v4719_v8  ;;  %v1345_v33 = vsel %vm1341_vm4, %v1328_v32, %v1330_v11  ;;  %v1344_v39 = vsel %vm1341_vm4, %v5036_v4, %v1328_v32  ;;  %v1739_v3 = vsel %vm335_vm2, %v1719_v63, 0  ;;  %3567 = vperm.xlu1 %4648, %v3557_v35   ;;  %v5273_v54 = vld [vmem:[%s4787_s26 + $0x68] sm:$0xff]  }
  0xe4   : > { %v1364_v43 = vsel %vm335_vm2, %v1344_v39, 0  ;;  %v3558_v39 = vld [vmem:[%s237_s21 + $0x10] sm:$0xff] }
  0xe6   : > { %4257 = vmatmul.mubr.msk.bf16.vlgmr.msra.gmra.mrb[0].mxu0 %vm328_vm0, %v5026_v2  ;;  %v1707_v37 = vpop.permute.xlu1 %1706 }
  0xe7   : > { %1385 = vmatpush1.bf16.msra.mxu0 %v1358_v15  ;;  %1416 = vmatprep.mubr.bf16.mxu0 %v4719_v8  ;;  %v1722_v46 = vsel %vm1716_vm5, %v1707_v37, %v1709_v45  ;;  %v1721_v47 = vsel %vm1716_vm5, %v1705_v38, %v1707_v37  ;;  %v5197_v15 = vld [vmem:[%s4787_s26 + $0x50] sm:$0xff]  }
  0xe8   : > { %4064 = vmatprep.subr.msk.bf16.mxu0 %vm335_vm2, %v1347_v16  ;;  %v1745_v50 = vsel %vm335_vm2, %v1721_v47, 0  ;;  %3572 = vperm.xlu1 %4648, %v3558_v39  }
  0xea   : > { %4028 = vmatmul.mubr.msk.bf16.vlgmr.msra.gmra.mrb[24].mxu1 %vm328_vm0, %v4924_v34  ;;  %v1382_v34 = vsel %vm335_vm2, %v1350_v26, 0  ;;  %v1336_v40 = vpop.permute.xlu1 %1335 }
  0xeb   : > { %1063 = vmatpush1.bf16.msra.mxu1 %v989_v20  ;;  %871 = vmatprep.mubr.bf16.mxu1 %v4719_v8  ;;  %v1348_v53 = vsel %vm1341_vm4, %v5060_v14, %v1336_v40 }
  0xec   : > { %4047 = vmatprep.subr.msk.bf16.mxu1 %vm335_vm2, %v974_v22  ;;  %v1376_v56 = vsel %vm335_vm2, %v1348_v53, 0 }
  0xee   : > { %4059 = vmatmul.mubr.msk.bf16.vlgmr.msra.gmra.mrb[4].mxu0 %vm328_vm0, %v5077_v21  ;;  %v1715_v51 = vpop.permute.xlu1 %1714 }
  0xef   : > { %1491 = vmatpush1.bf16.msra.mxu0 %v1370_v24  ;;  %1426 = vmatprep.mubr.bf16.mxu0 %v4719_v8  ;;  %v1725_v52 = vsel %vm1716_vm5, %v1713_v48, %v1715_v51 }
  0xf0   : > { %4587 = vmatprep.subr.msk.bf16.mxu0 %vm335_vm2, %v1350_v26  ;;  %v1757_v61 = vsel %vm335_vm2, %v1725_v52, 0 }
  0xf2   : > { %4029 = vmatmul.mubr.msk.bf16.gmra.mrb[28].mxu1 %vm328_vm0, %v4947_v41  ;;  %v1349_v41 = vsel %vm1341_vm4, %v1336_v40, %v1338_v25  ;;  %v2072_v58 = vpop.permute.xlu1 %2071  ;;  %v3559_v40 = vld [vmem:[%s237_s21 + $0x18] sm:$0xff] }
  0xf3   : > { %1094 = vmatprep.mubr.bf16.mxu1 %v4719_v8 }
  0xf6   : > { %4060 = vmatmul.mubr.msk.bf16.gmra.mrb[8].mxu0 %vm328_vm0, %v5091_v27  ;;  %v2076_v60 = vpop.permute.xlu1 %2075 }
  0xf7   : > { %1522 = vmatprep.mubr.bf16.mxu0 %v4719_v8 }
  0xfa   : > { %4042 = vmatmul.mubr.msk.bf16.vlgmr.msra.gmra.mrb[8].mxu1 %vm328_vm0, %v5012_v59  ;;  %v2080_v4 = vpop.permute.xlu1 %2079 }
  0xfb   : > { %1169 = vmatpush1.bf16.msra.mxu1 %v1001_v31  ;;  %1104 = vmatprep.mubr.bf16.mxu1 %v4719_v8 }
  0xfc   : > { %4061 = vmatprep.subr.msk.bf16.mxu1 %vm335_vm2, %v1345_v33 }
  0xfe   : > { %4065 = vmatmul.mubr.msk.bf16.vlgmr.msra.gmra.mrb[12].mxu0 %vm328_vm0, %v5077_v21  ;;  %v2084_v6 = vpop.permute.xlu1 %2083 }
  0xff   : > { %4261 = vmatpush3.bf16.msra.mxu0 %v1382_v34  ;;  %1532 = vmatprep.mubr.bf16.mxu0 %v4719_v8  ;;  %v3556_v34 = vld [vmem:[%s237_s21] sm:$0xff] }
 0x100   : > { %4078 = vmatprep.subr.msk.bf16.mxu0 %vm335_vm2, %v1718_v36  ;;  %3562 = vperm.xlu0 %4647, %v3556_v34  }
 0x102   : > { %4043 = vmatmul.mubr.msk.bf16.gmra.mrb[12].mxu1 %vm328_vm0, %v5026_v2  ;;  %v2088_v18 = vpop.permute.xlu1 %2087 }
 0x103   : > { %1200 = vmatprep.mubr.bf16.mxu1 %v4719_v8 }
 0x104   : > { %3577 = vperm.xlu0 %4647, %v3559_v40  }
 0x106   : > { %4066 = vmatmul.mubr.msk.bf16.gmra.mrb[16].mxu0 %vm328_vm0, %v5091_v27  ;;  %v2447_v22 = vpop.permute.xlu1 %2446 }
 0x107   : > { %4262 = vmatprep.mubr.msk.bf16.mxu0 %vm328_vm0, %v5077_v21 }
 0x10a   : > { %4048 = vmatmul.mubr.msk.bf16.vlgmr.msra.gmra.mrb[24].mxu1 %vm328_vm0, %v5012_v59  ;;  %v2074_v59 = vpop.permute.xlu0 %2073 }
 0x10b   : > { %1438 = vmatpush1.bf16.msra.mxu1 %v1364_v43  ;;  %1210 = vmatprep.mubr.bf16.mxu1 %v4719_v8  ;;  %v2093_v62 = vsel %vm2091_vm6, %v2074_v59, %v2076_v60  ;;  %v2092_v0 = vsel %vm2091_vm6, %v2072_v58, %v2074_v59 }
 0x10c   : > { %4067 = vmatprep.subr.msk.bf16.mxu1 %vm335_vm2, %v1349_v41  ;;  %v2108_v7 = vsel %vm335_vm2, %v2092_v0, 0 }
 0x10e   : > { %4263 = vmatmul.mubr.msk.bf16.vlgmr.msra.gmra.mrb[0].mxu0 %vm328_vm0, %v5091_v27  ;;  %v1711_v1 = vpop.permute.xlu0 %1710 }
 0x10f   : > { %1760 = vmatpush1.bf16.msra.mxu0 %v1733_v44  ;;  %1791 = vmatprep.mubr.bf16.mxu0 %v4719_v8  ;;  %v1723_v10 = vsel %vm1716_vm5, %v1709_v45, %v1711_v1 }
 0x110   : > { %4084 = vmatprep.subr.msk.bf16.mxu0 %vm335_vm2, %v1722_v46  ;;  %v1751_v14 = vsel %vm335_vm2, %v1723_v10, 0  ;;  %v5258_v46 = vld [vmem:[%s4787_s26 + $0x60] sm:$0xff]  }
 0x112   : > { %4049 = vmatmul.mubr.msk.bf16.gmra.mrb[28].mxu1 %vm328_vm0, %v5026_v2  ;;  %v1724_v2 = vsel %vm1716_vm5, %v1711_v1, %v1713_v48  ;;  %v2082_v5 = vpop.permute.xlu0 %2081 }
 0x113   : > { %1469 = vmatprep.mubr.bf16.mxu1 %v4719_v8  ;;  %v2097_v9 = vsel %vm2091_vm6, %v2082_v5, %v2084_v6  ;;  %v2096_v13 = vsel %vm2091_vm6, %v2080_v4, %v2082_v5 }
 0x114   : > { %v2120_v17 = vsel %vm335_vm2, %v2096_v13, 0 }
 0x116   : > { %4079 = vmatmul.mubr.msk.bf16.vlgmr.msra.gmra.mrb[4].mxu0 %vm328_vm0, %v5137_v49  ;;  %v2078_v11 = vpop.permute.xlu0 %2077 }
 0x117   : > { %1866 = vmatpush1.bf16.msra.mxu0 %v1745_v50  ;;  %1801 = vmatprep.mubr.bf16.mxu0 %v4719_v8  ;;  %v2095_v12 = vsel %vm2091_vm6, %v2078_v11, %v2080_v4  ;;  %v2094_v23 = vsel %vm2091_vm6, %v2076_v60, %v2078_v11 }
 0x118   : > { %4588 = vmatprep.subr.msk.bf16.mxu0 %vm335_vm2, %v1725_v52  ;;  %v2114_v26 = vsel %vm335_vm2, %v2094_v23, 0 }
 0x11a   : > { %4062 = vmatmul.mubr.msk.bf16.vlgmr.msra.gmra.mrb[8].mxu1 %vm328_vm0, %v5077_v21  ;;  %v2090_v16 = vpop.permute.xlu0 %2089 }
 0x11b   : > { %1544 = vmatpush1.bf16.msra.mxu1 %v1376_v56  ;;  %1479 = vmatprep.mubr.bf16.mxu1 %v4719_v8  ;;  %v2100_v19 = vsel %vm2091_vm6, %v2088_v18, %v2090_v16 }
 0x11c   : > { %4081 = vmatprep.subr.msk.bf16.mxu1 %vm335_vm2, %v1720_v55  ;;  %v2132_v28 = vsel %vm335_vm2, %v2100_v19, 0 }
 0x11e   : > { %4080 = vmatmul.mubr.msk.bf16.gmra.mrb[8].mxu0 %vm328_vm0, %v5153_v57  ;;  %v2449_v20 = vpop.permute.xlu0 %2448 }
 0x11f   : > { %1897 = vmatprep.mubr.bf16.mxu0 %v4719_v8  ;;  %v2467_v36 = vsel %vm2466_vm7, %v2447_v22, %v2449_v20  ;;  %v4674_v22 = vld [vmem:[%s4787_s26 + $0x70] sm:$0xff]  }
 0x120   : > { %v2483_v41 = vsel %vm335_vm2, %v2467_v36, 0 }
 0x122   : > { %4063 = vmatmul.mubr.msk.bf16.gmra.mrb[12].mxu1 %vm328_vm0, %v5091_v27  ;;  %v2086_v24 = vpop.permute.xlu0 %2085 }
 0x123   : > { %1575 = vmatprep.mubr.bf16.mxu1 %v4719_v8  ;;  %v2099_v25 = vsel %vm2091_vm6, %v2086_v24, %v2088_v18  ;;  %v2098_v32 = vsel %vm2091_vm6, %v2084_v6, %v2086_v24 }
 0x124   : > { %v2126_v38 = vsel %vm335_vm2, %v2098_v32, 0  ;;  %v4675_v32 = vld [vmem:[%s4787_s26 + $0x78] sm:$0xff]  }
 0x126   : > { %4085 = vmatmul.mubr.msk.bf16.vlgmr.msra.gmra.mrb[12].mxu0 %vm328_vm0, %v5137_v49  ;;  %v2457_v30 = vpop.permute.xlu0 %2456 }
 0x127   : > { %4267 = vmatpush3.bf16.msra.mxu0 %v1757_v61  ;;  %1907 = vmatprep.mubr.bf16.mxu0 %v4719_v8 }
 0x128   : > { %4098 = vmatprep.subr.msk.bf16.mxu0 %vm335_vm2, %v2093_v62 }
 0x12a   : > { %4068 = vmatmul.mubr.msk.bf16.vlgmr.msra.gmra.mrb[24].mxu1 %vm328_vm0, %v5077_v21  ;;  %v5210_v21 = vld [vmem:[%s4787_s26 + $0x58] sm:$0xff]   ;;  %v2453_v33 = vpop.permute.xlu0 %2452 }
 0x12b   : > { %1813 = vmatpush1.bf16.msra.mxu1 %v1739_v3  ;;  %1585 = vmatprep.mubr.bf16.mxu1 %v4719_v8 }
 0x12c   : > { %4087 = vmatprep.subr.msk.bf16.mxu1 %vm335_vm2, %v1724_v2 }
 0x12e   : > { %4086 = vmatmul.mubr.msk.bf16.gmra.mrb[16].mxu0 %vm328_vm0, %v5153_v57  ;;  %v2465_v48 = vpop.permute.xlu0 %2464 }
 0x12f   : > { %4268 = vmatprep.mubr.msk.bf16.mxu0 %vm328_vm0, %v5137_v49 }
 0x132   : > { %4069 = vmatmul.mubr.msk.bf16.gmra.mrb[28].mxu1 %vm328_vm0, %v5091_v27  ;;  %v2451_v27 = vpop.permute.xlu1 %2450  ;;  %v2822_v55 = vpop.permute.xlu0 %2821 }
 0x133   : > { %1844 = vmatprep.mubr.bf16.mxu1 %v4719_v8  ;;  %v2468_v29 = vsel %vm2466_vm7, %v2449_v20, %v2451_v27  ;;  %v2469_v50 = vsel %vm2466_vm7, %v2451_v27, %v2453_v33 }
 0x134   : > { %v2489_v53 = vsel %vm335_vm2, %v2469_v50, 0 }
 0x136   : > { %4269 = vmatmul.mubr.msk.bf16.vlgmr.msra.gmra.mrb[0].mxu0 %vm328_vm0, %v5153_v57  ;;  %v2455_v31 = vpop.permute.xlu1 %2454  ;;  %v2826_v61 = vpop.permute.xlu0 %2825 }
 0x137   : > { %2135 = vmatpush1.bf16.msra.mxu0 %v2108_v7  ;;  %2166 = vmatprep.mubr.bf16.mxu0 %v4719_v8  ;;  %v2470_v37 = vsel %vm2466_vm7, %v2453_v33, %v2455_v31  ;;  %v2471_v44 = vsel %vm2466_vm7, %v2455_v31, %v2457_v30 }
 0x138   : > { %4104 = vmatprep.subr.msk.bf16.mxu0 %vm335_vm2, %v2097_v9  ;;  %v2495_v47 = vsel %vm335_vm2, %v2471_v44, 0 }
 0x13a   : > { %4082 = vmatmul.mubr.msk.bf16.vlgmr.msra.gmra.mrb[8].mxu1 %vm328_vm0, %v5137_v49  ;;  %v2459_v42 = vpop.permute.xlu1 %2458  ;;  %v2830_v4 = vpop.permute.xlu0 %2829 }
 0x13b   : > { %1919 = vmatpush1.bf16.msra.mxu1 %v1751_v14  ;;  %1854 = vmatprep.mubr.bf16.mxu1 %v4719_v8  ;;  %v2472_v43 = vsel %vm2466_vm7, %v2457_v30, %v2459_v42 }
 0x13c   : > { %4101 = vmatprep.subr.msk.bf16.mxu1 %vm335_vm2, %v2095_v12 }
 0x13e   : > { %4099 = vmatmul.mubr.msk.bf16.vlgmr.msra.gmra.mrb[4].mxu0 %vm328_vm0, %v5197_v15  ;;  %v2463_v45 = vpop.permute.xlu1 %2462  ;;  %v2834_v11 = vpop.permute.xlu0 %2833 }
 0x13f   : > { %2241 = vmatpush1.bf16.msra.mxu0 %v2120_v17  ;;  %2176 = vmatprep.mubr.bf16.mxu0 %v4719_v8 }
 0x140   : > { %4589 = vmatprep.subr.msk.bf16.mxu0 %vm335_vm2, %v2100_v19 }
 0x142   : > { %4083 = vmatmul.mubr.msk.bf16.gmra.mrb[12].mxu1 %vm328_vm0, %v5153_v57  ;;  %v2461_v51 = vpop.permute.xlu1 %2460  ;;  %v2838_v17 = vpop.permute.xlu0 %2837 }
 0x143   : > { %1950 = vmatprep.mubr.bf16.mxu1 %v4719_v8  ;;  %v2474_v52 = vsel %vm2466_vm7, %v2461_v51, %v2463_v45  ;;  %v2473_v0 = vsel %vm2466_vm7, %v2459_v42, %v2461_v51 }
 0x144   : > { %v2501_v9 = vsel %vm335_vm2, %v2473_v0, 0 }
 0x146   : > { %4100 = vmatmul.mubr.msk.bf16.gmra.mrb[8].mxu0 %vm328_vm0, %v5210_v21  ;;  %v2824_v59 = vpop.permute.xlu1 %2823  ;;  %v3197_v23 = vpop.permute.xlu0 %3196 }
 0x147   : > { %2272 = vmatprep.mubr.bf16.mxu0 %v4719_v8  ;;  %v2843_v1 = vsel %vm2841_vm8, %v2824_v59, %v2826_v61  ;;  %v2842_v12 = vsel %vm2841_vm8, %v2822_v55, %v2824_v59  ;;  %v4676_v55 = vld [vmem:[%s4787_s26 + $0x80] sm:$0xff]  }
 0x148   : > { %v2858_v13 = vsel %vm335_vm2, %v2842_v12, 0 }
 0x14a   : > { %4088 = vmatmul.mubr.msk.bf16.vlgmr.msra.gmra.mrb[24].mxu1 %vm328_vm0, %v5137_v49  ;;  %v2475_v49 = vsel %vm2466_vm7, %v2463_v45, %v2465_v48  ;;  %v2828_v2 = vpop.permute.xlu1 %2827  ;;  %v3201_v31 = vpop.permute.xlu0 %3200 }
 0x14b   : > { %2188 = vmatpush1.bf16.msra.mxu1 %v2114_v26  ;;  %1960 = vmatprep.mubr.bf16.mxu1 %v4719_v8  ;;  %v2507_v62 = vsel %vm335_vm2, %v2475_v49, 0  ;;  %v2845_v7 = vsel %vm2841_vm8, %v2828_v2, %v2830_v4  ;;  %v2844_v14 = vsel %vm2841_vm8, %v2826_v61, %v2828_v2 }
 0x14c   : > { %4107 = vmatprep.subr.msk.bf16.mxu1 %vm335_vm2, %v2099_v25  ;;  %v2864_v18 = vsel %vm335_vm2, %v2844_v14, 0 }
 0x14e   : > { %4105 = vmatmul.mubr.msk.bf16.vlgmr.msra.gmra.mrb[12].mxu0 %vm328_vm0, %v5197_v15  ;;  %v2832_v10 = vpop.permute.xlu1 %2831 }
 0x14f   : > { %4273 = vmatpush3.bf16.msra.mxu0 %v2132_v28  ;;  %2282 = vmatprep.mubr.bf16.mxu0 %v4719_v8  ;;  %v2846_v19 = vsel %vm2841_vm8, %v2830_v4, %v2832_v10  ;;  %v4677_v4 = vld [vmem:[%s4787_s26 + $0x88] sm:$0xff]   ;;  %s5435_s26 = scalar_lea.vmem %s5522_s3, %s3984_s12 }
 0x150   : > { %4118 = vmatprep.subr.msk.bf16.mxu0 %vm335_vm2, %v2468_v29  ;;  %v2870_v24 = vsel %vm335_vm2, %v2846_v19, 0 }
 0x152   : > { %4089 = vmatmul.mubr.msk.bf16.gmra.mrb[28].mxu1 %vm328_vm0, %v5153_v57  ;;  %v2836_v16 = vpop.permute.xlu1 %2835 }
 0x153   : > { %2219 = vmatprep.mubr.bf16.mxu1 %v4719_v8  ;;  %v2849_v20 = vsel %vm2841_vm8, %v2836_v16, %v2838_v17  ;;  %v2848_v33 = vsel %vm2841_vm8, %v2834_v11, %v2836_v16 }
 0x154   : > { %v2876_v39 = vsel %vm335_vm2, %v2848_v33, 0 }
 0x156   : > { %4106 = vmatmul.mubr.msk.bf16.gmra.mrb[16].mxu0 %vm328_vm0, %v5210_v21 }
 0x157   : > { %4274 = vmatprep.mubr.msk.bf16.mxu0 %vm328_vm0, %v5197_v15 }
 0x15a   : > { %4102 = vmatmul.mubr.msk.bf16.vlgmr.msra.gmra.mrb[8].mxu1 %vm328_vm0, %v5197_v15 }
 0x15b   : > { %2294 = vmatpush1.bf16.msra.mxu1 %v2126_v38  ;;  %2229 = vmatprep.mubr.bf16.mxu1 %v4719_v8 }
 0x15c   : > { %4121 = vmatprep.subr.msk.bf16.mxu1 %vm335_vm2, %v2470_v37  ;;  %v3205_v37 = vpop.permute.xlu0 %3204 }
 0x15e   : > { %4275 = vmatmul.mubr.msk.bf16.vlgmr.msra.gmra.mrb[0].mxu0 %vm328_vm0, %v5210_v21 }
 0x15f   : > { %2510 = vmatpush1.bf16.msra.mxu0 %v2483_v41  ;;  %2541 = vmatprep.mubr.bf16.mxu0 %v4719_v8 }
 0x160   : > { %4124 = vmatprep.subr.msk.bf16.mxu0 %vm335_vm2, %v2472_v43  ;;  %v3209_v45 = vpop.permute.xlu0 %3208 }
 0x162   : > { %4103 = vmatmul.mubr.msk.bf16.gmra.mrb[12].mxu1 %vm328_vm0, %v5210_v21 }
 0x163   : > { %2325 = vmatprep.mubr.bf16.mxu1 %v4719_v8 }
 0x164   : > { %v3213_v48 = vpop.permute.xlu0 %3212 }
 0x166   : > { %4119 = vmatmul.mubr.msk.bf16.vlgmr.msra.gmra.mrb[4].mxu0 %vm328_vm0, %v5258_v46 }
 0x167   : > { %2616 = vmatpush1.bf16.msra.mxu0 %v2495_v47  ;;  %2551 = vmatprep.mubr.bf16.mxu0 %v4719_v8 }
 0x168   : > { %4590 = vmatprep.subr.msk.bf16.mxu0 %vm335_vm2, %v2475_v49 }
 0x16a   : > { %4108 = vmatmul.mubr.msk.bf16.vlgmr.msra.gmra.mrb[24].mxu1 %vm328_vm0, %v5197_v15  ;;  %v2847_v15 = vsel %vm2841_vm8, %v2832_v10, %v2834_v11 }
 0x16b   : > { %2563 = vmatpush1.bf16.msra.mxu1 %v2489_v53  ;;  %2335 = vmatprep.mubr.bf16.mxu1 %v4719_v8 }
 0x16c   : > { %4127 = vmatprep.subr.msk.bf16.mxu1 %vm335_vm2, %v2474_v52 }
 0x16d   : > { %v5277_v56 = vpop.f32.mrb[0].mxu1 }
 0x16e   : > { %4120 = vmatmul.mubr.msk.bf16.gmra.mrb[8].mxu0 %vm328_vm0, %v5273_v54  ;;  %v5281_v57 = vpop.f32.mrb[1].mxu1 }
 0x16f   : > { %v5283_v58 = vpop.f32.mrb[2].mxu1  ;;  %2647 = vmatprep.mubr.bf16.mxu0 %v4719_v8 }
 0x170   : > { %v5286_v60 = vpop.f32.mrb[3].mxu1 }
 0x172   : > { %4109 = vmatmul.mubr.msk.bf16.gmra.mrb[28].mxu1 %vm328_vm0, %v5210_v21  ;;  %v2840_v21 = vpop.permute.xlu1 %2839 }
 0x173   : > { %2594 = vmatprep.mubr.bf16.mxu1 %v4719_v8  ;;  %v2850_v26 = vsel %vm2841_vm8, %v2838_v17, %v2840_v21 }
 0x174   : > { %v2882_v42 = vsel %vm335_vm2, %v2850_v26, 0 }
 0x175   : > { %v5292_v63 = vpop.f32.mrb[4].mxu1 }
 0x176   : > { %4125 = vmatmul.mubr.msk.bf16.vlgmr.msra.gmra.mrb[12].mxu0 %vm328_vm0, %v5258_v46  ;;  %v5297_v3 = vpop.f32.mrb[5].mxu1  ;;  %v3199_v29 = vpop.permute.xlu1 %3198 }
 0x177   : > { %4279 = vmatpush3.bf16.msra.mxu0 %v2507_v62  ;;  %v5300_v5 = vpop.f32.mrb[6].mxu1  ;;  %2657 = vmatprep.mubr.bf16.mxu0 %v4719_v8  ;;  %v3218_v43 = vsel %vm3216_vm9, %v3199_v29, %v3201_v31  ;;  %v3217_v50 = vsel %vm3216_vm9, %v3197_v23, %v3199_v29 }
 0x178   : > { %v5303_v6 = vpop.f32.mrb[7].mxu1  ;;  %4138 = vmatprep.subr.msk.bf16.mxu0 %vm335_vm2, %v2843_v1  ;;  %v3233_v52 = vsel %vm335_vm2, %v3217_v50, 0 }
 0x17a   : > { %4122 = vmatmul.mubr.msk.bf16.vlgmr.msra.gmra.mrb[8].mxu1 %vm328_vm0, %v5258_v46  ;;  %v3203_v35 = vpop.permute.xlu1 %3202 }
 0x17b   : > { %2669 = vmatpush1.bf16.msra.mxu1 %v2501_v9  ;;  %2604 = vmatprep.mubr.bf16.mxu1 %v4719_v8  ;;  %v3220_v41 = vsel %vm3216_vm9, %v3203_v35, %v3205_v37 }
 0x17c   : > { %4141 = vmatprep.subr.msk.bf16.mxu1 %vm335_vm2, %v2845_v7 }
 0x17e   : > { %4126 = vmatmul.mubr.msk.bf16.gmra.mrb[16].mxu0 %vm328_vm0, %v5273_v54  ;;  %v3207_v44 = vpop.permute.xlu1 %3206 }
 0x17f   : > { %4280 = vmatprep.mubr.msk.bf16.mxu0 %vm328_vm0, %v5258_v46  ;;  %v3222_v53 = vsel %vm3216_vm9, %v3207_v44, %v3209_v45  ;;  %v5418_v9 = vpop.permute.xlu0 %3562 }
 0x182   : > { %4123 = vmatmul.mubr.msk.bf16.gmra.mrb[12].mxu1 %vm328_vm0, %v5273_v54  ;;  %v3211_v47 = vpop.permute.xlu1 %3210 }
 0x183   : > { %2700 = vmatprep.mubr.bf16.mxu1 %v4719_v8  ;;  %v3224_v51 = vsel %vm3216_vm9, %v3211_v47, %v3213_v48  ;;  %v3223_v62 = vsel %vm3216_vm9, %v3209_v45, %v3211_v47 }
 0x184   : > { %v3251_v2 = vsel %vm335_vm2, %v3223_v62, 0 }
 0x186   : > { %4281 = vmatmul.mubr.msk.bf16.vlgmr.msra.gmra.mrb[0].mxu0 %vm328_vm0, %v5273_v54  ;;  %v3215_v59 = vpop.permute.xlu1 %3214 }
 0x187   : > { %2885 = vmatpush1.bf16.msra.mxu0 %v2858_v13  ;;  %2916 = vmatprep.mubr.bf16.mxu0 %v4719_v8  ;;  %v3225_v1 = vsel %vm3216_vm9, %v3213_v48, %v3215_v59 }
 0x188   : > { %4144 = vmatprep.subr.msk.bf16.mxu0 %vm335_vm2, %v2847_v15  ;;  %v3257_v0 = vsel %vm335_vm2, %v3225_v1, 0 }
 0x18a   : > { %4128 = vmatmul.mubr.msk.bf16.vlgmr.msra.gmra.mrb[24].mxu1 %vm328_vm0, %v5258_v46  ;;  %v3219_v46 = vsel %vm3216_vm9, %v3201_v31, %v3203_v35  ;;  %v5422_v13 = vpop.permute.xlu1 %3567 }
 0x18b   : > { %2938 = vmatpush1.bf16.msra.mxu1 %v2864_v18  ;;  %2710 = vmatprep.mubr.bf16.mxu1 %v4719_v8  ;;  %v3239_v49 = vsel %vm335_vm2, %v3219_v46, 0 }
 0x18c   : > { %4147 = vmatprep.subr.msk.bf16.mxu1 %vm335_vm2, %v2849_v20 }
 0x18d   : > { %v5336_v25 = vpop.f32.mrb[16].mxu1 }
 0x18e   : > { %4139 = vmatmul.mubr.msk.bf16.vlgmr.msra.gmra.mrb[4].mxu0 %vm328_vm0, %v4674_v22  ;;  %v5340_v27 = vpop.f32.mrb[17].mxu1  ;;  %v5439_v47 = vpop.permute.xlu1 %3572 }
 0x18f   : > { %2991 = vmatpush1.bf16.msra.mxu0 %v2870_v24  ;;  %v5342_v28 = vpop.f32.mrb[18].mxu1  ;;  %2926 = vmatprep.mubr.bf16.mxu0 %v4719_v8 }
 0x190   : > { %v5345_v30 = vpop.f32.mrb[19].mxu1  ;;  %4591 = vmatprep.subr.msk.bf16.mxu0 %vm335_vm2, %v2850_v26 }
 0x192   : > { %4129 = vmatmul.mubr.msk.bf16.gmra.mrb[28].mxu1 %vm328_vm0, %v5273_v54  ;;  %v3221_v54 = vsel %vm3216_vm9, %v3205_v37, %v3207_v44 }
 0x193   : > { %2969 = vmatprep.mubr.bf16.mxu1 %v4719_v8  ;;  %v3245_v61 = vsel %vm335_vm2, %v3221_v54, 0 }
 0x195   : > { %v5353_v34 = vpop.f32.mrb[20].mxu1 }
 0x196   : > { %4140 = vmatmul.mubr.msk.bf16.gmra.mrb[8].mxu0 %vm328_vm0, %v4675_v32  ;;  %v5356_v36 = vpop.f32.mrb[21].mxu1 }
 0x197   : > { %v5358_v38 = vpop.f32.mrb[22].mxu1  ;;  %3022 = vmatprep.mubr.bf16.mxu0 %v4719_v8 }
 0x198   : > { %v5362_v40 = vpop.f32.mrb[23].mxu1 }
 0x19a   : > { %4142 = vmatmul.mubr.msk.bf16.vlgmr.msra.gmra.mrb[8].mxu1 %vm328_vm0, %v4674_v22 }
 0x19b   : > { %3044 = vmatpush1.bf16.msra.mxu1 %v2876_v39  ;;  %2979 = vmatprep.mubr.bf16.mxu1 %v4719_v8 }
 0x19c   : > { %4161 = vmatprep.subr.msk.bf16.mxu1 %vm335_vm2, %v3220_v41 }
 0x19e   : > { %4145 = vmatmul.mubr.msk.bf16.vlgmr.msra.gmra.mrb[12].mxu0 %vm328_vm0, %v4674_v22 }
 0x19f   : > { %4285 = vmatpush3.bf16.msra.mxu0 %v2882_v42  ;;  %3032 = vmatprep.mubr.bf16.mxu0 %v4719_v8 }
 0x1a0   : > { %4158 = vmatprep.subr.msk.bf16.mxu0 %vm335_vm2, %v3218_v43 }
 0x1a2   : > { %4143 = vmatmul.mubr.msk.bf16.gmra.mrb[12].mxu1 %vm328_vm0, %v4675_v32 }
 0x1a3   : > { %3075 = vmatprep.mubr.bf16.mxu1 %v4719_v8 }
 0x1a6   : > { %4146 = vmatmul.mubr.msk.bf16.gmra.mrb[16].mxu0 %vm328_vm0, %v4675_v32 }
 0x1a7   : > { %4286 = vmatprep.mubr.msk.bf16.mxu0 %vm328_vm0, %v4674_v22 }
 0x1aa   : > { %4148 = vmatmul.mubr.msk.bf16.vlgmr.msra.gmra.mrb[24].mxu1 %vm328_vm0, %v4674_v22 }
 0x1ab   : > { %3313 = vmatpush1.bf16.msra.mxu1 %v3239_v49  ;;  %3085 = vmatprep.mubr.bf16.mxu1 %v4719_v8 }
 0x1ac   : > { %4167 = vmatprep.subr.msk.bf16.mxu1 %vm335_vm2, %v3224_v51 }
 0x1ae   : > { %4287 = vmatmul.mubr.msk.bf16.vlgmr.msra.gmra.mrb[0].mxu0 %vm328_vm0, %v4675_v32 }
 0x1af   : > { %3260 = vmatpush1.bf16.msra.mxu0 %v3233_v52  ;;  %3291 = vmatprep.mubr.bf16.mxu0 %v4719_v8 }
 0x1b0   : > { %4164 = vmatprep.subr.msk.bf16.mxu0 %vm335_vm2, %v3222_v53 }
 0x1b2   : > { %4149 = vmatmul.mubr.msk.bf16.gmra.mrb[28].mxu1 %vm328_vm0, %v4675_v32 }
 0x1b3   : > { %3344 = vmatprep.mubr.bf16.mxu1 %v4719_v8 }
 0x1b6   : > { %4159 = vmatmul.mubr.msk.bf16.vlgmr.msra.gmra.mrb[4].mxu0 %vm328_vm0, %v4676_v55 }
 0x1b7   : > { %3366 = vmatpush1.bf16.msra.mxu0 %v3245_v61  ;;  %3301 = vmatprep.mubr.bf16.mxu0 %v4719_v8 }
 0x1b8   : > { %4592 = vmatprep.subr.msk.bf16.mxu0 %vm335_vm2, %v3225_v1 }
 0x1ba   : > { %4162 = vmatmul.mubr.msk.bf16.vlgmr.msra.gmra.mrb[8].mxu1 %vm328_vm0, %v4676_v55 }
 0x1bb   : > { %3419 = vmatpush1.bf16.msra.mxu1 %v3251_v2  ;;  %3354 = vmatprep.mubr.bf16.mxu1 %v4719_v8 }
 0x1be   : > { %4160 = vmatmul.mubr.msk.bf16.gmra.mrb[8].mxu0 %vm328_vm0, %v4677_v4 }
 0x1bf   : > { %3397 = vmatprep.mubr.bf16.mxu0 %v4719_v8 }
 0x1c2   : > { %4163 = vmatmul.mubr.msk.bf16.gmra.mrb[12].mxu1 %vm328_vm0, %v4677_v4 }
 0x1c3   : > { %3450 = vmatprep.mubr.bf16.mxu1 %v4719_v8 }
 0x1c6   : > { %4165 = vmatmul.mubr.msk.bf16.vlgmr.msra.gmra.mrb[12].mxu0 %vm328_vm0, %v4676_v55 }
 0x1c7   : > { %4291 = vmatpush3.bf16.msra.mxu0 %v3257_v0  ;;  %3407 = vmatprep.mubr.bf16.mxu0 %v4719_v8 }
 0x1ca   : > { %4168 = vmatmul.mubr.msk.bf16.vlgmr.msra.gmra.mrb[24].mxu1 %vm328_vm0, %v4676_v55 }
 0x1cb   : > { %3460 = vmatprep.mubr.bf16.mxu1 %v4719_v8 }
 0x1ce   : > { %4166 = vmatmul.mubr.msk.bf16.gmra.mrb[16].mxu0 %vm328_vm0, %v4677_v4 }
 0x1cf   : > { %4292 = vmatprep.mubr.msk.bf16.mxu0 %vm328_vm0, %v4676_v55 }
 0x1d2   : > { %4169 = vmatmul.mubr.msk.bf16.gmra.mrb[28].mxu1 %vm328_vm0, %v4677_v4 }
 0x1d6   : > { %4293 = vmatmul.mubr.msk.bf16.vlgmr.msra.gmra.mrb[0].mxu0 %vm328_vm0, %v4677_v4  ;;  %v5448_v4 = vpop.permute.xlu0 %3577 }
 0x289   : > { %v3293_v7 = vpop.f32.mrb[4].mxu0 }
 0x28a   : > { %v4296_v10 = vadd.f32 %v3293_v7, %v5277_v56  ;;  %v3295_v11 = vpop.f32.mrb[5].mxu0 }
 0x28b   : > { %v4297_v12 = vadd.f32 %v3295_v11, %v5281_v57  ;;  %v3297_v8 = vpop.f32.mrb[6].mxu0 }
 0x28c   : > { %v3580_v14 = vadd.f32 %v4296_v10, %v5418_v9  ;;  %v4298_v15 = vadd.f32 %v3297_v8, %v5283_v58  ;;  %v3299_v16 = vpop.f32.mrb[7].mxu0 }
 0x28d   : > { %v3581_v17 = vadd.f32 %v4297_v12, %v5418_v9  ;;  %v4299_v18 = vadd.f32 %v3299_v16, %v5286_v60  ;;  %v3346_v19 = vpop.f32.mrb[8].mxu1 }
 0x28e   : > { %vm3616_vm10 = vcmp.ge.f32.partialorder %v3580_v14, 0.0  ;;  %v3652_v56 = vmul.f32 0.1, %v3580_v14  ;;  %v3582_v20 = vadd.f32 %v5418_v9, %v3346_v19  ;;  %v3589_v57 = vadd.f32 %v4298_v15, %v5422_v13  ;;  %v3348_v21 = vpop.f32.mrb[9].mxu1 }
 0x28f   : > { %vm3617_vm11 = vcmp.ge.f32.partialorder %v3581_v17, 0.0  ;;  %v3653_v22 = vmul.f32 0.1, %v3581_v17  ;;  %v3590_v23 = vadd.f32 %v4299_v18, %v5422_v13  ;;  %v3583_v58 = vadd.f32 %v5418_v9, %v3348_v21  ;;  %v3350_v24 = vpop.f32.mrb[10].mxu1 }
 0x290   : > { %v3688_v26 = vsel %vm3616_vm10, %v3580_v14, %v3652_v56  ;;  %vm3618_vm12 = vcmp.ge.f32.partialorder %v3582_v20, 0.0  ;;  %v3654_v29 = vmul.f32 0.1, %v3582_v20  ;;  %vm3625_vm13 = vcmp.ge.f32.partialorder %v3589_v57, 0.0  ;;  %v3352_v60 = vpop.f32.mrb[11].mxu1 }
 0x291   : > { %v3689_v31 = vsel %vm3617_vm11, %v3581_v17, %v3653_v22  ;;  %vm3626_vm14 = vcmp.ge.f32.partialorder %v3590_v23, 0.0  ;;  %v3661_v32 = vmul.f32 0.1, %v3589_v57  ;;  %v3662_v33 = vmul.f32 0.1, %v3590_v23  ;;  %v3303_v35 = vpop.f32.mrb[8].mxu0 }
 0x292   : > { %v4195_v37 = vpack.c.bf16 %v3689_v31, %v3688_v26  ;;  %v3690_v39 = vsel %vm3618_vm12, %v3582_v20, %v3654_v29  ;;  %vm3619_vm15 = vcmp.ge.f32.partialorder %v3583_v58, 0.0  ;;  %v3655_v41 = vmul.f32 0.1, %v3583_v58  ;;  %v3305_v42 = vpop.f32.mrb[9].mxu0 }
 0x293   : > { %v3697_v43 = vsel %vm3625_vm13, %v3589_v57, %v3661_v32  ;;  %v3698_v44 = vsel %vm3626_vm14, %v3590_v23, %v3662_v33  ;;  %v3591_v45 = vadd.f32 %v5422_v13, %v3350_v24  ;;  %v3592_v46 = vadd.f32 %v5422_v13, %v3352_v60  ;;  %v3307_v48 = vpop.f32.mrb[10].mxu0 }
 0x294   : > { %3836 = vst [vmem:[%s5435_s26] sm:$0xff] %v4195_v37  ;;  %v4200_v49 = vpack.c.bf16 %v3698_v44, %v3697_v43  ;;  %v3691_v50 = vsel %vm3619_vm15, %v3583_v58, %v3655_v41  ;;  %v4300_v51 = vadd.f32 %v3303_v35, %v5292_v63  ;;  %v4301_v52 = vadd.f32 %v3305_v42, %v5297_v3  ;;  %v3309_v53 = vpop.f32.mrb[11].mxu0 }
 0x295   : > { %v4196_v54 = vpack.c.bf16 %v3691_v50, %v3690_v39  ;;  %vm3627_vm0 = vcmp.ge.f32.partialorder %v3591_v45, 0.0  ;;  %v3663_v55 = vmul.f32 0.1, %v3591_v45  ;;  %vm3628_vm1 = vcmp.ge.f32.partialorder %v3592_v46, 0.0  ;;  %v3356_v59 = vpop.f32.mrb[12].mxu1 }
 0x296   : > { %3841 = vst [vmem:[%s5435_s26 + $0x24] sm:$0xff] %v4200_v49  ;;  %v3664_v61 = vmul.f32 0.1, %v3592_v46  ;;  %v3598_v62 = vadd.f32 %v4300_v51, %v5439_v47  ;;  %v3599_v1 = vadd.f32 %v4301_v52, %v5439_v47  ;;  %v4302_v2 = vadd.f32 %v3307_v48, %v5300_v5  ;;  %v3358_v0 = vpop.f32.mrb[13].mxu1 }
 0x297   : > { %3837 = vst [vmem:[%s5435_s26 + $0x8] sm:$0xff] %v4196_v54  ;;  %v3699_v63 = vsel %vm3627_vm0, %v3591_v45, %v3663_v55  ;;  %v4303_v3 = vadd.f32 %v3309_v53, %v5303_v6  ;;  %v3600_v7 = vadd.f32 %v5439_v47, %v3356_v59  ;;  %v3601_v10 = vadd.f32 %v5439_v47, %v3358_v0  ;;  %v3360_v11 = vpop.f32.mrb[14].mxu1 }
 0x298   : > { %v3700_v12 = vsel %vm3628_vm1, %v3592_v46, %v3664_v61  ;;  %vm3634_vm2 = vcmp.ge.f32.partialorder %v3598_v62, 0.0  ;;  %vm3635_vm3 = vcmp.ge.f32.partialorder %v3599_v1, 0.0  ;;  %v3670_v8 = vmul.f32 0.1, %v3598_v62  ;;  %v3362_v14 = vpop.f32.mrb[15].mxu1 }
 0x299   : > { %v4201_v15 = vpack.c.bf16 %v3700_v12, %v3699_v63  ;;  %v3671_v5 = vmul.f32 0.1, %v3599_v1  ;;  %v3607_v16 = vadd.f32 %v4302_v2, %v5448_v4  ;;  %v3608_v17 = vadd.f32 %v4303_v3, %v5448_v4  ;;  %v3399_v18 = vpop.f32.mrb[12].mxu0 }
 0x29a   : > { %v3706_v19 = vsel %vm3634_vm2, %v3598_v62, %v3670_v8  ;;  %vm3636_vm4 = vcmp.ge.f32.partialorder %v3600_v7, 0.0  ;;  %v3672_v6 = vmul.f32 0.1, %v3600_v7  ;;  %vm3637_vm5 = vcmp.ge.f32.partialorder %v3601_v10, 0.0  ;;  %v3401_v56 = vpop.f32.mrb[13].mxu0 }
 0x29b   : > { %3842 = vst [vmem:[%s5435_s26 + $0x2c] sm:$0xff] %v4201_v15  ;;  %v3707_v20 = vsel %vm3635_vm3, %v3599_v1, %v3671_v5  ;;  %vm3643_vm6 = vcmp.ge.f32.partialorder %v3607_v16, 0.0  ;;  %vm3644_vm7 = vcmp.ge.f32.partialorder %v3608_v17, 0.0  ;;  %v3679_v57 = vmul.f32 0.1, %v3607_v16  ;;  %v3403_v21 = vpop.f32.mrb[14].mxu0 }
 0x29c   : > { %v4205_v22 = vpack.c.bf16 %v3707_v20, %v3706_v19  ;;  %v3680_v23 = vmul.f32 0.1, %v3608_v17  ;;  %v3708_v58 = vsel %vm3636_vm4, %v3600_v7, %v3672_v6  ;;  %v3673_v24 = vmul.f32 0.1, %v3601_v10  ;;  %v3405_v26 = vpop.f32.mrb[15].mxu0 }
 0x29d   : > { %v3715_v29 = vsel %vm3643_vm6, %v3607_v16, %v3679_v57  ;;  %v3609_v60 = vadd.f32 %v5448_v4, %v3360_v11  ;;  %v3610_v31 = vadd.f32 %v5448_v4, %v3362_v14  ;;  %v4304_v32 = vadd.f32 %v3399_v18, %v5336_v25  ;;  %v3452_v33 = vpop.f32.mrb[24].mxu1 }
 0x29e   : > { %3846 = vst [vmem:[%s5435_s26 + $0x48] sm:$0xff] %v4205_v22  ;;  %v3716_v35 = vsel %vm3644_vm7, %v3608_v17, %v3680_v23  ;;  %v3709_v37 = vsel %vm3637_vm5, %v3601_v10, %v3673_v24  ;;  %v4305_v39 = vadd.f32 %v3401_v56, %v5340_v27  ;;  %v4306_v41 = vadd.f32 %v3403_v21, %v5342_v28  ;;  %v3454_v42 = vpop.f32.mrb[25].mxu1 }
 0x29f   : > { %v4210_v43 = vpack.c.bf16 %v3716_v35, %v3715_v29  ;;  %v4206_v44 = vpack.c.bf16 %v3709_v37, %v3708_v58  ;;  %vm3645_vm8 = vcmp.ge.f32.partialorder %v3609_v60, 0.0  ;;  %v3681_v45 = vmul.f32 0.1, %v3609_v60  ;;  %v3456_v46 = vpop.f32.mrb[26].mxu1 }
 0x2a0   : > { %vm3646_vm9 = vcmp.ge.f32.partialorder %v3610_v31, 0.0  ;;  %v3682_v48 = vmul.f32 0.1, %v3610_v31  ;;  %v3584_v25 = vadd.f32 %v4304_v32, %v5418_v9  ;;  %v3585_v49 = vadd.f32 %v4305_v39, %v5418_v9  ;;  %v3458_v50 = vpop.f32.mrb[27].mxu1 }
 0x2a1   : > { %3851 = vst [vmem:[%s5435_s26 + $0x6c] sm:$0xff] %v4210_v43  ;;  %3847 = vst [vmem:[%s5435_s26 + $0x50] sm:$0xff] %v4206_v44  ;;  %v3717_v51 = vsel %vm3645_vm8, %v3609_v60, %v3681_v45  ;;  %v3593_v27 = vadd.f32 %v4306_v41, %v5422_v13  ;;  %v4307_v28 = vadd.f32 %v3405_v26, %v5345_v30  ;;  %v3409_v53 = vpop.f32.mrb[16].mxu0 }
 0x2a2   : > { %v3586_v52 = vadd.f32 %v5418_v9, %v3452_v33  ;;  %v3718_v54 = vsel %vm3646_vm9, %v3610_v31, %v3682_v48  ;;  %vm3620_vm10 = vcmp.ge.f32.partialorder %v3584_v25, 0.0  ;;  %v3656_v55 = vmul.f32 0.1, %v3584_v25  ;;  %v3411_v59 = vpop.f32.mrb[17].mxu0 }
 0x2a3   : > { %vm3621_vm11 = vcmp.ge.f32.partialorder %v3585_v49, 0.0  ;;  %v4211_v61 = vpack.c.bf16 %v3718_v54, %v3717_v51  ;;  %v3657_v62 = vmul.f32 0.1, %v3585_v49  ;;  %vm3629_vm12 = vcmp.ge.f32.partialorder %v3593_v27, 0.0  ;;  %v3413_v2 = vpop.f32.mrb[18].mxu0 }
 0x2a4   : > { %v3665_v1 = vmul.f32 0.1, %v3593_v27  ;;  %v3692_v0 = vsel %vm3620_vm10, %v3584_v25, %v3656_v55  ;;  %v3594_v63 = vadd.f32 %v4307_v28, %v5422_v13  ;;  %vm3622_vm13 = vcmp.ge.f32.partialorder %v3586_v52, 0.0  ;;  %v3415_v30 = vpop.f32.mrb[19].mxu0 }
 0x2a5   : > { %v3658_v3 = vmul.f32 0.1, %v3586_v52  ;;  %3852 = vst [vmem:[%s5435_s26 + $0x74] sm:$0xff] %v4211_v61  ;;  %v3693_v7 = vsel %vm3621_vm11, %v3585_v49, %v3657_v62  ;;  %v3587_v11 = vadd.f32 %v5418_v9, %v3454_v42  ;;  %v3595_v12 = vadd.f32 %v5422_v13, %v3456_v46  ;;  %v3462_v8 = vpop.f32.mrb[28].mxu1 }
 0x2a6   : > { %v3701_v10 = vsel %vm3629_vm12, %v3593_v27, %v3665_v1  ;;  %v4197_v14 = vpack.c.bf16 %v3693_v7, %v3692_v0  ;;  %vm3630_vm14 = vcmp.ge.f32.partialorder %v3594_v63, 0.0  ;;  %v3666_v15 = vmul.f32 0.1, %v3594_v63  ;;  %v3464_v16 = vpop.f32.mrb[29].mxu1 }
 0x2a7   : > { %v3694_v5 = vsel %vm3622_vm13, %v3586_v52, %v3658_v3  ;;  %vm3623_vm15 = vcmp.ge.f32.partialorder %v3587_v11, 0.0  ;;  %v3659_v17 = vmul.f32 0.1, %v3587_v11  ;;  %vm3631_vm0 = vcmp.ge.f32.partialorder %v3595_v12, 0.0  ;;  %v3466_v57 = vpop.f32.mrb[30].mxu1 }
 0x2a8   : > { %v3667_v18 = vmul.f32 0.1, %v3595_v12  ;;  %3838 = vst [vmem:[%s5435_s26 + $0x10] sm:$0xff] %v4197_v14  ;;  %v3702_v19 = vsel %vm3630_vm14, %v3594_v63, %v3666_v15  ;;  %v3596_v6 = vadd.f32 %v5422_v13, %v3458_v50  ;;  %v4308_v56 = vadd.f32 %v3409_v53, %v5353_v34  ;;  %v3468_v24 = vpop.f32.mrb[31].mxu1 }
 0x2a9   : > { %v4309_v20 = vadd.f32 %v3411_v59, %v5356_v36  ;;  %v4202_v21 = vpack.c.bf16 %v3702_v19, %v3701_v10  ;;  %v3695_v22 = vsel %vm3623_vm15, %v3587_v11, %v3659_v17  ;;  %v4310_v58 = vadd.f32 %v3413_v2, %v5358_v38  ;;  %v4294_v26 = vpop.f32.mrb[0].mxu0 }
 0x2aa   : > { %v3703_v23 = vsel %vm3631_vm0, %v3595_v12, %v3667_v18  ;;  %v4198_v29 = vpack.c.bf16 %v3695_v22, %v3694_v5  ;;  %vm3632_vm1 = vcmp.ge.f32.partialorder %v3596_v6, 0.0  ;;  %v3668_v60 = vmul.f32 0.1, %v3596_v6  ;;  %v3505_v32 = vpop.f32.mrb[1].mxu0 }
 0x2ab   : > { %v3602_v31 = vadd.f32 %v4308_v56, %v5439_v47  ;;  %3843 = vst [vmem:[%s5435_s26 + $0x34] sm:$0xff] %v4202_v21  ;;  %v3603_v34 = vadd.f32 %v4309_v20, %v5439_v47  ;;  %v3611_v36 = vadd.f32 %v4310_v58, %v5448_v4  ;;  %v4311_v33 = vadd.f32 %v3415_v30, %v5362_v40  ;;  %v4295_v37 = vpop.f32.mrb[2].mxu0 }
 0x2ac   : > { %v3604_v35 = vadd.f32 %v5439_v47, %v3462_v8  ;;  %3839 = vst [vmem:[%s5435_s26 + $0x18] sm:$0xff] %v4198_v29  ;;  %v3704_v38 = vsel %vm3632_vm1, %v3596_v6, %v3668_v60  ;;  %v3605_v41 = vadd.f32 %v5439_v47, %v3464_v16  ;;  %v3508_v42 = vpop.f32.mrb[3].mxu0  ;;  %v3613_v53 = vadd.f32 %v5448_v4, %v3466_v57 }
 0x2ad   : > { %vm3638_vm2 = vcmp.ge.f32.partialorder %v3602_v31, 0.0  ;;  %v3674_v39 = vmul.f32 0.1, %v3602_v31  ;;  %v4203_v43 = vpack.c.bf16 %v3704_v38, %v3703_v23  ;;  %vm3639_vm3 = vcmp.ge.f32.partialorder %v3603_v34, 0.0 }
 0x2ae   : > { %v3675_v44 = vmul.f32 0.1, %v3603_v34  ;;  %vm3647_vm4 = vcmp.ge.f32.partialorder %v3611_v36, 0.0  ;;  %v3683_v46 = vmul.f32 0.1, %v3611_v36  ;;  %v3612_v40 = vadd.f32 %v4311_v33, %v5448_v4 }
 0x2af   : > { %v3710_v45 = vsel %vm3638_vm2, %v3602_v31, %v3674_v39  ;;  %vm3640_vm5 = vcmp.ge.f32.partialorder %v3604_v35, 0.0  ;;  %3844 = vst [vmem:[%s5435_s26 + $0x3c] sm:$0xff] %v4203_v43  ;;  %v3676_v25 = vmul.f32 0.1, %v3604_v35  ;;  %vm3641_vm6 = vcmp.ge.f32.partialorder %v3605_v41, 0.0 }
 0x2b0   : > { %v3711_v48 = vsel %vm3639_vm3, %v3603_v34, %v3675_v44  ;;  %v3677_v49 = vmul.f32 0.1, %v3605_v41  ;;  %v3719_v51 = vsel %vm3647_vm4, %v3611_v36, %v3683_v46  ;;  %vm3648_vm7 = vcmp.ge.f32.partialorder %v3612_v40, 0.0 }
 0x2b1   : > { %v4207_v50 = vpack.c.bf16 %v3711_v48, %v3710_v45  ;;  %v3684_v27 = vmul.f32 0.1, %v3612_v40  ;;  %v3712_v28 = vsel %vm3640_vm5, %v3604_v35, %v3676_v25  ;;  %v3614_v54 = vadd.f32 %v5448_v4, %v3468_v24 }
 0x2b2   : > { %v3713_v52 = vsel %vm3641_vm6, %v3605_v41, %v3677_v49  ;;  %v3606_v61 = vadd.f32 %v4294_v26, %v5439_v47  ;;  %v3588_v62 = vadd.f32 %v5418_v9, %v3505_v32  ;;  %vm3649_vm8 = vcmp.ge.f32.partialorder %v3613_v53, 0.0 }
 0x2b3   : > { %3848 = vst [vmem:[%s5435_s26 + $0x58] sm:$0xff] %v4207_v50  ;;  %v3720_v55 = vsel %vm3648_vm7, %v3612_v40, %v3684_v27  ;;  %v4208_v59 = vpack.c.bf16 %v3713_v52, %v3712_v28  ;;  %v3685_v2 = vmul.f32 0.1, %v3613_v53  ;;  %vm3650_vm9 = vcmp.ge.f32.partialorder %v3614_v54, 0.0 }
 0x2b4   : > { %v4212_v1 = vpack.c.bf16 %v3720_v55, %v3719_v51  ;;  %v3686_v0 = vmul.f32 0.1, %v3614_v54  ;;  %vm3642_vm10 = vcmp.ge.f32.partialorder %v3606_v61, 0.0  ;;  %v3678_v63 = vmul.f32 0.1, %v3606_v61 }
 0x2b5   : > { %3849 = vst [vmem:[%s5435_s26 + $0x60] sm:$0xff] %v4208_v59  ;;  %vm3624_vm11 = vcmp.ge.f32.partialorder %v3588_v62, 0.0  ;;  %v3721_v3 = vsel %vm3649_vm8, %v3613_v53, %v3685_v2  ;;  %v3660_v30 = vmul.f32 0.1, %v3588_v62  ;;  %v3615_v7 = vadd.f32 %v4295_v37, %v5448_v4 }
 0x2b6   : > { %3853 = vst [vmem:[%s5435_s26 + $0x7c] sm:$0xff] %v4212_v1  ;;  %v3597_v47 = vadd.f32 %v5422_v13, %v3508_v42  ;;  %v3722_v9 = vsel %vm3650_vm9, %v3614_v54, %v3686_v0  ;;  %v3714_v10 = vsel %vm3642_vm10, %v3606_v61, %v3678_v63 }
 0x2b7   : > { %v4213_v11 = vpack.c.bf16 %v3722_v9, %v3721_v3  ;;  %v4209_v12 = vpack.c.bf16 %v3714_v10, %v3714_v10  ;;  %v3696_v8 = vsel %vm3624_vm11, %v3588_v62, %v3660_v30  ;;  %vm3651_vm12 = vcmp.ge.f32.partialorder %v3615_v7, 0.0 }
 0x2b8   : > { %v4199_v14 = vpack.c.bf16 %v3696_v8, %v3696_v8  ;;  %v3687_v15 = vmul.f32 0.1, %v3615_v7  ;;  %vm3633_vm13 = vcmp.ge.f32.partialorder %v3597_v47, 0.0  ;;  %v3669_v5 = vmul.f32 0.1, %v3597_v47 }
 0x2b9   : > { %3854 = vst [vmem:[%s5435_s26 + $0x84] sm:$0xff] %v4213_v11  ;;  %3850 = vst [vmem:[%s5435_s26 + $0x68] sm:$0xf] %v4209_v12 }
 0x2ba   : > { %3840 = vst [vmem:[%s5435_s26 + $0x20] sm:$0xf] %v4199_v14  ;;  %v3723_v16 = vsel %vm3651_vm12, %v3615_v7, %v3687_v15  ;;  %v3705_v17 = vsel %vm3633_vm13, %v3597_v47, %v3669_v5 }
 0x2bb   : > { %v4214_v4 = vpack.c.bf16 %v3723_v16, %v3723_v16  ;;  %v4204_v18 = vpack.c.bf16 %v3705_v17, %v3705_v17 }
 0x2bd   : > { %3855 = vst [vmem:[%s5435_s26 + $0x8c] sm:$0xf] %v4214_v4  ;;  %3845 = vst [vmem:[%s5435_s26 + $0x44] sm:$0xf] %v4204_v18 }
 0x2be PF: > { %s13_s16 = sadd.s32 1, %s4716_s16   ;;  %s5523_s12 = smov %s4708_s14 }
 0x2bf   : > { %p10_p7 = scmp.ge.s32.totalorder %s13_s16, 12   ;;  %s5524_s13 = smov %s4712_s15 }
 0x2c0   : > { %s5525_s14 = smov %s5528_s17  ;;  %s5526_s15 = smov %s5532_s18 }
 0x2c1   :  { %12 = sbr.rel (!%p10_p7) target bundleno = 3 (0x3), region = 76 }

// kernel: discriminator_b_forward.9
= control target key start
LH: loop header
LB: loop body
LE: loop exit
PB: predicated region body
PF: predicated region fallthrough
CT: control target
= control target key end

     0   :  { %s5027_s12 = smov 0   ;;  %s5029_s13 = smov 0   ;;  %s6752_s0 = inlined_call_operand.vmem [shape: bf16[2,5,2,96,768], index: 0, kind: input, shape index: {}]   ;;  %s6753_s1 = inlined_call_operand.vmem [shape: bf16[5,9,32,96], index: 1, kind: input, shape index: {}]   ;;  %s6754_s2 = inlined_call_operand.vmem [shape: f32[5,32,1], index: 2, kind: input, shape index: {}]   ;;  %s6755_s3 = inlined_call_operand.vmem [shape: bf16[2,5,32,640], index: 3, kind: output, shape index: {}]  }
   0x1   :  { %s5031_s14 = smov 0   ;;  %s5033_s15 = smov 0  }
   0x2   :  { %s5035_s16 = smov 0  }
   0x3 LB: > { %s22_s17 = sadd.s32 1, %s4992_s14  ;;  %s25_s18 = sadd.s32 1, %s4996_s15  ;;  %s5000_s16 = sphi %s5035_s16, %s13_s16   ;;  %s4996_s15 = sphi %s5033_s15, %s6891_s15   ;;  %s4992_s14 = sphi %s5031_s14, %s6890_s14   ;;  %s4988_s13 = sphi %s5029_s13, %s6889_s13   ;;  %s4984_s12 = sphi %s5027_s12, %s6888_s12  }
   0x4   : > { %p23_p0 = scmp.ge.s32.totalorder %s22_s17, 5  ;;  %p3948_p1 = scmp.ge.s32.totalorder %s5000_s16, 1 }
   0x5   : > { %p177_p2 = scmp.lt.s32.totalorder %s5000_s16, 11 }
   0x6   : > { %s6893_s17 = smov (%p23_p0, %s22_s17), 0  ;;  %s6895_s18 = smov (!%p23_p0, %s25_s18), %s4996_s15 }
   0x7   : > { %p178_p3 = pnand %p3948_p1, %p177_p2  ;;  %p27_p4 = scmp.ge.s32.totalorder %s6895_s18, 2 }
   0x9   : > { %s6897_s18 = smov (%p27_p4, %s6895_s18), 0  ;;  %181 = sbr.rel (%p178_p3) target bundleno = 881 (0x371), region = 32 }
  0x10   : > { %p219_p5 = scmp.lt.s32.totalorder %s4988_s13, 1  ;;  %p221_p6 = scmp.lt.s32.totalorder %s4984_s12, 4  ;;  %v6759_v18 = vmov 0   ;;  %vm496_vm0 = vcmask 785408   ;;  %vm1252_vm1 = vcmask 1039360   ;;  %vm2089_vm2 = vcmask 1031168  }
  0x11   : > { %s5002_s26 = smov 127   ;;  %1351 = vmatprep.mubr.bf16.mxu0 %v6759_v18  ;;  %535 = vmatprep.mubr.bf16.mxu1 %v6759_v18  ;;  %s5004_s30 = smov 126   ;;  %vm2746_vm3 = vcmask 1022976   ;;  %vm3403_vm4 = vcmask 1014784  }
  0x12   : > { %s6899_s13 = smov (!%p219_p5, %s4988_s13), 1  ;;  %s6901_s12 = smov (!%p221_p6, %s4984_s12), 4  ;;  %4714 = vset.pattern.permute.xlu0 %v6759_v18  ;;  %4715 = vset.pattern.permute.xlu1 %v6759_v18 }
  0x13   : > { %s4666_s19 = smul.u32 720, %s6899_s13  ;;  %s5005_s4 = smov 125  }
  0x14   : > { %s4665_s20 = smul.u32 144, %s6901_s12  ;;  %s5006_s5 = smov 124  }
  0x15   : > { %s4276_s6 = sshll.u32 %s6901_s12, 5  ;;  %s4667_s10 = smul.u32 20, %s6901_s12 }
  0x16   : > { %s225_s21 = sadd.s32 %s4666_s19, %s4665_s20  ;;  %s5243_s29 = scalar_lea.vmem %s6753_s1, %s4665_s20 }
  0x17   : > { %s3949_s22 = sshll.u32 %s225_s21, 2  ;;  %v5314_v49 = vld [vmem:[%s5243_s29 + $0x10] sm:$0xff]   ;;  %v5365_v57 = vld [vmem:[%s5243_s29 + $0x18] sm:$0xff]   ;;  %s237_s9 = scalar_lea.vmem %s6754_s2, %s4276_s6 }
  0x18   : > { %s5068_s25 = scalar_lea.vmem %s6752_s0, %s3949_s22  ;;  %s4668_s11 = smul.u32 100, %s6899_s13 }
  0x19   : > { %v5071_v0 = vld [vmem:[%s5068_s25 + $0x4] ss:$24 sps:$4 sm:$0xff]   ;;  %v5074_v1 = vld [vmem:[%s5068_s25] ss:$24 sps:$4 sm:$0xff]   ;;  %v5084_v3 = vld [vmem:[%s5068_s25 + $0x34] ss:$24 sps:$4 sm:$0xff]  }
  0x1a   : > { %1182 = vrot.lane.b32.xlu0 %v5071_v0, %s5002_s26  ;;  %v5079_v2 = vld [vmem:[%s5068_s25 + $0x8] ss:$24 sps:$4 sm:$0xff]   ;;  %1180 = vrot.lane.b32.xlu1 %v5074_v1, %s5002_s26  ;;  %v5089_v4 = vld [vmem:[%s5068_s25 + $0x38] ss:$24 sps:$4 sm:$0xff]   ;;  %s244_s19 = sadd.s32 %s4668_s11, %s4667_s10 }
  0x1b   : > { %v5094_v5 = vld [vmem:[%s5068_s25 + $0x30] ss:$24 sps:$4 sm:$0xff]   ;;  %v5099_v6 = vld [vmem:[%s5068_s25 + $0x64] ss:$24 sps:$4 sm:$0xff]   ;;  %v5109_v8 = vld [vmem:[%s5068_s25 + $0x60] ss:$24 sps:$4 sm:$0xff]  }
  0x1c   : > { %v5104_v7 = vld [vmem:[%s5068_s25 + $0x68] ss:$24 sps:$4 sm:$0xff]   ;;  %v5114_v9 = vld [vmem:[%s5068_s25 + $0x94] ss:$24 sps:$4 sm:$0xff]   ;;  %v5119_v10 = vld [vmem:[%s5068_s25 + $0x98] ss:$24 sps:$4 sm:$0xff]  }
  0x1d   : > { %v5124_v11 = vld [vmem:[%s5068_s25 + $0x90] ss:$24 sps:$4 sm:$0xff]   ;;  %v5127_v12 = vld [vmem:[%s5068_s25 + $0xc4] ss:$24 sps:$4 sm:$0xff]   ;;  %v5141_v15 = vld [vmem:[%s5068_s25 + $0x120] ss:$24 sps:$4 sm:$0xff]  }
  0x1e   : > { %1184 = vrot.lane.b32.xlu0 %v5079_v2, %s5002_s26  ;;  %1194 = vrot.lane.b32.xlu1 %v5084_v3, %s5002_s26  ;;  %v5132_v13 = vld [vmem:[%s5068_s25 + $0x124] ss:$24 sps:$4 sm:$0xff]   ;;  %v5137_v14 = vld [vmem:[%s5068_s25 + $0xc8] ss:$24 sps:$4 sm:$0xff]   ;;  %s3953_s12 = sshll.u32 %s244_s19, 2 }
  0x1f   : > { %503 = vmatprep.subr.bf16.mxu1 %v5132_v13  ;;  %v5146_v16 = vld [vmem:[%s5068_s25 + $0xc0] ss:$24 sps:$4 sm:$0xff]   ;;  %v5149_v17 = vld [vmem:[%s5068_s25 + $0x154] ss:$24 sps:$4 sm:$0xff]   ;;  %v5164_v21 = vld [vmem:[%s5068_s25 + $0x150] ss:$24 sps:$4 sm:$0xff]   ;;  %s6695_s21 = scalar_lea.vmem %s6755_s3, %s3953_s12 }
  0x20   : > { %v5155_v19 = vld [vmem:[%s5068_s25 + $0xf4] ss:$24 sps:$4 sm:$0xff]   ;;  %504 = vmatpush1.bf16.msra.mxu1 %v5141_v15  ;;  %v5161_v20 = vld [vmem:[%s5068_s25 + $0xf8] ss:$24 sps:$4 sm:$0xff]   ;;  %v5171_v22 = vld [vmem:[%s5068_s25 + $0x184] ss:$24 sps:$4 sm:$0xff]  }
  0x21   : > { %505 = vmatprep.subr.bf16.mxu1 %v5149_v17  ;;  %v5176_v23 = vld [vmem:[%s5068_s25 + $0xf0] ss:$24 sps:$4 sm:$0xff]   ;;  %v5181_v24 = vld [vmem:[%s5068_s25 + $0x180] ss:$24 sps:$4 sm:$0xff]   ;;  %v5189_v26 = vld [vmem:[%s5068_s25 + $0x1b4] ss:$24 sps:$4 sm:$0xff]  }
  0x22   : > { %1196 = vrot.lane.b32.xlu0 %v5089_v4, %s5002_s26  ;;  %1192 = vrot.lane.b32.xlu1 %v5094_v5, %s5002_s26  ;;  %v5186_v25 = vld [vmem:[%s5068_s25 + $0x10] ss:$24 sps:$4 sm:$0xff]   ;;  %v5194_v27 = vld [vmem:[%s5068_s25 + $0x14] ss:$24 sps:$4 sm:$0xff]  }
  0x23   : > { %v5199_v28 = vld [vmem:[%s5068_s25 + $0x40] ss:$24 sps:$4 sm:$0xff]   ;;  %v5202_v29 = vld [vmem:[%s5068_s25 + $0x1b0] ss:$24 sps:$4 sm:$0xff]   ;;  %v5207_v30 = vld [vmem:[%s5068_s25 + $0x1e4] ss:$24 sps:$4 sm:$0xff]  }
  0x24   : > { %506 = vmatpush1.bf16.msra.mxu1 %v5164_v21  ;;  %v5212_v31 = vld [vmem:[%s5068_s25 + $0x44] ss:$24 sps:$4 sm:$0xff]   ;;  %v5217_v32 = vld [vmem:[%s5068_s25 + $0x70] ss:$24 sps:$4 sm:$0xff]   ;;  %v5220_v33 = vld [vmem:[%s5068_s25 + $0x1e0] ss:$24 sps:$4 sm:$0xff]  }
  0x25   : > { %507 = vmatprep.subr.bf16.mxu1 %v5171_v22  ;;  %v5225_v34 = vld [vmem:[%s5068_s25 + $0x214] ss:$24 sps:$4 sm:$0xff]   ;;  %v5236_v37 = vld [vmem:[%s5068_s25 + $0x210] ss:$24 sps:$4 sm:$0xff]   ;;  %v5248_v38 = vld [vmem:[%s5068_s25 + $0xa0] ss:$24 sps:$4 sm:$0xff]  }
  0x26   : > { %1206 = vrot.lane.b32.xlu0 %v5099_v6, %s5002_s26  ;;  %1208 = vrot.lane.b32.xlu1 %v5104_v7, %s5002_s26  ;;  %v5230_v35 = vld [vmem:[%s5068_s25 + $0x74] ss:$24 sps:$4 sm:$0xff]   ;;  %v5253_v39 = vld [vmem:[%s5068_s25 + $0xa4] ss:$24 sps:$4 sm:$0xff]  }
  0x27   : > { %v4768_v36 = vld [vmem:[%s5068_s25 + $0x12c] ss:$24 sps:$4 sm:$0xff]   ;;  %v5257_v40 = vld [vmem:[%s5068_s25 + $0xd0] ss:$24 sps:$4 sm:$0xff]   ;;  %v5267_v42 = vld [vmem:[%s5068_s25 + $0x100] ss:$24 sps:$4 sm:$0xff]  }
  0x28   : > { %508 = vmatpush1.bf16.msra.mxu1 %v5181_v24  ;;  %v5260_v41 = vld [vmem:[%s5068_s25 + $0xd4] ss:$24 sps:$4 sm:$0xff]   ;;  %v5270_v43 = vld [vmem:[%s5068_s25 + $0x104] ss:$24 sps:$4 sm:$0xff]   ;;  %v5277_v44 = vld [vmem:[%s5068_s25 + $0x128] ss:$24 sps:$4 sm:$0xff]  }
  0x29   : > { %509 = vmatprep.subr.bf16.mxu1 %v5189_v26  ;;  %v5288_v45 = vld [vmem:[%s5068_s25 + $0x158] ss:$24 sps:$4 sm:$0xff]   ;;  %v5295_v46 = vld [vmem:[%s5068_s25 + $0x188] ss:$24 sps:$4 sm:$0xff]   ;;  %v5306_v47 = vld [vmem:[%s5068_s25 + $0x15c] ss:$24 sps:$4 sm:$0xff]  }
  0x2a   : > { %1204 = vrot.lane.b32.xlu0 %v5109_v8, %s5002_s26  ;;  %1218 = vrot.lane.b32.xlu1 %v5114_v9, %s5002_s26  ;;  %6801 = vst [vmem:[#allocation2_spill] sm:$0xff] %v5306_v47  ;;  %v5311_v48 = vld [vmem:[%s5068_s25 + $0x1b8] ss:$24 sps:$4 sm:$0xff]   ;;  %v5323_v50 = vld [vmem:[%s5068_s25 + $0x18c] ss:$24 sps:$4 sm:$0xff]  }
  0x2b   : > { %6802 = vst [vmem:[#allocation3_spill] sm:$0xff] %v5323_v50  ;;  %v5331_v51 = vld [vmem:[%s5068_s25 + $0x1e8] ss:$24 sps:$4 sm:$0xff]   ;;  %v5335_v52 = vld [vmem:[%s5068_s25 + $0x1bc] ss:$24 sps:$4 sm:$0xff]  }
  0x2c   : > { %510 = vmatpush1.bf16.msra.mxu1 %v5202_v29  ;;  %6803 = vst [vmem:[#allocation4_spill] sm:$0xff] %v5335_v52  ;;  %v5344_v53 = vld [vmem:[%s5068_s25 + $0x1ec] ss:$24 sps:$4 sm:$0xff]   ;;  %v5349_v54 = vld [vmem:[%s5068_s25 + $0x218] ss:$24 sps:$4 sm:$0xff]  }
  0x2d   : > { %511 = vmatprep.subr.bf16.mxu1 %v5207_v30  ;;  %6804 = vst [vmem:[#allocation5_spill] sm:$0xff] %v5344_v53  ;;  %v5356_v55 = vld [vmem:[%s5068_s25 + $0x21c] ss:$24 sps:$4 sm:$0xff]   ;;  %v5361_v56 = vld [vmem:[%s5068_s25 + $0x130] ss:$24 sps:$4 sm:$0xff]  }
  0x2e   : > { %1220 = vrot.lane.b32.xlu0 %v5119_v10, %s5002_s26  ;;  %1216 = vrot.lane.b32.xlu1 %v5124_v11, %s5002_s26  ;;  %6805 = vst [vmem:[#allocation6_spill] sm:$0xff] %v5356_v55  ;;  %v5370_v58 = vld [vmem:[%s5068_s25 + $0x134] ss:$24 sps:$4 sm:$0xff]   ;;  %v5379_v59 = vld [vmem:[%s5068_s25 + $0x160] ss:$24 sps:$4 sm:$0xff]  }
  0x2f   : > { %v5385_v60 = vld [vmem:[%s5068_s25 + $0x164] ss:$24 sps:$4 sm:$0xff]   ;;  %v4827_v61 = vld [vmem:[%s5068_s25 + $0x130] ss:$24 sps:$4 sm:$0xff]   ;;  %v5397_v63 = vld [vmem:[%s5068_s25 + $0x194] ss:$24 sps:$4 sm:$0xff]  }
  0x30   : > { %512 = vmatpush1.bf16.msra.mxu1 %v5220_v33  ;;  %v5392_v62 = vld [vmem:[%s5068_s25 + $0x190] ss:$24 sps:$4 sm:$0xff]   ;;  %6806 = vst [vmem:[#allocation7_spill] sm:$0xff] %v5397_v63 }
  0x31   : > { %513 = vmatprep.subr.bf16.mxu1 %v5225_v34 }
  0x32   : > { %1230 = vrot.lane.b32.xlu0 %v5127_v12, %s5002_s26  ;;  %1232 = vrot.lane.b32.xlu1 %v5137_v14, %s5002_s26 }
  0x34   : > { %514 = vmatpush1.bf16.msra.mxu1 %v5236_v37 }
  0x35   : > { %556 = vmatprep.subr.bf16.mxu1 %v4768_v36  ;;  %v4828_v36 = vld [vmem:[%s5068_s25 + $0x160] ss:$24 sps:$4 sm:$0xff]  }
  0x36   : > { %1228 = vrot.lane.b32.xlu0 %v5146_v16, %s5002_s26  ;;  %1242 = vrot.lane.b32.xlu1 %v5155_v19, %s5002_s26 }
  0x37   : > { %4026 = vmatmul.mubr.msk.bf16.vlgmr.msra.gmra.mrb[0].mxu1 %vm496_vm0, %v5314_v49 }
  0x38   : > { %557 = vmatpush1.bf16.msra.mxu1 %v5277_v44  ;;  %545 = vmatprep.mubr.bf16.mxu1 %v6759_v18 }
  0x39   : > { %558 = vmatprep.subr.bf16.mxu1 %v5306_v47  ;;  %v5437_v47 = vld [vmem:[%s5068_s25 + $0x224] ss:$24 sps:$4 sm:$0xff]  }
  0x3a   : > { %1244 = vrot.lane.b32.xlu0 %v5161_v20, %s5002_s26  ;;  %1240 = vrot.lane.b32.xlu1 %v5176_v23, %s5002_s26  ;;  %6812 = vst [vmem:[#allocation13_spill] sm:$0xff] %v5437_v47 }
  0x3c   : > { %559 = vmatpush1.bf16.msra.mxu1 %v5288_v45 }
  0x3d   : > { %560 = vmatprep.subr.bf16.mxu1 %v5323_v50  ;;  %v4833_v50 = vld [vmem:[%s5068_s25 + $0x1c0] ss:$24 sps:$4 sm:$0xff]  }
  0x3e   : > { %1188 = vrot.lane.b32.xlu0 %v5186_v25, %s5002_s26  ;;  %1190 = vrot.lane.b32.xlu1 %v5194_v27, %s5002_s26 }
  0x3f   : > { %4027 = vmatmul.mubr.msk.bf16.gmra.mrb[4].mxu1 %vm496_vm0, %v5365_v57 }
  0x40   : > { %561 = vmatpush1.bf16.msra.mxu1 %v5295_v46  ;;  %588 = vmatprep.mubr.bf16.mxu1 %v6759_v18 }
  0x41   : > { %562 = vmatprep.subr.bf16.mxu1 %v5335_v52  ;;  %v4831_v52 = vld [vmem:[%s5068_s25 + $0x190] ss:$24 sps:$4 sm:$0xff]  }
  0x42   : > { %1200 = vrot.lane.b32.xlu0 %v5199_v28, %s5002_s26  ;;  %1202 = vrot.lane.b32.xlu1 %v5212_v31, %s5002_s26 }
  0x44   : > { %563 = vmatpush1.bf16.msra.mxu1 %v5311_v48 }
  0x45   : > { %564 = vmatprep.subr.bf16.mxu1 %v5344_v53  ;;  %v5411_v53 = vld [vmem:[%s5068_s25 + $0x1c4] ss:$24 sps:$4 sm:$0xff]  }
  0x46   : > { %1212 = vrot.lane.b32.xlu0 %v5217_v32, %s5002_s26  ;;  %1214 = vrot.lane.b32.xlu1 %v5230_v35, %s5002_s26  ;;  %6808 = vst [vmem:[#allocation9_spill] sm:$0xff] %v5411_v53 }
  0x48   : > { %565 = vmatpush1.bf16.msra.mxu1 %v5331_v51 }
  0x49   : > { %566 = vmatprep.subr.bf16.mxu1 %v5356_v55  ;;  %v5406_v55 = vld [vmem:[%s5068_s25 + $0x1c0] ss:$24 sps:$4 sm:$0xff]  }
  0x4a   : > { %1224 = vrot.lane.b32.xlu0 %v5248_v38, %s5002_s26  ;;  %1226 = vrot.lane.b32.xlu1 %v5253_v39, %s5002_s26  ;;  %6807 = vst [vmem:[#allocation8_spill] sm:$0xff] %v5406_v55 }
  0x4c   : > { %567 = vmatpush1.bf16.msra.mxu1 %v5349_v54 }
  0x4d   : > { %4361 = vmatprep.subr.bf16.mxu1 %v4827_v61 }
  0x4e   : > { %1236 = vrot.lane.b32.xlu0 %v5257_v40, %s5002_s26  ;;  %1238 = vrot.lane.b32.xlu1 %v5260_v41, %s5002_s26 }
  0x4f   : > { %4028 = vmatmul.mubr.msk.bf16.vlgmr.msra.gmra.mrb[8].mxu1 %vm496_vm0, %v5314_v49 }
  0x50   : > { %4362 = vmatpush3.bf16.msra.mxu1 %v4827_v61  ;;  %598 = vmatprep.mubr.bf16.mxu1 %v6759_v18  ;;  %v5417_v61 = vld [vmem:[%s5068_s25 + $0x1f0] ss:$24 sps:$4 sm:$0xff]   ;;  %v5422_v18 = vld [vmem:[%s5068_s25 + $0x1f4] ss:$24 sps:$4 sm:$0xff]  }
  0x51   : > { %4363 = vmatprep.subr.bf16.mxu1 %v4828_v36  ;;  %6809 = vst [vmem:[#allocation10_spill] sm:$0xff] %v5417_v61  ;;  %6810 = vst [vmem:[#allocation11_spill] sm:$0xff] %v5422_v18 }
  0x52   : > { %1248 = vrot.lane.b32.xlu0 %v5267_v42, %s5002_s26  ;;  %1250 = vrot.lane.b32.xlu1 %v5270_v43, %s5002_s26 }
  0x54   : > { %4364 = vmatpush3.bf16.msra.mxu1 %v4828_v36  ;;  %v5432_v36 = vld [vmem:[%s5068_s25 + $0x220] ss:$24 sps:$4 sm:$0xff]  }
  0x55   : > { %4365 = vmatprep.subr.bf16.mxu1 %v4831_v52  ;;  %6811 = vst [vmem:[#allocation12_spill] sm:$0xff] %v5432_v36 }
  0x56   : > { %1691 = vrot.lane.b32.xlu0 %v5132_v13, %s5002_s26  ;;  %1693 = vrot.lane.b32.xlu1 %v5277_v44, %s5002_s26 }
  0x57   : > { %4029 = vmatmul.mubr.msk.bf16.gmra.mrb[12].mxu1 %vm496_vm0, %v5365_v57 }
  0x58   : > { %4366 = vmatpush3.bf16.msra.mxu1 %v4831_v52  ;;  %4373 = vmatprep.mubr.msk.bf16.mxu1 %vm496_vm0, %v5314_v49  ;;  %v4834_v52 = vld [vmem:[%s5068_s25 + $0x1f0] ss:$24 sps:$4 sm:$0xff]  }
  0x59   : > { %4367 = vmatprep.subr.bf16.mxu1 %v4833_v50 }
  0x5a   : > { %1689 = vrot.lane.b32.xlu0 %v5141_v15, %s5002_s26  ;;  %1703 = vrot.lane.b32.xlu1 %v5149_v17, %s5002_s26 }
  0x5c   : > { %4368 = vmatpush3.bf16.msra.mxu1 %v4833_v50 }
  0x5d   : > { %4369 = vmatprep.subr.bf16.mxu1 %v4834_v52 }
  0x5e   : > { %1705 = vrot.lane.b32.xlu0 %v5288_v45, %s5002_s26  ;;  %1701 = vrot.lane.b32.xlu1 %v5164_v21, %s5002_s26 }
  0x60   : > { %4370 = vmatpush3.bf16.msra.mxu1 %v4834_v52 }
  0x62   : > { %1715 = vrot.lane.b32.xlu0 %v5171_v22, %s5002_s26  ;;  %1717 = vrot.lane.b32.xlu1 %v5295_v46, %s5002_s26 }
  0x66   : > { %1713 = vrot.lane.b32.xlu0 %v5181_v24, %s5002_s26  ;;  %1727 = vrot.lane.b32.xlu1 %v5189_v26, %s5002_s26 }
  0x6a   : > { %1729 = vrot.lane.b32.xlu0 %v5311_v48, %s5002_s26  ;;  %1725 = vrot.lane.b32.xlu1 %v5202_v29, %s5002_s26 }
  0x6e   : > { %1739 = vrot.lane.b32.xlu0 %v5207_v30, %s5002_s26  ;;  %1741 = vrot.lane.b32.xlu1 %v5331_v51, %s5002_s26 }
  0x72   : > { %1737 = vrot.lane.b32.xlu0 %v5220_v33, %s5002_s26  ;;  %1751 = vrot.lane.b32.xlu1 %v5225_v34, %s5002_s26 }
  0x76   : > { %1753 = vrot.lane.b32.xlu0 %v5349_v54, %s5002_s26  ;;  %1749 = vrot.lane.b32.xlu1 %v5236_v37, %s5002_s26 }
  0x7a   : > { %1697 = vrot.lane.b32.xlu0 %v5361_v56, %s5002_s26  ;;  %1699 = vrot.lane.b32.xlu1 %v5370_v58, %s5002_s26 }
  0x7e   : > { %1709 = vrot.lane.b32.xlu0 %v5379_v59, %s5002_s26  ;;  %1711 = vrot.lane.b32.xlu1 %v5385_v60, %s5002_s26 }
  0x82   : > { %1721 = vrot.lane.b32.xlu0 %v5392_v62, %s5002_s26  ;;  %1723 = vrot.lane.b32.xlu1 %v5397_v63, %s5002_s26  ;;  %v4835_v63 = vld [vmem:[%s5068_s25 + $0x220] ss:$24 sps:$4 sm:$0xff]  }
  0x83   : > { %4371 = vmatprep.subr.bf16.mxu1 %v4835_v63 }
  0x84   : > { %4372 = vmatpush3.bf16.msra.mxu1 %v4835_v63  ;;  %v4839_v63 = vld [vmem:[%s5068_s25 + $0x30] ss:$24 sps:$4 sm:$0xff]  }
  0x86   : > { %1733 = vrot.lane.b32.xlu0 %v5406_v55, %s5002_s26  ;;  %1735 = vrot.lane.b32.xlu1 %v5411_v53, %s5002_s26 }
  0x87   : > { %4374 = vmatmul.mubr.msk.bf16.vlgmr.msra.gmra.mrb[16].mxu1 %vm496_vm0, %v5365_v57 }
  0x8a   : > { %1745 = vrot.lane.b32.xlu0 %v5417_v61, %s5002_s26  ;;  %1747 = vrot.lane.b32.xlu1 %v5422_v18, %s5002_s26 }
  0x8c   : > { %v1183_v53 = vpop.permute.xlu0 %1182  ;;  %v1181_v55 = vpop.permute.xlu1 %1180 }
  0x8d   : > { %v1253_v50 = vsel %vm1252_vm1, %v1181_v55, %v1183_v53  ;;  %v4841_v55 = vld [vmem:[%s5068_s25 + $0x34] ss:$24 sps:$4 sm:$0xff]  }
  0x8e   : > { %1757 = vrot.lane.b32.xlu0 %v5432_v36, %s5002_s26  ;;  %1759 = vrot.lane.b32.xlu1 %v5437_v47, %s5002_s26 }
  0x90   : > { %v5444_v49 = vpop.permute.xlu0 %1184  ;;  %v1195_v61 = vpop.permute.xlu1 %1194 }
  0x91   : > { %6813 = vst [vmem:[#allocation14_spill] sm:$0xff] %v5444_v49  ;;  %v1254_v18 = vsel %vm1252_vm1, %v1183_v53, %v5444_v49  ;;  %v4838_v49 = vld [vmem:[%s5068_s25 + $0x4] ss:$24 sps:$4 sm:$0xff]  }
  0x92   : > { %2019 = vrot.lane.b32.xlu0 %v5071_v0, %s5004_s30  ;;  %1319 = vmatprep.subr.bf16.mxu0 %v1254_v18  ;;  %v4836_v18 = vld [vmem:[%s5068_s25] ss:$24 sps:$4 sm:$0xff]  }
  0x93   : > { %2021 = vrot.lane.b32.xlu1 %v5079_v2, %s5004_s30  ;;  %1320 = vmatpush1.bf16.msra.mxu0 %v1253_v50 }
  0x94   : > { %v5454_v47 = vpop.permute.xlu0 %1196  ;;  %v1193_v36 = vpop.permute.xlu1 %1192  ;;  %830 = vmatprep.subr.bf16.mxu1 %v4838_v49  ;;  %v4844_v49 = vld [vmem:[%s5068_s25 + $0x64] ss:$24 sps:$4 sm:$0xff]  }
  0x95   : > { %v1259_v52 = vsel %vm1252_vm1, %v1195_v61, %v5454_v47  ;;  %v1258_v0 = vsel %vm1252_vm1, %v1193_v36, %v1195_v61  ;;  %831 = vmatpush1.bf16.msra.mxu1 %v4836_v18  ;;  %v4845_v18 = vld [vmem:[%s5068_s25 + $0x90] ss:$24 sps:$4 sm:$0xff]  }
  0x96   : > { %2017 = vrot.lane.b32.xlu0 %v5074_v1, %s5004_s30  ;;  %1321 = vmatprep.subr.bf16.mxu0 %v1259_v52  ;;  %v6814_v1 = vmov 0  }
  0x97   : > { %2031 = vrot.lane.b32.xlu1 %v5084_v3, %s5004_s30  ;;  %1322 = vmatpush1.bf16.msra.mxu0 %v1258_v0  ;;  %v4847_v0 = vld [vmem:[%s5068_s25 + $0x94] ss:$24 sps:$4 sm:$0xff]  }
  0x98   : > { %v1207_v2 = vpop.permute.xlu0 %1206  ;;  %v5467_v53 = vpop.permute.xlu1 %1208  ;;  %862 = vmatprep.mubr.bf16.mxu1 %v6814_v1  ;;  %832 = vmatprep.subr.bf16.mxu1 %v4841_v55  ;;  %v4850_v55 = vld [vmem:[%s5068_s25 + $0xc4] ss:$24 sps:$4 sm:$0xff]  }
  0x99   : > { %v1264_v3 = vsel %vm1252_vm1, %v1207_v2, %v5467_v53  ;;  %833 = vmatpush1.bf16.msra.mxu1 %v4839_v63 }
  0x9a   : > { %2033 = vrot.lane.b32.xlu0 %v5089_v4, %s5004_s30  ;;  %1323 = vmatprep.subr.bf16.mxu0 %v1264_v3  ;;  %v4842_v4 = vld [vmem:[%s5068_s25 + $0x60] ss:$24 sps:$4 sm:$0xff]  }
  0x9b   : > { %2029 = vrot.lane.b32.xlu1 %v5094_v5, %s5004_s30  ;;  %834 = vmatprep.subr.bf16.mxu1 %v4844_v49  ;;  %v4848_v3 = vld [vmem:[%s5068_s25 + $0xc0] ss:$24 sps:$4 sm:$0xff]  }
  0x9c   : > { %v1205_v57 = vpop.permute.xlu0 %1204  ;;  %v1219_v61 = vpop.permute.xlu1 %1218 }
  0x9d   : > { %v1263_v36 = vsel %vm1252_vm1, %v1205_v57, %v1207_v2  ;;  %835 = vmatpush1.bf16.msra.mxu1 %v4842_v4  ;;  %v4857_v4 = vld [vmem:[%s5068_s25 + $0xc] ss:$24 sps:$4 sm:$0xff]  }
  0x9e   : > { %2043 = vrot.lane.b32.xlu0 %v5099_v6, %s5004_s30  ;;  %1324 = vmatpush1.bf16.msra.mxu0 %v1263_v36 }
  0x9f   : > { %2045 = vrot.lane.b32.xlu1 %v5104_v7, %s5004_s30  ;;  %836 = vmatprep.subr.bf16.mxu1 %v4847_v0 }
  0xa0   : > { %v5485_v5 = vpop.permute.xlu0 %1220  ;;  %v1217_v50 = vpop.permute.xlu1 %1216 }
  0xa1   : > { %v1269_v52 = vsel %vm1252_vm1, %v1219_v61, %v5485_v5  ;;  %v1268_v6 = vsel %vm1252_vm1, %v1217_v50, %v1219_v61  ;;  %837 = vmatpush1.bf16.msra.mxu1 %v4845_v18  ;;  %v4853_v61 = vld [vmem:[%s5068_s25 + $0xf4] ss:$24 sps:$4 sm:$0xff]   ;;  %v5522_v50 = vld [vmem:[%s5243_s29 + $0x20] sm:$0xff]   ;;  %v4859_v18 = vld [vmem:[%s5068_s25 + $0x38] ss:$24 sps:$4 sm:$0xff]  }
  0xa2   : > { %2041 = vrot.lane.b32.xlu0 %v5109_v8, %s5004_s30  ;;  %1325 = vmatprep.subr.bf16.mxu0 %v1269_v52  ;;  %v5526_v52 = vld [vmem:[%s5243_s29] sm:$0xff]  }
  0xa3   : > { %2055 = vrot.lane.b32.xlu1 %v5114_v9, %s5004_s30  ;;  %1326 = vmatpush1.bf16.msra.mxu0 %v1268_v6  ;;  %v4861_v6 = vld [vmem:[%s5068_s25 + $0x3c] ss:$24 sps:$4 sm:$0xff]  }
  0xa4   : > { %v1231_v7 = vpop.permute.xlu0 %1230  ;;  %v5496_v2 = vpop.permute.xlu1 %1232  ;;  %838 = vmatprep.subr.bf16.mxu1 %v4850_v55 }
  0xa5   : > { %v1274_v8 = vsel %vm1252_vm1, %v1231_v7, %v5496_v2  ;;  %839 = vmatpush1.bf16.msra.mxu1 %v4848_v3  ;;  %v5554_v3 = vld [vmem:[%s5243_s29 + $0x28] sm:$0xff]  }
  0xa6   : > { %2057 = vrot.lane.b32.xlu0 %v5119_v10, %s5004_s30  ;;  %1327 = vmatprep.subr.bf16.mxu0 %v1274_v8  ;;  %v4851_v10 = vld [vmem:[%s5068_s25 + $0xf0] ss:$24 sps:$4 sm:$0xff]  }
  0xa7   : > { %2053 = vrot.lane.b32.xlu1 %v5124_v11, %s5004_s30  ;;  %840 = vmatprep.subr.bf16.mxu1 %v4853_v61  ;;  %v4865_v61 = vld [vmem:[%s5068_s25 + $0x98] ss:$24 sps:$4 sm:$0xff]  }
  0xa8   : > { %v1229_v9 = vpop.permute.xlu0 %1228  ;;  %v1243_v63 = vpop.permute.xlu1 %1242 }
  0xa9   : > { %v1273_v57 = vsel %vm1252_vm1, %v1229_v9, %v1231_v7  ;;  %841 = vmatpush1.bf16.msra.mxu1 %v4851_v10 }
  0xaa   : > { %2067 = vrot.lane.b32.xlu0 %v5127_v12, %s5004_s30  ;;  %1328 = vmatpush1.bf16.msra.mxu0 %v1273_v57 }
  0xab   : > { %2069 = vrot.lane.b32.xlu1 %v5137_v14, %s5004_s30  ;;  %v4855_v14 = vld [vmem:[%s5068_s25 + $0x8] ss:$24 sps:$4 sm:$0xff]   ;;  %883 = vmatprep.subr.bf16.mxu1 %v4857_v4 }
  0xac   : > { %v5513_v11 = vpop.permute.xlu0 %1244  ;;  %v1241_v36 = vpop.permute.xlu1 %1240  ;;  %4064 = vmatmul.mubr.msk.bf16.vlgmr.msra.gmra.mrb[0].mxu1 %vm496_vm0, %v5526_v52  ;;  %v4868_v4 = vld [vmem:[%s5068_s25 + $0xc8] ss:$24 sps:$4 sm:$0xff]  }
  0xad   : > { %v1279_v49 = vsel %vm1252_vm1, %v1243_v63, %v5513_v11  ;;  %v1278_v12 = vsel %vm1252_vm1, %v1241_v36, %v1243_v63  ;;  %884 = vmatpush1.bf16.msra.mxu1 %v4855_v14  ;;  %872 = vmatprep.mubr.bf16.mxu1 %v6814_v1  ;;  %v4862_v63 = vld [vmem:[%s5068_s25 + $0x68] ss:$24 sps:$4 sm:$0xff]  }
  0xae   : > { %2065 = vrot.lane.b32.xlu0 %v5146_v16, %s5004_s30  ;;  %1329 = vmatprep.subr.bf16.mxu0 %v1279_v49  ;;  %v5581_v36 = vld [vmem:[%s5243_s29 + $0x8] sm:$0xff]  }
  0xaf   : > { %2079 = vrot.lane.b32.xlu1 %v5155_v19, %s5004_s30  ;;  %1330 = vmatpush1.bf16.msra.mxu0 %v1278_v12  ;;  %v4875_v12 = vld [vmem:[%s5068_s25 + $0xfc] ss:$24 sps:$4 sm:$0xff]  }
  0xb0   : > { %v5530_v0 = vpop.permute.xlu0 %1188  ;;  %v1191_v16 = vpop.permute.xlu1 %1190  ;;  %885 = vmatprep.subr.bf16.mxu1 %v4861_v6  ;;  %v4873_v6 = vld [vmem:[%s5068_s25 + $0xf8] ss:$24 sps:$4 sm:$0xff]  }
  0xb1   : > { %v1257_v19 = vsel %vm1252_vm1, %v5530_v0, %v1191_v16  ;;  %886 = vmatpush1.bf16.msra.mxu1 %v4859_v18 }
  0xb2   : > { %2081 = vrot.lane.b32.xlu0 %v5161_v20, %s5004_s30  ;;  %4112 = vmatmul.mubr.msk.bf16.vlgmr.msra.gmra.mrb[0].mxu0 %vm496_vm0, %v5522_v50  ;;  %v4864_v20 = vld [vmem:[%s5068_s25 + $0x6c] ss:$24 sps:$4 sm:$0xff]  }
  0xb3   : > { %2077 = vrot.lane.b32.xlu1 %v5176_v23, %s5004_s30  ;;  %4393 = vmatprep.subr.bf16.mxu0 %v1257_v19 }
  0xb4   : > { %4394 = vmatpush3.bf16.msra.mxu0 %v1257_v19  ;;  %v5545_v7 = vpop.permute.xlu0 %1200  ;;  %1361 = vmatprep.mubr.bf16.mxu0 %v6814_v1  ;;  %v1203_v55 = vpop.permute.xlu1 %1202  ;;  %v4876_v19 = vld [vmem:[%s5068_s25 + $0x10] ss:$24 sps:$4 sm:$0xff]  }
  0xb5   : > { %v1262_v8 = vsel %vm1252_vm1, %v5545_v7, %v1203_v55  ;;  %887 = vmatprep.subr.bf16.mxu1 %v4864_v20  ;;  %4065 = vmatmul.mubr.msk.bf16.gmra.mrb[4].mxu1 %vm496_vm0, %v5581_v36  ;;  %v4877_v55 = vld [vmem:[%s5068_s25 + $0x40] ss:$24 sps:$4 sm:$0xff]  }
  0xb6   : > { %2025 = vrot.lane.b32.xlu0 %v5186_v25, %s5004_s30  ;;  %4395 = vmatprep.subr.bf16.mxu0 %v1262_v8 }
  0xb7   : > { %2027 = vrot.lane.b32.xlu1 %v5194_v27, %s5004_s30  ;;  %v4867_v27 = vld [vmem:[%s5068_s25 + $0x9c] ss:$24 sps:$4 sm:$0xff]   ;;  %888 = vmatpush1.bf16.msra.mxu1 %v4862_v63 }
  0xb8   : > { %4396 = vmatpush3.bf16.msra.mxu0 %v1262_v8  ;;  %v5558_v23 = vpop.permute.xlu0 %1212  ;;  %v1215_v9 = vpop.permute.xlu1 %1214  ;;  %889 = vmatprep.subr.bf16.mxu1 %v4867_v27  ;;  %v4878_v8 = vld [vmem:[%s5068_s25 + $0x70] ss:$24 sps:$4 sm:$0xff]  }
  0xb9   : > { %v1267_v25 = vsel %vm1252_vm1, %v5558_v23, %v1215_v9  ;;  %915 = vmatprep.mubr.bf16.mxu1 %v6814_v1 }
  0xba   : > { %2037 = vrot.lane.b32.xlu0 %v5199_v28, %s5004_s30  ;;  %4113 = vmatmul.mubr.msk.bf16.gmra.mrb[4].mxu0 %vm496_vm0, %v5554_v3 }
  0xbb   : > { %2039 = vrot.lane.b32.xlu1 %v5212_v31, %s5004_s30  ;;  %4397 = vmatprep.subr.bf16.mxu0 %v1267_v25  ;;  %v4870_v31 = vld [vmem:[%s5068_s25 + $0xcc] ss:$24 sps:$4 sm:$0xff]  }
  0xbc   : > { %4398 = vmatpush3.bf16.msra.mxu0 %v1267_v25  ;;  %v5570_v57 = vpop.permute.xlu0 %1224  ;;  %4405 = vmatprep.mubr.msk.bf16.mxu0 %vm496_vm0, %v5522_v50  ;;  %v1227_v28 = vpop.permute.xlu1 %1226 }
  0xbd   : > { %v1272_v10 = vsel %vm1252_vm1, %v5570_v57, %v1227_v28  ;;  %890 = vmatpush1.bf16.msra.mxu1 %v4865_v61 }
  0xbe   : > { %2049 = vrot.lane.b32.xlu0 %v5217_v32, %s5004_s30  ;;  %4399 = vmatprep.subr.bf16.mxu0 %v1272_v10 }
  0xbf   : > { %2051 = vrot.lane.b32.xlu1 %v5230_v35, %s5004_s30  ;;  %891 = vmatprep.subr.bf16.mxu1 %v4870_v31 }
  0xc0   : > { %4400 = vmatpush3.bf16.msra.mxu0 %v1272_v10  ;;  %v5585_v49 = vpop.permute.xlu0 %1236  ;;  %v1239_v32 = vpop.permute.xlu1 %1238 }
  0xc1   : > { %v1277_v35 = vsel %vm1252_vm1, %v5585_v49, %v1239_v32  ;;  %892 = vmatpush1.bf16.msra.mxu1 %v4868_v4 }
  0xc2   : > { %2061 = vrot.lane.b32.xlu0 %v5248_v38, %s5004_s30  ;;  %4401 = vmatprep.subr.bf16.mxu0 %v1277_v35 }
  0xc3   : > { %2063 = vrot.lane.b32.xlu1 %v5253_v39, %s5004_s30  ;;  %893 = vmatprep.subr.bf16.mxu1 %v4875_v12 }
  0xc4   : > { %4402 = vmatpush3.bf16.msra.mxu0 %v1277_v35  ;;  %v5598_v14 = vpop.permute.xlu0 %1248  ;;  %v1251_v16 = vpop.permute.xlu1 %1250 }
  0xc5   : > { %v1282_v38 = vsel %vm1252_vm1, %v5598_v14, %v1251_v16  ;;  %894 = vmatpush1.bf16.msra.mxu1 %v4873_v6 }
  0xc6   : > { %2073 = vrot.lane.b32.xlu0 %v5257_v40, %s5004_s30  ;;  %4403 = vmatprep.subr.bf16.mxu0 %v1282_v38 }
  0xc7   : > { %2075 = vrot.lane.b32.xlu1 %v5260_v41, %s5004_s30  ;;  %4377 = vmatprep.subr.bf16.mxu1 %v4876_v19 }
  0xc8   : > { %4404 = vmatpush3.bf16.msra.mxu0 %v1282_v38  ;;  %v1692_v39 = vpop.permute.xlu0 %1691  ;;  %v5608_v18 = vpop.permute.xlu1 %1693  ;;  %4066 = vmatmul.mubr.msk.bf16.vlgmr.msra.gmra.mrb[8].mxu1 %vm496_vm0, %v5526_v52 }
  0xc9   : > { %v1762_v40 = vsel %vm1252_vm1, %v1692_v39, %v5608_v18  ;;  %4378 = vmatpush3.bf16.msra.mxu1 %v4876_v19  ;;  %925 = vmatprep.mubr.bf16.mxu1 %v6814_v1 }
  0xca   : > { %2085 = vrot.lane.b32.xlu0 %v5267_v42, %s5004_s30  ;;  %1827 = vmatprep.subr.bf16.mxu0 %v1762_v40  ;;  %v5719_v40 = vld [vmem:[%s5243_s29 + $0x38] sm:$0xff]  }
  0xcb   : > { %2087 = vrot.lane.b32.xlu1 %v5270_v43, %s5004_s30  ;;  %4406 = vmatmul.mubr.msk.bf16.vlgmr.msra.gmra.mrb[8].mxu0 %vm496_vm0, %v5554_v3 }
  0xcc   : > { %v1690_v41 = vpop.permute.xlu0 %1689  ;;  %v1704_v42 = vpop.permute.xlu1 %1703  ;;  %1859 = vmatprep.mubr.bf16.mxu0 %v6814_v1  ;;  %4379 = vmatprep.subr.bf16.mxu1 %v4877_v55 }
  0xcd   : > { %v1761_v20 = vsel %vm1252_vm1, %v1690_v41, %v1692_v39  ;;  %4380 = vmatpush3.bf16.msra.mxu1 %v4877_v55  ;;  %v5730_v41 = vld [vmem:[%s5068_s25 + $0x6c] ss:$24 sps:$4 sm:$0xff]  }
  0xce   : > { %2348 = vrot.lane.b32.xlu0 %v5132_v13, %s5004_s30  ;;  %1828 = vmatpush1.bf16.msra.mxu0 %v1761_v20  ;;  %v4879_v13 = vld [vmem:[%s5068_s25 + $0xa0] ss:$24 sps:$4 sm:$0xff]  }
  0xcf   : > { %2350 = vrot.lane.b32.xlu1 %v5277_v44, %s5004_s30  ;;  %4381 = vmatprep.subr.bf16.mxu1 %v4878_v8 }
  0xd0   : > { %v5627_v43 = vpop.permute.xlu0 %1705  ;;  %v1702_v9 = vpop.permute.xlu1 %1701  ;;  %4067 = vmatmul.mubr.msk.bf16.gmra.mrb[12].mxu1 %vm496_vm0, %v5581_v36 }
  0xd1   : > { %v1767_v63 = vsel %vm1252_vm1, %v1704_v42, %v5627_v43  ;;  %v1766_v25 = vsel %vm1252_vm1, %v1702_v9, %v1704_v42  ;;  %4382 = vmatpush3.bf16.msra.mxu1 %v4878_v8  ;;  %4389 = vmatprep.mubr.msk.bf16.mxu1 %vm496_vm0, %v5526_v52  ;;  %v4881_v52 = vld [vmem:[%s5068_s25 + $0x100] ss:$24 sps:$4 sm:$0xff]  }
  0xd2   : > { %2346 = vrot.lane.b32.xlu0 %v5141_v15, %s5004_s30  ;;  %1829 = vmatprep.subr.bf16.mxu0 %v1767_v63 }
  0xd3   : > { %2360 = vrot.lane.b32.xlu1 %v5149_v17, %s5004_s30  ;;  %1830 = vmatpush1.bf16.msra.mxu0 %v1766_v25  ;;  %v4880_v17 = vld [vmem:[%s5068_s25 + $0xd0] ss:$24 sps:$4 sm:$0xff]  }
  0xd4   : > { %v1716_v44 = vpop.permute.xlu0 %1715  ;;  %v5641_v27 = vpop.permute.xlu1 %1717  ;;  %4383 = vmatprep.subr.bf16.mxu1 %v4879_v13 }
  0xd5   : > { %v1772_v15 = vsel %vm1252_vm1, %v1716_v44, %v5641_v27  ;;  %4384 = vmatpush3.bf16.msra.mxu1 %v4879_v13 }
  0xd6   : > { %2362 = vrot.lane.b32.xlu0 %v5288_v45, %s5004_s30  ;;  %1831 = vmatprep.subr.bf16.mxu0 %v1772_v15 }
  0xd7   : > { %2358 = vrot.lane.b32.xlu1 %v5164_v21, %s5004_s30  ;;  %4385 = vmatprep.subr.bf16.mxu1 %v4880_v17 }
  0xd8   : > { %v1714_v28 = vpop.permute.xlu0 %1713  ;;  %v1728_v10 = vpop.permute.xlu1 %1727 }
  0xd9   : > { %v1771_v61 = vsel %vm1252_vm1, %v1714_v28, %v1716_v44  ;;  %4386 = vmatpush3.bf16.msra.mxu1 %v4880_v17  ;;  %v5764_v44 = vld [vmem:[%s5068_s25 + $0xcc] ss:$24 sps:$4 sm:$0xff]   ;;  %v6816_v28 = vld [vmem:[#allocation8_spill] sm:$0xff] }
  0xda   : > { %2372 = vrot.lane.b32.xlu0 %v5171_v22, %s5004_s30  ;;  %1832 = vmatpush1.bf16.msra.mxu0 %v1771_v61  ;;  %v5777_v61 = vld [vmem:[%s5068_s25 + $0xfc] ss:$24 sps:$4 sm:$0xff]  }
  0xdb   : > { %2374 = vrot.lane.b32.xlu1 %v5295_v46, %s5004_s30  ;;  %4387 = vmatprep.subr.bf16.mxu1 %v4881_v52 }
  0xdc   : > { %v5657_v45 = vpop.permute.xlu0 %1729  ;;  %v1726_v31 = vpop.permute.xlu1 %1725 }
  0xdd   : > { %v1777_v21 = vsel %vm1252_vm1, %v1728_v10, %v5657_v45  ;;  %v1776_v32 = vsel %vm1252_vm1, %v1726_v31, %v1728_v10  ;;  %4388 = vmatpush3.bf16.msra.mxu1 %v4881_v52 }
  0xde   : > { %2370 = vrot.lane.b32.xlu0 %v5181_v24, %s5004_s30  ;;  %1833 = vmatprep.subr.bf16.mxu0 %v1777_v21  ;;  %v6817_v21 = vld [vmem:[#allocation9_spill] sm:$0xff] }
  0xdf   : > { %2384 = vrot.lane.b32.xlu1 %v5189_v26, %s5004_s30  ;;  %1834 = vmatpush1.bf16.msra.mxu0 %v1776_v32 }
  0xe0   : > { %v1740_v22 = vpop.permute.xlu0 %1739  ;;  %v5667_v46 = vpop.permute.xlu1 %1741  ;;  %4390 = vmatmul.mubr.msk.bf16.vlgmr.msra.gmra.mrb[16].mxu1 %vm496_vm0, %v5581_v36 }
  0xe1   : > { %v1782_v4 = vsel %vm1252_vm1, %v1740_v22, %v5667_v46  ;;  %1404 = vmatprep.mubr.bf16.mxu1 %v6814_v1 }
  0xe2   : > { %2386 = vrot.lane.b32.xlu0 %v5311_v48, %s5004_s30  ;;  %1835 = vmatprep.subr.bf16.mxu0 %v1782_v4  ;;  %v5684_v48 = vld [vmem:[%s5068_s25 + $0xc] ss:$24 sps:$4 sm:$0xff]  }
  0xe3   : > { %2382 = vrot.lane.b32.xlu1 %v5202_v29, %s5004_s30 }
  0xe4   : > { %v1738_v24 = vpop.permute.xlu0 %1737  ;;  %v1752_v35 = vpop.permute.xlu1 %1751 }
  0xe5   : > { %v1781_v26 = vsel %vm1252_vm1, %v1738_v24, %v1740_v22 }
  0xe6   : > { %2396 = vrot.lane.b32.xlu0 %v5207_v30, %s5004_s30  ;;  %1836 = vmatpush1.bf16.msra.mxu0 %v1781_v26  ;;  %v5694_v30 = vld [vmem:[%s5243_s29 + $0x30] sm:$0xff]   ;;  %v6818_v26 = vld [vmem:[#allocation10_spill] sm:$0xff] }
  0xe7   : > { %2398 = vrot.lane.b32.xlu1 %v5331_v51, %s5004_s30 }
  0xe8   : > { %v5686_v29 = vpop.permute.xlu0 %1753  ;;  %v1750_v12 = vpop.permute.xlu1 %1749 }
  0xe9   : > { %v1787_v36 = vsel %vm1252_vm1, %v1752_v35, %v5686_v29  ;;  %v1786_v16 = vsel %vm1252_vm1, %v1750_v12, %v1752_v35  ;;  %v6819_v35 = vld [vmem:[#allocation11_spill] sm:$0xff] }
  0xea   : > { %2394 = vrot.lane.b32.xlu0 %v5220_v33, %s5004_s30  ;;  %1837 = vmatprep.subr.bf16.mxu0 %v1787_v36  ;;  %v5709_v33 = vld [vmem:[%s5068_s25 + $0x3c] ss:$24 sps:$4 sm:$0xff]  }
  0xeb   : > { %1186 = vrot.lane.b32.xlu1 %v5684_v48, %s5002_s26  ;;  %1838 = vmatpush1.bf16.msra.mxu0 %v1786_v16  ;;  %v5799_v16 = vld [vmem:[%s5068_s25 + $0x12c] ss:$24 sps:$4 sm:$0xff]  }
  0xec   : > { %v5698_v51 = vpop.permute.xlu0 %1697  ;;  %v1700_v6 = vpop.permute.xlu1 %1699 }
  0xed   : > { %v1765_v38 = vsel %vm1252_vm1, %v5698_v51, %v1700_v6 }
  0xee   : > { %2408 = vrot.lane.b32.xlu0 %v5225_v34, %s5004_s30  ;;  %4196 = vmatmul.mubr.msk.bf16.vlgmr.msra.gmra.mrb[0].mxu0 %vm496_vm0, %v5694_v30 }
  0xef   : > { %2410 = vrot.lane.b32.xlu1 %v5349_v54, %s5004_s30  ;;  %4409 = vmatprep.subr.bf16.mxu0 %v1765_v38 }
  0xf0   : > { %4410 = vmatpush3.bf16.msra.mxu0 %v1765_v38  ;;  %v5711_v19 = vpop.permute.xlu0 %1709  ;;  %1869 = vmatprep.mubr.bf16.mxu0 %v6814_v1  ;;  %v1712_v39 = vpop.permute.xlu1 %1711  ;;  %v6820_v38 = vld [vmem:[#allocation12_spill] sm:$0xff] }
  0xf1   : > { %v1770_v34 = vsel %vm1252_vm1, %v5711_v19, %v1712_v39 }
  0xf2   : > { %2406 = vrot.lane.b32.xlu0 %v5236_v37, %s5004_s30  ;;  %4411 = vmatprep.subr.bf16.mxu0 %v1770_v34 }
  0xf3   : > { %1198 = vrot.lane.b32.xlu1 %v5709_v33, %s5002_s26 }
  0xf4   : > { %4412 = vmatpush3.bf16.msra.mxu0 %v1770_v34  ;;  %v5723_v54 = vpop.permute.xlu0 %1721  ;;  %v1724_v55 = vpop.permute.xlu1 %1723 }
  0xf5   : > { %v1775_v37 = vsel %vm1252_vm1, %v5723_v54, %v1724_v55 }
  0xf6   : > { %2354 = vrot.lane.b32.xlu0 %v5361_v56, %s5004_s30  ;;  %4197 = vmatmul.mubr.msk.bf16.gmra.mrb[4].mxu0 %vm496_vm0, %v5719_v40 }
  0xf7   : > { %2356 = vrot.lane.b32.xlu1 %v5370_v58, %s5004_s30  ;;  %4413 = vmatprep.subr.bf16.mxu0 %v1775_v37  ;;  %v5747_v58 = vld [vmem:[%s5068_s25 + $0x9c] ss:$24 sps:$4 sm:$0xff]  }
  0xf8   : > { %4414 = vmatpush3.bf16.msra.mxu0 %v1775_v37  ;;  %v5736_v20 = vpop.permute.xlu0 %1733  ;;  %4421 = vmatprep.mubr.msk.bf16.mxu0 %vm496_vm0, %v5694_v30  ;;  %v1736_v42 = vpop.permute.xlu1 %1735  ;;  %v6821_v37 = vld [vmem:[#allocation13_spill] sm:$0xff] }
  0xf9   : > { %v1780_v56 = vsel %vm1252_vm1, %v5736_v20, %v1736_v42  ;;  %v6822_v42 = vld [vmem:[#allocation2_spill] sm:$0xff] }
  0xfa   : > { %1210 = vrot.lane.b32.xlu0 %v5730_v41, %s5002_s26  ;;  %4415 = vmatprep.subr.bf16.mxu0 %v1780_v56 }
  0xfb   : > { %2366 = vrot.lane.b32.xlu1 %v5379_v59, %s5004_s30 }
  0xfc   : > { %4416 = vmatpush3.bf16.msra.mxu0 %v1780_v56  ;;  %v5749_v8 = vpop.permute.xlu0 %1745  ;;  %v1748_v9 = vpop.permute.xlu1 %1747 }
  0xfd   : > { %v1785_v63 = vsel %vm1252_vm1, %v5749_v8, %v1748_v9 }
  0xfe   : > { %2368 = vrot.lane.b32.xlu0 %v5385_v60, %s5004_s30  ;;  %4417 = vmatprep.subr.bf16.mxu0 %v1785_v63  ;;  %v6815_v60 = vld [vmem:[#allocation7_spill] sm:$0xff] }
  0xff   : > { %1222 = vrot.lane.b32.xlu1 %v5747_v58, %s5002_s26 }
 0x100   : > { %4418 = vmatpush3.bf16.msra.mxu0 %v1785_v63  ;;  %v5757_v59 = vpop.permute.xlu0 %1757  ;;  %v1760_v25 = vpop.permute.xlu1 %1759 }
 0x101   : > { %v1790_v13 = vsel %vm1252_vm1, %v5757_v59, %v1760_v25 }
 0x102   : > { %2378 = vrot.lane.b32.xlu0 %v5392_v62, %s5004_s30  ;;  %4419 = vmatprep.subr.bf16.mxu0 %v1790_v13 }
 0x103   : > { %2380 = vrot.lane.b32.xlu1 %v6815_v60, %s5004_s30  ;;  %v5823_v60 = vld [vmem:[%s5068_s25 + $0x8] ss:$24 sps:$4 sm:$0xff]  }
 0x104   : > { %4420 = vmatpush3.bf16.msra.mxu0 %v1790_v13  ;;  %v2020_v15 = vpop.permute.xlu0 %2019  ;;  %v5818_v13 = vld [vmem:[%s5068_s25 + $0x4] ss:$24 sps:$4 sm:$0xff]  }
 0x105   : > { %v5768_v17 = vpop.permute.xlu1 %2021 }
 0x106   : > { %1234 = vrot.lane.b32.xlu0 %v5764_v44, %s5002_s26  ;;  %v2091_v62 = vsel %vm2089_vm2, %v2020_v15, %v5768_v17 }
 0x107   : > { %2390 = vrot.lane.b32.xlu1 %v6816_v28, %s5004_s30  ;;  %2156 = vmatprep.subr.bf16.mxu0 %v2091_v62  ;;  %v5830_v28 = vld [vmem:[%s5068_s25] ss:$24 sps:$4 sm:$0xff]  }
 0x108   : > { %v2018_v10 = vpop.permute.xlu0 %2017  ;;  %4422 = vmatmul.mubr.msk.bf16.vlgmr.msra.gmra.mrb[8].mxu0 %vm496_vm0, %v5719_v40 }
 0x109   : > { %v2090_v52 = vsel %vm2089_vm2, %v2018_v10, %v2020_v15  ;;  %v2032_v31 = vpop.permute.xlu1 %2031  ;;  %2188 = vmatprep.mubr.bf16.mxu0 %v6814_v1 }
 0x10a   : > { %2392 = vrot.lane.b32.xlu0 %v6817_v21, %s5004_s30  ;;  %2157 = vmatpush1.bf16.msra.mxu0 %v2090_v52  ;;  %v6823_v52 = vld [vmem:[#allocation3_spill] sm:$0xff] }
 0x10b   : > { %1246 = vrot.lane.b32.xlu1 %v5777_v61, %s5002_s26 }
 0x10c   : > { %v5787_v32 = vpop.permute.xlu0 %2033 }
 0x10d   : > { %v2030_v22 = vpop.permute.xlu1 %2029  ;;  %v2096_v4 = vsel %vm2089_vm2, %v2032_v31, %v5787_v32 }
 0x10e   : > { %v2095_v24 = vsel %vm2089_vm2, %v2030_v22, %v2032_v31  ;;  %2402 = vrot.lane.b32.xlu0 %v6818_v26, %s5004_s30  ;;  %2158 = vmatprep.subr.bf16.mxu0 %v2096_v4  ;;  %v5840_v4 = vld [vmem:[%s5068_s25 + $0x34] ss:$24 sps:$4 sm:$0xff]  }
 0x10f   : > { %2404 = vrot.lane.b32.xlu1 %v6819_v35, %s5004_s30  ;;  %2159 = vmatpush1.bf16.msra.mxu0 %v2095_v24  ;;  %v5845_v24 = vld [vmem:[%s5068_s25 + $0x38] ss:$24 sps:$4 sm:$0xff]  }
 0x110   : > { %v2044_v12 = vpop.permute.xlu0 %2043 }
 0x111   : > { %v5796_v36 = vpop.permute.xlu1 %2045 }
 0x112   : > { %1695 = vrot.lane.b32.xlu0 %v5799_v16, %s5002_s26  ;;  %v2101_v6 = vsel %vm2089_vm2, %v2044_v12, %v5796_v36 }
 0x113   : > { %2414 = vrot.lane.b32.xlu1 %v6820_v38, %s5004_s30  ;;  %2160 = vmatprep.subr.bf16.mxu0 %v2101_v6  ;;  %v5855_v38 = vld [vmem:[%s5068_s25 + $0x30] ss:$24 sps:$4 sm:$0xff]  }
 0x114   : > { %v2042_v39 = vpop.permute.xlu0 %2041 }
 0x115   : > { %v2100_v34 = vsel %vm2089_vm2, %v2042_v39, %v2044_v12  ;;  %v2056_v55 = vpop.permute.xlu1 %2055  ;;  %v5860_v39 = vld [vmem:[%s5243_s29 + $0x40] sm:$0xff]  }
 0x116   : > { %2416 = vrot.lane.b32.xlu0 %v6821_v37, %s5004_s30  ;;  %2161 = vmatpush1.bf16.msra.mxu0 %v2100_v34  ;;  %6824 = vst [vmem:[#allocation7_spill] sm:$0xff] %v5860_v39  ;;  %v6825_v34 = vld [vmem:[#allocation4_spill] sm:$0xff] }
 0x117   : > { %1707 = vrot.lane.b32.xlu1 %v6822_v42, %s5002_s26  ;;  %v5867_v42 = vld [vmem:[%s5068_s25 + $0x64] ss:$24 sps:$4 sm:$0xff]  }
 0x118   : > { %v5812_v56 = vpop.permute.xlu0 %2057 }
 0x119   : > { %v2054_v9 = vpop.permute.xlu1 %2053  ;;  %v2106_v63 = vsel %vm2089_vm2, %v2056_v55, %v5812_v56 }
 0x11a   : > { %v2105_v25 = vsel %vm2089_vm2, %v2054_v9, %v2056_v55  ;;  %2676 = vrot.lane.b32.xlu0 %v5818_v13, %s5005_s4  ;;  %2162 = vmatprep.subr.bf16.mxu0 %v2106_v63  ;;  %v5876_v63 = vld [vmem:[%s5068_s25 + $0x68] ss:$24 sps:$4 sm:$0xff]  }
 0x11b   : > { %2678 = vrot.lane.b32.xlu1 %v5823_v60, %s5005_s4  ;;  %2163 = vmatpush1.bf16.msra.mxu0 %v2105_v25  ;;  %6826 = vst [vmem:[#allocation8_spill] sm:$0xff] %v5876_v63 }
 0x11c   : > { %v2068_v15 = vpop.permute.xlu0 %2067 }
 0x11d   : > { %v5827_v62 = vpop.permute.xlu1 %2069 }
 0x11e   : > { %2674 = vrot.lane.b32.xlu0 %v5830_v28, %s5005_s4  ;;  %v2111_v10 = vsel %vm2089_vm2, %v2068_v15, %v5827_v62 }
 0x11f   : > { %1719 = vrot.lane.b32.xlu1 %v6823_v52, %s5002_s26  ;;  %2164 = vmatprep.subr.bf16.mxu0 %v2111_v10  ;;  %v5884_v10 = vld [vmem:[%s5068_s25 + $0x60] ss:$24 sps:$4 sm:$0xff]  }
 0x120   : > { %v2066_v31 = vpop.permute.xlu0 %2065  ;;  %6827 = vst [vmem:[#allocation9_spill] sm:$0xff] %v5884_v10 }
 0x121   : > { %v2110_v21 = vsel %vm2089_vm2, %v2066_v31, %v2068_v15  ;;  %v2080_v22 = vpop.permute.xlu1 %2079  ;;  %v5891_v31 = vld [vmem:[%s5243_s29 + $0x48] sm:$0xff]  }
 0x122   : > { %2688 = vrot.lane.b32.xlu0 %v5840_v4, %s5005_s4  ;;  %2165 = vmatpush1.bf16.msra.mxu0 %v2110_v21  ;;  %6828 = vst [vmem:[#allocation10_spill] sm:$0xff] %v5891_v31  ;;  %v6829_v21 = vld [vmem:[#allocation5_spill] sm:$0xff] }
 0x123   : > { %2690 = vrot.lane.b32.xlu1 %v5845_v24, %s5005_s4 }
 0x124   : > { %v5849_v26 = vpop.permute.xlu0 %2081 }
 0x125   : > { %v2078_v35 = vpop.permute.xlu1 %2077  ;;  %v2116_v12 = vsel %vm2089_vm2, %v2080_v22, %v5849_v26 }
 0x126   : > { %v2115_v6 = vsel %vm2089_vm2, %v2078_v35, %v2080_v22  ;;  %2686 = vrot.lane.b32.xlu0 %v5855_v38, %s5005_s4  ;;  %2166 = vmatprep.subr.bf16.mxu0 %v2116_v12  ;;  %v5898_v12 = vld [vmem:[%s5068_s25 + $0x94] ss:$24 sps:$4 sm:$0xff]  }
 0x127   : > { %1731 = vrot.lane.b32.xlu1 %v6825_v34, %s5002_s26  ;;  %2167 = vmatpush1.bf16.msra.mxu0 %v2115_v6  ;;  %6830 = vst [vmem:[#allocation11_spill] sm:$0xff] %v5898_v12  ;;  %v5907_v34 = vld [vmem:[%s5068_s25 + $0x98] ss:$24 sps:$4 sm:$0xff]  }
 0x128   : > { %v5864_v55 = vpop.permute.xlu0 %2025  ;;  %6831 = vst [vmem:[#allocation12_spill] sm:$0xff] %v5907_v34 }
 0x129   : > { %v2028_v37 = vpop.permute.xlu1 %2027 }
 0x12a   : > { %2700 = vrot.lane.b32.xlu0 %v5867_v42, %s5005_s4  ;;  %v2094_v9 = vsel %vm2089_vm2, %v5864_v55, %v2028_v37  ;;  %4208 = vmatmul.mubr.msk.bf16.vlgmr.msra.gmra.mrb[0].mxu0 %vm496_vm0, %v5860_v39 }
 0x12b   : > { %2702 = vrot.lane.b32.xlu1 %v5876_v63, %s5005_s4  ;;  %4425 = vmatprep.subr.bf16.mxu0 %v2094_v9 }
 0x12c   : > { %4426 = vmatpush3.bf16.msra.mxu0 %v2094_v9  ;;  %v5880_v25 = vpop.permute.xlu0 %2037  ;;  %2198 = vmatprep.mubr.bf16.mxu0 %v6814_v1 }
 0x12d   : > { %v2040_v15 = vpop.permute.xlu1 %2039 }
 0x12e   : > { %2698 = vrot.lane.b32.xlu0 %v5884_v10, %s5005_s4  ;;  %v2099_v52 = vsel %vm2089_vm2, %v5880_v25, %v2040_v15  ;;  %v5916_v15 = vld [vmem:[%s5068_s25 + $0x90] ss:$24 sps:$4 sm:$0xff]  }
 0x12f   : > { %1743 = vrot.lane.b32.xlu1 %v6829_v21, %s5002_s26  ;;  %4427 = vmatprep.subr.bf16.mxu0 %v2099_v52  ;;  %6832 = vst [vmem:[#allocation13_spill] sm:$0xff] %v5916_v15  ;;  %v6833_v21 = vld [vmem:[#allocation6_spill] sm:$0xff] }
 0x130   : > { %4428 = vmatpush3.bf16.msra.mxu0 %v2099_v52  ;;  %v5895_v22 = vpop.permute.xlu0 %2049 }
 0x131   : > { %v2052_v35 = vpop.permute.xlu1 %2051 }
 0x132   : > { %2712 = vrot.lane.b32.xlu0 %v5898_v12, %s5005_s4  ;;  %v2104_v6 = vsel %vm2089_vm2, %v5895_v22, %v2052_v35  ;;  %4209 = vmatmul.mubr.msk.bf16.gmra.mrb[4].mxu0 %vm496_vm0, %v5891_v31  ;;  %v5934_v12 = vld [vmem:[%s5068_s25 + $0xc8] ss:$24 sps:$4 sm:$0xff]  }
 0x133   : > { %2714 = vrot.lane.b32.xlu1 %v5907_v34, %s5005_s4  ;;  %4429 = vmatprep.subr.bf16.mxu0 %v2104_v6  ;;  %v5927_v34 = vld [vmem:[%s5068_s25 + $0xc4] ss:$24 sps:$4 sm:$0xff]   ;;  %6835 = vst [vmem:[#allocation3_spill] sm:$0xff] %v5934_v12 }
 0x134   : > { %4430 = vmatpush3.bf16.msra.mxu0 %v2104_v6  ;;  %v5911_v37 = vpop.permute.xlu0 %2061  ;;  %4437 = vmatprep.mubr.msk.bf16.mxu0 %vm496_vm0, %v5860_v39  ;;  %6834 = vst [vmem:[#allocation2_spill] sm:$0xff] %v5927_v34  ;;  %v5959_v39 = vld [vmem:[%s5068_s25 + $0xf8] ss:$24 sps:$4 sm:$0xff]  }
 0x135   : > { %v2064_v9 = vpop.permute.xlu1 %2063  ;;  %6839 = vst [vmem:[#allocation15_spill] sm:$0xff] %v5959_v39 }
 0x136   : > { %2710 = vrot.lane.b32.xlu0 %v5916_v15, %s5005_s4  ;;  %v2109_v52 = vsel %vm2089_vm2, %v5911_v37, %v2064_v9 }
 0x137   : > { %1755 = vrot.lane.b32.xlu1 %v6833_v21, %s5002_s26  ;;  %4431 = vmatprep.subr.bf16.mxu0 %v2109_v52  ;;  %v5941_v21 = vld [vmem:[%s5068_s25 + $0xc0] ss:$24 sps:$4 sm:$0xff]  }
 0x138   : > { %4432 = vmatpush3.bf16.msra.mxu0 %v2109_v52  ;;  %v5924_v35 = vpop.permute.xlu0 %2073  ;;  %6836 = vst [vmem:[#allocation4_spill] sm:$0xff] %v5941_v21 }
 0x139   : > { %v2076_v6 = vpop.permute.xlu1 %2075 }
 0x13a   : > { %2724 = vrot.lane.b32.xlu0 %v5927_v34, %s5005_s4  ;;  %v2114_v15 = vsel %vm2089_vm2, %v5924_v35, %v2076_v6 }
 0x13b   : > { %2726 = vrot.lane.b32.xlu1 %v5934_v12, %s5005_s4  ;;  %4433 = vmatprep.subr.bf16.mxu0 %v2114_v15 }
 0x13c   : > { %4434 = vmatpush3.bf16.msra.mxu0 %v2114_v15  ;;  %v5938_v9 = vpop.permute.xlu0 %2085  ;;  %v5952_v15 = vld [vmem:[%s5068_s25 + $0xf4] ss:$24 sps:$4 sm:$0xff]  }
 0x13d   : > { %v2088_v52 = vpop.permute.xlu1 %2087  ;;  %6838 = vst [vmem:[#allocation6_spill] sm:$0xff] %v5952_v15 }
 0x13e   : > { %2722 = vrot.lane.b32.xlu0 %v5941_v21, %s5005_s4  ;;  %v2119_v34 = vsel %vm2089_vm2, %v5938_v9, %v2088_v52 }
 0x13f   : > { %2023 = vrot.lane.b32.xlu1 %v5684_v48, %s5004_s30  ;;  %4435 = vmatprep.subr.bf16.mxu0 %v2119_v34 }
 0x140   : > { %4436 = vmatpush3.bf16.msra.mxu0 %v2119_v34  ;;  %v2349_v6 = vpop.permute.xlu0 %2348 }
 0x141   : > { %v5949_v12 = vpop.permute.xlu1 %2350 }
 0x142   : > { %6837 = vst [vmem:[#allocation5_spill] sm:$0xff] %v5949_v12  ;;  %2736 = vrot.lane.b32.xlu0 %v5952_v15, %s5005_s4  ;;  %v2419_v21 = vsel %vm2089_vm2, %v2349_v6, %v5949_v12  ;;  %v5968_v15 = vld [vmem:[%s5068_s25 + $0xf0] ss:$24 sps:$4 sm:$0xff]  }
 0x143   : > { %2738 = vrot.lane.b32.xlu1 %v5959_v39, %s5005_s4  ;;  %2484 = vmatprep.subr.bf16.mxu0 %v2419_v21  ;;  %6840 = vst [vmem:[#allocation16_spill] sm:$0xff] %v5968_v15 }
 0x144   : > { %v2347_v52 = vpop.permute.xlu0 %2346  ;;  %4438 = vmatmul.mubr.msk.bf16.vlgmr.msra.gmra.mrb[8].mxu0 %vm496_vm0, %v5891_v31 }
 0x145   : > { %v2418_v34 = vsel %vm2089_vm2, %v2347_v52, %v2349_v6  ;;  %v2361_v10 = vpop.permute.xlu1 %2360  ;;  %2516 = vmatprep.mubr.bf16.mxu0 %v6814_v1  ;;  %v5980_v52 = vld [vmem:[%s5068_s25 + $0x10] ss:$24 sps:$4 sm:$0xff]  }
 0x146   : > { %2734 = vrot.lane.b32.xlu0 %v5968_v15, %s5005_s4  ;;  %2485 = vmatpush1.bf16.msra.mxu0 %v2418_v34  ;;  %6842 = vst [vmem:[#allocation18_spill] sm:$0xff] %v5980_v52  ;;  %v5985_v34 = vld [vmem:[%s5068_s25 + $0x14] ss:$24 sps:$4 sm:$0xff]  }
 0x147   : > { %2035 = vrot.lane.b32.xlu1 %v5709_v33, %s5004_s30  ;;  %6843 = vst [vmem:[#allocation19_spill] sm:$0xff] %v5985_v34 }
 0x148   : > { %v5974_v21 = vpop.permute.xlu0 %2362 }
 0x149   : > { %6841 = vst [vmem:[#allocation17_spill] sm:$0xff] %v5974_v21  ;;  %v2359_v39 = vpop.permute.xlu1 %2358  ;;  %v2424_v31 = vsel %vm2089_vm2, %v2361_v10, %v5974_v21 }
 0x14a   : > { %v2423_v6 = vsel %vm2089_vm2, %v2359_v39, %v2361_v10  ;;  %2682 = vrot.lane.b32.xlu0 %v5980_v52, %s5005_s4  ;;  %2486 = vmatprep.subr.bf16.mxu0 %v2424_v31  ;;  %v5996_v10 = vld [vmem:[%s5068_s25 + $0x40] ss:$24 sps:$4 sm:$0xff]   ;;  %v6002_v52 = vld [vmem:[%s5068_s25 + $0x44] ss:$24 sps:$4 sm:$0xff]  }
 0x14b   : > { %2684 = vrot.lane.b32.xlu1 %v5985_v34, %s5005_s4  ;;  %2487 = vmatpush1.bf16.msra.mxu0 %v2423_v6  ;;  %6845 = vst [vmem:[#allocation21_spill] sm:$0xff] %v5996_v10  ;;  %6846 = vst [vmem:[#allocation22_spill] sm:$0xff] %v6002_v52 }
 0x14c   : > { %v2373_v15 = vpop.permute.xlu0 %2372 }
 0x14d   : > { %v5989_v12 = vpop.permute.xlu1 %2374 }
 0x14e   : > { %6844 = vst [vmem:[#allocation20_spill] sm:$0xff] %v5989_v12  ;;  %2047 = vrot.lane.b32.xlu0 %v5730_v41, %s5004_s30  ;;  %v2429_v39 = vsel %vm2089_vm2, %v2373_v15, %v5989_v12 }
 0x14f   : > { %2694 = vrot.lane.b32.xlu1 %v5996_v10, %s5005_s4  ;;  %2488 = vmatprep.subr.bf16.mxu0 %v2429_v39 }
 0x150   : > { %v2371_v31 = vpop.permute.xlu0 %2370 }
 0x151   : > { %v2428_v6 = vsel %vm2089_vm2, %v2371_v31, %v2373_v15  ;;  %v2385_v34 = vpop.permute.xlu1 %2384  ;;  %v6014_v15 = vld [vmem:[%s5068_s25 + $0x70] ss:$24 sps:$4 sm:$0xff]   ;;  %v6019_v31 = vld [vmem:[%s5068_s25 + $0x74] ss:$24 sps:$4 sm:$0xff]  }
 0x152   : > { %2696 = vrot.lane.b32.xlu0 %v6002_v52, %s5005_s4  ;;  %2489 = vmatpush1.bf16.msra.mxu0 %v2428_v6  ;;  %6848 = vst [vmem:[#allocation24_spill] sm:$0xff] %v6014_v15  ;;  %6849 = vst [vmem:[#allocation25_spill] sm:$0xff] %v6019_v31 }
 0x153   : > { %2059 = vrot.lane.b32.xlu1 %v5747_v58, %s5004_s30 }
 0x154   : > { %v6008_v12 = vpop.permute.xlu0 %2386 }
 0x155   : > { %6847 = vst [vmem:[#allocation23_spill] sm:$0xff] %v6008_v12  ;;  %v2383_v21 = vpop.permute.xlu1 %2382  ;;  %v2434_v39 = vsel %vm2089_vm2, %v2385_v34, %v6008_v12  ;;  %v6853_v12 = vld [vmem:[#allocation14_spill] sm:$0xff] }
 0x156   : > { %v2433_v10 = vsel %vm2089_vm2, %v2383_v21, %v2385_v34  ;;  %2706 = vrot.lane.b32.xlu0 %v6014_v15, %s5005_s4  ;;  %2490 = vmatprep.subr.bf16.mxu0 %v2434_v39  ;;  %v6030_v34 = vld [vmem:[%s5068_s25 + $0xa0] ss:$24 sps:$4 sm:$0xff]   ;;  %v6036_v15 = vld [vmem:[%s5068_s25 + $0xa4] ss:$24 sps:$4 sm:$0xff]  }
 0x157   : > { %2708 = vrot.lane.b32.xlu1 %v6019_v31, %s5005_s4  ;;  %2491 = vmatpush1.bf16.msra.mxu0 %v2433_v10  ;;  %6851 = vst [vmem:[#allocation27_spill] sm:$0xff] %v6030_v34  ;;  %6852 = vst [vmem:[#allocation28_spill] sm:$0xff] %v6036_v15 }
 0x158   : > { %v2397_v6 = vpop.permute.xlu0 %2396 }
 0x159   : > { %v6023_v52 = vpop.permute.xlu1 %2398 }
 0x15a   : > { %6850 = vst [vmem:[#allocation26_spill] sm:$0xff] %v6023_v52  ;;  %2071 = vrot.lane.b32.xlu0 %v5764_v44, %s5004_s30  ;;  %v2439_v21 = vsel %vm2089_vm2, %v2397_v6, %v6023_v52 }
 0x15b   : > { %2718 = vrot.lane.b32.xlu1 %v6030_v34, %s5005_s4  ;;  %2492 = vmatprep.subr.bf16.mxu0 %v2439_v21 }
 0x15c   : > { %v2395_v39 = vpop.permute.xlu0 %2394 }
 0x15d   : > { %v2438_v10 = vsel %vm2089_vm2, %v2395_v39, %v2397_v6  ;;  %v1187_v31 = vpop.permute.xlu1 %1186  ;;  %v6049_v39 = vld [vmem:[%s5068_s25 + $0xd0] ss:$24 sps:$4 sm:$0xff]  }
 0x15e   : > { %2720 = vrot.lane.b32.xlu0 %v6036_v15, %s5005_s4  ;;  %v1256_v52 = vsel %vm1252_vm1, %v1187_v31, %v5530_v0  ;;  %2493 = vmatpush1.bf16.msra.mxu0 %v2438_v10  ;;  %v1255_v63 = vsel %vm1252_vm1, %v6853_v12, %v1187_v31  ;;  %6854 = vst [vmem:[#allocation14_spill] sm:$0xff] %v6049_v39  ;;  %v6056_v10 = vld [vmem:[%s5068_s25 + $0xd4] ss:$24 sps:$4 sm:$0xff]  }
 0x15f   : > { %2083 = vrot.lane.b32.xlu1 %v5777_v61, %s5004_s30  ;;  %1372 = vmatprep.subr.bf16.mxu1 %v1256_v52  ;;  %6855 = vst [vmem:[#allocation29_spill] sm:$0xff] %v6056_v10  ;;  %v6062_v31 = vld [vmem:[%s5243_s29 + $0x50] sm:$0xff]  }
 0x160   : > { %1373 = vmatpush1.bf16.msra.mxu1 %v1255_v63  ;;  %v2409_v6 = vpop.permute.xlu0 %2408 }
 0x161   : > { %v6046_v21 = vpop.permute.xlu1 %2410 }
 0x162   : > { %2730 = vrot.lane.b32.xlu0 %v6049_v39, %s5005_s4  ;;  %v2444_v0 = vsel %vm2089_vm2, %v2409_v6, %v6046_v21 }
 0x163   : > { %2732 = vrot.lane.b32.xlu1 %v6056_v10, %s5005_s4  ;;  %2494 = vmatprep.subr.bf16.mxu0 %v2444_v0  ;;  %v6071_v10 = vld [vmem:[%s5068_s25 + $0x100] ss:$24 sps:$4 sm:$0xff]  }
 0x164   : > { %v2407_v63 = vpop.permute.xlu0 %2406  ;;  %6856 = vst [vmem:[#allocation30_spill] sm:$0xff] %v6071_v10 }
 0x165   : > { %v2443_v12 = vsel %vm2089_vm2, %v2407_v63, %v2409_v6  ;;  %v1199_v52 = vpop.permute.xlu1 %1198 }
 0x166   : > { %2352 = vrot.lane.b32.xlu0 %v5799_v16, %s5004_s30  ;;  %v1261_v15 = vsel %vm1252_vm1, %v1199_v52, %v5545_v7  ;;  %2495 = vmatpush1.bf16.msra.mxu0 %v2443_v12  ;;  %v1260_v39 = vsel %vm1252_vm1, %v5454_v47, %v1199_v52  ;;  %v6080_v7 = vld [vmem:[%s5068_s25 + $0x104] ss:$24 sps:$4 sm:$0xff]  }
 0x167   : > { %2742 = vrot.lane.b32.xlu1 %v6071_v10, %s5005_s4  ;;  %1374 = vmatprep.subr.bf16.mxu1 %v1261_v15  ;;  %6857 = vst [vmem:[#allocation31_spill] sm:$0xff] %v6080_v7  ;;  %v6088_v15 = vld [vmem:[%s5068_s25 + $0x15c] ss:$24 sps:$4 sm:$0xff]   ;;  %v4923_v10 = vld [vmem:[%s5068_s25 + $0x128] ss:$24 sps:$4 sm:$0xff]  }
 0x168   : > { %1375 = vmatpush1.bf16.msra.mxu1 %v1260_v39  ;;  %v6075_v6 = vpop.permute.xlu0 %2354 }
 0x169   : > { %v2357_v0 = vpop.permute.xlu1 %2356  ;;  %4220 = vmatmul.mubr.msk.bf16.vlgmr.msra.gmra.mrb[0].mxu0 %vm496_vm0, %v6062_v31 }
 0x16a   : > { %2744 = vrot.lane.b32.xlu0 %v6080_v7, %s5005_s4  ;;  %v2422_v47 = vsel %vm2089_vm2, %v6075_v6, %v2357_v0  ;;  %2526 = vmatprep.mubr.bf16.mxu0 %v6814_v1  ;;  %v6099_v0 = vld [vmem:[%s5243_s29 + $0x58] sm:$0xff]  }
 0x16b   : > { %2364 = vrot.lane.b32.xlu1 %v6088_v15, %s5004_s30  ;;  %4441 = vmatprep.subr.bf16.mxu0 %v2422_v47  ;;  %v4922_v7 = vld [vmem:[%s5068_s25 + $0x124] ss:$24 sps:$4 sm:$0xff]  }
 0x16c   : > { %4442 = vmatpush3.bf16.msra.mxu0 %v2422_v47  ;;  %v1211_v39 = vpop.permute.xlu0 %1210 }
 0x16d   : > { %v6092_v63 = vpop.permute.xlu1 %2366  ;;  %v1266_v12 = vsel %vm1252_vm1, %v1211_v39, %v5558_v23  ;;  %v1265_v52 = vsel %vm1252_vm1, %v5467_v53, %v1211_v39  ;;  %v4924_v53 = vld [vmem:[%s5068_s25 + $0x120] ss:$24 sps:$4 sm:$0xff]   ;;  %v6116_v39 = vld [vmem:[%s5068_s25 + $0x18c] ss:$24 sps:$4 sm:$0xff]  }
 0x16e   : > { %3005 = vrot.lane.b32.xlu0 %v4922_v7, %s5005_s4  ;;  %1376 = vmatprep.subr.bf16.mxu1 %v1266_v12 }
 0x16f   : > { %3007 = vrot.lane.b32.xlu1 %v4923_v10, %s5005_s4  ;;  %1377 = vmatpush1.bf16.msra.mxu1 %v1265_v52 }
 0x170   : > { %v2369_v47 = vpop.permute.xlu0 %2368 }
 0x171   : > { %v1223_v34 = vpop.permute.xlu1 %1222  ;;  %v2427_v23 = vsel %vm2089_vm2, %v6092_v63, %v2369_v47  ;;  %4221 = vmatmul.mubr.msk.bf16.gmra.mrb[4].mxu0 %vm496_vm0, %v6099_v0 }
 0x172   : > { %3003 = vrot.lane.b32.xlu0 %v4924_v53, %s5005_s4  ;;  %v1271_v7 = vsel %vm1252_vm1, %v1223_v34, %v5570_v57  ;;  %4443 = vmatprep.subr.bf16.mxu0 %v2427_v23  ;;  %v1270_v10 = vsel %vm1252_vm1, %v5485_v5, %v1223_v34  ;;  %v4926_v57 = vld [vmem:[%s5068_s25 + $0x154] ss:$24 sps:$4 sm:$0xff]   ;;  %v4927_v34 = vld [vmem:[%s5068_s25 + $0x158] ss:$24 sps:$4 sm:$0xff]  }
 0x173   : > { %2376 = vrot.lane.b32.xlu1 %v6116_v39, %s5004_s30  ;;  %1378 = vmatprep.subr.bf16.mxu1 %v1271_v7 }
 0x174   : > { %1379 = vmatpush1.bf16.msra.mxu1 %v1270_v10  ;;  %4444 = vmatpush3.bf16.msra.mxu0 %v2427_v23  ;;  %v6120_v12 = vpop.permute.xlu0 %2378  ;;  %v4928_v10 = vld [vmem:[%s5068_s25 + $0x150] ss:$24 sps:$4 sm:$0xff]  }
 0x175   : > { %v2381_v52 = vpop.permute.xlu1 %2380  ;;  %4453 = vmatprep.mubr.msk.bf16.mxu0 %vm496_vm0, %v6062_v31 }
 0x176   : > { %3017 = vrot.lane.b32.xlu0 %v4926_v57, %s5005_s4  ;;  %v2432_v5 = vsel %vm2089_vm2, %v6120_v12, %v2381_v52  ;;  %v6139_v52 = vld [vmem:[%s5068_s25 + $0x1bc] ss:$24 sps:$4 sm:$0xff]  }
 0x177   : > { %3019 = vrot.lane.b32.xlu1 %v4927_v34, %s5005_s4  ;;  %4445 = vmatprep.subr.bf16.mxu0 %v2432_v5  ;;  %v4930_v34 = vld [vmem:[%s5068_s25 + $0x184] ss:$24 sps:$4 sm:$0xff]  }
 0x178   : > { %4446 = vmatpush3.bf16.msra.mxu0 %v2432_v5  ;;  %v1235_v47 = vpop.permute.xlu0 %1234 }
 0x179   : > { %v6130_v23 = vpop.permute.xlu1 %2390  ;;  %v1276_v53 = vsel %vm1252_vm1, %v1235_v47, %v5585_v49  ;;  %v1275_v7 = vsel %vm1252_vm1, %v5496_v2, %v1235_v47 }
 0x17a   : > { %3015 = vrot.lane.b32.xlu0 %v4928_v10, %s5005_s4  ;;  %1380 = vmatprep.subr.bf16.mxu1 %v1276_v53  ;;  %v4931_v53 = vld [vmem:[%s5068_s25 + $0x188] ss:$24 sps:$4 sm:$0xff]  }
 0x17b   : > { %2388 = vrot.lane.b32.xlu1 %v6139_v52, %s5004_s30  ;;  %1381 = vmatpush1.bf16.msra.mxu1 %v1275_v7 }
 0x17c   : > { %v2393_v57 = vpop.permute.xlu0 %2392 }
 0x17d   : > { %v1247_v5 = vpop.permute.xlu1 %1246  ;;  %v2437_v49 = vsel %vm2089_vm2, %v6130_v23, %v2393_v57  ;;  %v4932_v57 = vld [vmem:[%s5068_s25 + $0x180] ss:$24 sps:$4 sm:$0xff]  }
 0x17e   : > { %3029 = vrot.lane.b32.xlu0 %v4930_v34, %s5005_s4  ;;  %v1281_v2 = vsel %vm1252_vm1, %v1247_v5, %v5598_v14  ;;  %4447 = vmatprep.subr.bf16.mxu0 %v2437_v49  ;;  %v1280_v47 = vsel %vm1252_vm1, %v5513_v11, %v1247_v5  ;;  %v6160_v34 = vld [vmem:[%s5068_s25 + $0x1ec] ss:$24 sps:$4 sm:$0xff]  }
 0x17f   : > { %3031 = vrot.lane.b32.xlu1 %v4931_v53, %s5005_s4  ;;  %1382 = vmatprep.subr.bf16.mxu1 %v1281_v2  ;;  %v4935_v53 = vld [vmem:[%s5068_s25 + $0x1b8] ss:$24 sps:$4 sm:$0xff]  }
 0x180   : > { %1383 = vmatpush1.bf16.msra.mxu1 %v1280_v47  ;;  %4448 = vmatpush3.bf16.msra.mxu0 %v2437_v49  ;;  %v6153_v7 = vpop.permute.xlu0 %2402  ;;  %v4934_v47 = vld [vmem:[%s5068_s25 + $0x1b4] ss:$24 sps:$4 sm:$0xff]  }
 0x181   : > { %v2405_v10 = vpop.permute.xlu1 %2404 }
 0x182   : > { %3027 = vrot.lane.b32.xlu0 %v4932_v57, %s5005_s4  ;;  %v2442_v14 = vsel %vm2089_vm2, %v6153_v7, %v2405_v10  ;;  %v4936_v57 = vld [vmem:[%s5068_s25 + $0x1b0] ss:$24 sps:$4 sm:$0xff]  }
 0x183   : > { %2400 = vrot.lane.b32.xlu1 %v6160_v34, %s5004_s30  ;;  %4449 = vmatprep.subr.bf16.mxu0 %v2442_v14 }
 0x184   : > { %4450 = vmatpush3.bf16.msra.mxu0 %v2442_v14  ;;  %v1696_v11 = vpop.permute.xlu0 %1695  ;;  %4114 = vmatmul.mubr.msk.bf16.vlgmr.msra.gmra.mrb[8].mxu1 %vm496_vm0, %v5522_v50 }
 0x185   : > { %v6166_v5 = vpop.permute.xlu1 %2414  ;;  %v1764_v49 = vsel %vm1252_vm1, %v1696_v11, %v5698_v51  ;;  %v1763_v2 = vsel %vm1252_vm1, %v5608_v18, %v1696_v11  ;;  %1414 = vmatprep.mubr.bf16.mxu1 %v6814_v1  ;;  %v6186_v11 = vld [vmem:[%s5068_s25 + $0x21c] ss:$24 sps:$4 sm:$0xff]  }
 0x186   : > { %3041 = vrot.lane.b32.xlu0 %v4934_v47, %s5005_s4  ;;  %1880 = vmatprep.subr.bf16.mxu1 %v1764_v49  ;;  %v4939_v47 = vld [vmem:[%s5068_s25 + $0x1e8] ss:$24 sps:$4 sm:$0xff]  }
 0x187   : > { %3043 = vrot.lane.b32.xlu1 %v4935_v53, %s5005_s4  ;;  %1881 = vmatpush1.bf16.msra.mxu1 %v1763_v2 }
 0x188   : > { %v2417_v50 = vpop.permute.xlu0 %2416 }
 0x189   : > { %v1708_v10 = vpop.permute.xlu1 %1707  ;;  %v2447_v51 = vsel %vm2089_vm2, %v6166_v5, %v2417_v50 }
 0x18a   : > { %3039 = vrot.lane.b32.xlu0 %v4936_v57, %s5005_s4  ;;  %v1769_v18 = vsel %vm1252_vm1, %v1708_v10, %v5711_v19  ;;  %4451 = vmatprep.subr.bf16.mxu0 %v2447_v51  ;;  %v1768_v14 = vsel %vm1252_vm1, %v5627_v43, %v1708_v10  ;;  %v4938_v19 = vld [vmem:[%s5068_s25 + $0x1e4] ss:$24 sps:$4 sm:$0xff]   ;;  %v4940_v10 = vld [vmem:[%s5068_s25 + $0x1e0] ss:$24 sps:$4 sm:$0xff]  }
 0x18b   : > { %2412 = vrot.lane.b32.xlu1 %v6186_v11, %s5004_s30  ;;  %1882 = vmatprep.subr.bf16.mxu1 %v1769_v18 }
 0x18c   : > { %1883 = vmatpush1.bf16.msra.mxu1 %v1768_v14  ;;  %4452 = vmatpush3.bf16.msra.mxu0 %v2447_v51  ;;  %v2677_v49 = vpop.permute.xlu0 %2676 }
 0x18d   : > { %v6190_v2 = vpop.permute.xlu1 %2678  ;;  %4115 = vmatmul.mubr.msk.bf16.gmra.mrb[12].mxu1 %vm496_vm0, %v5554_v3 }
 0x18e   : > { %3053 = vrot.lane.b32.xlu0 %v4938_v19, %s5005_s4  ;;  %v2748_v43 = vsel %vm2746_vm3, %v2677_v49, %v6190_v2  ;;  %1912 = vmatprep.mubr.bf16.mxu1 %v6814_v1 }
 0x18f   : > { %3055 = vrot.lane.b32.xlu1 %v4939_v47, %s5005_s4  ;;  %2813 = vmatprep.subr.bf16.mxu0 %v2748_v43  ;;  %v4943_v47 = vld [vmem:[%s5068_s25 + $0x210] ss:$24 sps:$4 sm:$0xff]  }
 0x190   : > { %v2675_v53 = vpop.permute.xlu0 %2674  ;;  %4454 = vmatmul.mubr.msk.bf16.vlgmr.msra.gmra.mrb[8].mxu0 %vm496_vm0, %v6099_v0 }
 0x191   : > { %v2747_v50 = vsel %vm2746_vm3, %v2675_v53, %v2677_v49  ;;  %v1720_v3 = vpop.permute.xlu1 %1719  ;;  %2845 = vmatprep.mubr.bf16.mxu0 %v6814_v1  ;;  %v4941_v49 = vld [vmem:[%s5068_s25 + $0x214] ss:$24 sps:$4 sm:$0xff]  }
 0x192   : > { %3051 = vrot.lane.b32.xlu0 %v4940_v10, %s5005_s4  ;;  %v1774_v51 = vsel %vm1252_vm1, %v1720_v3, %v5723_v54  ;;  %2814 = vmatpush1.bf16.msra.mxu0 %v2747_v50  ;;  %v1773_v57 = vsel %vm1252_vm1, %v5641_v27, %v1720_v3  ;;  %v4942_v54 = vld [vmem:[%s5068_s25 + $0x218] ss:$24 sps:$4 sm:$0xff]  }
 0x193   : > { %2680 = vrot.lane.b32.xlu1 %v5684_v48, %s5005_s4  ;;  %1884 = vmatprep.subr.bf16.mxu1 %v1774_v51  ;;  %v4944_v51 = vld [vmem:[%s5068_s25 + $0x130] ss:$24 sps:$4 sm:$0xff]  }
 0x194   : > { %1885 = vmatpush1.bf16.msra.mxu1 %v1773_v57  ;;  %v2689_v18 = vpop.permute.xlu0 %2688 }
 0x195   : > { %v6213_v14 = vpop.permute.xlu1 %2690 }
 0x196   : > { %3065 = vrot.lane.b32.xlu0 %v4941_v49, %s5005_s4  ;;  %v2753_v19 = vsel %vm2746_vm3, %v2689_v18, %v6213_v14 }
 0x197   : > { %3067 = vrot.lane.b32.xlu1 %v4942_v54, %s5005_s4  ;;  %2815 = vmatprep.subr.bf16.mxu0 %v2753_v19  ;;  %v4946_v54 = vld [vmem:[%s5068_s25 + $0x160] ss:$24 sps:$4 sm:$0xff]  }
 0x198   : > { %v2687_v27 = vpop.permute.xlu0 %2686 }
 0x199   : > { %v2752_v48 = vsel %vm2746_vm3, %v2687_v27, %v2689_v18  ;;  %v1732_v43 = vpop.permute.xlu1 %1731 }
 0x19a   : > { %3063 = vrot.lane.b32.xlu0 %v4943_v47, %s5005_s4  ;;  %v1779_v53 = vsel %vm1252_vm1, %v1732_v43, %v5736_v20  ;;  %2816 = vmatpush1.bf16.msra.mxu0 %v2752_v48  ;;  %v1778_v50 = vsel %vm1252_vm1, %v5657_v45, %v1732_v43  ;;  %v4945_v20 = vld [vmem:[%s5068_s25 + $0x134] ss:$24 sps:$4 sm:$0xff]   ;;  %v4947_v43 = vld [vmem:[%s5068_s25 + $0x164] ss:$24 sps:$4 sm:$0xff]  }
 0x19b   : > { %2692 = vrot.lane.b32.xlu1 %v5709_v33, %s5005_s4  ;;  %1886 = vmatprep.subr.bf16.mxu1 %v1779_v53  ;;  %v4948_v53 = vld [vmem:[%s5068_s25 + $0x190] ss:$24 sps:$4 sm:$0xff]  }
 0x19c   : > { %1887 = vmatpush1.bf16.msra.mxu1 %v1778_v50  ;;  %v2701_v3 = vpop.permute.xlu0 %2700 }
 0x19d   : > { %v6230_v10 = vpop.permute.xlu1 %2702 }
 0x19e   : > { %3011 = vrot.lane.b32.xlu0 %v4944_v51, %s5005_s4  ;;  %v2758_v57 = vsel %vm2746_vm3, %v2701_v3, %v6230_v10  ;;  %v4949_v51 = vld [vmem:[%s5068_s25 + $0x194] ss:$24 sps:$4 sm:$0xff]  }
 0x19f   : > { %3013 = vrot.lane.b32.xlu1 %v4945_v20, %s5005_s4  ;;  %2817 = vmatprep.subr.bf16.mxu0 %v2758_v57 }
 0x1a0   : > { %v2699_v45 = vpop.permute.xlu0 %2698 }
 0x1a1   : > { %v2757_v33 = vsel %vm2746_vm3, %v2699_v45, %v2701_v3  ;;  %v1744_v18 = vpop.permute.xlu1 %1743 }
 0x1a2   : > { %2704 = vrot.lane.b32.xlu0 %v5730_v41, %s5005_s4  ;;  %v1784_v49 = vsel %vm1252_vm1, %v1744_v18, %v5749_v8  ;;  %2818 = vmatpush1.bf16.msra.mxu0 %v2757_v33  ;;  %v1783_v19 = vsel %vm1252_vm1, %v5667_v46, %v1744_v18  ;;  %v4951_v18 = vld [vmem:[%s5068_s25 + $0x1c4] ss:$24 sps:$4 sm:$0xff]  }
 0x1a3   : > { %3023 = vrot.lane.b32.xlu1 %v4946_v54, %s5005_s4  ;;  %1888 = vmatprep.subr.bf16.mxu1 %v1784_v49  ;;  %v6286_v54 = vpop.f32.mrb[0].mxu1 }
 0x1a4   : > { %1889 = vmatpush1.bf16.msra.mxu1 %v1783_v19  ;;  %v2713_v27 = vpop.permute.xlu0 %2712 }
 0x1a5   : > { %v6247_v48 = vpop.permute.xlu1 %2714 }
 0x1a6   : > { %3025 = vrot.lane.b32.xlu0 %v4947_v43, %s5005_s4  ;;  %v2763_v41 = vsel %vm2746_vm3, %v2713_v27, %v6247_v48  ;;  %v6292_v43 = vpop.f32.mrb[1].mxu1 }
 0x1a7   : > { %2716 = vrot.lane.b32.xlu1 %v5747_v58, %s5005_s4  ;;  %2819 = vmatprep.subr.bf16.mxu0 %v2763_v41 }
 0x1a8   : > { %v2711_v46 = vpop.permute.xlu0 %2710 }
 0x1a9   : > { %v2762_v8 = vsel %vm2746_vm3, %v2711_v46, %v2713_v27  ;;  %v1756_v47 = vpop.permute.xlu1 %1755  ;;  %v4952_v27 = vld [vmem:[%s5068_s25 + $0x1f0] ss:$24 sps:$4 sm:$0xff]  }
 0x1aa   : > { %3035 = vrot.lane.b32.xlu0 %v4948_v53, %s5005_s4  ;;  %v1789_v50 = vsel %vm1252_vm1, %v1756_v47, %v5757_v59  ;;  %2820 = vmatpush1.bf16.msra.mxu0 %v2762_v8  ;;  %v1788_v3 = vsel %vm1252_vm1, %v5686_v29, %v1756_v47  ;;  %v4950_v59 = vld [vmem:[%s5068_s25 + $0x1c0] ss:$24 sps:$4 sm:$0xff]  }
 0x1ab   : > { %3037 = vrot.lane.b32.xlu1 %v4949_v51, %s5005_s4  ;;  %1890 = vmatprep.subr.bf16.mxu1 %v1789_v50  ;;  %v6302_v47 = vld [vmem:[%s5243_s29 + $0x60] sm:$0xff]  }
 0x1ac   : > { %1891 = vmatpush1.bf16.msra.mxu1 %v1788_v3  ;;  %v2725_v58 = vpop.permute.xlu0 %2724  ;;  %v4954_v3 = vld [vmem:[%s5068_s25 + $0x220] ss:$24 sps:$4 sm:$0xff]  }
 0x1ad   : > { %v6264_v57 = vpop.permute.xlu1 %2726 }
 0x1ae   : > { %2728 = vrot.lane.b32.xlu0 %v5764_v44, %s5005_s4  ;;  %v2768_v20 = vsel %vm2746_vm3, %v2725_v58, %v6264_v57 }
 0x1af   : > { %3047 = vrot.lane.b32.xlu1 %v4950_v59, %s5005_s4  ;;  %2821 = vmatprep.subr.bf16.mxu0 %v2768_v20 }
 0x1b0   : > { %v2723_v29 = vpop.permute.xlu0 %2722  ;;  %4198 = vmatmul.mubr.msk.bf16.vlgmr.msra.gmra.mrb[8].mxu1 %vm496_vm0, %v5694_v30 }
 0x1b1   : > { %v2767_v45 = vsel %vm2746_vm3, %v2723_v29, %v2725_v58  ;;  %v2024_v33 = vpop.permute.xlu1 %2023  ;;  %1922 = vmatprep.mubr.bf16.mxu1 %v6814_v1 }
 0x1b2   : > { %3049 = vrot.lane.b32.xlu0 %v4951_v18, %s5005_s4  ;;  %v2093_v44 = vsel %vm2089_vm2, %v2024_v33, %v5864_v55  ;;  %2822 = vmatpush1.bf16.msra.mxu0 %v2767_v45  ;;  %v2092_v49 = vsel %vm2089_vm2, %v5768_v17, %v2024_v33  ;;  %v4953_v17 = vld [vmem:[%s5068_s25 + $0x1f4] ss:$24 sps:$4 sm:$0xff]  }
 0x1b3   : > { %2740 = vrot.lane.b32.xlu1 %v5777_v61, %s5005_s4  ;;  %2209 = vmatprep.subr.bf16.mxu1 %v2093_v44  ;;  %v6296_v61 = vpop.f32.mrb[2].mxu1  ;;  %v6333_v45 = vld [vmem:[%s5243_s29 + $0x68] sm:$0xff]  }
 0x1b4   : > { %2210 = vmatpush1.bf16.msra.mxu1 %v2092_v49  ;;  %v2737_v30 = vpop.permute.xlu0 %2736  ;;  %v6305_v53 = vpop.f32.mrb[3].mxu1 }
 0x1b5   : > { %v6284_v19 = vpop.permute.xlu1 %2738 }
 0x1b6   : > { %3059 = vrot.lane.b32.xlu0 %v4952_v27, %s5005_s4  ;;  %v2773_v55 = vsel %vm2746_vm3, %v2737_v30, %v6284_v19 }
 0x1b7   : > { %3061 = vrot.lane.b32.xlu1 %v4953_v17, %s5005_s4  ;;  %2823 = vmatprep.subr.bf16.mxu0 %v2773_v55 }
 0x1b8   : > { %v2735_v41 = vpop.permute.xlu0 %2734  ;;  %4199 = vmatmul.mubr.msk.bf16.gmra.mrb[12].mxu1 %vm496_vm0, %v5719_v40 }
 0x1b9   : > { %v2772_v46 = vsel %vm2746_vm3, %v2735_v41, %v2737_v30  ;;  %v2036_v8 = vpop.permute.xlu1 %2035  ;;  %2241 = vmatprep.mubr.bf16.mxu1 %v6814_v1 }
 0x1ba   : > { %3009 = vrot.lane.b32.xlu0 %v5799_v16, %s5005_s4  ;;  %v2098_v50 = vsel %vm2089_vm2, %v2036_v8, %v5880_v25  ;;  %2824 = vmatpush1.bf16.msra.mxu0 %v2772_v46  ;;  %v2097_v40 = vsel %vm2089_vm2, %v5787_v32, %v2036_v8  ;;  %v4955_v16 = vld [vmem:[%s5068_s25 + $0x224] ss:$24 sps:$4 sm:$0xff]  }
 0x1bb   : > { %3071 = vrot.lane.b32.xlu1 %v4954_v3, %s5005_s4  ;;  %2211 = vmatprep.subr.bf16.mxu1 %v2098_v50  ;;  %v6859_v46 = vld [vmem:[#allocation9_spill] sm:$0xff] }
 0x1bc   : > { %2212 = vmatpush1.bf16.msra.mxu1 %v2097_v40  ;;  %v6315_v51 = vpop.permute.xlu0 %2682  ;;  %v6861_v8 = vld [vmem:[#allocation5_spill] sm:$0xff] }
 0x1bd   : > { %v2685_v58 = vpop.permute.xlu1 %2684  ;;  %4232 = vmatmul.mubr.msk.bf16.vlgmr.msra.gmra.mrb[0].mxu0 %vm496_vm0, %v6302_v47 }
 0x1be   : > { %3073 = vrot.lane.b32.xlu0 %v4955_v16, %s5005_s4  ;;  %v2751_v25 = vsel %vm2746_vm3, %v6315_v51, %v2685_v58  ;;  %2855 = vmatprep.mubr.bf16.mxu0 %v6814_v1  ;;  %v6862_v58 = vld [vmem:[#allocation11_spill] sm:$0xff] }
 0x1bf   : > { %3021 = vrot.lane.b32.xlu1 %v6088_v15, %s5005_s4  ;;  %4457 = vmatprep.subr.bf16.mxu0 %v2751_v25 }
 0x1c0   : > { %4458 = vmatpush3.bf16.msra.mxu0 %v2751_v25  ;;  %v2048_v32 = vpop.permute.xlu0 %2047 }
 0x1c1   : > { %v6326_v20 = vpop.permute.xlu1 %2694  ;;  %v2103_v59 = vsel %vm2089_vm2, %v2048_v32, %v5895_v22  ;;  %v2102_v29 = vsel %vm2089_vm2, %v5796_v36, %v2048_v32  ;;  %v6343_v36 = vpop.f32.mrb[4].mxu1 }
 0x1c2   : > { %3333 = vrot.lane.b32.xlu0 %v5818_v13, %s5006_s5  ;;  %2213 = vmatprep.subr.bf16.mxu1 %v2103_v59  ;;  %v6351_v22 = vpop.f32.mrb[5].mxu1  ;;  %v6864_v59 = vld [vmem:[#allocation17_spill] sm:$0xff] }
 0x1c3   : > { %3335 = vrot.lane.b32.xlu1 %v5823_v60, %s5006_s5  ;;  %2214 = vmatpush1.bf16.msra.mxu1 %v2102_v29  ;;  %v6355_v44 = vpop.f32.mrb[6].mxu1 }
 0x1c4   : > { %v2697_v15 = vpop.permute.xlu0 %2696 }
 0x1c5   : > { %v2060_v33 = vpop.permute.xlu1 %2059  ;;  %v2756_v18 = vsel %vm2746_vm3, %v6326_v20, %v2697_v15  ;;  %4233 = vmatmul.mubr.msk.bf16.gmra.mrb[4].mxu0 %vm496_vm0, %v6333_v45 }
 0x1c6   : > { %3331 = vrot.lane.b32.xlu0 %v5830_v28, %s5006_s5  ;;  %v2108_v13 = vsel %vm2089_vm2, %v2060_v33, %v5911_v37  ;;  %4459 = vmatprep.subr.bf16.mxu0 %v2756_v18  ;;  %v2107_v60 = vsel %vm2089_vm2, %v5812_v56, %v2060_v33  ;;  %v6361_v37 = vpop.f32.mrb[7].mxu1 }
 0x1c7   : > { %3033 = vrot.lane.b32.xlu1 %v6116_v39, %s5005_s4  ;;  %2215 = vmatprep.subr.bf16.mxu1 %v2108_v13  ;;  %v6866_v13 = vld [vmem:[#allocation10_spill] sm:$0xff] }
 0x1c8   : > { %2216 = vmatpush1.bf16.msra.mxu1 %v2107_v60  ;;  %4460 = vmatpush3.bf16.msra.mxu0 %v2756_v18  ;;  %v6357_v49 = vpop.permute.xlu0 %2706  ;;  %v6867_v60 = vld [vmem:[#allocation2_spill] sm:$0xff] }
 0x1c9   : > { %v2709_v28 = vpop.permute.xlu1 %2708  ;;  %4469 = vmatprep.mubr.msk.bf16.mxu0 %vm496_vm0, %v6302_v47 }
 0x1ca   : > { %3345 = vrot.lane.b32.xlu0 %v5840_v4, %s5006_s5  ;;  %v2761_v56 = vsel %vm2746_vm3, %v6357_v49, %v2709_v28 }
 0x1cb   : > { %3347 = vrot.lane.b32.xlu1 %v5845_v24, %s5006_s5  ;;  %4461 = vmatprep.subr.bf16.mxu0 %v2761_v56 }
 0x1cc   : > { %4462 = vmatpush3.bf16.msra.mxu0 %v2761_v56  ;;  %v2072_v39 = vpop.permute.xlu0 %2071 }
 0x1cd   : > { %v2112_v30 = vsel %vm2089_vm2, %v5827_v62, %v2072_v39  ;;  %v6371_v27 = vpop.permute.xlu1 %2718  ;;  %v2113_v55 = vsel %vm2089_vm2, %v2072_v39, %v5924_v35 }
 0x1ce   : > { %3343 = vrot.lane.b32.xlu0 %v5855_v38, %s5006_s5  ;;  %2217 = vmatprep.subr.bf16.mxu1 %v2113_v55  ;;  %v6858_v38 = vld [vmem:[#allocation8_spill] sm:$0xff] }
 0x1cf   : > { %3045 = vrot.lane.b32.xlu1 %v6139_v52, %s5005_s4  ;;  %2218 = vmatpush1.bf16.msra.mxu1 %v2112_v30  ;;  %v6435_v30 = vpop.f32.mrb[16].mxu1  ;;  %v6869_v55 = vld [vmem:[#allocation20_spill] sm:$0xff] }
 0x1d0   : > { %v2721_v4 = vpop.permute.xlu0 %2720 }
 0x1d1   : > { %v2084_v24 = vpop.permute.xlu1 %2083  ;;  %v2766_v17 = vsel %vm2746_vm3, %v6371_v27, %v2721_v4 }
 0x1d2   : > { %v2117_v62 = vsel %vm2089_vm2, %v5849_v26, %v2084_v24  ;;  %3357 = vrot.lane.b32.xlu0 %v5867_v42, %s5006_s5  ;;  %v2118_v35 = vsel %vm2089_vm2, %v2084_v24, %v5938_v9  ;;  %4463 = vmatprep.subr.bf16.mxu0 %v2766_v17  ;;  %v6860_v9 = vld [vmem:[#allocation7_spill] sm:$0xff]  ;;  %v6870_v24 = vld [vmem:[#allocation4_spill] sm:$0xff] }
 0x1d3   : > { %3359 = vrot.lane.b32.xlu1 %v6858_v38, %s5006_s5  ;;  %2219 = vmatprep.subr.bf16.mxu1 %v2118_v35  ;;  %v4956_v35 = vld [vmem:[%s5068_s25 + $0xc] ss:$24 sps:$4 sm:$0xff]  }
 0x1d4   : > { %2220 = vmatpush1.bf16.msra.mxu1 %v2117_v62  ;;  %4464 = vmatpush3.bf16.msra.mxu0 %v2766_v17  ;;  %v6389_v52 = vpop.permute.xlu0 %2730  ;;  %v6443_v62 = vpop.f32.mrb[17].mxu1 }
 0x1d5   : > { %v2733_v41 = vpop.permute.xlu1 %2732  ;;  %v6447_v38 = vpop.f32.mrb[18].mxu1 }
 0x1d6   : > { %3355 = vrot.lane.b32.xlu0 %v6859_v46, %s5006_s5  ;;  %v2771_v26 = vsel %vm2746_vm3, %v6389_v52, %v2733_v41 }
 0x1d7   : > { %3057 = vrot.lane.b32.xlu1 %v6160_v34, %s5005_s4  ;;  %4465 = vmatprep.subr.bf16.mxu0 %v2771_v26  ;;  %v6863_v34 = vld [vmem:[#allocation12_spill] sm:$0xff] }
 0x1d8   : > { %4466 = vmatpush3.bf16.msra.mxu0 %v2771_v26  ;;  %v2353_v42 = vpop.permute.xlu0 %2352  ;;  %4210 = vmatmul.mubr.msk.bf16.vlgmr.msra.gmra.mrb[8].mxu1 %vm496_vm0, %v6860_v9  ;;  %v6451_v26 = vpop.f32.mrb[19].mxu1  ;;  %v6872_v9 = vld [vmem:[#allocation6_spill] sm:$0xff] }
 0x1d9   : > { %v2420_v50 = vsel %vm2089_vm2, %v6861_v8, %v2353_v42  ;;  %v6401_v40 = vpop.permute.xlu1 %2742  ;;  %v2421_v3 = vsel %vm2089_vm2, %v2353_v42, %v6075_v6  ;;  %2251 = vmatprep.mubr.bf16.mxu1 %v6814_v1  ;;  %v6865_v6 = vld [vmem:[#allocation13_spill] sm:$0xff]  ;;  %v6871_v42 = vld [vmem:[#allocation18_spill] sm:$0xff] }
 0x1da   : > { %3369 = vrot.lane.b32.xlu0 %v6862_v58, %s5006_s5  ;;  %2537 = vmatprep.subr.bf16.mxu1 %v2421_v3  ;;  %v6873_v58 = vld [vmem:[#allocation23_spill] sm:$0xff] }
 0x1db   : > { %3371 = vrot.lane.b32.xlu1 %v6863_v34, %s5006_s5  ;;  %2538 = vmatpush1.bf16.msra.mxu1 %v2420_v50 }
 0x1dc   : > { %v2745_v16 = vpop.permute.xlu0 %2744 }
 0x1dd   : > { %v2365_v25 = vpop.permute.xlu1 %2364  ;;  %v2776_v32 = vsel %vm2746_vm3, %v6401_v40, %v2745_v16  ;;  %v6874_v16 = vld [vmem:[#allocation15_spill] sm:$0xff] }
 0x1de   : > { %v2425_v29 = vsel %vm2089_vm2, %v6864_v59, %v2365_v25  ;;  %3367 = vrot.lane.b32.xlu0 %v6865_v6, %s5006_s5  ;;  %v2426_v15 = vsel %vm2089_vm2, %v2365_v25, %v6092_v63  ;;  %4467 = vmatprep.subr.bf16.mxu0 %v2776_v32  ;;  %v4957_v6 = vld [vmem:[%s5068_s25 + $0x3c] ss:$24 sps:$4 sm:$0xff]  }
 0x1df   : > { %3069 = vrot.lane.b32.xlu1 %v6186_v11, %s5005_s4  ;;  %2539 = vmatprep.subr.bf16.mxu1 %v2426_v15  ;;  %v6868_v11 = vld [vmem:[#allocation3_spill] sm:$0xff] }
 0x1e0   : > { %2540 = vmatpush1.bf16.msra.mxu1 %v2425_v29  ;;  %4468 = vmatpush3.bf16.msra.mxu0 %v2776_v32  ;;  %v3006_v33 = vpop.permute.xlu0 %3005  ;;  %v6875_v32 = vld [vmem:[#allocation16_spill] sm:$0xff] }
 0x1e1   : > { %v6420_v18 = vpop.permute.xlu1 %3007  ;;  %4211 = vmatmul.mubr.msk.bf16.gmra.mrb[12].mxu1 %vm496_vm0, %v6866_v13 }
 0x1e2   : > { %3381 = vrot.lane.b32.xlu0 %v6867_v60, %s5006_s5  ;;  %v3076_v63 = vsel %vm2746_vm3, %v3006_v33, %v6420_v18  ;;  %2569 = vmatprep.mubr.bf16.mxu1 %v6814_v1 }
 0x1e3   : > { %3383 = vrot.lane.b32.xlu1 %v6868_v11, %s5006_s5  ;;  %3141 = vmatprep.subr.bf16.mxu0 %v3076_v63  ;;  %v6877_v63 = vld [vmem:[#allocation26_spill] sm:$0xff] }
 0x1e4   : > { %v3004_v28 = vpop.permute.xlu0 %3003  ;;  %4470 = vmatmul.mubr.msk.bf16.vlgmr.msra.gmra.mrb[8].mxu0 %vm496_vm0, %v6333_v45 }
 0x1e5   : > { %v3075_v56 = vsel %vm2746_vm3, %v3004_v28, %v3006_v33  ;;  %v2377_v39 = vpop.permute.xlu1 %2376  ;;  %3173 = vmatprep.mubr.bf16.mxu0 %v6814_v1  ;;  %v6876_v33 = vld [vmem:[#allocation21_spill] sm:$0xff]  ;;  %v6878_v28 = vld [vmem:[#allocation19_spill] sm:$0xff] }
 0x1e6   : > { %v2430_v4 = vsel %vm2089_vm2, %v6869_v55, %v2377_v39  ;;  %3379 = vrot.lane.b32.xlu0 %v6870_v24, %s5006_s5  ;;  %v2431_v17 = vsel %vm2089_vm2, %v2377_v39, %v6120_v12  ;;  %3142 = vmatpush1.bf16.msra.mxu0 %v3075_v56  ;;  %v4958_v39 = vld [vmem:[%s5068_s25 + $0x6c] ss:$24 sps:$4 sm:$0xff]   ;;  %v6879_v24 = vld [vmem:[#allocation24_spill] sm:$0xff] }
 0x1e7   : > { %3337 = vrot.lane.b32.xlu1 %v4956_v35, %s5006_s5  ;;  %2541 = vmatprep.subr.bf16.mxu1 %v2431_v17  ;;  %v6880_v35 = vld [vmem:[#allocation22_spill] sm:$0xff] }
 0x1e8   : > { %2542 = vmatpush1.bf16.msra.mxu1 %v2430_v4  ;;  %v3018_v41 = vpop.permute.xlu0 %3017 }
 0x1e9   : > { %v6449_v46 = vpop.permute.xlu1 %3019 }
 0x1ea   : > { %3339 = vrot.lane.b32.xlu0 %v6871_v42, %s5006_s5  ;;  %v3081_v12 = vsel %vm2746_vm3, %v3018_v41, %v6449_v46 }
 0x1eb   : > { %3393 = vrot.lane.b32.xlu1 %v6872_v9, %s5006_s5  ;;  %3143 = vmatprep.subr.bf16.mxu0 %v3081_v12  ;;  %v4959_v9 = vld [vmem:[%s5068_s25 + $0x9c] ss:$24 sps:$4 sm:$0xff]  }
 0x1ec   : > { %v3016_v8 = vpop.permute.xlu0 %3015 }
 0x1ed   : > { %v3080_v50 = vsel %vm2746_vm3, %v3016_v8, %v3018_v41  ;;  %v2389_v3 = vpop.permute.xlu1 %2388 }
 0x1ee   : > { %v2435_v34 = vsel %vm2089_vm2, %v6873_v58, %v2389_v3  ;;  %3395 = vrot.lane.b32.xlu0 %v6874_v16, %s5006_s5  ;;  %v2436_v25 = vsel %vm2089_vm2, %v2389_v3, %v6130_v23  ;;  %3144 = vmatpush1.bf16.msra.mxu0 %v3080_v50  ;;  %v6881_v50 = vld [vmem:[#allocation27_spill] sm:$0xff] }
 0x1ef   : > { %3391 = vrot.lane.b32.xlu1 %v6875_v32, %s5006_s5  ;;  %2543 = vmatprep.subr.bf16.mxu1 %v2436_v25  ;;  %v4960_v16 = vld [vmem:[%s5068_s25 + $0xcc] ss:$24 sps:$4 sm:$0xff]  }
 0x1f0   : > { %2544 = vmatpush1.bf16.msra.mxu1 %v2435_v34  ;;  %v3030_v59 = vpop.permute.xlu0 %3029  ;;  %v6882_v34 = vld [vmem:[#allocation25_spill] sm:$0xff] }
 0x1f1   : > { %v6468_v29 = vpop.permute.xlu1 %3031 }
 0x1f2   : > { %3349 = vrot.lane.b32.xlu0 %v4957_v6, %s5006_s5  ;;  %v3086_v15 = vsel %vm2746_vm3, %v3030_v59, %v6468_v29  ;;  %v6883_v6 = vld [vmem:[#allocation14_spill] sm:$0xff] }
 0x1f3   : > { %3351 = vrot.lane.b32.xlu1 %v6876_v33, %s5006_s5  ;;  %3145 = vmatprep.subr.bf16.mxu0 %v3086_v15  ;;  %v6884_v33 = vld [vmem:[#allocation28_spill] sm:$0xff] }
 0x1f4   : > { %v3028_v23 = vpop.permute.xlu0 %3027 }
 0x1f5   : > { %v3085_v13 = vsel %vm2746_vm3, %v3028_v23, %v3030_v59  ;;  %v2401_v60 = vpop.permute.xlu1 %2400 }
 0x1f6   : > { %v2440_v11 = vsel %vm2089_vm2, %v6877_v63, %v2401_v60  ;;  %3341 = vrot.lane.b32.xlu0 %v6878_v28, %s5006_s5  ;;  %v2441_v56 = vsel %vm2089_vm2, %v2401_v60, %v6153_v7  ;;  %3146 = vmatpush1.bf16.msra.mxu0 %v3085_v13  ;;  %v4961_v13 = vld [vmem:[%s5068_s25 + $0xfc] ss:$24 sps:$4 sm:$0xff]   ;;  %v6885_v60 = vld [vmem:[#allocation30_spill] sm:$0xff] }
 0x1f7   : > { %3361 = vrot.lane.b32.xlu1 %v4958_v39, %s5006_s5  ;;  %2545 = vmatprep.subr.bf16.mxu1 %v2441_v56  ;;  %v6538_v28 = vld [vmem:[%s5243_s29 + $0x70] sm:$0xff]   ;;  %v6886_v39 = vld [vmem:[#allocation29_spill] sm:$0xff] }
 0x1f8   : > { %2546 = vmatpush1.bf16.msra.mxu1 %v2440_v11  ;;  %v3042_v55 = vpop.permute.xlu0 %3041 }
 0x1f9   : > { %v6485_v4 = vpop.permute.xlu1 %3043 }
 0x1fa   : > { %3363 = vrot.lane.b32.xlu0 %v6879_v24, %s5006_s5  ;;  %v3091_v17 = vsel %vm2746_vm3, %v3042_v55, %v6485_v4  ;;  %v3645_v24 = vld [vmem:[%s237_s9] sm:$0xff] }
 0x1fb   : > { %3353 = vrot.lane.b32.xlu1 %v6880_v35, %s5006_s5  ;;  %3147 = vmatprep.subr.bf16.mxu0 %v3091_v17  ;;  %v3646_v35 = vld [vmem:[%s237_s9 + $0x8] sm:$0xff] }
 0x1fc   : > { %v3040_v7 = vpop.permute.xlu0 %3039 }
 0x1fd   : > { %v3090_v41 = vsel %vm2746_vm3, %v3040_v7, %v3042_v55  ;;  %v2413_v42 = vpop.permute.xlu1 %2412  ;;  %v6887_v55 = vld [vmem:[#allocation31_spill] sm:$0xff] }
 0x1fe   : > { %v2445_v12 = vsel %vm2089_vm2, %v6046_v21, %v2413_v42  ;;  %3373 = vrot.lane.b32.xlu0 %v4959_v9, %s5006_s5  ;;  %v2446_v8 = vsel %vm2089_vm2, %v2413_v42, %v6166_v5  ;;  %3148 = vmatpush1.bf16.msra.mxu0 %v3090_v41  ;;  %v3647_v42 = vld [vmem:[%s237_s9 + $0x10] sm:$0xff] }
 0x1ff   : > { %3375 = vrot.lane.b32.xlu1 %v6881_v50, %s5006_s5  ;;  %2547 = vmatprep.subr.bf16.mxu1 %v2446_v8  ;;  %v6561_v50 = vld [vmem:[%s5243_s29 + $0x78] sm:$0xff]  }
 0x200   : > { %2548 = vmatpush1.bf16.msra.mxu1 %v2445_v12  ;;  %v3054_v3 = vpop.permute.xlu0 %3053 }
 0x201   : > { %v6502_v58 = vpop.permute.xlu1 %3055 }
 0x202   : > { %3365 = vrot.lane.b32.xlu0 %v6882_v34, %s5006_s5  ;;  %v3096_v21 = vsel %vm2746_vm3, %v3054_v3, %v6502_v58 }
 0x203   : > { %3385 = vrot.lane.b32.xlu1 %v4960_v16, %s5006_s5  ;;  %3149 = vmatprep.subr.bf16.mxu0 %v3096_v21 }
 0x204   : > { %v3052_v5 = vpop.permute.xlu0 %3051  ;;  %4222 = vmatmul.mubr.msk.bf16.vlgmr.msra.gmra.mrb[8].mxu1 %vm496_vm0, %v6062_v31 }
 0x205   : > { %v3095_v25 = vsel %vm2746_vm3, %v3052_v5, %v3054_v3  ;;  %v2681_v32 = vpop.permute.xlu1 %2680  ;;  %2579 = vmatprep.mubr.bf16.mxu1 %v6814_v1 }
 0x206   : > { %v2749_v59 = vsel %vm2746_vm3, %v6190_v2, %v2681_v32  ;;  %3387 = vrot.lane.b32.xlu0 %v6883_v6, %s5006_s5  ;;  %v2750_v15 = vsel %vm2746_vm3, %v2681_v32, %v6315_v51  ;;  %3150 = vmatpush1.bf16.msra.mxu0 %v3095_v25 }
 0x207   : > { %3377 = vrot.lane.b32.xlu1 %v6884_v33, %s5006_s5  ;;  %2866 = vmatprep.subr.bf16.mxu1 %v2750_v15 }
 0x208   : > { %2867 = vmatpush1.bf16.msra.mxu1 %v2749_v59  ;;  %v3066_v31 = vpop.permute.xlu0 %3065 }
 0x209   : > { %v6522_v23 = vpop.permute.xlu1 %3067 }
 0x20a   : > { %3397 = vrot.lane.b32.xlu0 %v4961_v13, %s5006_s5  ;;  %v3101_v2 = vsel %vm2746_vm3, %v3066_v31, %v6522_v23 }
 0x20b   : > { %3399 = vrot.lane.b32.xlu1 %v6885_v60, %s5006_s5  ;;  %3151 = vmatprep.subr.bf16.mxu0 %v3101_v2 }
 0x20c   : > { %v3064_v51 = vpop.permute.xlu0 %3063  ;;  %4223 = vmatmul.mubr.msk.bf16.gmra.mrb[12].mxu1 %vm496_vm0, %v6099_v0 }
 0x20d   : > { %v3100_v63 = vsel %vm2746_vm3, %v3064_v51, %v3066_v31  ;;  %v2693_v11 = vpop.permute.xlu1 %2692  ;;  %2898 = vmatprep.mubr.bf16.mxu1 %v6814_v1 }
 0x20e   : > { %v2754_v56 = vsel %vm2746_vm3, %v6213_v14, %v2693_v11  ;;  %3389 = vrot.lane.b32.xlu0 %v6886_v39, %s5006_s5  ;;  %v2755_v0 = vsel %vm2746_vm3, %v2693_v11, %v6326_v20  ;;  %3152 = vmatpush1.bf16.msra.mxu0 %v3100_v63  ;;  %v3648_v20 = vld [vmem:[%s237_s9 + $0x18] sm:$0xff] }
 0x20f   : > { %3401 = vrot.lane.b32.xlu1 %v6887_v55, %s5006_s5  ;;  %2868 = vmatprep.subr.bf16.mxu1 %v2755_v0 }
 0x210   : > { %2869 = vmatpush1.bf16.msra.mxu1 %v2754_v56  ;;  %v6549_v17 = vpop.permute.xlu0 %3011 }
 0x211   : > { %v3014_v7 = vpop.permute.xlu1 %3013  ;;  %4244 = vmatmul.mubr.msk.bf16.vlgmr.msra.gmra.mrb[0].mxu0 %vm496_vm0, %v6538_v28 }
 0x212   : > { %v3079_v14 = vsel %vm2746_vm3, %v6549_v17, %v3014_v7  ;;  %3183 = vmatprep.mubr.bf16.mxu0 %v6814_v1  ;;  %3651 = vperm.xlu0 %4714, %v3645_v24  }
 0x213   : > { %4473 = vmatprep.subr.bf16.mxu0 %v3079_v14  ;;  %3656 = vperm.xlu1 %4715, %v3646_v35  }
 0x214   : > { %4474 = vmatpush3.bf16.msra.mxu0 %v3079_v14  ;;  %v2705_v41 = vpop.permute.xlu0 %2704 }
 0x215   : > { %v2759_v12 = vsel %vm2746_vm3, %v6230_v10, %v2705_v41  ;;  %v3024_v9 = vpop.permute.xlu1 %3023  ;;  %v2760_v8 = vsel %vm2746_vm3, %v2705_v41, %v6357_v49 }
 0x216   : > { %2870 = vmatprep.subr.bf16.mxu1 %v2760_v8  ;;  %3666 = vperm.xlu0 %4714, %v3648_v20  }
 0x217   : > { %2871 = vmatpush1.bf16.msra.mxu1 %v2759_v12  ;;  %3661 = vperm.xlu1 %4715, %v3647_v42  }
 0x218   : > { %v3026_v3 = vpop.permute.xlu0 %3025 }
 0x219   : > { %v2717_v34 = vpop.permute.xlu1 %2716  ;;  %v3084_v21 = vsel %vm2746_vm3, %v3024_v9, %v3026_v3  ;;  %4245 = vmatmul.mubr.msk.bf16.gmra.mrb[4].mxu0 %vm496_vm0, %v6561_v50 }
 0x21a   : > { %v2764_v10 = vsel %vm2746_vm3, %v6247_v48, %v2717_v34  ;;  %v2765_v16 = vsel %vm2746_vm3, %v2717_v34, %v6371_v27  ;;  %4475 = vmatprep.subr.bf16.mxu0 %v3084_v21  ;;  %4485 = vmatprep.mubr.msk.bf16.mxu0 %vm496_vm0, %v6538_v28 }
 0x21b   : > { %2872 = vmatprep.subr.bf16.mxu1 %v2765_v16  ;;  %4476 = vmatpush3.bf16.msra.mxu0 %v3084_v21 }
 0x21c   : > { %2873 = vmatpush1.bf16.msra.mxu1 %v2764_v10  ;;  %v3036_v49 = vpop.permute.xlu0 %3035 }
 0x21d   : > { %v3038_v5 = vpop.permute.xlu1 %3037 }
 0x21e   : > { %v3089_v25 = vsel %vm2746_vm3, %v3036_v49, %v3038_v5 }
 0x21f   : > { %4477 = vmatprep.subr.bf16.mxu0 %v3089_v25 }
 0x220   : > { %4478 = vmatpush3.bf16.msra.mxu0 %v3089_v25  ;;  %v2729_v32 = vpop.permute.xlu0 %2728 }
 0x221   : > { %v2769_v48 = vsel %vm2746_vm3, %v6264_v57, %v2729_v32  ;;  %v3048_v59 = vpop.permute.xlu1 %3047  ;;  %v2770_v27 = vsel %vm2746_vm3, %v2729_v32, %v6389_v52 }
 0x222   : > { %2874 = vmatprep.subr.bf16.mxu1 %v2770_v27 }
 0x223   : > { %2875 = vmatpush1.bf16.msra.mxu1 %v2769_v48 }
 0x224   : > { %v3050_v6 = vpop.permute.xlu0 %3049 }
 0x225   : > { %v2741_v15 = vpop.permute.xlu1 %2740  ;;  %v3094_v33 = vsel %vm2746_vm3, %v3048_v59, %v3050_v6 }
 0x226   : > { %v2774_v31 = vsel %vm2746_vm3, %v6284_v19, %v2741_v15  ;;  %v2775_v13 = vsel %vm2746_vm3, %v2741_v15, %v6401_v40  ;;  %4479 = vmatprep.subr.bf16.mxu0 %v3094_v33 }
 0x227   : > { %2876 = vmatprep.subr.bf16.mxu1 %v2775_v13  ;;  %4480 = vmatpush3.bf16.msra.mxu0 %v3094_v33 }
 0x228   : > { %2877 = vmatpush1.bf16.msra.mxu1 %v2774_v31  ;;  %v3060_v57 = vpop.permute.xlu0 %3059 }
 0x229   : > { %v3062_v2 = vpop.permute.xlu1 %3061 }
 0x22a   : > { %v3099_v52 = vsel %vm2746_vm3, %v3060_v57, %v3062_v2 }
 0x22b   : > { %4481 = vmatprep.subr.bf16.mxu0 %v3099_v52  ;;  %4234 = vmatmul.mubr.msk.bf16.vlgmr.msra.gmra.mrb[8].mxu1 %vm496_vm0, %v6302_v47 }
 0x22c   : > { %4482 = vmatpush3.bf16.msra.mxu0 %v3099_v52  ;;  %v3010_v60 = vpop.permute.xlu0 %3009  ;;  %2908 = vmatprep.mubr.bf16.mxu1 %v6814_v1 }
 0x22d   : > { %v3077_v19 = vsel %vm2746_vm3, %v6420_v18, %v3010_v60  ;;  %v6588_v40 = vpop.permute.xlu1 %3071  ;;  %v3078_v51 = vsel %vm2746_vm3, %v3010_v60, %v6549_v17 }
 0x22e   : > { %3194 = vmatprep.subr.bf16.mxu1 %v3078_v51 }
 0x22f   : > { %3195 = vmatpush1.bf16.msra.mxu1 %v3077_v19 }
 0x230   : > { %v3074_v63 = vpop.permute.xlu0 %3073 }
 0x231   : > { %v3022_v11 = vpop.permute.xlu1 %3021  ;;  %v3104_v56 = vsel %vm2746_vm3, %v6588_v40, %v3074_v63 }
 0x232   : > { %v3082_v47 = vsel %vm2746_vm3, %v6449_v46, %v3022_v11  ;;  %v3083_v39 = vsel %vm2746_vm3, %v3022_v11, %v3024_v9  ;;  %4483 = vmatprep.subr.bf16.mxu0 %v3104_v56  ;;  %v4888_v11 = vld [vmem:[%s5243_s29 + $0x80] sm:$0xff]  }
 0x233   : > { %3196 = vmatprep.subr.bf16.mxu1 %v3083_v39  ;;  %4484 = vmatpush3.bf16.msra.mxu0 %v3104_v56 }
 0x234   : > { %3197 = vmatpush1.bf16.msra.mxu1 %v3082_v47  ;;  %v3334_v18 = vpop.permute.xlu0 %3333 }
 0x235   : > { %v6597_v0 = vpop.permute.xlu1 %3335  ;;  %4235 = vmatmul.mubr.msk.bf16.gmra.mrb[12].mxu1 %vm496_vm0, %v6333_v45 }
 0x236   : > { %v3405_v55 = vsel %vm3403_vm4, %v3334_v18, %v6597_v0  ;;  %4486 = vmatmul.mubr.msk.bf16.vlgmr.msra.gmra.mrb[8].mxu0 %vm496_vm0, %v6561_v50  ;;  %3226 = vmatprep.mubr.bf16.mxu1 %v6814_v1 }
 0x237   : > { %3470 = vmatprep.subr.bf16.mxu0 %v3405_v55  ;;  %3502 = vmatprep.mubr.bf16.mxu0 %v6814_v1 }
 0x238   : > { %v3332_v46 = vpop.permute.xlu0 %3331 }
 0x239   : > { %v3404_v24 = vsel %vm3403_vm4, %v3332_v46, %v3334_v18  ;;  %v3034_v17 = vpop.permute.xlu1 %3033  ;;  %v4889_v46 = vld [vmem:[%s5243_s29 + $0x88] sm:$0xff]  }
 0x23a   : > { %v3087_v35 = vsel %vm2746_vm3, %v6468_v29, %v3034_v17  ;;  %v3088_v45 = vsel %vm2746_vm3, %v3034_v17, %v3036_v49  ;;  %3471 = vmatpush1.bf16.msra.mxu0 %v3404_v24 }
 0x23b   : > { %3198 = vmatprep.subr.bf16.mxu1 %v3088_v45 }
 0x23c   : > { %3199 = vmatpush1.bf16.msra.mxu1 %v3087_v35  ;;  %v3346_v7 = vpop.permute.xlu0 %3345 }
 0x23d   : > { %v3348_v14 = vpop.permute.xlu1 %3347 }
 0x23e   : > { %v3410_v20 = vsel %vm3403_vm4, %v3346_v7, %v3348_v14 }
 0x23f   : > { %3472 = vmatprep.subr.bf16.mxu0 %v3410_v20 }
 0x240   : > { %v3344_v41 = vpop.permute.xlu0 %3343 }
 0x241   : > { %v3409_v42 = vsel %vm3403_vm4, %v3344_v41, %v3346_v7  ;;  %v3046_v12 = vpop.permute.xlu1 %3045 }
 0x242   : > { %v3092_v9 = vsel %vm2746_vm3, %v6485_v4, %v3046_v12  ;;  %v3093_v8 = vsel %vm2746_vm3, %v3046_v12, %v3048_v59  ;;  %3473 = vmatpush1.bf16.msra.mxu0 %v3409_v42 }
 0x243   : > { %3200 = vmatprep.subr.bf16.mxu1 %v3093_v8 }
 0x244   : > { %3201 = vmatpush1.bf16.msra.mxu1 %v3092_v9  ;;  %v3358_v29 = vpop.permute.xlu0 %3357 }
 0x245   : > { %v6616_v3 = vpop.permute.xlu1 %3359 }
 0x246   : > { %v3415_v34 = vsel %vm3403_vm4, %v3358_v29, %v6616_v3 }
 0x247   : > { %3474 = vmatprep.subr.bf16.mxu0 %v3415_v34 }
 0x248   : > { %v3356_v21 = vpop.permute.xlu0 %3355 }
 0x249   : > { %v3414_v10 = vsel %vm3403_vm4, %v3356_v21, %v3358_v29  ;;  %v3058_v16 = vpop.permute.xlu1 %3057 }
 0x24a   : > { %v3097_v49 = vsel %vm2746_vm3, %v6502_v58, %v3058_v16  ;;  %v3098_v4 = vsel %vm2746_vm3, %v3058_v16, %v3060_v57  ;;  %3475 = vmatpush1.bf16.msra.mxu0 %v3414_v10 }
 0x24b   : > { %3202 = vmatprep.subr.bf16.mxu1 %v3098_v4 }
 0x24c   : > { %3203 = vmatpush1.bf16.msra.mxu1 %v3097_v49  ;;  %v3370_v5 = vpop.permute.xlu0 %3369 }
 0x24d   : > { %v6624_v25 = vpop.permute.xlu1 %3371 }
 0x24e   : > { %v3420_v32 = vsel %vm3403_vm4, %v3370_v5, %v6624_v25 }
 0x24f   : > { %3476 = vmatprep.subr.bf16.mxu0 %v3420_v32 }
 0x250   : > { %v3368_v48 = vpop.permute.xlu0 %3367 }
 0x251   : > { %v3419_v59 = vsel %vm3403_vm4, %v3368_v48, %v3370_v5  ;;  %v3070_v27 = vpop.permute.xlu1 %3069 }
 0x252   : > { %v3102_v6 = vsel %vm2746_vm3, %v6522_v23, %v3070_v27  ;;  %v3103_v58 = vsel %vm2746_vm3, %v3070_v27, %v6588_v40  ;;  %3477 = vmatpush1.bf16.msra.mxu0 %v3419_v59 }
 0x253   : > { %3204 = vmatprep.subr.bf16.mxu1 %v3103_v58 }
 0x254   : > { %3205 = vmatpush1.bf16.msra.mxu1 %v3102_v6  ;;  %v3382_v15 = vpop.permute.xlu0 %3381 }
 0x255   : > { %v6633_v33 = vpop.permute.xlu1 %3383 }
 0x256   : > { %v3425_v31 = vsel %vm3403_vm4, %v3382_v15, %v6633_v33 }
 0x257   : > { %3478 = vmatprep.subr.bf16.mxu0 %v3425_v31  ;;  %4246 = vmatmul.mubr.msk.bf16.vlgmr.msra.gmra.mrb[8].mxu1 %vm496_vm0, %v6538_v28 }
 0x258   : > { %v3380_v13 = vpop.permute.xlu0 %3379  ;;  %3236 = vmatprep.mubr.bf16.mxu1 %v6814_v1 }
 0x259   : > { %v3424_v23 = vsel %vm3403_vm4, %v3380_v13, %v3382_v15  ;;  %v3338_v57 = vpop.permute.xlu1 %3337 }
 0x25a   : > { %3479 = vmatpush1.bf16.msra.mxu0 %v3424_v23  ;;  %v3406_v19 = vsel %vm3403_vm4, %v6597_v0, %v3338_v57 }
 0x25c   : > { %v3340_v2 = vpop.permute.xlu0 %3339 }
 0x25d   : > { %v3394_v52 = vpop.permute.xlu1 %3393  ;;  %v3407_v60 = vsel %vm3403_vm4, %v3338_v57, %v3340_v2 }
 0x25e   : > { %3523 = vmatprep.subr.bf16.mxu1 %v3407_v60 }
 0x25f   : > { %3524 = vmatpush1.bf16.msra.mxu1 %v3406_v19 }
 0x260   : > { %v3396_v40 = vpop.permute.xlu0 %3395  ;;  %4247 = vmatmul.mubr.msk.bf16.gmra.mrb[12].mxu1 %vm496_vm0, %v6561_v50 }
 0x261   : > { %v3392_v28 = vpop.permute.xlu1 %3391  ;;  %v3430_v51 = vsel %vm3403_vm4, %v3394_v52, %v3396_v40  ;;  %3555 = vmatprep.mubr.bf16.mxu1 %v6814_v1 }
 0x262   : > { %v3429_v63 = vsel %vm3403_vm4, %v3392_v28, %v3394_v52  ;;  %3480 = vmatprep.subr.bf16.mxu0 %v3430_v51 }
 0x263   : > { %3481 = vmatpush1.bf16.msra.mxu0 %v3429_v63 }
 0x264   : > { %v3350_v56 = vpop.permute.xlu0 %3349 }
 0x265   : > { %v3411_v47 = vsel %vm3403_vm4, %v3348_v14, %v3350_v56  ;;  %v3352_v39 = vpop.permute.xlu1 %3351 }
 0x266   : > { %4256 = vmatmul.mubr.msk.bf16.vlgmr.msra.gmra.mrb[0].mxu0 %vm496_vm0, %v4888_v11  ;;  %v3412_v18 = vsel %vm3403_vm4, %v3350_v56, %v3352_v39 }
 0x267   : > { %3525 = vmatprep.subr.bf16.mxu1 %v3412_v18  ;;  %3512 = vmatprep.mubr.bf16.mxu0 %v6814_v1 }
 0x268   : > { %3526 = vmatpush1.bf16.msra.mxu1 %v3411_v47  ;;  %v3342_v50 = vpop.permute.xlu0 %3341 }
 0x269   : > { %v3362_v0 = vpop.permute.xlu1 %3361  ;;  %v3408_v55 = vsel %vm3403_vm4, %v3340_v2, %v3342_v50 }
 0x26a   : > { %4489 = vmatprep.subr.bf16.mxu0 %v3408_v55  ;;  %v3416_v45 = vsel %vm3403_vm4, %v6616_v3, %v3362_v0 }
 0x26b   : > { %4490 = vmatpush3.bf16.msra.mxu0 %v3408_v55 }
 0x26c   : > { %v3364_v24 = vpop.permute.xlu0 %3363 }
 0x26d   : > { %v3354_v17 = vpop.permute.xlu1 %3353  ;;  %v3417_v35 = vsel %vm3403_vm4, %v3362_v0, %v3364_v24 }
 0x26e   : > { %4257 = vmatmul.mubr.msk.bf16.gmra.mrb[4].mxu0 %vm496_vm0, %v4889_v46  ;;  %3527 = vmatprep.subr.bf16.mxu1 %v3417_v35  ;;  %v3413_v7 = vsel %vm3403_vm4, %v3352_v39, %v3354_v17 }
 0x26f   : > { %4491 = vmatprep.subr.bf16.mxu0 %v3413_v7  ;;  %3528 = vmatpush1.bf16.msra.mxu1 %v3416_v45 }
 0x270   : > { %4492 = vmatpush3.bf16.msra.mxu0 %v3413_v7  ;;  %v3374_v14 = vpop.permute.xlu0 %3373  ;;  %4501 = vmatprep.mubr.msk.bf16.mxu0 %vm496_vm0, %v4888_v11 }
 0x271   : > { %v3421_v20 = vsel %vm3403_vm4, %v6624_v25, %v3374_v14  ;;  %v3376_v41 = vpop.permute.xlu1 %3375 }
 0x272   : > { %v3422_v42 = vsel %vm3403_vm4, %v3374_v14, %v3376_v41 }
 0x273   : > { %3529 = vmatprep.subr.bf16.mxu1 %v3422_v42 }
 0x274   : > { %3530 = vmatpush1.bf16.msra.mxu1 %v3421_v20  ;;  %v3366_v12 = vpop.permute.xlu0 %3365 }
 0x275   : > { %v3386_v9 = vpop.permute.xlu1 %3385  ;;  %v3418_v8 = vsel %vm3403_vm4, %v3364_v24, %v3366_v12 }
 0x276   : > { %4493 = vmatprep.subr.bf16.mxu0 %v3418_v8  ;;  %v3426_v21 = vsel %vm3403_vm4, %v6633_v33, %v3386_v9 }
 0x277   : > { %4494 = vmatpush3.bf16.msra.mxu0 %v3418_v8 }
 0x278   : > { %v3388_v29 = vpop.permute.xlu0 %3387 }
 0x279   : > { %v3378_v3 = vpop.permute.xlu1 %3377  ;;  %v3427_v34 = vsel %vm3403_vm4, %v3386_v9, %v3388_v29 }
 0x27a   : > { %3531 = vmatprep.subr.bf16.mxu1 %v3427_v34  ;;  %v3423_v10 = vsel %vm3403_vm4, %v3376_v41, %v3378_v3 }
 0x27b   : > { %4495 = vmatprep.subr.bf16.mxu0 %v3423_v10  ;;  %3532 = vmatpush1.bf16.msra.mxu1 %v3426_v21 }
 0x27c   : > { %4496 = vmatpush3.bf16.msra.mxu0 %v3423_v10  ;;  %v3398_v16 = vpop.permute.xlu0 %3397 }
 0x27d   : > { %v3431_v49 = vsel %vm3403_vm4, %v3396_v40, %v3398_v16  ;;  %v3400_v4 = vpop.permute.xlu1 %3399 }
 0x27e   : > { %v3432_v5 = vsel %vm3403_vm4, %v3398_v16, %v3400_v4 }
 0x27f   : > { %3533 = vmatprep.subr.bf16.mxu1 %v3432_v5 }
 0x280   : > { %3534 = vmatpush1.bf16.msra.mxu1 %v3431_v49  ;;  %v3390_v25 = vpop.permute.xlu0 %3389 }
 0x281   : > { %v3402_v32 = vpop.permute.xlu1 %3401  ;;  %v3428_v48 = vsel %vm3403_vm4, %v3388_v29, %v3390_v25 }
 0x282   : > { %4497 = vmatprep.subr.bf16.mxu0 %v3428_v48  ;;  %v3433_v59 = vsel %vm3403_vm4, %v3400_v4, %v3402_v32 }
 0x283   : > { %4258 = vmatmul.mubr.msk.bf16.vlgmr.msra.gmra.mrb[8].mxu1 %vm496_vm0, %v4888_v11  ;;  %4498 = vmatpush3.bf16.msra.mxu0 %v3428_v48 }
 0x284   : > { %4499 = vmatprep.subr.bf16.mxu0 %v3433_v59  ;;  %3565 = vmatprep.mubr.bf16.mxu1 %v6814_v1 }
 0x287   : > { %4500 = vmatpush3.bf16.msra.mxu0 %v3433_v59 }
 0x28a   : > { %4502 = vmatmul.mubr.msk.bf16.vlgmr.msra.gmra.mrb[8].mxu0 %vm496_vm0, %v4889_v46 }
 0x28b   : > { %4259 = vmatmul.mubr.msk.bf16.gmra.mrb[12].mxu1 %vm496_vm0, %v4889_v46 }
 0x291   : > { %v6680_v6 = vpop.permute.xlu0 %3651 }
 0x292   : > { %v6684_v13 = vpop.permute.xlu1 %3656 }
 0x295   : > { %v6701_v55 = vpop.permute.xlu0 %3666 }
 0x296   : > { %v6697_v63 = vpop.permute.xlu1 %3661 }
 0x339   : > { %v3504_v27 = vpop.f32.mrb[0].mxu0 }
 0x33a   : > { %v4505_v58 = vadd.f32 %v3504_v27, %v6286_v54  ;;  %v3506_v15 = vpop.f32.mrb[1].mxu0 }
 0x33b   : > { %v4506_v33 = vadd.f32 %v3506_v15, %v6292_v43  ;;  %v3508_v31 = vpop.f32.mrb[2].mxu0 }
 0x33c   : > { %v3669_v1 = vadd.f32 %v4505_v58, %v6680_v6  ;;  %v4507_v23 = vadd.f32 %v3508_v31, %v6296_v61  ;;  %v3510_v57 = vpop.f32.mrb[3].mxu0 }
 0x33d   : > { %v3670_v2 = vadd.f32 %v4506_v33, %v6680_v6  ;;  %v4508_v52 = vadd.f32 %v3510_v57, %v6305_v53 }
 0x33e   : > { %vm3689_vm5 = vcmp.ge.f32.partialorder %v3669_v1, 0.0  ;;  %v3709_v60 = vmul.f32 0.1, %v3669_v1  ;;  %v3674_v54 = vadd.f32 %v4507_v23, %v6684_v13 }
 0x33f   : > { %vm3690_vm6 = vcmp.ge.f32.partialorder %v3670_v2, 0.0  ;;  %v3710_v43 = vmul.f32 0.1, %v3670_v2  ;;  %v3675_v19 = vadd.f32 %v4508_v52, %v6684_v13 }
 0x340   : > { %v3729_v40 = vsel %vm3689_vm5, %v3669_v1, %v3709_v60  ;;  %vm3694_vm7 = vcmp.ge.f32.partialorder %v3674_v54, 0.0  ;;  %v3714_v28 = vmul.f32 0.1, %v3674_v54 }
 0x341   : > { %v3730_v61 = vsel %vm3690_vm6, %v3670_v2, %v3710_v43  ;;  %vm3695_vm8 = vcmp.ge.f32.partialorder %v3675_v19, 0.0  ;;  %v3715_v53 = vmul.f32 0.1, %v3675_v19  ;;  %v3514_v51 = vpop.f32.mrb[4].mxu0 }
 0x342   : > { %v4277_v11 = vpack.c.bf16 %v3730_v61, %v3729_v40  ;;  %v3734_v56 = vsel %vm3694_vm7, %v3674_v54, %v3714_v28  ;;  %v4509_v47 = vadd.f32 %v3514_v51, %v6343_v36  ;;  %v3516_v39 = vpop.f32.mrb[5].mxu0 }
 0x343   : > { %v3735_v18 = vsel %vm3695_vm8, %v3675_v19, %v3715_v53  ;;  %v4510_v50 = vadd.f32 %v3516_v39, %v6351_v22  ;;  %v3518_v0 = vpop.f32.mrb[6].mxu0 }
 0x344   : > { %3813 = vst [vmem:[%s6695_s21] sm:$0xff] %v4277_v11  ;;  %v4280_v46 = vpack.c.bf16 %v3735_v18, %v3734_v56  ;;  %v4511_v24 = vadd.f32 %v3518_v0, %v6355_v44  ;;  %v3679_v17 = vadd.f32 %v4509_v47, %v6697_v63  ;;  %v3520_v35 = vpop.f32.mrb[7].mxu0 }
 0x345   : > { %v3680_v45 = vadd.f32 %v4510_v50, %v6697_v63  ;;  %v4512_v7 = vadd.f32 %v3520_v35, %v6361_v37 }
 0x346   : > { %3816 = vst [vmem:[%s6695_s21 + $0x14] sm:$0xff] %v4280_v46  ;;  %vm3699_vm9 = vcmp.ge.f32.partialorder %v3679_v17, 0.0  ;;  %v3719_v36 = vmul.f32 0.1, %v3679_v17  ;;  %v3684_v22 = vadd.f32 %v4511_v24, %v6701_v55 }
 0x347   : > { %vm3700_vm10 = vcmp.ge.f32.partialorder %v3680_v45, 0.0  ;;  %v3720_v14 = vmul.f32 0.1, %v3680_v45  ;;  %v3685_v20 = vadd.f32 %v4512_v7, %v6701_v55 }
 0x348   : > { %v3739_v41 = vsel %vm3699_vm9, %v3679_v17, %v3719_v36  ;;  %vm3704_vm11 = vcmp.ge.f32.partialorder %v3684_v22, 0.0  ;;  %v3724_v44 = vmul.f32 0.1, %v3684_v22 }
 0x349   : > { %v3740_v42 = vsel %vm3700_vm10, %v3680_v45, %v3720_v14  ;;  %vm3705_vm12 = vcmp.ge.f32.partialorder %v3685_v20, 0.0  ;;  %v3725_v12 = vmul.f32 0.1, %v3685_v20 }
 0x34a   : > { %v4283_v9 = vpack.c.bf16 %v3740_v42, %v3739_v41  ;;  %v3744_v8 = vsel %vm3704_vm11, %v3684_v22, %v3724_v44 }
 0x34b   : > { %v3745_v37 = vsel %vm3705_vm12, %v3685_v20, %v3725_v12 }
 0x34c   : > { %3819 = vst [vmem:[%s6695_s21 + $0x28] sm:$0xff] %v4283_v9  ;;  %v4286_v29 = vpack.c.bf16 %v3745_v37, %v3744_v8 }
 0x34e   : > { %3822 = vst [vmem:[%s6695_s21 + $0x3c] sm:$0xff] %v4286_v29 }
 0x356   : > { %v3557_v3 = vpop.f32.mrb[8].mxu1 }
 0x357   : > { %v3671_v34 = vadd.f32 %v6680_v6, %v3557_v3  ;;  %v3559_v21 = vpop.f32.mrb[9].mxu1 }
 0x358   : > { %v3672_v10 = vadd.f32 %v6680_v6, %v3559_v21  ;;  %v3561_v16 = vpop.f32.mrb[10].mxu1 }
 0x359   : > { %vm3691_vm13 = vcmp.ge.f32.partialorder %v3671_v34, 0.0  ;;  %v3711_v49 = vmul.f32 0.1, %v3671_v34  ;;  %v3676_v4 = vadd.f32 %v6684_v13, %v3561_v16  ;;  %v3563_v5 = vpop.f32.mrb[11].mxu1 }
 0x35a   : > { %vm3692_vm14 = vcmp.ge.f32.partialorder %v3672_v10, 0.0  ;;  %v3712_v25 = vmul.f32 0.1, %v3672_v10  ;;  %v3677_v32 = vadd.f32 %v6684_v13, %v3563_v5 }
 0x35b   : > { %v3731_v48 = vsel %vm3691_vm13, %v3671_v34, %v3711_v49  ;;  %vm3696_vm15 = vcmp.ge.f32.partialorder %v3676_v4, 0.0  ;;  %v3716_v59 = vmul.f32 0.1, %v3676_v4 }
 0x35c   : > { %v3732_v27 = vsel %vm3692_vm14, %v3672_v10, %v3712_v25  ;;  %vm3697_vm0 = vcmp.ge.f32.partialorder %v3677_v32, 0.0  ;;  %v3717_v58 = vmul.f32 0.1, %v3677_v32 }
 0x35d   : > { %v4278_v15 = vpack.c.bf16 %v3732_v27, %v3731_v48  ;;  %v3736_v33 = vsel %vm3696_vm15, %v3676_v4, %v3716_v59  ;;  %v4503_v31 = vpop.f32.mrb[8].mxu0 }
 0x35e   : > { %v3737_v1 = vsel %vm3697_vm0, %v3677_v32, %v3717_v58  ;;  %v3567_v23 = vpop.f32.mrb[12].mxu1  ;;  %v4513_v57 = vadd.f32 %v4503_v31, %v6435_v30  ;;  %v3610_v2 = vpop.f32.mrb[9].mxu0 }
 0x35f   : > { %3814 = vst [vmem:[%s6695_s21 + $0x8] sm:$0xff] %v4278_v15  ;;  %v4281_v52 = vpack.c.bf16 %v3737_v1, %v3736_v33  ;;  %v3681_v60 = vadd.f32 %v6697_v63, %v3567_v23  ;;  %v3569_v54 = vpop.f32.mrb[13].mxu1  ;;  %v4514_v43 = vadd.f32 %v3610_v2, %v6443_v62  ;;  %v4504_v19 = vpop.f32.mrb[10].mxu0 }
 0x360   : > { %v3683_v40 = vadd.f32 %v4513_v57, %v6697_v63  ;;  %v3682_v28 = vadd.f32 %v6697_v63, %v3569_v54  ;;  %v3571_v61 = vpop.f32.mrb[14].mxu1  ;;  %v4515_v53 = vadd.f32 %v4504_v19, %v6447_v38  ;;  %v3613_v51 = vpop.f32.mrb[11].mxu0 }
 0x361   : > { %3817 = vst [vmem:[%s6695_s21 + $0x1c] sm:$0xff] %v4281_v52  ;;  %vm3701_vm1 = vcmp.ge.f32.partialorder %v3681_v60, 0.0  ;;  %v3721_v30 = vmul.f32 0.1, %v3681_v60  ;;  %v3673_v11 = vadd.f32 %v4514_v43, %v6680_v6  ;;  %v3686_v56 = vadd.f32 %v6701_v55, %v3571_v61  ;;  %v3573_v47 = vpop.f32.mrb[15].mxu1 }
 0x362   : > { %vm3703_vm2 = vcmp.ge.f32.partialorder %v3683_v40, 0.0  ;;  %v3723_v39 = vmul.f32 0.1, %v3683_v40  ;;  %vm3702_vm3 = vcmp.ge.f32.partialorder %v3682_v28, 0.0  ;;  %v3722_v62 = vmul.f32 0.1, %v3682_v28 }
 0x363   : > { %v3741_v18 = vsel %vm3701_vm1, %v3681_v60, %v3721_v30  ;;  %vm3693_vm4 = vcmp.ge.f32.partialorder %v3673_v11, 0.0  ;;  %v3713_v63 = vmul.f32 0.1, %v3673_v11  ;;  %vm3706_vm5 = vcmp.ge.f32.partialorder %v3686_v56, 0.0 }
 0x364   : > { %v3743_v38 = vsel %vm3703_vm2, %v3683_v40, %v3723_v39  ;;  %v3742_v50 = vsel %vm3702_vm3, %v3682_v28, %v3722_v62  ;;  %v3726_v0 = vmul.f32 0.1, %v3686_v56  ;;  %v3688_v46 = vadd.f32 %v4515_v53, %v6701_v55 }
 0x365   : > { %v4285_v6 = vpack.c.bf16 %v3743_v38, %v3743_v38  ;;  %v4284_v24 = vpack.c.bf16 %v3742_v50, %v3741_v18  ;;  %v3733_v17 = vsel %vm3693_vm4, %v3673_v11, %v3713_v63  ;;  %v3687_v35 = vadd.f32 %v6701_v55, %v3573_v47 }
 0x366   : > { %v4279_v45 = vpack.c.bf16 %v3733_v17, %v3733_v17  ;;  %vm3708_vm6 = vcmp.ge.f32.partialorder %v3688_v46, 0.0  ;;  %v3728_v7 = vmul.f32 0.1, %v3688_v46  ;;  %v3746_v36 = vsel %vm3706_vm5, %v3686_v56, %v3726_v0 }
 0x367   : > { %3821 = vst [vmem:[%s6695_s21 + $0x38] sm:$0xf] %v4285_v6  ;;  %3820 = vst [vmem:[%s6695_s21 + $0x30] sm:$0xff] %v4284_v24  ;;  %vm3707_vm7 = vcmp.ge.f32.partialorder %v3687_v35, 0.0  ;;  %v3727_v22 = vmul.f32 0.1, %v3687_v35  ;;  %v4516_v14 = vadd.f32 %v3613_v51, %v6451_v26 }
 0x368   : > { %3815 = vst [vmem:[%s6695_s21 + $0x10] sm:$0xf] %v4279_v45  ;;  %v3748_v20 = vsel %vm3708_vm6, %v3688_v46, %v3728_v7 }
 0x369   : > { %v4288_v41 = vpack.c.bf16 %v3748_v20, %v3748_v20  ;;  %v3747_v44 = vsel %vm3707_vm7, %v3687_v35, %v3727_v22  ;;  %v3678_v42 = vadd.f32 %v4516_v14, %v6684_v13 }
 0x36a   : > { %v4287_v55 = vpack.c.bf16 %v3747_v44, %v3746_v36 }
 0x36b   : > { %3824 = vst [vmem:[%s6695_s21 + $0x4c] sm:$0xf] %v4288_v41  ;;  %vm3698_vm8 = vcmp.ge.f32.partialorder %v3678_v42, 0.0  ;;  %v3718_v12 = vmul.f32 0.1, %v3678_v42 }
 0x36c   : > { %3823 = vst [vmem:[%s6695_s21 + $0x44] sm:$0xff] %v4287_v55 }
 0x36d   : > { %v3738_v9 = vsel %vm3698_vm8, %v3678_v42, %v3718_v12 }
 0x36e   : > { %v4282_v8 = vpack.c.bf16 %v3738_v9, %v3738_v9 }
 0x370   : > { %3818 = vst [vmem:[%s6695_s21 + $0x24] sm:$0xf] %v4282_v8 }
 0x371 PF: > { %s13_s16 = sadd.s32 1, %s5000_s16   ;;  %s6888_s12 = smov %s4992_s14 }
 0x372   : > { %p10_p7 = scmp.ge.s32.totalorder %s13_s16, 12   ;;  %s6889_s13 = smov %s4996_s15 }
 0x373   : > { %s6890_s14 = smov %s6893_s17  ;;  %s6891_s15 = smov %s6897_s18 }
 0x374   :  { %12 = sbr.rel (!%p10_p7) target bundleno = 3 (0x3), region = 77 }

// kernel: discriminator_b_forward.10
= control target key start
LH: loop header
LB: loop body
LE: loop exit
PB: predicated region body
PF: predicated region fallthrough
CT: control target
= control target key end

     0   :  { %s3823_s12 = smov 0   ;;  %s3825_s13 = smov 0   ;;  %s4867_s0 = inlined_call_operand.vmem [shape: bf16[2,5,2,96,640], index: 0, kind: input, shape index: {}]   ;;  %s4868_s1 = inlined_call_operand.vmem [shape: bf16[5,9,32,96], index: 1, kind: input, shape index: {}]   ;;  %s4869_s2 = inlined_call_operand.vmem [shape: f32[5,32,1], index: 2, kind: input, shape index: {}]   ;;  %s4870_s3 = inlined_call_operand.vmem [shape: bf16[2,5,32,512], index: 3, kind: output, shape index: {}]  }
   0x1   :  { %s3827_s14 = smov 0   ;;  %s3829_s15 = smov 0  }
   0x2   :  { %s3831_s16 = smov 0  }
   0x3 LB: > { %s22_s17 = sadd.s32 1, %s3788_s14  ;;  %s25_s18 = sadd.s32 1, %s3792_s15  ;;  %s3796_s16 = sphi %s3831_s16, %s13_s16   ;;  %s3792_s15 = sphi %s3829_s15, %s4896_s15   ;;  %s3788_s14 = sphi %s3827_s14, %s4895_s14   ;;  %s3784_s13 = sphi %s3825_s13, %s4894_s13   ;;  %s3780_s12 = sphi %s3823_s12, %s4893_s12  }
   0x4   : > { %p23_p0 = scmp.ge.s32.totalorder %s22_s17, 5  ;;  %p3143_p1 = scmp.ge.s32.totalorder %s3796_s16, 1 }
   0x5   : > { %p177_p2 = scmp.lt.s32.totalorder %s3796_s16, 11 }
   0x6   : > { %s4898_s17 = smov (%p23_p0, %s22_s17), 0  ;;  %s4900_s18 = smov (!%p23_p0, %s25_s18), %s3792_s15 }
   0x7   : > { %p178_p3 = pnand %p3143_p1, %p177_p2  ;;  %p27_p4 = scmp.ge.s32.totalorder %s4900_s18, 2 }
   0x9   : > { %s4902_s18 = smov (%p27_p4, %s4900_s18), 0  ;;  %181 = sbr.rel (%p178_p3) target bundleno = 797 (0x31d), region = 32 }
  0x10   : > { %p219_p5 = scmp.lt.s32.totalorder %s3784_s13, 1  ;;  %p221_p6 = scmp.lt.s32.totalorder %s3780_s12, 4  ;;  %v4871_v0 = vmov 0   ;;  %vm436_vm0 = vcmask 785408   ;;  %vm1028_vm1 = vcmask 1039360   ;;  %vm1693_vm2 = vcmask 1031168  }
  0x11   : > { %528 = vmatprep.mubr.bf16.mxu1 %v4871_v0  ;;  %475 = vmatprep.mubr.bf16.mxu0 %v4871_v0  ;;  %s3799_s30 = smov 127   ;;  %s3800_s4 = smov 126   ;;  %vm2196_vm3 = vcmask 1022976   ;;  %vm2699_vm4 = vcmask 1014784  }
  0x12   : > { %s4904_s13 = smov (!%p219_p5, %s3784_s13), 1  ;;  %3600 = vset.pattern.permute.xlu0 %v4871_v0  ;;  %3601 = vset.pattern.permute.xlu1 %v4871_v0  ;;  %s4906_s12 = smov (!%p221_p6, %s3780_s12), 4 }
  0x13   : > { %s3552_s19 = smul.u32 600, %s4904_s13  ;;  %s3801_s5 = smov 125  }
  0x14   : > { %s3551_s20 = smul.u32 120, %s4906_s12  ;;  %s3802_s6 = smov 124  }
  0x15   : > { %s3553_s21 = smul.u32 144, %s4906_s12  ;;  %s3414_s7 = sshll.u32 %s4906_s12, 5 }
  0x16   : > { %s225_s22 = sadd.s32 %s3552_s19, %s3551_s20  ;;  %s237_s10 = scalar_lea.vmem %s4869_s2, %s3414_s7 }
  0x17   : > { %s3144_s23 = sshll.u32 %s225_s22, 2  ;;  %s3867_s26 = scalar_lea.vmem %s4868_s1, %s3553_s21 }
  0x18   : > { %s3872_s29 = scalar_lea.vmem %s4867_s0, %s3144_s23  ;;  %v3684_v50 = vld [vmem:[%s3867_s26 + $0x10] sm:$0xff]   ;;  %v3686_v56 = vld [vmem:[%s3867_s26 + $0x18] sm:$0xff]   ;;  %v3688_v58 = vld [vmem:[%s3867_s26] sm:$0xff]   ;;  %s3554_s11 = smul.u32 80, %s4904_s13 }
  0x19   : > { %v3875_v1 = vld [vmem:[%s3872_s29 + $0xc] ss:$20 sps:$4 sm:$0xff]   ;;  %v3878_v2 = vld [vmem:[%s3872_s29 + $0x4] ss:$20 sps:$4 sm:$0xff]   ;;  %v3888_v4 = vld [vmem:[%s3872_s29 + $0x8] ss:$20 sps:$4 sm:$0xff]  }
  0x1a   : > { %974 = vrot.lane.b32.xlu1 %v3875_v1, %s3799_s30  ;;  %v3883_v3 = vld [vmem:[%s3872_s29 + $0x10] ss:$20 sps:$4 sm:$0xff]   ;;  %970 = vrot.lane.b32.xlu0 %v3878_v2, %s3799_s30  ;;  %v3893_v5 = vld [vmem:[%s3872_s29 + $0x2c] ss:$20 sps:$4 sm:$0xff]   ;;  %s3148_s19 = sshll.u32 %s4906_s12, 4 }
  0x1b   : > { %v3898_v6 = vld [vmem:[%s3872_s29] ss:$20 sps:$4 sm:$0xff]   ;;  %v3908_v8 = vld [vmem:[%s3872_s29 + $0x30] ss:$20 sps:$4 sm:$0xff]   ;;  %v3913_v9 = vld [vmem:[%s3872_s29 + $0x28] ss:$20 sps:$4 sm:$0xff]   ;;  %s244_s20 = sadd.s32 %s3554_s11, %s3148_s19 }
  0x1c   : > { %v3903_v7 = vld [vmem:[%s3872_s29 + $0x34] ss:$20 sps:$4 sm:$0xff]   ;;  %v3918_v10 = vld [vmem:[%s3872_s29 + $0x38] ss:$20 sps:$4 sm:$0xff]   ;;  %v3936_v14 = vld [vmem:[%s3872_s29 + $0x5c] ss:$20 sps:$4 sm:$0xff]  }
  0x1d   : > { %v3923_v11 = vld [vmem:[%s3872_s29 + $0x58] ss:$20 sps:$4 sm:$0xff]   ;;  %v3928_v12 = vld [vmem:[%s3872_s29 + $0x54] ss:$20 sps:$4 sm:$0xff]   ;;  %v3944_v16 = vld [vmem:[%s3872_s29 + $0x7c] ss:$20 sps:$4 sm:$0xff]  }
  0x1e   : > { %976 = vrot.lane.b32.xlu1 %v3883_v3, %s3799_s30  ;;  %972 = vrot.lane.b32.xlu0 %v3888_v4, %s3799_s30  ;;  %v3931_v13 = vld [vmem:[%s3872_s29 + $0x60] ss:$20 sps:$4 sm:$0xff]   ;;  %v3947_v17 = vld [vmem:[%s3872_s29 + $0x50] ss:$20 sps:$4 sm:$0xff]   ;;  %s3149_s21 = sshll.u32 %s244_s20, 2 }
  0x1f   : > { %v3941_v15 = vld [vmem:[%s3872_s29 + $0xf4] ss:$20 sps:$4 sm:$0xff]   ;;  %v3950_v18 = vld [vmem:[%s3872_s29 + $0xfc] ss:$20 sps:$4 sm:$0xff]   ;;  %v3956_v19 = vld [vmem:[%s3872_s29 + $0xf8] ss:$20 sps:$4 sm:$0xff]   ;;  %s4841_s22 = scalar_lea.vmem %s4870_s3, %s3149_s21 }
  0x20   : > { %443 = vmatprep.subr.bf16.mxu0 %v3941_v15  ;;  %v3959_v20 = vld [vmem:[%s3872_s29 + $0xf0] ss:$20 sps:$4 sm:$0xff]   ;;  %496 = vmatprep.subr.bf16.mxu1 %v3950_v18  ;;  %v3976_v24 = vld [vmem:[%s3872_s29 + $0x80] ss:$20 sps:$4 sm:$0xff]   ;;  %v3986_v26 = vld [vmem:[%s3872_s29 + $0x118] ss:$20 sps:$4 sm:$0xff]  }
  0x21   : > { %v3964_v21 = vld [vmem:[%s3872_s29 + $0x11c] ss:$20 sps:$4 sm:$0xff]   ;;  %v3967_v22 = vld [vmem:[%s3872_s29 + $0x124] ss:$20 sps:$4 sm:$0xff]   ;;  %497 = vmatpush1.bf16.msra.mxu1 %v3956_v19  ;;  %444 = vmatpush1.bf16.msra.mxu0 %v3959_v20  ;;  %v3979_v25 = vld [vmem:[%s3872_s29 + $0x120] ss:$20 sps:$4 sm:$0xff]  }
  0x22   : > { %980 = vrot.lane.b32.xlu1 %v3893_v5, %s3799_s30  ;;  %968 = vrot.lane.b32.xlu0 %v3898_v6, %s3799_s30  ;;  %v3971_v23 = vld [vmem:[%s3872_s29 + $0x84] ss:$20 sps:$4 sm:$0xff]   ;;  %v3991_v27 = vld [vmem:[%s3872_s29 + $0x148] ss:$20 sps:$4 sm:$0xff]  }
  0x23   : > { %498 = vmatprep.subr.bf16.mxu1 %v3967_v22  ;;  %445 = vmatprep.subr.bf16.mxu0 %v3964_v21  ;;  %v3994_v28 = vld [vmem:[%s3872_s29 + $0x144] ss:$20 sps:$4 sm:$0xff]   ;;  %v3997_v29 = vld [vmem:[%s3872_s29 + $0x14c] ss:$20 sps:$4 sm:$0xff]   ;;  %v4010_v32 = vld [vmem:[%s3872_s29 + $0x174] ss:$20 sps:$4 sm:$0xff]  }
  0x24   : > { %v4000_v30 = vld [vmem:[%s3872_s29 + $0x78] ss:$20 sps:$4 sm:$0xff]   ;;  %v4005_v31 = vld [vmem:[%s3872_s29 + $0x140] ss:$20 sps:$4 sm:$0xff]   ;;  %v4015_v33 = vld [vmem:[%s3872_s29 + $0x88] ss:$20 sps:$4 sm:$0xff]  }
  0x25   : > { %499 = vmatpush1.bf16.msra.mxu1 %v3979_v25  ;;  %446 = vmatpush1.bf16.msra.mxu0 %v3986_v26  ;;  %v4020_v34 = vld [vmem:[%s3872_s29 + $0x170] ss:$20 sps:$4 sm:$0xff]   ;;  %v4023_v35 = vld [vmem:[%s3872_s29 + $0x16c] ss:$20 sps:$4 sm:$0xff]   ;;  %v4028_v36 = vld [vmem:[%s3872_s29 + $0x168] ss:$20 sps:$4 sm:$0xff]  }
  0x26   : > { %984 = vrot.lane.b32.xlu1 %v3903_v7, %s3799_s30  ;;  %982 = vrot.lane.b32.xlu0 %v3908_v8, %s3799_s30  ;;  %v4031_v37 = vld [vmem:[%s3872_s29 + $0x19c] ss:$20 sps:$4 sm:$0xff]   ;;  %v4036_v38 = vld [vmem:[%s3872_s29 + $0x194] ss:$20 sps:$4 sm:$0xff]  }
  0x27   : > { %500 = vmatprep.subr.bf16.mxu1 %v3997_v29  ;;  %447 = vmatprep.subr.bf16.mxu0 %v3994_v28  ;;  %v4041_v39 = vld [vmem:[%s3872_s29 + $0xa8] ss:$20 sps:$4 sm:$0xff]   ;;  %v4046_v40 = vld [vmem:[%s3872_s29 + $0xa4] ss:$20 sps:$4 sm:$0xff]   ;;  %v4070_v46 = vld [vmem:[%s3872_s29 + $0xac] ss:$20 sps:$4 sm:$0xff]  }
  0x28   : > { %v4049_v41 = vld [vmem:[%s3872_s29 + $0x198] ss:$20 sps:$4 sm:$0xff]   ;;  %v4052_v42 = vld [vmem:[%s3872_s29 + $0xb0] ss:$20 sps:$4 sm:$0xff]   ;;  %v4075_v47 = vld [vmem:[%s3872_s29 + $0x1c0] ss:$20 sps:$4 sm:$0xff]  }
  0x29   : > { %501 = vmatpush1.bf16.msra.mxu1 %v3991_v27  ;;  %448 = vmatpush1.bf16.msra.mxu0 %v4005_v31  ;;  %v4057_v43 = vld [vmem:[%s3872_s29 + $0x190] ss:$20 sps:$4 sm:$0xff]   ;;  %4883 = vst [vmem:[#allocation5_spill] sm:$0xff] %v4075_v47  ;;  %v4080_v48 = vld [vmem:[%s3872_s29 + $0x1b8] ss:$20 sps:$4 sm:$0xff]  }
  0x2a   : > { %978 = vrot.lane.b32.xlu1 %v3913_v9, %s3799_s30  ;;  %986 = vrot.lane.b32.xlu0 %v3918_v10, %s3799_s30  ;;  %4880 = vst [vmem:[#allocation2_spill] sm:$0xff] %v4057_v43  ;;  %v4060_v44 = vld [vmem:[%s3872_s29 + $0x1c4] ss:$20 sps:$4 sm:$0xff]   ;;  %v4065_v45 = vld [vmem:[%s3872_s29 + $0x1bc] ss:$20 sps:$4 sm:$0xff]   ;;  %4884 = vst [vmem:[#allocation6_spill] sm:$0xff] %v4080_v48 }
  0x2b   : > { %502 = vmatprep.subr.bf16.mxu1 %v4010_v32  ;;  %449 = vmatprep.subr.bf16.mxu0 %v4023_v35  ;;  %4881 = vst [vmem:[#allocation3_spill] sm:$0xff] %v4060_v44  ;;  %4882 = vst [vmem:[#allocation4_spill] sm:$0xff] %v4065_v45  ;;  %v4083_v49 = vld [vmem:[%s3872_s29 + $0xcc] ss:$20 sps:$4 sm:$0xff]   ;;  %v4096_v52 = vld [vmem:[%s3872_s29 + $0xd4] ss:$20 sps:$4 sm:$0xff]  }
  0x2c   : > { %v4091_v51 = vld [vmem:[%s3872_s29 + $0xa0] ss:$20 sps:$4 sm:$0xff]   ;;  %v4101_v53 = vld [vmem:[%s3872_s29 + $0xd0] ss:$20 sps:$4 sm:$0xff]   ;;  %v4111_v54 = vld [vmem:[%s3872_s29 + $0xc8] ss:$20 sps:$4 sm:$0xff]  }
  0x2d   : > { %503 = vmatpush1.bf16.msra.mxu1 %v4020_v34  ;;  %450 = vmatpush1.bf16.msra.mxu0 %v4028_v36  ;;  %v4116_v55 = vld [vmem:[%s3872_s29 + $0xd8] ss:$20 sps:$4 sm:$0xff]   ;;  %v4144_v57 = vld [vmem:[%s3872_s29 + $0x100] ss:$20 sps:$4 sm:$0xff]   ;;  %v4175_v59 = vld [vmem:[%s3872_s29 + $0x128] ss:$20 sps:$4 sm:$0xff]  }
  0x2e   : > { %992 = vrot.lane.b32.xlu1 %v3923_v11, %s3799_s30  ;;  %990 = vrot.lane.b32.xlu0 %v3928_v12, %s3799_s30  ;;  %v3689_v60 = vld [vmem:[%s3867_s26 + $0x8] sm:$0xff]   ;;  %v4189_v61 = vld [vmem:[%s3872_s29 + $0x150] ss:$20 sps:$4 sm:$0xff]  }
  0x2f   : > { %504 = vmatprep.subr.bf16.mxu1 %v4031_v37  ;;  %451 = vmatprep.subr.bf16.mxu0 %v4036_v38  ;;  %v4210_v62 = vld [vmem:[%s3872_s29 + $0x178] ss:$20 sps:$4 sm:$0xff]   ;;  %v4219_v63 = vld [vmem:[%s3872_s29 + $0x1a0] ss:$20 sps:$4 sm:$0xff]  }
  0x31   : > { %505 = vmatpush1.bf16.msra.mxu1 %v4049_v41  ;;  %452 = vmatpush1.bf16.msra.mxu0 %v4057_v43 }
  0x32   : > { %996 = vrot.lane.b32.xlu1 %v3931_v13, %s3799_s30  ;;  %994 = vrot.lane.b32.xlu0 %v3936_v14, %s3799_s30 }
  0x33   : > { %506 = vmatprep.subr.bf16.mxu1 %v4060_v44  ;;  %453 = vmatprep.subr.bf16.mxu0 %v4065_v45 }
  0x35   : > { %507 = vmatpush1.bf16.msra.mxu1 %v4075_v47  ;;  %454 = vmatpush1.bf16.msra.mxu0 %v4080_v48 }
  0x36   : > { %1000 = vrot.lane.b32.xlu1 %v3944_v16, %s3799_s30  ;;  %988 = vrot.lane.b32.xlu0 %v3947_v17, %s3799_s30 }
  0x37   : > { %738 = vmatprep.subr.bf16.mxu1 %v3875_v1  ;;  %685 = vmatprep.subr.bf16.mxu0 %v3878_v2 }
  0x38   : > { %3206 = vmatmul.mubr.msk.bf16.vlgmr.msra.gmra.mrb[0].mxu1 %vm436_vm0, %v3684_v50  ;;  %3204 = vmatmul.mubr.msk.bf16.vlgmr.msra.gmra.mrb[0].mxu0 %vm436_vm0, %v3684_v50  ;;  %v4236_v50 = vld [vmem:[%s3872_s29 + $0x1c8] ss:$20 sps:$4 sm:$0xff]  }
  0x39   : > { %739 = vmatpush1.bf16.msra.mxu1 %v3888_v4  ;;  %686 = vmatpush1.bf16.msra.mxu0 %v3898_v6  ;;  %4885 = vst [vmem:[#allocation7_spill] sm:$0xff] %v4236_v50 }
  0x3a   : > { %1004 = vrot.lane.b32.xlu1 %v3971_v23, %s3799_s30  ;;  %1002 = vrot.lane.b32.xlu0 %v3976_v24, %s3799_s30 }
  0x3b   : > { %740 = vmatprep.subr.bf16.mxu1 %v3903_v7  ;;  %687 = vmatprep.subr.bf16.mxu0 %v3893_v5 }
  0x3c   : > { %538 = vmatprep.mubr.bf16.mxu1 %v4871_v0  ;;  %485 = vmatprep.mubr.bf16.mxu0 %v4871_v0 }
  0x3d   : > { %741 = vmatpush1.bf16.msra.mxu1 %v3908_v8  ;;  %688 = vmatpush1.bf16.msra.mxu0 %v3913_v9 }
  0x3e   : > { %998 = vrot.lane.b32.xlu1 %v4000_v30, %s3799_s30  ;;  %1006 = vrot.lane.b32.xlu0 %v4015_v33, %s3799_s30 }
  0x3f   : > { %742 = vmatprep.subr.bf16.mxu1 %v3936_v14  ;;  %689 = vmatprep.subr.bf16.mxu0 %v3928_v12 }
  0x40   : > { %3207 = vmatmul.mubr.msk.bf16.gmra.mrb[4].mxu1 %vm436_vm0, %v3686_v56  ;;  %3205 = vmatmul.mubr.msk.bf16.gmra.mrb[4].mxu0 %vm436_vm0, %v3686_v56 }
  0x41   : > { %743 = vmatpush1.bf16.msra.mxu1 %v3923_v11  ;;  %690 = vmatpush1.bf16.msra.mxu0 %v3947_v17 }
  0x42   : > { %1012 = vrot.lane.b32.xlu1 %v4041_v39, %s3799_s30  ;;  %1010 = vrot.lane.b32.xlu0 %v4046_v40, %s3799_s30 }
  0x43   : > { %744 = vmatprep.subr.bf16.mxu1 %v3971_v23  ;;  %691 = vmatprep.subr.bf16.mxu0 %v3944_v16 }
  0x44   : > { %770 = vmatprep.mubr.bf16.mxu1 %v4871_v0  ;;  %717 = vmatprep.mubr.bf16.mxu0 %v4871_v0 }
  0x45   : > { %745 = vmatpush1.bf16.msra.mxu1 %v3976_v24  ;;  %692 = vmatpush1.bf16.msra.mxu0 %v4000_v30 }
  0x46   : > { %1016 = vrot.lane.b32.xlu1 %v4052_v42, %s3799_s30  ;;  %1014 = vrot.lane.b32.xlu0 %v4070_v46, %s3799_s30 }
  0x47   : > { %746 = vmatprep.subr.bf16.mxu1 %v4070_v46  ;;  %693 = vmatprep.subr.bf16.mxu0 %v4046_v40 }
  0x49   : > { %747 = vmatpush1.bf16.msra.mxu1 %v4041_v39  ;;  %694 = vmatpush1.bf16.msra.mxu0 %v4091_v51 }
  0x4a   : > { %1020 = vrot.lane.b32.xlu1 %v4083_v49, %s3799_s30  ;;  %1008 = vrot.lane.b32.xlu0 %v4091_v51, %s3799_s30 }
  0x4b   : > { %748 = vmatprep.subr.bf16.mxu1 %v4096_v52  ;;  %695 = vmatprep.subr.bf16.mxu0 %v4083_v49 }
  0x4d   : > { %749 = vmatpush1.bf16.msra.mxu1 %v4101_v53  ;;  %696 = vmatpush1.bf16.msra.mxu0 %v4111_v54 }
  0x4e   : > { %1024 = vrot.lane.b32.xlu1 %v4096_v52, %s3799_s30  ;;  %1022 = vrot.lane.b32.xlu0 %v4101_v53, %s3799_s30 }
  0x50   : > { %3236 = vmatmul.mubr.msk.bf16.vlgmr.msra.gmra.mrb[0].mxu1 %vm436_vm0, %v3688_v58  ;;  %3234 = vmatmul.mubr.msk.bf16.vlgmr.msra.gmra.mrb[0].mxu0 %vm436_vm0, %v3688_v58 }
  0x51   : > { %780 = vmatprep.mubr.bf16.mxu1 %v4871_v0  ;;  %727 = vmatprep.mubr.bf16.mxu0 %v4871_v0 }
  0x52   : > { %1018 = vrot.lane.b32.xlu1 %v4111_v54, %s3799_s30  ;;  %1026 = vrot.lane.b32.xlu0 %v4116_v55, %s3799_s30 }
  0x56   : > { %1386 = vrot.lane.b32.xlu1 %v3956_v19, %s3799_s30  ;;  %1384 = vrot.lane.b32.xlu0 %v3941_v15, %s3799_s30 }
  0x58   : > { %3237 = vmatmul.mubr.msk.bf16.gmra.mrb[4].mxu1 %vm436_vm0, %v3689_v60  ;;  %3235 = vmatmul.mubr.msk.bf16.gmra.mrb[4].mxu0 %vm436_vm0, %v3689_v60 }
  0x59   : > { %1168 = vmatprep.mubr.bf16.mxu1 %v4871_v0  ;;  %1115 = vmatprep.mubr.bf16.mxu0 %v4871_v0 }
  0x5a   : > { %1390 = vrot.lane.b32.xlu1 %v4144_v57, %s3799_s30  ;;  %1388 = vrot.lane.b32.xlu0 %v3950_v18, %s3799_s30 }
  0x5e   : > { %1394 = vrot.lane.b32.xlu1 %v3964_v21, %s3799_s30  ;;  %1382 = vrot.lane.b32.xlu0 %v3959_v20, %s3799_s30 }
  0x62   : > { %1398 = vrot.lane.b32.xlu1 %v3967_v22, %s3799_s30  ;;  %1396 = vrot.lane.b32.xlu0 %v3979_v25, %s3799_s30 }
  0x66   : > { %1392 = vrot.lane.b32.xlu1 %v3986_v26, %s3799_s30  ;;  %1400 = vrot.lane.b32.xlu0 %v4175_v59, %s3799_s30 }
  0x6a   : > { %1406 = vrot.lane.b32.xlu1 %v3991_v27, %s3799_s30  ;;  %1404 = vrot.lane.b32.xlu0 %v3994_v28, %s3799_s30 }
  0x6e   : > { %1410 = vrot.lane.b32.xlu1 %v4189_v61, %s3799_s30  ;;  %1408 = vrot.lane.b32.xlu0 %v3997_v29, %s3799_s30 }
  0x72   : > { %1414 = vrot.lane.b32.xlu1 %v4023_v35, %s3799_s30  ;;  %1402 = vrot.lane.b32.xlu0 %v4005_v31, %s3799_s30 }
  0x76   : > { %1418 = vrot.lane.b32.xlu1 %v4010_v32, %s3799_s30  ;;  %1416 = vrot.lane.b32.xlu0 %v4020_v34, %s3799_s30 }
  0x7a   : > { %1412 = vrot.lane.b32.xlu1 %v4028_v36, %s3799_s30  ;;  %1420 = vrot.lane.b32.xlu0 %v4210_v62, %s3799_s30 }
  0x7e   : > { %1426 = vrot.lane.b32.xlu1 %v4049_v41, %s3799_s30  ;;  %1424 = vrot.lane.b32.xlu0 %v4036_v38, %s3799_s30 }
  0x82   : > { %1430 = vrot.lane.b32.xlu1 %v4219_v63, %s3799_s30  ;;  %1428 = vrot.lane.b32.xlu0 %v4031_v37, %s3799_s30 }
  0x86   : > { %1434 = vrot.lane.b32.xlu1 %v4065_v45, %s3799_s30  ;;  %1422 = vrot.lane.b32.xlu0 %v4057_v43, %s3799_s30 }
  0x8a   : > { %1438 = vrot.lane.b32.xlu1 %v4060_v44, %s3799_s30  ;;  %1436 = vrot.lane.b32.xlu0 %v4075_v47, %s3799_s30 }
  0x8c   : > { %v975_v56 = vpop.permute.xlu1 %974  ;;  %v971_v58 = vpop.permute.xlu0 %970 }
  0x8e   : > { %1432 = vrot.lane.b32.xlu1 %v4080_v48, %s3799_s30  ;;  %1440 = vrot.lane.b32.xlu0 %v4236_v50, %s3799_s30 }
  0x90   : > { %v977_v60 = vpop.permute.xlu1 %976  ;;  %v973_v0 = vpop.permute.xlu0 %972 }
  0x91   : > { %v1032_v43 = vsel %vm1028_vm1, %v975_v56, %v977_v60  ;;  %v1030_v47 = vsel %vm1028_vm1, %v971_v58, %v973_v0  ;;  %v1031_v44 = vsel %vm1028_vm1, %v973_v0, %v975_v56 }
  0x92   : > { %1637 = vrot.lane.b32.xlu1 %v3888_v4, %s3800_s4  ;;  %1136 = vmatprep.subr.bf16.mxu1 %v1032_v43 }
  0x93   : > { %1635 = vrot.lane.b32.xlu0 %v3878_v2, %s3800_s4  ;;  %1083 = vmatprep.subr.bf16.mxu0 %v1030_v47 }
  0x94   : > { %1137 = vmatpush1.bf16.msra.mxu1 %v1031_v44  ;;  %v981_v48 = vpop.permute.xlu1 %980  ;;  %v969_v50 = vpop.permute.xlu0 %968 }
  0x95   : > { %v1029_v45 = vsel %vm1028_vm1, %v969_v50, %v971_v58 }
  0x96   : > { %1641 = vrot.lane.b32.xlu1 %v3883_v3, %s3800_s4  ;;  %1084 = vmatpush1.bf16.msra.mxu0 %v1029_v45 }
  0x97   : > { %1639 = vrot.lane.b32.xlu0 %v3875_v1, %s3800_s4 }
  0x98   : > { %v985_v4 = vpop.permute.xlu1 %984  ;;  %v983_v43 = vpop.permute.xlu0 %982 }
  0x99   : > { %v1034_v0 = vsel %vm1028_vm1, %v981_v48, %v983_v43  ;;  %v1035_v3 = vsel %vm1028_vm1, %v983_v43, %v985_v4 }
  0x9a   : > { %1645 = vrot.lane.b32.xlu1 %v3893_v5, %s3800_s4  ;;  %1085 = vmatprep.subr.bf16.mxu0 %v1034_v0 }
  0x9b   : > { %1633 = vrot.lane.b32.xlu0 %v3898_v6, %s3800_s4 }
  0x9c   : > { %v979_v2 = vpop.permute.xlu1 %978  ;;  %v987_v47 = vpop.permute.xlu0 %986 }
  0x9d   : > { %v1033_v44 = vsel %vm1028_vm1, %v979_v2, %v981_v48  ;;  %v1036_v1 = vsel %vm1028_vm1, %v985_v4, %v987_v47 }
  0x9e   : > { %1649 = vrot.lane.b32.xlu1 %v3903_v7, %s3800_s4  ;;  %1086 = vmatpush1.bf16.msra.mxu0 %v1033_v44 }
  0x9f   : > { %1647 = vrot.lane.b32.xlu0 %v3908_v8, %s3800_s4  ;;  %1138 = vmatprep.subr.bf16.mxu1 %v1036_v1 }
  0xa0   : > { %1139 = vmatpush1.bf16.msra.mxu1 %v1035_v3  ;;  %v993_v5 = vpop.permute.xlu1 %992  ;;  %v991_v6 = vpop.permute.xlu0 %990 }
  0xa1   : > { %v1038_v45 = vsel %vm1028_vm1, %v991_v6, %v993_v5 }
  0xa2   : > { %1643 = vrot.lane.b32.xlu1 %v3913_v9, %s3800_s4  ;;  %1087 = vmatprep.subr.bf16.mxu0 %v1038_v45 }
  0xa3   : > { %1651 = vrot.lane.b32.xlu0 %v3918_v10, %s3800_s4 }
  0xa4   : > { %v997_v7 = vpop.permute.xlu1 %996  ;;  %v995_v48 = vpop.permute.xlu0 %994 }
  0xa5   : > { %v1040_v8 = vsel %vm1028_vm1, %v995_v48, %v997_v7  ;;  %v1039_v50 = vsel %vm1028_vm1, %v993_v5, %v995_v48 }
  0xa6   : > { %1657 = vrot.lane.b32.xlu1 %v3923_v11, %s3800_s4  ;;  %1140 = vmatprep.subr.bf16.mxu1 %v1040_v8 }
  0xa7   : > { %1655 = vrot.lane.b32.xlu0 %v3928_v12, %s3800_s4  ;;  %1141 = vmatpush1.bf16.msra.mxu1 %v1039_v50 }
  0xa8   : > { %v1001_v9 = vpop.permute.xlu1 %1000  ;;  %v989_v56 = vpop.permute.xlu0 %988 }
  0xa9   : > { %v1037_v58 = vsel %vm1028_vm1, %v989_v56, %v991_v6  ;;  %v3690_v56 = vld [vmem:[%s3867_s26 + $0x20] sm:$0xff]  }
  0xaa   : > { %1661 = vrot.lane.b32.xlu1 %v3931_v13, %s3800_s4  ;;  %1088 = vmatpush1.bf16.msra.mxu0 %v1037_v58 }
  0xab   : > { %1659 = vrot.lane.b32.xlu0 %v3936_v14, %s3800_s4 }
  0xac   : > { %v1005_v10 = vpop.permute.xlu1 %1004  ;;  %v1003_v11 = vpop.permute.xlu0 %1002 }
  0xad   : > { %v1042_v12 = vsel %vm1028_vm1, %v1001_v9, %v1003_v11  ;;  %v1043_v14 = vsel %vm1028_vm1, %v1003_v11, %v1005_v10 }
  0xae   : > { %1665 = vrot.lane.b32.xlu1 %v3944_v16, %s3800_s4  ;;  %1089 = vmatprep.subr.bf16.mxu0 %v1042_v12  ;;  %v4886_v12 = vmov 0  }
  0xaf   : > { %1653 = vrot.lane.b32.xlu0 %v3947_v17, %s3800_s4 }
  0xb0   : > { %v999_v60 = vpop.permute.xlu1 %998  ;;  %v1007_v43 = vpop.permute.xlu0 %1006 }
  0xb1   : > { %v1041_v4 = vsel %vm1028_vm1, %v999_v60, %v1001_v9  ;;  %v1044_v13 = vsel %vm1028_vm1, %v1005_v10, %v1007_v43 }
  0xb2   : > { %1669 = vrot.lane.b32.xlu1 %v3971_v23, %s3800_s4  ;;  %1090 = vmatpush1.bf16.msra.mxu0 %v1041_v4 }
  0xb3   : > { %1667 = vrot.lane.b32.xlu0 %v3976_v24, %s3800_s4  ;;  %1142 = vmatprep.subr.bf16.mxu1 %v1044_v13 }
  0xb4   : > { %1143 = vmatpush1.bf16.msra.mxu1 %v1043_v14  ;;  %v1013_v16 = vpop.permute.xlu1 %1012  ;;  %v1011_v17 = vpop.permute.xlu0 %1010  ;;  %v3691_v14 = vld [vmem:[%s3867_s26 + $0x28] sm:$0xff]  }
  0xb5   : > { %v1046_v0 = vsel %vm1028_vm1, %v1011_v17, %v1013_v16 }
  0xb6   : > { %1663 = vrot.lane.b32.xlu1 %v4000_v30, %s3800_s4  ;;  %1091 = vmatprep.subr.bf16.mxu0 %v1046_v0 }
  0xb7   : > { %1671 = vrot.lane.b32.xlu0 %v4015_v33, %s3800_s4 }
  0xb8   : > { %v1017_v23 = vpop.permute.xlu1 %1016  ;;  %v1015_v2 = vpop.permute.xlu0 %1014 }
  0xb9   : > { %v1048_v24 = vsel %vm1028_vm1, %v1015_v2, %v1017_v23  ;;  %v1047_v44 = vsel %vm1028_vm1, %v1013_v16, %v1015_v2 }
  0xba   : > { %1677 = vrot.lane.b32.xlu1 %v4041_v39, %s3800_s4  ;;  %1144 = vmatprep.subr.bf16.mxu1 %v1048_v24 }
  0xbb   : > { %1675 = vrot.lane.b32.xlu0 %v4046_v40, %s3800_s4  ;;  %1145 = vmatpush1.bf16.msra.mxu1 %v1047_v44 }
  0xbc   : > { %v1021_v47 = vpop.permute.xlu1 %1020  ;;  %v1009_v1 = vpop.permute.xlu0 %1008 }
  0xbd   : > { %v1045_v3 = vsel %vm1028_vm1, %v1009_v1, %v1011_v17 }
  0xbe   : > { %1681 = vrot.lane.b32.xlu1 %v4052_v42, %s3800_s4  ;;  %1092 = vmatpush1.bf16.msra.mxu0 %v1045_v3 }
  0xbf   : > { %1679 = vrot.lane.b32.xlu0 %v4070_v46, %s3800_s4 }
  0xc0   : > { %v1025_v5 = vpop.permute.xlu1 %1024  ;;  %v1023_v6 = vpop.permute.xlu0 %1022 }
  0xc1   : > { %v1050_v45 = vsel %vm1028_vm1, %v1021_v47, %v1023_v6  ;;  %v1051_v9 = vsel %vm1028_vm1, %v1023_v6, %v1025_v5 }
  0xc2   : > { %1685 = vrot.lane.b32.xlu1 %v4083_v49, %s3800_s4  ;;  %1093 = vmatprep.subr.bf16.mxu0 %v1050_v45 }
  0xc3   : > { %1673 = vrot.lane.b32.xlu0 %v4091_v51, %s3800_s4 }
  0xc4   : > { %v1019_v7 = vpop.permute.xlu1 %1018  ;;  %v1027_v8 = vpop.permute.xlu0 %1026 }
  0xc5   : > { %v1049_v48 = vsel %vm1028_vm1, %v1019_v7, %v1021_v47  ;;  %v1052_v50 = vsel %vm1028_vm1, %v1025_v5, %v1027_v8 }
  0xc6   : > { %1689 = vrot.lane.b32.xlu1 %v4096_v52, %s3800_s4  ;;  %1094 = vmatpush1.bf16.msra.mxu0 %v1049_v48 }
  0xc7   : > { %1687 = vrot.lane.b32.xlu0 %v4101_v53, %s3800_s4  ;;  %1146 = vmatprep.subr.bf16.mxu1 %v1052_v50 }
  0xc8   : > { %1147 = vmatpush1.bf16.msra.mxu1 %v1051_v9  ;;  %v1387_v58 = vpop.permute.xlu1 %1386  ;;  %v1385_v10 = vpop.permute.xlu0 %1384 }
  0xc9   : > { %3274 = vmatmul.mubr.msk.bf16.vlgmr.msra.gmra.mrb[0].mxu0 %vm436_vm0, %v3690_v56  ;;  %v1443_v11 = vsel %vm1028_vm1, %v1385_v10, %v1387_v58 }
  0xca   : > { %1683 = vrot.lane.b32.xlu1 %v4111_v54, %s3800_s4  ;;  %1125 = vmatprep.mubr.bf16.mxu0 %v4886_v12 }
  0xcb   : > { %1691 = vrot.lane.b32.xlu0 %v4116_v55, %s3800_s4  ;;  %1496 = vmatprep.subr.bf16.mxu0 %v1443_v11 }
  0xcc   : > { %v1391_v60 = vpop.permute.xlu1 %1390  ;;  %3276 = vmatmul.mubr.msk.bf16.vlgmr.msra.gmra.mrb[0].mxu1 %vm436_vm0, %v3690_v56  ;;  %v1389_v4 = vpop.permute.xlu0 %1388 }
  0xcd   : > { %1178 = vmatprep.mubr.bf16.mxu1 %v4886_v12  ;;  %v1445_v43 = vsel %vm1028_vm1, %v1389_v4, %v1391_v60  ;;  %v1444_v13 = vsel %vm1028_vm1, %v1387_v58, %v1389_v4 }
  0xce   : > { %1889 = vrot.lane.b32.xlu1 %v3956_v19, %s3800_s4  ;;  %1549 = vmatprep.subr.bf16.mxu1 %v1445_v43  ;;  %v4887_v43 = vld [vmem:[#allocation4_spill] sm:$0xff] }
  0xcf   : > { %1887 = vrot.lane.b32.xlu0 %v3941_v15, %s3800_s4  ;;  %1550 = vmatpush1.bf16.msra.mxu1 %v1444_v13  ;;  %v4888_v13 = vld [vmem:[#allocation2_spill] sm:$0xff] }
  0xd0   : > { %v1395_v16 = vpop.permute.xlu1 %1394  ;;  %v1383_v17 = vpop.permute.xlu0 %1382 }
  0xd1   : > { %3275 = vmatmul.mubr.msk.bf16.gmra.mrb[4].mxu0 %vm436_vm0, %v3691_v14  ;;  %v1442_v0 = vsel %vm1028_vm1, %v1383_v17, %v1385_v10 }
  0xd2   : > { %1893 = vrot.lane.b32.xlu1 %v4144_v57, %s3800_s4  ;;  %1528 = vmatprep.mubr.bf16.mxu0 %v4886_v12 }
  0xd3   : > { %1891 = vrot.lane.b32.xlu0 %v3950_v18, %s3800_s4  ;;  %1497 = vmatpush1.bf16.msra.mxu0 %v1442_v0  ;;  %v4889_v0 = vld [vmem:[#allocation3_spill] sm:$0xff] }
  0xd4   : > { %v1399_v19 = vpop.permute.xlu1 %1398  ;;  %3277 = vmatmul.mubr.msk.bf16.gmra.mrb[4].mxu1 %vm436_vm0, %v3691_v14  ;;  %v1397_v15 = vpop.permute.xlu0 %1396 }
  0xd5   : > { %1581 = vmatprep.mubr.bf16.mxu1 %v4886_v12  ;;  %v1447_v23 = vsel %vm1028_vm1, %v1395_v16, %v1397_v15 }
  0xd6   : > { %1897 = vrot.lane.b32.xlu1 %v3964_v21, %s3800_s4  ;;  %1498 = vmatprep.subr.bf16.mxu0 %v1447_v23  ;;  %v1448_v21 = vsel %vm1028_vm1, %v1397_v15, %v1399_v19  ;;  %v3692_v23 = vld [vmem:[%s3867_s26 + $0x30] sm:$0xff]  }
  0xd7   : > { %1885 = vrot.lane.b32.xlu0 %v3959_v20, %s3800_s4 }
  0xd8   : > { %v1393_v2 = vpop.permute.xlu1 %1392  ;;  %v1401_v18 = vpop.permute.xlu0 %1400 }
  0xd9   : > { %v1446_v24 = vsel %vm1028_vm1, %v1393_v2, %v1395_v16  ;;  %v1449_v44 = vsel %vm1028_vm1, %v1399_v19, %v1401_v18  ;;  %v4890_v19 = vld [vmem:[#allocation5_spill] sm:$0xff]  ;;  %v4891_v18 = vld [vmem:[#allocation6_spill] sm:$0xff] }
  0xda   : > { %1901 = vrot.lane.b32.xlu1 %v3967_v22, %s3800_s4  ;;  %1499 = vmatpush1.bf16.msra.mxu0 %v1446_v24 }
  0xdb   : > { %1899 = vrot.lane.b32.xlu0 %v3979_v25, %s3800_s4  ;;  %1551 = vmatprep.subr.bf16.mxu1 %v1449_v44 }
  0xdc   : > { %1552 = vmatpush1.bf16.msra.mxu1 %v1448_v21  ;;  %v1407_v47 = vpop.permute.xlu1 %1406  ;;  %v1405_v20 = vpop.permute.xlu0 %1404  ;;  %v4892_v21 = vld [vmem:[#allocation7_spill] sm:$0xff] }
  0xdd   : > { %v1451_v1 = vsel %vm1028_vm1, %v1405_v20, %v1407_v47 }
  0xde   : > { %1895 = vrot.lane.b32.xlu1 %v3986_v26, %s3800_s4  ;;  %1500 = vmatprep.subr.bf16.mxu0 %v1451_v1  ;;  %v4427_v1 = vld [vmem:[%s3872_s29 + $0x8] ss:$20 sps:$4 sm:$0xff]  }
  0xdf   : > { %1903 = vrot.lane.b32.xlu0 %v4175_v59, %s3800_s4 }
  0xe0   : > { %v1411_v22 = vpop.permute.xlu1 %1410  ;;  %v1409_v3 = vpop.permute.xlu0 %1408 }
  0xe1   : > { %v1453_v25 = vsel %vm1028_vm1, %v1409_v3, %v1411_v22  ;;  %v1452_v5 = vsel %vm1028_vm1, %v1407_v47, %v1409_v3 }
  0xe2   : > { %1909 = vrot.lane.b32.xlu1 %v3991_v27, %s3800_s4  ;;  %1553 = vmatprep.subr.bf16.mxu1 %v1453_v25  ;;  %v4434_v25 = vld [vmem:[%s3872_s29 + $0x4] ss:$20 sps:$4 sm:$0xff]  }
  0xe3   : > { %1907 = vrot.lane.b32.xlu0 %v3994_v28, %s3800_s4  ;;  %1554 = vmatpush1.bf16.msra.mxu1 %v1452_v5  ;;  %v3693_v5 = vld [vmem:[%s3867_s26 + $0x38] sm:$0xff]  }
  0xe4   : > { %v1415_v26 = vpop.permute.xlu1 %1414  ;;  %v1403_v6 = vpop.permute.xlu0 %1402 }
  0xe5   : > { %v1450_v45 = vsel %vm1028_vm1, %v1403_v6, %v1405_v20 }
  0xe6   : > { %1913 = vrot.lane.b32.xlu1 %v4189_v61, %s3800_s4  ;;  %1501 = vmatpush1.bf16.msra.mxu0 %v1450_v45 }
  0xe7   : > { %1911 = vrot.lane.b32.xlu0 %v3997_v29, %s3800_s4 }
  0xe8   : > { %v1419_v27 = vpop.permute.xlu1 %1418  ;;  %v1417_v7 = vpop.permute.xlu0 %1416 }
  0xe9   : > { %v1455_v28 = vsel %vm1028_vm1, %v1415_v26, %v1417_v7 }
  0xea   : > { %1917 = vrot.lane.b32.xlu1 %v4023_v35, %s3800_s4  ;;  %1502 = vmatprep.subr.bf16.mxu0 %v1455_v28  ;;  %v1456_v35 = vsel %vm1028_vm1, %v1417_v7, %v1419_v27  ;;  %v4448_v7 = vld [vmem:[%s3872_s29 + $0xc] ss:$20 sps:$4 sm:$0xff]  }
  0xeb   : > { %1905 = vrot.lane.b32.xlu0 %v4005_v31, %s3800_s4 }
  0xec   : > { %v1413_v48 = vpop.permute.xlu1 %1412  ;;  %v1421_v50 = vpop.permute.xlu0 %1420 }
  0xed   : > { %v1454_v8 = vsel %vm1028_vm1, %v1413_v48, %v1415_v26  ;;  %v1457_v29 = vsel %vm1028_vm1, %v1419_v27, %v1421_v50  ;;  %v4442_v27 = vld [vmem:[%s3872_s29 + $0x10] ss:$20 sps:$4 sm:$0xff]  }
  0xee   : > { %1921 = vrot.lane.b32.xlu1 %v4010_v32, %s3800_s4  ;;  %1503 = vmatpush1.bf16.msra.mxu0 %v1454_v8  ;;  %v4455_v8 = vld [vmem:[%s3872_s29 + $0x2c] ss:$20 sps:$4 sm:$0xff]  }
  0xef   : > { %1919 = vrot.lane.b32.xlu0 %v4020_v34, %s3800_s4  ;;  %1555 = vmatprep.subr.bf16.mxu1 %v1457_v29  ;;  %v4461_v29 = vld [vmem:[%s3872_s29] ss:$20 sps:$4 sm:$0xff]  }
  0xf0   : > { %1556 = vmatpush1.bf16.msra.mxu1 %v1456_v35  ;;  %v1427_v9 = vpop.permute.xlu1 %1426  ;;  %v1425_v31 = vpop.permute.xlu0 %1424 }
  0xf1   : > { %v1459_v56 = vsel %vm1028_vm1, %v1425_v31, %v1427_v9 }
  0xf2   : > { %1915 = vrot.lane.b32.xlu1 %v4028_v36, %s3800_s4  ;;  %1504 = vmatprep.subr.bf16.mxu0 %v1459_v56  ;;  %v4467_v56 = vld [vmem:[%s3872_s29 + $0x34] ss:$20 sps:$4 sm:$0xff]  }
  0xf3   : > { %1923 = vrot.lane.b32.xlu0 %v4210_v62, %s3800_s4 }
  0xf4   : > { %v1431_v32 = vpop.permute.xlu1 %1430  ;;  %v1429_v58 = vpop.permute.xlu0 %1428 }
  0xf5   : > { %v1461_v34 = vsel %vm1028_vm1, %v1429_v58, %v1431_v32  ;;  %v1460_v10 = vsel %vm1028_vm1, %v1427_v9, %v1429_v58  ;;  %v4473_v58 = vld [vmem:[%s3872_s29 + $0x30] ss:$20 sps:$4 sm:$0xff]  }
  0xf6   : > { %1929 = vrot.lane.b32.xlu1 %v4049_v41, %s3800_s4  ;;  %1557 = vmatprep.subr.bf16.mxu1 %v1461_v34 }
  0xf7   : > { %1927 = vrot.lane.b32.xlu0 %v4036_v38, %s3800_s4  ;;  %1558 = vmatpush1.bf16.msra.mxu1 %v1460_v10 }
  0xf8   : > { %v1435_v36 = vpop.permute.xlu1 %1434  ;;  %v1423_v11 = vpop.permute.xlu0 %1422 }
  0xf9   : > { %v1458_v60 = vsel %vm1028_vm1, %v1423_v11, %v1425_v31  ;;  %v4479_v11 = vld [vmem:[%s3872_s29 + $0x28] ss:$20 sps:$4 sm:$0xff]  }
  0xfa   : > { %1933 = vrot.lane.b32.xlu1 %v4219_v63, %s3800_s4  ;;  %1505 = vmatpush1.bf16.msra.mxu0 %v1458_v60 }
  0xfb   : > { %1931 = vrot.lane.b32.xlu0 %v4031_v37, %s3800_s4 }
  0xfc   : > { %v1439_v41 = vpop.permute.xlu1 %1438  ;;  %v1437_v4 = vpop.permute.xlu0 %1436 }
  0xfd   : > { %v1463_v38 = vsel %vm1028_vm1, %v1435_v36, %v1437_v4  ;;  %v1464_v15 = vsel %vm1028_vm1, %v1437_v4, %v1439_v41 }
  0xfe   : > { %1937 = vrot.lane.b32.xlu1 %v4887_v43, %s3800_s4  ;;  %1506 = vmatprep.subr.bf16.mxu0 %v1463_v38  ;;  %v4490_v38 = vld [vmem:[%s3872_s29 + $0x58] ss:$20 sps:$4 sm:$0xff]  }
  0xff   : > { %1925 = vrot.lane.b32.xlu0 %v4888_v13, %s3800_s4 }
 0x100   : > { %v1433_v14 = vpop.permute.xlu1 %1432  ;;  %v1441_v17 = vpop.permute.xlu0 %1440 }
 0x101   : > { %v1462_v16 = vsel %vm1028_vm1, %v1433_v14, %v1435_v36  ;;  %v1465_v37 = vsel %vm1028_vm1, %v1439_v41, %v1441_v17  ;;  %v4485_v41 = vld [vmem:[%s3872_s29 + $0x38] ss:$20 sps:$4 sm:$0xff]  }
 0x102   : > { %1941 = vrot.lane.b32.xlu1 %v4889_v0, %s3800_s4  ;;  %1507 = vmatpush1.bf16.msra.mxu0 %v1462_v16  ;;  %v4497_v16 = vld [vmem:[%s3872_s29 + $0x54] ss:$20 sps:$4 sm:$0xff]  }
 0x103   : > { %1939 = vrot.lane.b32.xlu0 %v4890_v19, %s3800_s4  ;;  %1559 = vmatprep.subr.bf16.mxu1 %v1465_v37  ;;  %v4503_v19 = vld [vmem:[%s3872_s29 + $0x60] ss:$20 sps:$4 sm:$0xff]  }
 0x104   : > { %1560 = vmatpush1.bf16.msra.mxu1 %v1464_v15  ;;  %v1638_v2 = vpop.permute.xlu1 %1637  ;;  %v4508_v15 = vld [vmem:[%s3872_s29 + $0x5c] ss:$20 sps:$4 sm:$0xff]  }
 0x105   : > { %v1636_v24 = vpop.permute.xlu0 %1635  ;;  %3350 = vmatmul.mubr.msk.bf16.vlgmr.msra.gmra.mrb[0].mxu0 %vm436_vm0, %v3692_v23 }
 0x106   : > { %1935 = vrot.lane.b32.xlu1 %v4891_v18, %s3800_s4  ;;  %v1695_v44 = vsel %vm1693_vm2, %v1636_v24, %v1638_v2  ;;  %1538 = vmatprep.mubr.bf16.mxu0 %v4886_v12 }
 0x107   : > { %1943 = vrot.lane.b32.xlu0 %v4892_v21, %s3800_s4  ;;  %1748 = vmatprep.subr.bf16.mxu0 %v1695_v44  ;;  %v4519_v44 = vld [vmem:[%s3872_s29 + $0x50] ss:$20 sps:$4 sm:$0xff]  }
 0x108   : > { %v1642_v47 = vpop.permute.xlu1 %1641  ;;  %3352 = vmatmul.mubr.msk.bf16.vlgmr.msra.gmra.mrb[0].mxu1 %vm436_vm0, %v3692_v23 }
 0x109   : > { %v1640_v20 = vpop.permute.xlu0 %1639  ;;  %1591 = vmatprep.mubr.bf16.mxu1 %v4886_v12 }
 0x10a   : > { %2140 = vrot.lane.b32.xlu1 %v4427_v1, %s3801_s5  ;;  %v1697_v22 = vsel %vm1693_vm2, %v1640_v20, %v1642_v47  ;;  %v1696_v3 = vsel %vm1693_vm2, %v1638_v2, %v1640_v20 }
 0x10b   : > { %2138 = vrot.lane.b32.xlu0 %v4434_v25, %s3801_s5  ;;  %1801 = vmatprep.subr.bf16.mxu1 %v1697_v22 }
 0x10c   : > { %1802 = vmatpush1.bf16.msra.mxu1 %v1696_v3  ;;  %v1646_v26 = vpop.permute.xlu1 %1645  ;;  %v4525_v3 = vld [vmem:[%s3872_s29 + $0x84] ss:$20 sps:$4 sm:$0xff]  }
 0x10d   : > { %v1634_v6 = vpop.permute.xlu0 %1633  ;;  %3351 = vmatmul.mubr.msk.bf16.gmra.mrb[4].mxu0 %vm436_vm0, %v3693_v5 }
 0x10e   : > { %v1694_v45 = vsel %vm1693_vm2, %v1634_v6, %v1636_v24  ;;  %2144 = vrot.lane.b32.xlu1 %v4442_v27, %s3801_s5  ;;  %1780 = vmatprep.mubr.bf16.mxu0 %v4886_v12  ;;  %v4513_v24 = vld [vmem:[%s3872_s29 + $0x7c] ss:$20 sps:$4 sm:$0xff]  }
 0x10f   : > { %2142 = vrot.lane.b32.xlu0 %v4448_v7, %s3801_s5  ;;  %1749 = vmatpush1.bf16.msra.mxu0 %v1694_v45 }
 0x110   : > { %v1650_v28 = vpop.permute.xlu1 %1649  ;;  %3353 = vmatmul.mubr.msk.bf16.gmra.mrb[4].mxu1 %vm436_vm0, %v3693_v5 }
 0x111   : > { %v1648_v48 = vpop.permute.xlu0 %1647  ;;  %1833 = vmatprep.mubr.bf16.mxu1 %v4886_v12 }
 0x112   : > { %2148 = vrot.lane.b32.xlu1 %v4455_v8, %s3801_s5  ;;  %v1699_v50 = vsel %vm1693_vm2, %v1646_v26, %v1648_v48  ;;  %v1700_v34 = vsel %vm1693_vm2, %v1648_v48, %v1650_v28 }
 0x113   : > { %2136 = vrot.lane.b32.xlu0 %v4461_v29, %s3801_s5  ;;  %1750 = vmatprep.subr.bf16.mxu0 %v1699_v50 }
 0x114   : > { %v1644_v35 = vpop.permute.xlu1 %1643 }
 0x115   : > { %v1698_v9 = vsel %vm1693_vm2, %v1644_v35, %v1646_v26  ;;  %v1652_v31 = vpop.permute.xlu0 %1651  ;;  %v4531_v26 = vld [vmem:[%s3872_s29 + $0x80] ss:$20 sps:$4 sm:$0xff]  }
 0x116   : > { %2152 = vrot.lane.b32.xlu1 %v4467_v56, %s3801_s5  ;;  %1751 = vmatpush1.bf16.msra.mxu0 %v1698_v9  ;;  %v1701_v32 = vsel %vm1693_vm2, %v1650_v28, %v1652_v31 }
 0x117   : > { %2150 = vrot.lane.b32.xlu0 %v4473_v58, %s3801_s5  ;;  %1803 = vmatprep.subr.bf16.mxu1 %v1701_v32 }
 0x118   : > { %1804 = vmatpush1.bf16.msra.mxu1 %v1700_v34  ;;  %v1658_v10 = vpop.permute.xlu1 %1657 }
 0x119   : > { %v1656_v36 = vpop.permute.xlu0 %1655 }
 0x11a   : > { %2146 = vrot.lane.b32.xlu1 %v4479_v11, %s3801_s5  ;;  %v1703_v60 = vsel %vm1693_vm2, %v1656_v36, %v1658_v10 }
 0x11b   : > { %2154 = vrot.lane.b32.xlu0 %v4485_v41, %s3801_s5  ;;  %1752 = vmatprep.subr.bf16.mxu0 %v1703_v60  ;;  %v3694_v60 = vld [vmem:[%s3867_s26 + $0x40] sm:$0xff]  }
 0x11c   : > { %v1662_v4 = vpop.permute.xlu1 %1661 }
 0x11d   : > { %v1660_v43 = vpop.permute.xlu0 %1659 }
 0x11e   : > { %2160 = vrot.lane.b32.xlu1 %v4490_v38, %s3801_s5  ;;  %v1705_v13 = vsel %vm1693_vm2, %v1660_v43, %v1662_v4  ;;  %v1704_v14 = vsel %vm1693_vm2, %v1658_v10, %v1660_v43 }
 0x11f   : > { %2158 = vrot.lane.b32.xlu0 %v4497_v16, %s3801_s5  ;;  %1805 = vmatprep.subr.bf16.mxu1 %v1705_v13  ;;  %v3722_v13 = vld [vmem:[%s3872_s29 + $0xf8] ss:$20 sps:$4 sm:$0xff]  }
 0x120   : > { %1806 = vmatpush1.bf16.msra.mxu1 %v1704_v14  ;;  %v1666_v17 = vpop.permute.xlu1 %1665 }
 0x121   : > { %v1654_v0 = vpop.permute.xlu0 %1653 }
 0x122   : > { %v1702_v37 = vsel %vm1693_vm2, %v1654_v0, %v1656_v36  ;;  %2164 = vrot.lane.b32.xlu1 %v4503_v19, %s3801_s5 }
 0x123   : > { %2162 = vrot.lane.b32.xlu0 %v4508_v15, %s3801_s5  ;;  %1753 = vmatpush1.bf16.msra.mxu0 %v1702_v37 }
 0x124   : > { %v1670_v23 = vpop.permute.xlu1 %1669 }
 0x125   : > { %v1668_v2 = vpop.permute.xlu0 %1667 }
 0x126   : > { %2168 = vrot.lane.b32.xlu1 %v4513_v24, %s3801_s5  ;;  %v1707_v18 = vsel %vm1693_vm2, %v1666_v17, %v1668_v2  ;;  %v1708_v6 = vsel %vm1693_vm2, %v1668_v2, %v1670_v23  ;;  %v3724_v2 = vld [vmem:[%s3872_s29 + $0xfc] ss:$20 sps:$4 sm:$0xff]  }
 0x127   : > { %2156 = vrot.lane.b32.xlu0 %v4519_v44, %s3801_s5  ;;  %1754 = vmatprep.subr.bf16.mxu0 %v1707_v18 }
 0x128   : > { %v1664_v47 = vpop.permute.xlu1 %1663 }
 0x129   : > { %v1706_v20 = vsel %vm1693_vm2, %v1664_v47, %v1666_v17  ;;  %v1672_v22 = vpop.permute.xlu0 %1671  ;;  %v3723_v17 = vld [vmem:[%s3872_s29 + $0xf4] ss:$20 sps:$4 sm:$0xff]  }
 0x12a   : > { %2172 = vrot.lane.b32.xlu1 %v4525_v3, %s3801_s5  ;;  %1755 = vmatpush1.bf16.msra.mxu0 %v1706_v20  ;;  %v1709_v5 = vsel %vm1693_vm2, %v1670_v23, %v1672_v22  ;;  %v3725_v20 = vld [vmem:[%s3872_s29 + $0x11c] ss:$20 sps:$4 sm:$0xff]  }
 0x12b   : > { %2170 = vrot.lane.b32.xlu0 %v4531_v26, %s3801_s5  ;;  %1807 = vmatprep.subr.bf16.mxu1 %v1709_v5 }
 0x12c   : > { %1808 = vmatpush1.bf16.msra.mxu1 %v1708_v6  ;;  %v1678_v45 = vpop.permute.xlu1 %1677 }
 0x12d   : > { %v1676_v28 = vpop.permute.xlu0 %1675 }
 0x12e   : > { %2166 = vrot.lane.b32.xlu1 %v4000_v30, %s3801_s5  ;;  %v1711_v48 = vsel %vm1693_vm2, %v1676_v28, %v1678_v45 }
 0x12f   : > { %2174 = vrot.lane.b32.xlu0 %v4015_v33, %s3801_s5  ;;  %1756 = vmatprep.subr.bf16.mxu0 %v1711_v48 }
 0x130   : > { %v1682_v50 = vpop.permute.xlu1 %1681 }
 0x131   : > { %v1680_v35 = vpop.permute.xlu0 %1679 }
 0x132   : > { %2180 = vrot.lane.b32.xlu1 %v4041_v39, %s3801_s5  ;;  %v1713_v9 = vsel %vm1693_vm2, %v1680_v35, %v1682_v50  ;;  %v1712_v31 = vsel %vm1693_vm2, %v1678_v45, %v1680_v35  ;;  %v3728_v50 = vld [vmem:[%s3872_s29 + $0x120] ss:$20 sps:$4 sm:$0xff]  }
 0x133   : > { %2178 = vrot.lane.b32.xlu0 %v4046_v40, %s3801_s5  ;;  %1809 = vmatprep.subr.bf16.mxu1 %v1713_v9 }
 0x134   : > { %1810 = vmatpush1.bf16.msra.mxu1 %v1712_v31  ;;  %v1686_v30 = vpop.permute.xlu1 %1685 }
 0x135   : > { %v1674_v32 = vpop.permute.xlu0 %1673 }
 0x136   : > { %v1710_v34 = vsel %vm1693_vm2, %v1674_v32, %v1676_v28  ;;  %2184 = vrot.lane.b32.xlu1 %v4052_v42, %s3801_s5  ;;  %v3727_v28 = vld [vmem:[%s3872_s29 + $0x124] ss:$20 sps:$4 sm:$0xff]  }
 0x137   : > { %2182 = vrot.lane.b32.xlu0 %v4070_v46, %s3801_s5  ;;  %1757 = vmatpush1.bf16.msra.mxu0 %v1710_v34 }
 0x138   : > { %v1690_v33 = vpop.permute.xlu1 %1689 }
 0x139   : > { %v1688_v39 = vpop.permute.xlu0 %1687 }
 0x13a   : > { %2188 = vrot.lane.b32.xlu1 %v4083_v49, %s3801_s5  ;;  %v1715_v40 = vsel %vm1693_vm2, %v1686_v30, %v1688_v39  ;;  %v1716_v49 = vsel %vm1693_vm2, %v1688_v39, %v1690_v33  ;;  %v3730_v39 = vld [vmem:[%s3872_s29 + $0x148] ss:$20 sps:$4 sm:$0xff]  }
 0x13b   : > { %2176 = vrot.lane.b32.xlu0 %v4091_v51, %s3801_s5  ;;  %1758 = vmatprep.subr.bf16.mxu0 %v1715_v40 }
 0x13c   : > { %v1684_v10 = vpop.permute.xlu1 %1683 }
 0x13d   : > { %v1714_v36 = vsel %vm1693_vm2, %v1684_v10, %v1686_v30  ;;  %v1692_v42 = vpop.permute.xlu0 %1691  ;;  %v3729_v30 = vld [vmem:[%s3872_s29 + $0x118] ss:$20 sps:$4 sm:$0xff]  }
 0x13e   : > { %2192 = vrot.lane.b32.xlu1 %v4096_v52, %s3801_s5  ;;  %1759 = vmatpush1.bf16.msra.mxu0 %v1714_v36  ;;  %v1717_v46 = vsel %vm1693_vm2, %v1690_v33, %v1692_v42  ;;  %v3731_v36 = vld [vmem:[%s3872_s29 + $0x144] ss:$20 sps:$4 sm:$0xff]  }
 0x13f   : > { %2190 = vrot.lane.b32.xlu0 %v4101_v53, %s3801_s5  ;;  %1811 = vmatprep.subr.bf16.mxu1 %v1717_v46 }
 0x140   : > { %1812 = vmatpush1.bf16.msra.mxu1 %v1716_v49  ;;  %v1890_v51 = vpop.permute.xlu1 %1889  ;;  %v3732_v49 = vld [vmem:[%s3872_s29 + $0x14c] ss:$20 sps:$4 sm:$0xff]  }
 0x141   : > { %v1888_v4 = vpop.permute.xlu0 %1887  ;;  %3360 = vmatmul.mubr.msk.bf16.vlgmr.msra.gmra.mrb[0].mxu0 %vm436_vm0, %v3694_v60 }
 0x142   : > { %2186 = vrot.lane.b32.xlu1 %v4111_v54, %s3801_s5  ;;  %v1946_v52 = vsel %vm1693_vm2, %v1888_v4, %v1890_v51  ;;  %1790 = vmatprep.mubr.bf16.mxu0 %v4886_v12 }
 0x143   : > { %2194 = vrot.lane.b32.xlu0 %v4116_v55, %s3801_s5  ;;  %1999 = vmatprep.subr.bf16.mxu0 %v1946_v52  ;;  %v3695_v55 = vld [vmem:[%s3867_s26 + $0x48] sm:$0xff]  }
 0x144   : > { %v1894_v53 = vpop.permute.xlu1 %1893  ;;  %3362 = vmatmul.mubr.msk.bf16.vlgmr.msra.gmra.mrb[0].mxu1 %vm436_vm0, %v3694_v60 }
 0x145   : > { %v1892_v43 = vpop.permute.xlu0 %1891  ;;  %1843 = vmatprep.mubr.bf16.mxu1 %v4886_v12 }
 0x146   : > { %2392 = vrot.lane.b32.xlu1 %v3722_v13, %s3801_s5  ;;  %v1948_v54 = vsel %vm1693_vm2, %v1892_v43, %v1894_v53  ;;  %v1947_v14 = vsel %vm1693_vm2, %v1890_v51, %v1892_v43  ;;  %v3734_v53 = vld [vmem:[%s3872_s29 + $0x140] ss:$20 sps:$4 sm:$0xff]  }
 0x147   : > { %2390 = vrot.lane.b32.xlu0 %v3723_v17, %s3801_s5  ;;  %2052 = vmatprep.subr.bf16.mxu1 %v1948_v54  ;;  %v3735_v54 = vld [vmem:[%s3872_s29 + $0x174] ss:$20 sps:$4 sm:$0xff]   ;;  %v3736_v17 = vld [vmem:[%s3872_s29 + $0x170] ss:$20 sps:$4 sm:$0xff]  }
 0x148   : > { %2053 = vmatpush1.bf16.msra.mxu1 %v1947_v14  ;;  %v1898_v0 = vpop.permute.xlu1 %1897 }
 0x149   : > { %v1886_v37 = vpop.permute.xlu0 %1885  ;;  %3361 = vmatmul.mubr.msk.bf16.gmra.mrb[4].mxu0 %vm436_vm0, %v3695_v55 }
 0x14a   : > { %v1945_v23 = vsel %vm1693_vm2, %v1886_v37, %v1888_v4  ;;  %2396 = vrot.lane.b32.xlu1 %v4144_v57, %s3801_s5  ;;  %2031 = vmatprep.mubr.bf16.mxu0 %v4886_v12  ;;  %v3726_v57 = vld [vmem:[%s3872_s29 + $0xf0] ss:$20 sps:$4 sm:$0xff]   ;;  %v3733_v4 = vld [vmem:[%s3872_s29 + $0x16c] ss:$20 sps:$4 sm:$0xff]  }
 0x14b   : > { %2394 = vrot.lane.b32.xlu0 %v3724_v2, %s3801_s5  ;;  %2000 = vmatpush1.bf16.msra.mxu0 %v1945_v23  ;;  %v3737_v23 = vld [vmem:[%s3872_s29 + $0x168] ss:$20 sps:$4 sm:$0xff]  }
 0x14c   : > { %v1902_v18 = vpop.permute.xlu1 %1901  ;;  %3363 = vmatmul.mubr.msk.bf16.gmra.mrb[4].mxu1 %vm436_vm0, %v3695_v55 }
 0x14d   : > { %v1900_v47 = vpop.permute.xlu0 %1899  ;;  %2084 = vmatprep.mubr.bf16.mxu1 %v4886_v12 }
 0x14e   : > { %2400 = vrot.lane.b32.xlu1 %v3725_v20, %s3801_s5  ;;  %v1950_v22 = vsel %vm1693_vm2, %v1898_v0, %v1900_v47  ;;  %v1951_v35 = vsel %vm1693_vm2, %v1900_v47, %v1902_v18  ;;  %v3738_v20 = vld [vmem:[%s3872_s29 + $0x198] ss:$20 sps:$4 sm:$0xff]  }
 0x14f   : > { %2388 = vrot.lane.b32.xlu0 %v3726_v57, %s3801_s5  ;;  %2001 = vmatprep.subr.bf16.mxu0 %v1950_v22 }
 0x150   : > { %v1896_v5 = vpop.permute.xlu1 %1895 }
 0x151   : > { %v1949_v6 = vsel %vm1693_vm2, %v1896_v5, %v1898_v0  ;;  %v1904_v45 = vpop.permute.xlu0 %1903  ;;  %v3739_v5 = vld [vmem:[%s3872_s29 + $0x194] ss:$20 sps:$4 sm:$0xff]  }
 0x152   : > { %2404 = vrot.lane.b32.xlu1 %v3727_v28, %s3801_s5  ;;  %2002 = vmatpush1.bf16.msra.mxu0 %v1949_v6  ;;  %v1952_v48 = vsel %vm1693_vm2, %v1902_v18, %v1904_v45  ;;  %v3740_v28 = vld [vmem:[%s3872_s29 + $0x19c] ss:$20 sps:$4 sm:$0xff]  }
 0x153   : > { %2402 = vrot.lane.b32.xlu0 %v3728_v50, %s3801_s5  ;;  %2054 = vmatprep.subr.bf16.mxu1 %v1952_v48 }
 0x154   : > { %2055 = vmatpush1.bf16.msra.mxu1 %v1951_v35  ;;  %v1910_v9 = vpop.permute.xlu1 %1909  ;;  %v3741_v35 = vld [vmem:[%s3872_s29 + $0x1bc] ss:$20 sps:$4 sm:$0xff]  }
 0x155   : > { %v1908_v31 = vpop.permute.xlu0 %1907 }
 0x156   : > { %2398 = vrot.lane.b32.xlu1 %v3729_v30, %s3801_s5  ;;  %v1954_v32 = vsel %vm1693_vm2, %v1908_v31, %v1910_v9 }
 0x157   : > { %2406 = vrot.lane.b32.xlu0 %v4175_v59, %s3801_s5  ;;  %2003 = vmatprep.subr.bf16.mxu0 %v1954_v32 }
 0x158   : > { %v1914_v34 = vpop.permute.xlu1 %1913 }
 0x159   : > { %v1912_v33 = vpop.permute.xlu0 %1911 }
 0x15a   : > { %2412 = vrot.lane.b32.xlu1 %v3730_v39, %s3801_s5  ;;  %v1956_v40 = vsel %vm1693_vm2, %v1912_v33, %v1914_v34  ;;  %v1955_v10 = vsel %vm1693_vm2, %v1910_v9, %v1912_v33  ;;  %v3743_v34 = vld [vmem:[%s3872_s29 + $0x1c4] ss:$20 sps:$4 sm:$0xff]  }
 0x15b   : > { %2410 = vrot.lane.b32.xlu0 %v3731_v36, %s3801_s5  ;;  %2056 = vmatprep.subr.bf16.mxu1 %v1956_v40  ;;  %v3744_v40 = vld [vmem:[%s3872_s29 + $0x1c0] ss:$20 sps:$4 sm:$0xff]  }
 0x15c   : > { %2057 = vmatpush1.bf16.msra.mxu1 %v1955_v10  ;;  %v1918_v42 = vpop.permute.xlu1 %1917  ;;  %v3696_v10 = vld [vmem:[%s3867_s26 + $0x50] sm:$0xff]  }
 0x15d   : > { %v1906_v59 = vpop.permute.xlu0 %1905 }
 0x15e   : > { %v1953_v46 = vsel %vm1693_vm2, %v1906_v59, %v1908_v31  ;;  %2416 = vrot.lane.b32.xlu1 %v4189_v61, %s3801_s5  ;;  %v3742_v31 = vld [vmem:[%s3872_s29 + $0x190] ss:$20 sps:$4 sm:$0xff]   ;;  %v3745_v59 = vld [vmem:[%s3872_s29 + $0x1b8] ss:$20 sps:$4 sm:$0xff]  }
 0x15f   : > { %2414 = vrot.lane.b32.xlu0 %v3732_v49, %s3801_s5  ;;  %2004 = vmatpush1.bf16.msra.mxu0 %v1953_v46 }
 0x160   : > { %v1922_v60 = vpop.permute.xlu1 %1921 }
 0x161   : > { %v1920_v51 = vpop.permute.xlu0 %1919 }
 0x162   : > { %2420 = vrot.lane.b32.xlu1 %v3733_v4, %s3801_s5  ;;  %v1958_v52 = vsel %vm1693_vm2, %v1918_v42, %v1920_v51  ;;  %v1959_v55 = vsel %vm1693_vm2, %v1920_v51, %v1922_v60 }
 0x163   : > { %2408 = vrot.lane.b32.xlu0 %v3734_v53, %s3801_s5  ;;  %2005 = vmatprep.subr.bf16.mxu0 %v1958_v52 }
 0x164   : > { %v1916_v43 = vpop.permute.xlu1 %1915 }
 0x165   : > { %v1957_v61 = vsel %vm1693_vm2, %v1916_v43, %v1918_v42  ;;  %v1924_v13 = vpop.permute.xlu0 %1923 }
 0x166   : > { %2424 = vrot.lane.b32.xlu1 %v3735_v54, %s3801_s5  ;;  %2006 = vmatpush1.bf16.msra.mxu0 %v1957_v61  ;;  %v1960_v14 = vsel %vm1693_vm2, %v1922_v60, %v1924_v13 }
 0x167   : > { %2422 = vrot.lane.b32.xlu0 %v3736_v17, %s3801_s5  ;;  %2058 = vmatprep.subr.bf16.mxu1 %v1960_v14 }
 0x168   : > { %2059 = vmatpush1.bf16.msra.mxu1 %v1959_v55  ;;  %v1930_v0 = vpop.permute.xlu1 %1929 }
 0x169   : > { %v1928_v37 = vpop.permute.xlu0 %1927 }
 0x16a   : > { %2418 = vrot.lane.b32.xlu1 %v3737_v23, %s3801_s5  ;;  %v1962_v2 = vsel %vm1693_vm2, %v1928_v37, %v1930_v0 }
 0x16b   : > { %2426 = vrot.lane.b32.xlu0 %v4210_v62, %s3801_s5  ;;  %2007 = vmatprep.subr.bf16.mxu0 %v1962_v2 }
 0x16c   : > { %v1934_v18 = vpop.permute.xlu1 %1933 }
 0x16d   : > { %v1932_v47 = vpop.permute.xlu0 %1931 }
 0x16e   : > { %2432 = vrot.lane.b32.xlu1 %v3738_v20, %s3801_s5  ;;  %v1964_v22 = vsel %vm1693_vm2, %v1932_v47, %v1934_v18  ;;  %v1963_v57 = vsel %vm1693_vm2, %v1930_v0, %v1932_v47  ;;  %v3746_v20 = vld [vmem:[%s3872_s29 + $0x78] ss:$20 sps:$4 sm:$0xff]  }
 0x16f   : > { %2430 = vrot.lane.b32.xlu0 %v3739_v5, %s3801_s5  ;;  %2060 = vmatprep.subr.bf16.mxu1 %v1964_v22 }
 0x170   : > { %2061 = vmatpush1.bf16.msra.mxu1 %v1963_v57  ;;  %v1938_v6 = vpop.permute.xlu1 %1937 }
 0x171   : > { %v1926_v62 = vpop.permute.xlu0 %1925 }
 0x172   : > { %v1961_v45 = vsel %vm1693_vm2, %v1926_v62, %v1928_v37  ;;  %2436 = vrot.lane.b32.xlu1 %v4219_v63, %s3801_s5 }
 0x173   : > { %2434 = vrot.lane.b32.xlu0 %v3740_v28, %s3801_s5  ;;  %2008 = vmatpush1.bf16.msra.mxu0 %v1961_v45  ;;  %v3749_v45 = vld [vmem:[%s3872_s29 + $0xa4] ss:$20 sps:$4 sm:$0xff]  }
 0x174   : > { %v1942_v48 = vpop.permute.xlu1 %1941 }
 0x175   : > { %v1940_v50 = vpop.permute.xlu0 %1939 }
 0x176   : > { %2440 = vrot.lane.b32.xlu1 %v3741_v35, %s3801_s5  ;;  %v1966_v9 = vsel %vm1693_vm2, %v1938_v6, %v1940_v50  ;;  %v1967_v39 = vsel %vm1693_vm2, %v1940_v50, %v1942_v48  ;;  %v3750_v35 = vld [vmem:[%s3872_s29 + $0xb0] ss:$20 sps:$4 sm:$0xff]  }
 0x177   : > { %2428 = vrot.lane.b32.xlu0 %v3742_v31, %s3801_s5  ;;  %2009 = vmatprep.subr.bf16.mxu0 %v1966_v9  ;;  %v3751_v9 = vld [vmem:[%s3872_s29 + $0xac] ss:$20 sps:$4 sm:$0xff]  }
 0x178   : > { %v1936_v30 = vpop.permute.xlu1 %1935 }
 0x179   : > { %v1965_v63 = vsel %vm1693_vm2, %v1936_v30, %v1938_v6  ;;  %v1944_v32 = vpop.permute.xlu0 %1943  ;;  %v3748_v6 = vld [vmem:[%s3872_s29 + $0xa8] ss:$20 sps:$4 sm:$0xff]  }
 0x17a   : > { %2444 = vrot.lane.b32.xlu1 %v3743_v34, %s3801_s5  ;;  %2010 = vmatpush1.bf16.msra.mxu0 %v1965_v63  ;;  %v1968_v33 = vsel %vm1693_vm2, %v1942_v48, %v1944_v32  ;;  %v3752_v63 = vld [vmem:[%s3872_s29 + $0xcc] ss:$20 sps:$4 sm:$0xff]  }
 0x17b   : > { %2442 = vrot.lane.b32.xlu0 %v3744_v40, %s3801_s5  ;;  %2062 = vmatprep.subr.bf16.mxu1 %v1968_v33  ;;  %v3753_v34 = vld [vmem:[%s3872_s29 + $0xa0] ss:$20 sps:$4 sm:$0xff]  }
 0x17c   : > { %2063 = vmatpush1.bf16.msra.mxu1 %v1967_v39  ;;  %v2141_v36 = vpop.permute.xlu1 %2140 }
 0x17d   : > { %v2139_v42 = vpop.permute.xlu0 %2138  ;;  %3370 = vmatmul.mubr.msk.bf16.vlgmr.msra.gmra.mrb[0].mxu0 %vm436_vm0, %v3696_v10 }
 0x17e   : > { %2438 = vrot.lane.b32.xlu1 %v3745_v59, %s3801_s5  ;;  %v2198_v46 = vsel %vm2196_vm3, %v2139_v42, %v2141_v36  ;;  %2041 = vmatprep.mubr.bf16.mxu0 %v4886_v12  ;;  %v3755_v59 = vld [vmem:[%s3872_s29 + $0xd0] ss:$20 sps:$4 sm:$0xff]  }
 0x17f   : > { %2446 = vrot.lane.b32.xlu0 %v4892_v21, %s3801_s5  ;;  %2251 = vmatprep.subr.bf16.mxu0 %v2198_v46  ;;  %v3697_v21 = vld [vmem:[%s3867_s26 + $0x58] sm:$0xff]   ;;  %v3698_v46 = vld [vmem:[%s3867_s26 + $0x60] sm:$0xff]  }
 0x180   : > { %v2145_v49 = vpop.permute.xlu1 %2144  ;;  %3372 = vmatmul.mubr.msk.bf16.vlgmr.msra.gmra.mrb[0].mxu1 %vm436_vm0, %v3696_v10  ;;  %v3754_v10 = vld [vmem:[%s3872_s29 + $0xd4] ss:$20 sps:$4 sm:$0xff]  }
 0x181   : > { %v2143_v60 = vpop.permute.xlu0 %2142  ;;  %2094 = vmatprep.mubr.bf16.mxu1 %v4886_v12 }
 0x182   : > { %v2199_v51 = vsel %vm2196_vm3, %v2141_v36, %v2143_v60  ;;  %2643 = vrot.lane.b32.xlu1 %v4427_v1, %s3802_s6  ;;  %v2200_v4 = vsel %vm2196_vm3, %v2143_v60, %v2145_v49 }
 0x183   : > { %2641 = vrot.lane.b32.xlu0 %v4434_v25, %s3802_s6  ;;  %2304 = vmatprep.subr.bf16.mxu1 %v2200_v4 }
 0x184   : > { %2305 = vmatpush1.bf16.msra.mxu1 %v2199_v51  ;;  %v2149_v52 = vpop.permute.xlu1 %2148  ;;  %v3756_v51 = vld [vmem:[%s3872_s29 + $0xc8] ss:$20 sps:$4 sm:$0xff]  }
 0x185   : > { %v2137_v53 = vpop.permute.xlu0 %2136  ;;  %3371 = vmatmul.mubr.msk.bf16.gmra.mrb[4].mxu0 %vm436_vm0, %v3697_v21 }
 0x186   : > { %v2197_v43 = vsel %vm2196_vm3, %v2137_v53, %v2139_v42  ;;  %2647 = vrot.lane.b32.xlu1 %v4442_v27, %s3802_s6  ;;  %2283 = vmatprep.mubr.bf16.mxu0 %v4886_v12 }
 0x187   : > { %2645 = vrot.lane.b32.xlu0 %v4448_v7, %s3802_s6  ;;  %2252 = vmatpush1.bf16.msra.mxu0 %v2197_v43  ;;  %v2876_v43 = vld [vmem:[%s237_s10] sm:$0xff] }
 0x188   : > { %v2153_v1 = vpop.permute.xlu1 %2152  ;;  %3373 = vmatmul.mubr.msk.bf16.gmra.mrb[4].mxu1 %vm436_vm0, %v3697_v21  ;;  %v3757_v21 = vld [vmem:[%s3872_s29 + $0xd8] ss:$20 sps:$4 sm:$0xff]  }
 0x189   : > { %v2151_v25 = vpop.permute.xlu0 %2150  ;;  %2336 = vmatprep.mubr.bf16.mxu1 %v4886_v12 }
 0x18a   : > { %2651 = vrot.lane.b32.xlu1 %v4455_v8, %s3802_s6  ;;  %v2202_v61 = vsel %vm2196_vm3, %v2149_v52, %v2151_v25  ;;  %v2203_v14 = vsel %vm2196_vm3, %v2151_v25, %v2153_v1 }
 0x18b   : > { %2639 = vrot.lane.b32.xlu0 %v4461_v29, %s3802_s6  ;;  %2253 = vmatprep.subr.bf16.mxu0 %v2202_v61 }
 0x18c   : > { %v2147_v27 = vpop.permute.xlu1 %2146 }
 0x18d   : > { %v2201_v13 = vsel %vm2196_vm3, %v2147_v27, %v2149_v52  ;;  %v2155_v7 = vpop.permute.xlu0 %2154  ;;  %v3699_v27 = vld [vmem:[%s3867_s26 + $0x68] sm:$0xff]  }
 0x18e   : > { %2655 = vrot.lane.b32.xlu1 %v4467_v56, %s3802_s6  ;;  %2254 = vmatpush1.bf16.msra.mxu0 %v2201_v13  ;;  %v2204_v54 = vsel %vm2196_vm3, %v2153_v1, %v2155_v7  ;;  %v2877_v1 = vld [vmem:[%s237_s10 + $0x8] sm:$0xff]  ;;  %v2878_v13 = vld [vmem:[%s237_s10 + $0x10] sm:$0xff] }
 0x18f   : > { %2653 = vrot.lane.b32.xlu0 %v4473_v58, %s3802_s6  ;;  %2306 = vmatprep.subr.bf16.mxu1 %v2204_v54  ;;  %v2879_v54 = vld [vmem:[%s237_s10 + $0x18] sm:$0xff] }
 0x190   : > { %2307 = vmatpush1.bf16.msra.mxu1 %v2203_v14  ;;  %v2161_v8 = vpop.permute.xlu1 %2160 }
 0x191   : > { %v2159_v29 = vpop.permute.xlu0 %2158 }
 0x192   : > { %2649 = vrot.lane.b32.xlu1 %v4479_v11, %s3802_s6  ;;  %v2206_v17 = vsel %vm2196_vm3, %v2159_v29, %v2161_v8 }
 0x193   : > { %2657 = vrot.lane.b32.xlu0 %v4485_v41, %s3802_s6  ;;  %2255 = vmatprep.subr.bf16.mxu0 %v2206_v17 }
 0x194   : > { %v2165_v56 = vpop.permute.xlu1 %2164 }
 0x195   : > { %v2163_v55 = vpop.permute.xlu0 %2162 }
 0x196   : > { %v2207_v0 = vsel %vm2196_vm3, %v2161_v8, %v2163_v55  ;;  %2663 = vrot.lane.b32.xlu1 %v4490_v38, %s3802_s6  ;;  %v2208_v58 = vsel %vm2196_vm3, %v2163_v55, %v2165_v56 }
 0x197   : > { %2661 = vrot.lane.b32.xlu0 %v4497_v16, %s3802_s6  ;;  %2308 = vmatprep.subr.bf16.mxu1 %v2208_v58 }
 0x198   : > { %2309 = vmatpush1.bf16.msra.mxu1 %v2207_v0  ;;  %v2169_v11 = vpop.permute.xlu1 %2168 }
 0x199   : > { %v2157_v37 = vpop.permute.xlu0 %2156 }
 0x19a   : > { %v2205_v23 = vsel %vm2196_vm3, %v2157_v37, %v2159_v29  ;;  %2667 = vrot.lane.b32.xlu1 %v4503_v19, %s3802_s6 }
 0x19b   : > { %2665 = vrot.lane.b32.xlu0 %v4508_v15, %s3802_s6  ;;  %2256 = vmatpush1.bf16.msra.mxu0 %v2205_v23 }
 0x19c   : > { %v2173_v41 = vpop.permute.xlu1 %2172 }
 0x19d   : > { %v2171_v38 = vpop.permute.xlu0 %2170 }
 0x19e   : > { %2671 = vrot.lane.b32.xlu1 %v4513_v24, %s3802_s6  ;;  %v2210_v16 = vsel %vm2196_vm3, %v2169_v11, %v2171_v38  ;;  %v2211_v24 = vsel %vm2196_vm3, %v2171_v38, %v2173_v41 }
 0x19f   : > { %2659 = vrot.lane.b32.xlu0 %v4519_v44, %s3802_s6  ;;  %2257 = vmatprep.subr.bf16.mxu0 %v2210_v16 }
 0x1a0   : > { %v2167_v2 = vpop.permute.xlu1 %2166 }
 0x1a1   : > { %v2209_v19 = vsel %vm2196_vm3, %v2167_v2, %v2169_v11  ;;  %v2175_v18 = vpop.permute.xlu0 %2174 }
 0x1a2   : > { %2675 = vrot.lane.b32.xlu1 %v4525_v3, %s3802_s6  ;;  %2258 = vmatpush1.bf16.msra.mxu0 %v2209_v19  ;;  %v2212_v15 = vsel %vm2196_vm3, %v2173_v41, %v2175_v18  ;;  %v3747_v3 = vld [vmem:[%s3872_s29 + $0x88] ss:$20 sps:$4 sm:$0xff]  }
 0x1a3   : > { %2673 = vrot.lane.b32.xlu0 %v4531_v26, %s3802_s6  ;;  %2310 = vmatprep.subr.bf16.mxu1 %v2212_v15 }
 0x1a4   : > { %2311 = vmatpush1.bf16.msra.mxu1 %v2211_v24  ;;  %v2181_v44 = vpop.permute.xlu1 %2180 }
 0x1a5   : > { %v2179_v47 = vpop.permute.xlu0 %2178 }
 0x1a6   : > { %2669 = vrot.lane.b32.xlu1 %v3746_v20, %s3802_s6  ;;  %v2214_v22 = vsel %vm2196_vm3, %v2179_v47, %v2181_v44 }
 0x1a7   : > { %2677 = vrot.lane.b32.xlu0 %v3747_v3, %s3802_s6  ;;  %2259 = vmatprep.subr.bf16.mxu0 %v2214_v22 }
 0x1a8   : > { %v2185_v57 = vpop.permute.xlu1 %2184 }
 0x1a9   : > { %v2183_v5 = vpop.permute.xlu0 %2182 }
 0x1aa   : > { %v2215_v26 = vsel %vm2196_vm3, %v2181_v44, %v2183_v5  ;;  %2683 = vrot.lane.b32.xlu1 %v3748_v6, %s3802_s6  ;;  %v2216_v62 = vsel %vm2196_vm3, %v2183_v5, %v2185_v57 }
 0x1ab   : > { %2681 = vrot.lane.b32.xlu0 %v3749_v45, %s3802_s6  ;;  %2312 = vmatprep.subr.bf16.mxu1 %v2216_v62 }
 0x1ac   : > { %2313 = vmatpush1.bf16.msra.mxu1 %v2215_v26  ;;  %v2189_v28 = vpop.permute.xlu1 %2188 }
 0x1ad   : > { %v2177_v48 = vpop.permute.xlu0 %2176 }
 0x1ae   : > { %v2213_v50 = vsel %vm2196_vm3, %v2177_v48, %v2179_v47  ;;  %2687 = vrot.lane.b32.xlu1 %v3750_v35, %s3802_s6 }
 0x1af   : > { %2685 = vrot.lane.b32.xlu0 %v3751_v9, %s3802_s6  ;;  %2260 = vmatpush1.bf16.msra.mxu0 %v2213_v50 }
 0x1b0   : > { %v2193_v31 = vpop.permute.xlu1 %2192 }
 0x1b1   : > { %v2191_v30 = vpop.permute.xlu0 %2190 }
 0x1b2   : > { %2691 = vrot.lane.b32.xlu1 %v3752_v63, %s3802_s6  ;;  %v2218_v32 = vsel %vm2196_vm3, %v2189_v28, %v2191_v30  ;;  %v2219_v42 = vsel %vm2196_vm3, %v2191_v30, %v2193_v31 }
 0x1b3   : > { %2679 = vrot.lane.b32.xlu0 %v3753_v34, %s3802_s6  ;;  %2261 = vmatprep.subr.bf16.mxu0 %v2218_v32 }
 0x1b4   : > { %v2187_v33 = vpop.permute.xlu1 %2186 }
 0x1b5   : > { %v2217_v39 = vsel %vm2196_vm3, %v2187_v33, %v2189_v28  ;;  %v2195_v40 = vpop.permute.xlu0 %2194 }
 0x1b6   : > { %2695 = vrot.lane.b32.xlu1 %v3754_v10, %s3802_s6  ;;  %2262 = vmatpush1.bf16.msra.mxu0 %v2217_v39  ;;  %v2220_v36 = vsel %vm2196_vm3, %v2193_v31, %v2195_v40 }
 0x1b7   : > { %2693 = vrot.lane.b32.xlu0 %v3755_v59, %s3802_s6  ;;  %2314 = vmatprep.subr.bf16.mxu1 %v2220_v36  ;;  %v3700_v59 = vld [vmem:[%s3867_s26 + $0x70] sm:$0xff]  }
 0x1b8   : > { %2315 = vmatpush1.bf16.msra.mxu1 %v2219_v42  ;;  %v2393_v49 = vpop.permute.xlu1 %2392 }
 0x1b9   : > { %v2391_v60 = vpop.permute.xlu0 %2390  ;;  %3380 = vmatmul.mubr.msk.bf16.vlgmr.msra.gmra.mrb[0].mxu0 %vm436_vm0, %v3698_v46 }
 0x1ba   : > { %2689 = vrot.lane.b32.xlu1 %v3756_v51, %s3802_s6  ;;  %v2449_v4 = vsel %vm2196_vm3, %v2391_v60, %v2393_v49  ;;  %2293 = vmatprep.mubr.bf16.mxu0 %v4886_v12 }
 0x1bb   : > { %2697 = vrot.lane.b32.xlu0 %v3757_v21, %s3802_s6  ;;  %2502 = vmatprep.subr.bf16.mxu0 %v2449_v4  ;;  %v3701_v21 = vld [vmem:[%s3867_s26 + $0x78] sm:$0xff]  }
 0x1bc   : > { %v2397_v52 = vpop.permute.xlu1 %2396  ;;  %3382 = vmatmul.mubr.msk.bf16.vlgmr.msra.gmra.mrb[0].mxu1 %vm436_vm0, %v3698_v46 }
 0x1bd   : > { %v2395_v53 = vpop.permute.xlu0 %2394  ;;  %2346 = vmatprep.mubr.bf16.mxu1 %v4886_v12 }
 0x1be   : > { %v2450_v25 = vsel %vm2196_vm3, %v2393_v49, %v2395_v53  ;;  %v2451_v61 = vsel %vm2196_vm3, %v2395_v53, %v2397_v52  ;;  %2887 = vperm.xlu1 %3601, %v2877_v1  }
 0x1bf   : > { %2555 = vmatprep.subr.bf16.mxu1 %v2451_v61  ;;  %2882 = vperm.xlu0 %3600, %v2876_v43  }
 0x1c0   : > { %2556 = vmatpush1.bf16.msra.mxu1 %v2450_v25  ;;  %v2401_v7 = vpop.permute.xlu1 %2400 }
 0x1c1   : > { %v2389_v14 = vpop.permute.xlu0 %2388  ;;  %3381 = vmatmul.mubr.msk.bf16.gmra.mrb[4].mxu0 %vm436_vm0, %v3699_v27 }
 0x1c2   : > { %v2448_v8 = vsel %vm2196_vm3, %v2389_v14, %v2391_v60  ;;  %2534 = vmatprep.mubr.bf16.mxu0 %v4886_v12  ;;  %2892 = vperm.xlu1 %3601, %v2878_v13  }
 0x1c3   : > { %2503 = vmatpush1.bf16.msra.mxu0 %v2448_v8  ;;  %2897 = vperm.xlu0 %3600, %v2879_v54  }
 0x1c4   : > { %v2405_v29 = vpop.permute.xlu1 %2404  ;;  %3383 = vmatmul.mubr.msk.bf16.gmra.mrb[4].mxu1 %vm436_vm0, %v3699_v27 }
 0x1c5   : > { %v2403_v17 = vpop.permute.xlu0 %2402  ;;  %2587 = vmatprep.mubr.bf16.mxu1 %v4886_v12 }
 0x1c6   : > { %v2453_v56 = vsel %vm2196_vm3, %v2401_v7, %v2403_v17  ;;  %v2454_v37 = vsel %vm2196_vm3, %v2403_v17, %v2405_v29 }
 0x1c7   : > { %2504 = vmatprep.subr.bf16.mxu0 %v2453_v56 }
 0x1c8   : > { %v2399_v55 = vpop.permute.xlu1 %2398 }
 0x1c9   : > { %v2452_v0 = vsel %vm2196_vm3, %v2399_v55, %v2401_v7  ;;  %v2407_v58 = vpop.permute.xlu0 %2406 }
 0x1ca   : > { %2505 = vmatpush1.bf16.msra.mxu0 %v2452_v0  ;;  %v2455_v11 = vsel %vm2196_vm3, %v2405_v29, %v2407_v58 }
 0x1cb   : > { %2557 = vmatprep.subr.bf16.mxu1 %v2455_v11 }
 0x1cc   : > { %2558 = vmatpush1.bf16.msra.mxu1 %v2454_v37  ;;  %v2413_v23 = vpop.permute.xlu1 %2412 }
 0x1cd   : > { %v2411_v41 = vpop.permute.xlu0 %2410 }
 0x1ce   : > { %v2457_v38 = vsel %vm2196_vm3, %v2411_v41, %v2413_v23 }
 0x1cf   : > { %2506 = vmatprep.subr.bf16.mxu0 %v2457_v38 }
 0x1d0   : > { %v2417_v16 = vpop.permute.xlu1 %2416 }
 0x1d1   : > { %v2415_v2 = vpop.permute.xlu0 %2414 }
 0x1d2   : > { %v2458_v19 = vsel %vm2196_vm3, %v2413_v23, %v2415_v2  ;;  %v2459_v18 = vsel %vm2196_vm3, %v2415_v2, %v2417_v16 }
 0x1d3   : > { %2559 = vmatprep.subr.bf16.mxu1 %v2459_v18 }
 0x1d4   : > { %2560 = vmatpush1.bf16.msra.mxu1 %v2458_v19  ;;  %v2421_v15 = vpop.permute.xlu1 %2420 }
 0x1d5   : > { %v2409_v24 = vpop.permute.xlu0 %2408 }
 0x1d6   : > { %v2456_v44 = vsel %vm2196_vm3, %v2409_v24, %v2411_v41 }
 0x1d7   : > { %2507 = vmatpush1.bf16.msra.mxu0 %v2456_v44 }
 0x1d8   : > { %v2425_v47 = vpop.permute.xlu1 %2424 }
 0x1d9   : > { %v2423_v20 = vpop.permute.xlu0 %2422 }
 0x1da   : > { %v2461_v22 = vsel %vm2196_vm3, %v2421_v15, %v2423_v20  ;;  %v2462_v6 = vsel %vm2196_vm3, %v2423_v20, %v2425_v47 }
 0x1db   : > { %2508 = vmatprep.subr.bf16.mxu0 %v2461_v22 }
 0x1dc   : > { %v2419_v3 = vpop.permute.xlu1 %2418 }
 0x1dd   : > { %v2460_v57 = vsel %vm2196_vm3, %v2419_v3, %v2421_v15  ;;  %v2427_v5 = vpop.permute.xlu0 %2426 }
 0x1de   : > { %2509 = vmatpush1.bf16.msra.mxu0 %v2460_v57  ;;  %v2463_v26 = vsel %vm2196_vm3, %v2425_v47, %v2427_v5 }
 0x1df   : > { %2561 = vmatprep.subr.bf16.mxu1 %v2463_v26 }
 0x1e0   : > { %2562 = vmatpush1.bf16.msra.mxu1 %v2462_v6  ;;  %v2433_v62 = vpop.permute.xlu1 %2432 }
 0x1e1   : > { %v2431_v45 = vpop.permute.xlu0 %2430 }
 0x1e2   : > { %v2465_v28 = vsel %vm2196_vm3, %v2431_v45, %v2433_v62 }
 0x1e3   : > { %2510 = vmatprep.subr.bf16.mxu0 %v2465_v28 }
 0x1e4   : > { %v2437_v48 = vpop.permute.xlu1 %2436 }
 0x1e5   : > { %v2435_v50 = vpop.permute.xlu0 %2434 }
 0x1e6   : > { %v2466_v35 = vsel %vm2196_vm3, %v2433_v62, %v2435_v50  ;;  %v2467_v9 = vsel %vm2196_vm3, %v2435_v50, %v2437_v48 }
 0x1e7   : > { %2563 = vmatprep.subr.bf16.mxu1 %v2467_v9 }
 0x1e8   : > { %2564 = vmatpush1.bf16.msra.mxu1 %v2466_v35  ;;  %v2441_v31 = vpop.permute.xlu1 %2440 }
 0x1e9   : > { %v2429_v30 = vpop.permute.xlu0 %2428 }
 0x1ea   : > { %v2464_v63 = vsel %vm2196_vm3, %v2429_v30, %v2431_v45 }
 0x1eb   : > { %2511 = vmatpush1.bf16.msra.mxu0 %v2464_v63  ;;  %v3702_v63 = vld [vmem:[%s3867_s26 + $0x80] sm:$0xff]  }
 0x1ec   : > { %v2445_v32 = vpop.permute.xlu1 %2444 }
 0x1ed   : > { %v2443_v34 = vpop.permute.xlu0 %2442 }
 0x1ee   : > { %v2469_v33 = vsel %vm2196_vm3, %v2441_v31, %v2443_v34  ;;  %v2470_v42 = vsel %vm2196_vm3, %v2443_v34, %v2445_v32 }
 0x1ef   : > { %2512 = vmatprep.subr.bf16.mxu0 %v2469_v33  ;;  %v3703_v33 = vld [vmem:[%s3867_s26 + $0x88] sm:$0xff]  }
 0x1f0   : > { %v2439_v39 = vpop.permute.xlu1 %2438 }
 0x1f1   : > { %v2468_v40 = vsel %vm2196_vm3, %v2439_v39, %v2441_v31  ;;  %v2447_v10 = vpop.permute.xlu0 %2446 }
 0x1f2   : > { %2513 = vmatpush1.bf16.msra.mxu0 %v2468_v40  ;;  %v2471_v36 = vsel %vm2196_vm3, %v2445_v32, %v2447_v10 }
 0x1f3   : > { %2565 = vmatprep.subr.bf16.mxu1 %v2471_v36 }
 0x1f4   : > { %2566 = vmatpush1.bf16.msra.mxu1 %v2470_v42  ;;  %v2644_v46 = vpop.permute.xlu1 %2643 }
 0x1f5   : > { %v2642_v49 = vpop.permute.xlu0 %2641  ;;  %3390 = vmatmul.mubr.msk.bf16.vlgmr.msra.gmra.mrb[0].mxu0 %vm436_vm0, %v3700_v59 }
 0x1f6   : > { %v2701_v60 = vsel %vm2699_vm4, %v2642_v49, %v2644_v46  ;;  %2544 = vmatprep.mubr.bf16.mxu0 %v4886_v12 }
 0x1f7   : > { %2754 = vmatprep.subr.bf16.mxu0 %v2701_v60  ;;  %3392 = vmatmul.mubr.msk.bf16.vlgmr.msra.gmra.mrb[0].mxu1 %vm436_vm0, %v3700_v59 }
 0x1f8   : > { %v2648_v51 = vpop.permute.xlu1 %2647  ;;  %2597 = vmatprep.mubr.bf16.mxu1 %v4886_v12 }
 0x1f9   : > { %v2646_v4 = vpop.permute.xlu0 %2645 }
 0x1fa   : > { %v2702_v52 = vsel %vm2699_vm4, %v2644_v46, %v2646_v4  ;;  %v2703_v53 = vsel %vm2699_vm4, %v2646_v4, %v2648_v51 }
 0x1fb   : > { %2807 = vmatprep.subr.bf16.mxu1 %v2703_v53 }
 0x1fc   : > { %2808 = vmatpush1.bf16.msra.mxu1 %v2702_v52  ;;  %v2652_v43 = vpop.permute.xlu1 %2651 }
 0x1fd   : > { %v2640_v1 = vpop.permute.xlu0 %2639  ;;  %3391 = vmatmul.mubr.msk.bf16.gmra.mrb[4].mxu0 %vm436_vm0, %v3701_v21 }
 0x1fe   : > { %v2700_v25 = vsel %vm2699_vm4, %v2640_v1, %v2642_v49  ;;  %2786 = vmatprep.mubr.bf16.mxu0 %v4886_v12 }
 0x1ff   : > { %2755 = vmatpush1.bf16.msra.mxu0 %v2700_v25  ;;  %3393 = vmatmul.mubr.msk.bf16.gmra.mrb[4].mxu1 %vm436_vm0, %v3701_v21 }
 0x200   : > { %v2656_v61 = vpop.permute.xlu1 %2655  ;;  %2839 = vmatprep.mubr.bf16.mxu1 %v4886_v12 }
 0x201   : > { %v2654_v27 = vpop.permute.xlu0 %2653 }
 0x202   : > { %v2705_v13 = vsel %vm2699_vm4, %v2652_v43, %v2654_v27  ;;  %v2706_v29 = vsel %vm2699_vm4, %v2654_v27, %v2656_v61 }
 0x203   : > { %2756 = vmatprep.subr.bf16.mxu0 %v2705_v13 }
 0x204   : > { %v2650_v7 = vpop.permute.xlu1 %2649 }
 0x205   : > { %v2704_v54 = vsel %vm2699_vm4, %v2650_v7, %v2652_v43  ;;  %v2658_v14 = vpop.permute.xlu0 %2657 }
 0x206   : > { %2757 = vmatpush1.bf16.msra.mxu0 %v2704_v54  ;;  %v2707_v8 = vsel %vm2699_vm4, %v2656_v61, %v2658_v14 }
 0x207   : > { %2809 = vmatprep.subr.bf16.mxu1 %v2707_v8 }
 0x208   : > { %2810 = vmatpush1.bf16.msra.mxu1 %v2706_v29  ;;  %v2664_v17 = vpop.permute.xlu1 %2663 }
 0x209   : > { %v2662_v56 = vpop.permute.xlu0 %2661 }
 0x20a   : > { %v2709_v55 = vsel %vm2699_vm4, %v2662_v56, %v2664_v17 }
 0x20b   : > { %2758 = vmatprep.subr.bf16.mxu0 %v2709_v55 }
 0x20c   : > { %v2668_v0 = vpop.permute.xlu1 %2667 }
 0x20d   : > { %v2666_v58 = vpop.permute.xlu0 %2665 }
 0x20e   : > { %v2710_v11 = vsel %vm2699_vm4, %v2664_v17, %v2666_v58  ;;  %v2711_v37 = vsel %vm2699_vm4, %v2666_v58, %v2668_v0 }
 0x20f   : > { %2811 = vmatprep.subr.bf16.mxu1 %v2711_v37 }
 0x210   : > { %2812 = vmatpush1.bf16.msra.mxu1 %v2710_v11  ;;  %v2672_v23 = vpop.permute.xlu1 %2671 }
 0x211   : > { %v2660_v41 = vpop.permute.xlu0 %2659 }
 0x212   : > { %v2708_v38 = vsel %vm2699_vm4, %v2660_v41, %v2662_v56 }
 0x213   : > { %2759 = vmatpush1.bf16.msra.mxu0 %v2708_v38 }
 0x214   : > { %v2676_v16 = vpop.permute.xlu1 %2675 }
 0x215   : > { %v2674_v2 = vpop.permute.xlu0 %2673 }
 0x216   : > { %v2713_v19 = vsel %vm2699_vm4, %v2672_v23, %v2674_v2  ;;  %v2714_v47 = vsel %vm2699_vm4, %v2674_v2, %v2676_v16 }
 0x217   : > { %2760 = vmatprep.subr.bf16.mxu0 %v2713_v19 }
 0x218   : > { %v2670_v18 = vpop.permute.xlu1 %2669 }
 0x219   : > { %v2712_v15 = vsel %vm2699_vm4, %v2670_v18, %v2672_v23  ;;  %v2678_v24 = vpop.permute.xlu0 %2677 }
 0x21a   : > { %2761 = vmatpush1.bf16.msra.mxu0 %v2712_v15  ;;  %v2715_v44 = vsel %vm2699_vm4, %v2676_v16, %v2678_v24 }
 0x21b   : > { %2813 = vmatprep.subr.bf16.mxu1 %v2715_v44 }
 0x21c   : > { %2814 = vmatpush1.bf16.msra.mxu1 %v2714_v47  ;;  %v2684_v20 = vpop.permute.xlu1 %2683 }
 0x21d   : > { %v2682_v22 = vpop.permute.xlu0 %2681 }
 0x21e   : > { %v2717_v3 = vsel %vm2699_vm4, %v2682_v22, %v2684_v20 }
 0x21f   : > { %2762 = vmatprep.subr.bf16.mxu0 %v2717_v3 }
 0x220   : > { %v2688_v57 = vpop.permute.xlu1 %2687 }
 0x221   : > { %v2686_v5 = vpop.permute.xlu0 %2685 }
 0x222   : > { %v2718_v26 = vsel %vm2699_vm4, %v2684_v20, %v2686_v5  ;;  %v2719_v6 = vsel %vm2699_vm4, %v2686_v5, %v2688_v57 }
 0x223   : > { %2815 = vmatprep.subr.bf16.mxu1 %v2719_v6 }
 0x224   : > { %2816 = vmatpush1.bf16.msra.mxu1 %v2718_v26  ;;  %v2692_v62 = vpop.permute.xlu1 %2691 }
 0x225   : > { %v2680_v45 = vpop.permute.xlu0 %2679 }
 0x226   : > { %v2716_v28 = vsel %vm2699_vm4, %v2680_v45, %v2682_v22 }
 0x227   : > { %2763 = vmatpush1.bf16.msra.mxu0 %v2716_v28 }
 0x228   : > { %v2696_v48 = vpop.permute.xlu1 %2695 }
 0x229   : > { %v2694_v50 = vpop.permute.xlu0 %2693 }
 0x22a   : > { %v2721_v35 = vsel %vm2699_vm4, %v2692_v62, %v2694_v50  ;;  %v2722_v34 = vsel %vm2699_vm4, %v2694_v50, %v2696_v48 }
 0x22b   : > { %2764 = vmatprep.subr.bf16.mxu0 %v2721_v35 }
 0x22c   : > { %v2690_v9 = vpop.permute.xlu1 %2689 }
 0x22d   : > { %v2720_v31 = vsel %vm2699_vm4, %v2690_v9, %v2692_v62  ;;  %v2698_v30 = vpop.permute.xlu0 %2697 }
 0x22e   : > { %2765 = vmatpush1.bf16.msra.mxu0 %v2720_v31  ;;  %v2723_v32 = vsel %vm2699_vm4, %v2696_v48, %v2698_v30 }
 0x22f   : > { %2817 = vmatprep.subr.bf16.mxu1 %v2723_v32 }
 0x230   : > { %2818 = vmatpush1.bf16.msra.mxu1 %v2722_v34 }
 0x231   : > { %3400 = vmatmul.mubr.msk.bf16.vlgmr.msra.gmra.mrb[0].mxu0 %vm436_vm0, %v3702_v63 }
 0x232   : > { %2796 = vmatprep.mubr.bf16.mxu0 %v4886_v12 }
 0x233   : > { %3402 = vmatmul.mubr.msk.bf16.vlgmr.msra.gmra.mrb[0].mxu1 %vm436_vm0, %v3702_v63 }
 0x234   : > { %2849 = vmatprep.mubr.bf16.mxu1 %v4886_v12 }
 0x239   : > { %3401 = vmatmul.mubr.msk.bf16.gmra.mrb[4].mxu0 %vm436_vm0, %v3703_v33 }
 0x23b   : > { %3403 = vmatmul.mubr.msk.bf16.gmra.mrb[4].mxu1 %vm436_vm0, %v3703_v33 }
 0x23d   : > { %v2888_v10 = vpop.permute.xlu1 %2887 }
 0x23e   : > { %v2883_v39 = vpop.permute.xlu0 %2882 }
 0x241   : > { %v2893_v14 = vpop.permute.xlu1 %2892 }
 0x242   : > { %v2898_v24 = vpop.permute.xlu0 %2897 }
 0x304   : > { %v2788_v40 = vpop.f32.mrb[0].mxu0 }
 0x305   : > { %v2900_v36 = vadd.f32 %v2883_v39, %v2788_v40  ;;  %v2790_v42 = vpop.f32.mrb[1].mxu0 }
 0x306   : > { %v2901_v59 = vadd.f32 %v2883_v39, %v2790_v42  ;;  %v2841_v46 = vpop.f32.mrb[0].mxu1  ;;  %v2792_v49 = vpop.f32.mrb[2].mxu0 }
 0x307   : > { %vm2916_vm5 = vcmp.ge.f32.partialorder %v2900_v36, 0.0  ;;  %v2932_v60 = vmul.f32 0.1, %v2900_v36  ;;  %v2902_v12 = vadd.f32 %v2883_v39, %v2841_v46  ;;  %v2904_v51 = vadd.f32 %v2888_v10, %v2792_v49  ;;  %v2843_v4 = vpop.f32.mrb[1].mxu1  ;;  %v2794_v21 = vpop.f32.mrb[3].mxu0 }
 0x308   : > { %vm2917_vm6 = vcmp.ge.f32.partialorder %v2901_v59, 0.0  ;;  %v2933_v52 = vmul.f32 0.1, %v2901_v59  ;;  %v2903_v53 = vadd.f32 %v2883_v39, %v2843_v4  ;;  %v2905_v43 = vadd.f32 %v2888_v10, %v2794_v21  ;;  %v2845_v1 = vpop.f32.mrb[2].mxu1 }
 0x309   : > { %v2948_v25 = vsel %vm2916_vm5, %v2900_v36, %v2932_v60  ;;  %vm2918_vm7 = vcmp.ge.f32.partialorder %v2902_v12, 0.0  ;;  %v2934_v61 = vmul.f32 0.1, %v2902_v12  ;;  %vm2920_vm8 = vcmp.ge.f32.partialorder %v2904_v51, 0.0  ;;  %v2847_v27 = vpop.f32.mrb[3].mxu1 }
 0x30a   : > { %v2949_v13 = vsel %vm2917_vm6, %v2901_v59, %v2933_v52  ;;  %v2936_v7 = vmul.f32 0.1, %v2904_v51  ;;  %vm2919_vm9 = vcmp.ge.f32.partialorder %v2903_v53, 0.0  ;;  %v2935_v54 = vmul.f32 0.1, %v2903_v53 }
 0x30b   : > { %v3415_v8 = vpack.c.bf16 %v2949_v13, %v2948_v25  ;;  %v2950_v29 = vsel %vm2918_vm7, %v2902_v12, %v2934_v61  ;;  %vm2921_vm10 = vcmp.ge.f32.partialorder %v2905_v43, 0.0  ;;  %v2937_v17 = vmul.f32 0.1, %v2905_v43 }
 0x30c   : > { %v2952_v56 = vsel %vm2920_vm8, %v2904_v51, %v2936_v7  ;;  %v2951_v55 = vsel %vm2919_vm9, %v2903_v53, %v2935_v54  ;;  %v2906_v0 = vadd.f32 %v2888_v10, %v2845_v1  ;;  %v2907_v58 = vadd.f32 %v2888_v10, %v2847_v27  ;;  %v2798_v11 = vpop.f32.mrb[4].mxu0 }
 0x30d   : > { %3012 = vst [vmem:[%s4841_s22] sm:$0xff] %v3415_v8  ;;  %v3416_v37 = vpack.c.bf16 %v2951_v55, %v2950_v29  ;;  %v2953_v23 = vsel %vm2921_vm10, %v2905_v43, %v2937_v17  ;;  %v2908_v41 = vadd.f32 %v2893_v14, %v2798_v11  ;;  %v2800_v38 = vpop.f32.mrb[5].mxu0 }
 0x30e   : > { %v3417_v16 = vpack.c.bf16 %v2953_v23, %v2952_v56  ;;  %vm2922_vm11 = vcmp.ge.f32.partialorder %v2906_v0, 0.0  ;;  %v2938_v2 = vmul.f32 0.1, %v2906_v0  ;;  %vm2923_vm12 = vcmp.ge.f32.partialorder %v2907_v58, 0.0  ;;  %v2851_v19 = vpop.f32.mrb[4].mxu1  ;;  %v2802_v18 = vpop.f32.mrb[6].mxu0 }
 0x30f   : > { %3013 = vst [vmem:[%s4841_s22 + $0x8] sm:$0xff] %v3416_v37  ;;  %v2939_v15 = vmul.f32 0.1, %v2907_v58  ;;  %vm2924_vm13 = vcmp.ge.f32.partialorder %v2908_v41, 0.0  ;;  %v2940_v44 = vmul.f32 0.1, %v2908_v41  ;;  %v2909_v47 = vadd.f32 %v2893_v14, %v2800_v38 }
 0x310   : > { %v2853_v20 = vpop.f32.mrb[5].mxu1  ;;  %3014 = vst [vmem:[%s4841_s22 + $0x10] sm:$0xff] %v3417_v16  ;;  %v2954_v22 = vsel %vm2922_vm11, %v2906_v0, %v2938_v2  ;;  %v2910_v3 = vadd.f32 %v2893_v14, %v2851_v19  ;;  %v2912_v57 = vadd.f32 %v2898_v24, %v2802_v18  ;;  %v2804_v26 = vpop.f32.mrb[7].mxu0 }
 0x311   : > { %v2911_v5 = vadd.f32 %v2893_v14, %v2853_v20  ;;  %v2855_v6 = vpop.f32.mrb[6].mxu1  ;;  %v2955_v62 = vsel %vm2923_vm12, %v2907_v58, %v2939_v15  ;;  %v2956_v45 = vsel %vm2924_vm13, %v2908_v41, %v2940_v44  ;;  %vm2925_vm14 = vcmp.ge.f32.partialorder %v2909_v47, 0.0 }
 0x312   : > { %v2941_v28 = vmul.f32 0.1, %v2909_v47  ;;  %v2857_v48 = vpop.f32.mrb[7].mxu1  ;;  %v3418_v50 = vpack.c.bf16 %v2955_v62, %v2954_v22  ;;  %vm2926_vm15 = vcmp.ge.f32.partialorder %v2910_v3, 0.0  ;;  %v2942_v35 = vmul.f32 0.1, %v2910_v3 }
 0x313   : > { %vm2928_vm0 = vcmp.ge.f32.partialorder %v2912_v57, 0.0  ;;  %v2944_v31 = vmul.f32 0.1, %v2912_v57  ;;  %vm2927_vm1 = vcmp.ge.f32.partialorder %v2911_v5, 0.0  ;;  %v2943_v30 = vmul.f32 0.1, %v2911_v5 }
 0x314   : > { %v2957_v9 = vsel %vm2925_vm14, %v2909_v47, %v2941_v28  ;;  %3015 = vst [vmem:[%s4841_s22 + $0x18] sm:$0xff] %v3418_v50  ;;  %v2958_v32 = vsel %vm2926_vm15, %v2910_v3, %v2942_v35  ;;  %v2913_v34 = vadd.f32 %v2898_v24, %v2804_v26  ;;  %v2914_v33 = vadd.f32 %v2898_v24, %v2855_v6 }
 0x315   : > { %v3419_v63 = vpack.c.bf16 %v2957_v9, %v2956_v45  ;;  %v2960_v39 = vsel %vm2928_vm0, %v2912_v57, %v2944_v31  ;;  %v2959_v40 = vsel %vm2927_vm1, %v2911_v5, %v2943_v30  ;;  %v2915_v10 = vadd.f32 %v2898_v24, %v2857_v48 }
 0x316   : > { %v3420_v36 = vpack.c.bf16 %v2959_v40, %v2958_v32  ;;  %vm2929_vm2 = vcmp.ge.f32.partialorder %v2913_v34, 0.0  ;;  %v2945_v42 = vmul.f32 0.1, %v2913_v34  ;;  %vm2930_vm3 = vcmp.ge.f32.partialorder %v2914_v33, 0.0 }
 0x317   : > { %3016 = vst [vmem:[%s4841_s22 + $0x20] sm:$0xff] %v3419_v63  ;;  %v2946_v59 = vmul.f32 0.1, %v2914_v33  ;;  %vm2931_vm4 = vcmp.ge.f32.partialorder %v2915_v10, 0.0  ;;  %v2947_v46 = vmul.f32 0.1, %v2915_v10 }
 0x318   : > { %3017 = vst [vmem:[%s4841_s22 + $0x28] sm:$0xff] %v3420_v36  ;;  %v2961_v49 = vsel %vm2929_vm2, %v2913_v34, %v2945_v42 }
 0x319   : > { %v3421_v60 = vpack.c.bf16 %v2961_v49, %v2960_v39  ;;  %v2962_v12 = vsel %vm2930_vm3, %v2914_v33, %v2946_v59  ;;  %v2963_v51 = vsel %vm2931_vm4, %v2915_v10, %v2947_v46 }
 0x31a   : > { %v3422_v4 = vpack.c.bf16 %v2963_v51, %v2962_v12 }
 0x31b   : > { %3018 = vst [vmem:[%s4841_s22 + $0x30] sm:$0xff] %v3421_v60 }
 0x31c   : > { %3019 = vst [vmem:[%s4841_s22 + $0x38] sm:$0xff] %v3422_v4 }
 0x31d PF: > { %s13_s16 = sadd.s32 1, %s3796_s16   ;;  %s4893_s12 = smov %s3788_s14 }
 0x31e   : > { %p10_p7 = scmp.ge.s32.totalorder %s13_s16, 12   ;;  %s4894_s13 = smov %s3792_s15 }
 0x31f   : > { %s4895_s14 = smov %s4898_s17  ;;  %s4896_s15 = smov %s4902_s18 }
 0x320   :  { %12 = sbr.rel (!%p10_p7) target bundleno = 3 (0x3), region = 77 }

// kernel: discriminator_b_forward.12
= control target key start
LH: loop header
LB: loop body
LE: loop exit
PB: predicated region body
PF: predicated region fallthrough
CT: control target
= control target key end

     0   :  { %s1631_s12 = smov 0   ;;  %s1633_s13 = smov 0   ;;  %s1900_s0 = inlined_call_operand.vmem [shape: bf16[2,5,1,96,512], index: 0, kind: input, shape index: {}]   ;;  %s1901_s1 = inlined_call_operand.vmem [shape: bf16[5,3,32,96], index: 1, kind: input, shape index: {}]   ;;  %s1902_s2 = inlined_call_operand.vmem [shape: f32[5,32,1], index: 2, kind: input, shape index: {}]   ;;  %s1903_s3 = inlined_call_operand.vmem [shape: bf16[2,5,32,384], index: 3, kind: output, shape index: {}]  }
   0x1   :  { %s1635_s14 = smov 0   ;;  %s1637_s15 = smov 0  }
   0x2   :  { %s1639_s16 = smov 0  }
   0x3 LB: > { %s22_s17 = sadd.s32 1, %s1598_s14  ;;  %s25_s18 = sadd.s32 1, %s1602_s15  ;;  %s1606_s16 = sphi %s1639_s16, %s13_s16   ;;  %s1602_s15 = sphi %s1637_s15, %s1907_s15   ;;  %s1598_s14 = sphi %s1635_s14, %s1906_s14   ;;  %s1594_s13 = sphi %s1633_s13, %s1905_s13   ;;  %s1590_s12 = sphi %s1631_s12, %s1904_s12  }
   0x4   : > { %p23_p0 = scmp.ge.s32.totalorder %s22_s17, 5  ;;  %p1282_p1 = scmp.ge.s32.totalorder %s1606_s16, 1 }
   0x5   : > { %p177_p2 = scmp.lt.s32.totalorder %s1606_s16, 11 }
   0x6   : > { %s1909_s17 = smov (%p23_p0, %s22_s17), 0  ;;  %s1911_s18 = smov (!%p23_p0, %s25_s18), %s1602_s15 }
   0x7   : > { %p178_p3 = pnand %p1282_p1, %p177_p2  ;;  %p27_p4 = scmp.ge.s32.totalorder %s1911_s18, 2 }
   0x8   : > { %p219_p5 = scmp.lt.s32.totalorder (!%p178_p3), %s1594_s13, 1  ;;  %p221_p6 = scmp.lt.s32.totalorder (!%p178_p3), %s1590_s12, 4  ;;  %v1609_v20 = vmov (!%p178_p3), 0   ;;  %vm496_vm0 = vcmask (!%p178_p3), 785408   ;;  %vm459_vm1 = vcmask (!%p178_p3), 1039360   ;;  %vm882_vm2 = vcmask (!%p178_p3), 1031168  }
   0x9   : > { %s1913_s18 = smov (%p27_p4, %s1911_s18), 0  ;;  %181 = sbr.rel (%p178_p3) target bundleno = 468 (0x1d4), region = 32 }
   0xa   : > { %s1608_s26 = smov (!%p178_p3), 127   ;;  %535 = vmatprep.mubr.bf16.mxu0 (!%p178_p3), %v1609_v20  ;;  %1518 = vset.pattern.permute.xlu0 (!%p178_p3), %v1609_v20  ;;  %s1610_s30 = smov (!%p178_p3), 126  }
   0xb   : > { %1519 = vset.pattern.permute.xlu1 (!%p178_p3), %v1609_v20 }
  0x10   : > { %s1915_s13 = smov (!%p219_p5, %s1594_s13), 1  ;;  %s1917_s12 = smov (!%p221_p6, %s1590_s12), 4 }
  0x11   : > { %s1472_s19 = smul.u32 240, %s1915_s13  ;;  %s1366_s4 = sshll.u32 %s1917_s12, 5 }
  0x12   : > { %s1471_s20 = smul.u32 48, %s1917_s12  ;;  %s237_s7 = scalar_lea.vmem %s1902_s2, %s1366_s4 }
  0x13   : > { %v1039_v26 = vld [vmem:[%s237_s7] sm:$0xff]  ;;  %v1040_v27 = vld [vmem:[%s237_s7 + $0x8] sm:$0xff]  ;;  %v1042_v28 = vld [vmem:[%s237_s7 + $0x18] sm:$0xff]  ;;  %s1473_s8 = smul.u32 12, %s1917_s12 }
  0x14   : > { %s225_s21 = sadd.s32 %s1472_s19, %s1471_s20  ;;  %s1746_s29 = scalar_lea.vmem %s1901_s1, %s1471_s20  ;;  %v1041_v29 = vld [vmem:[%s237_s7 + $0x10] sm:$0xff] }
  0x15   : > { %s1283_s22 = sshll.u32 %s225_s21, 2  ;;  %v1751_v21 = vld [vmem:[%s1746_s29 + $0x10] sm:$0xff]   ;;  %s1474_s9 = smul.u32 60, %s1915_s13 }
  0x16   : > { %s1672_s25 = scalar_lea.vmem %s1900_s0, %s1283_s22  ;;  %1411 = vmatprep.mubr.msk.bf16.mxu1 %vm496_vm0, %v1751_v21 }
  0x17   : > { %v1675_v0 = vld [vmem:[%s1672_s25 + $0x4] ss:$16 sps:$4 sm:$0xff]   ;;  %v1678_v1 = vld [vmem:[%s1672_s25] ss:$16 sps:$4 sm:$0xff]   ;;  %v1523_v2 = vld [vmem:[%s1672_s25 + $0x8] ss:$16 sps:$4 sm:$0xff]   ;;  %s244_s10 = sadd.s32 %s1474_s9, %s1473_s8 }
  0x18   : > { %413 = vrot.lane.b32.xlu0 %v1675_v0, %s1608_s26  ;;  %411 = vrot.lane.b32.xlu1 %v1678_v1, %s1608_s26  ;;  %v1686_v3 = vld [vmem:[%s1672_s25 + $0x24] ss:$16 sps:$4 sm:$0xff]   ;;  %v1527_v4 = vld [vmem:[%s1672_s25 + $0x28] ss:$16 sps:$4 sm:$0xff]   ;;  %s1287_s11 = sshll.u32 %s244_s10, 2 }
  0x19   : > { %v1693_v5 = vld [vmem:[%s1672_s25 + $0x20] ss:$16 sps:$4 sm:$0xff]   ;;  %v1530_v6 = vld [vmem:[%s1672_s25 + $0xc] ss:$16 sps:$4 sm:$0xff]   ;;  %v1700_v7 = vld [vmem:[%s1672_s25 + $0x44] ss:$16 sps:$4 sm:$0xff]   ;;  %s1874_s19 = scalar_lea.vmem %s1903_s3, %s1287_s11 }
  0x1a   : > { %v1533_v8 = vld [vmem:[%s1672_s25 + $0x48] ss:$16 sps:$4 sm:$0xff]   ;;  %v1707_v9 = vld [vmem:[%s1672_s25 + $0x40] ss:$16 sps:$4 sm:$0xff]   ;;  %v1536_v10 = vld [vmem:[%s1672_s25 + $0x2c] ss:$16 sps:$4 sm:$0xff]  }
  0x1b   : > { %v1711_v11 = vld [vmem:[%s1672_s25 + $0x64] ss:$16 sps:$4 sm:$0xff]   ;;  %v1539_v12 = vld [vmem:[%s1672_s25 + $0x68] ss:$16 sps:$4 sm:$0xff]   ;;  %v1721_v13 = vld [vmem:[%s1672_s25 + $0x60] ss:$16 sps:$4 sm:$0xff]  }
  0x1c   : > { %415 = vrot.lane.b32.xlu0 %v1523_v2, %s1608_s26  ;;  %421 = vrot.lane.b32.xlu1 %v1686_v3, %s1608_s26  ;;  %v1542_v14 = vld [vmem:[%s1672_s25 + $0x4c] ss:$16 sps:$4 sm:$0xff]   ;;  %v1728_v15 = vld [vmem:[%s1672_s25 + $0x84] ss:$16 sps:$4 sm:$0xff]  }
  0x1d   : > { %v1545_v16 = vld [vmem:[%s1672_s25 + $0x88] ss:$16 sps:$4 sm:$0xff]   ;;  %v1735_v17 = vld [vmem:[%s1672_s25 + $0x80] ss:$16 sps:$4 sm:$0xff]   ;;  %v1548_v18 = vld [vmem:[%s1672_s25 + $0x6c] ss:$16 sps:$4 sm:$0xff]  }
  0x1e   : > { %v1739_v19 = vld [vmem:[%s1672_s25 + $0xa4] ss:$16 sps:$4 sm:$0xff]   ;;  %v1551_v22 = vld [vmem:[%s1672_s25 + $0xa8] ss:$16 sps:$4 sm:$0xff]   ;;  %v1764_v23 = vld [vmem:[%s1672_s25 + $0xa0] ss:$16 sps:$4 sm:$0xff]  }
  0x1f   : > { %v1554_v24 = vld [vmem:[%s1672_s25 + $0x8c] ss:$16 sps:$4 sm:$0xff]  }
  0x20   : > { %423 = vrot.lane.b32.xlu0 %v1527_v4, %s1608_s26  ;;  %419 = vrot.lane.b32.xlu1 %v1693_v5, %s1608_s26  ;;  %v1555_v25 = vld [vmem:[%s1672_s25 + $0xac] ss:$16 sps:$4 sm:$0xff]  }
  0x24   : > { %417 = vrot.lane.b32.xlu0 %v1530_v6, %s1608_s26  ;;  %429 = vrot.lane.b32.xlu1 %v1700_v7, %s1608_s26 }
  0x28   : > { %431 = vrot.lane.b32.xlu0 %v1533_v8, %s1608_s26  ;;  %427 = vrot.lane.b32.xlu1 %v1707_v9, %s1608_s26 }
  0x2c   : > { %425 = vrot.lane.b32.xlu0 %v1536_v10, %s1608_s26  ;;  %437 = vrot.lane.b32.xlu1 %v1711_v11, %s1608_s26 }
  0x30   : > { %439 = vrot.lane.b32.xlu0 %v1539_v12, %s1608_s26  ;;  %435 = vrot.lane.b32.xlu1 %v1721_v13, %s1608_s26 }
  0x34   : > { %433 = vrot.lane.b32.xlu0 %v1542_v14, %s1608_s26  ;;  %445 = vrot.lane.b32.xlu1 %v1728_v15, %s1608_s26 }
  0x38   : > { %447 = vrot.lane.b32.xlu0 %v1545_v16, %s1608_s26  ;;  %443 = vrot.lane.b32.xlu1 %v1735_v17, %s1608_s26 }
  0x3c   : > { %441 = vrot.lane.b32.xlu0 %v1548_v18, %s1608_s26  ;;  %453 = vrot.lane.b32.xlu1 %v1739_v19, %s1608_s26 }
  0x40   : > { %455 = vrot.lane.b32.xlu0 %v1551_v22, %s1608_s26  ;;  %451 = vrot.lane.b32.xlu1 %v1764_v23, %s1608_s26 }
  0x44   : > { %449 = vrot.lane.b32.xlu0 %v1554_v24, %s1608_s26  ;;  %457 = vrot.lane.b32.xlu1 %v1555_v25, %s1608_s26 }
  0x48   : > { %836 = vrot.lane.b32.xlu0 %v1675_v0, %s1610_s30  ;;  %838 = vrot.lane.b32.xlu1 %v1523_v2, %s1610_s30 }
  0x4c   : > { %834 = vrot.lane.b32.xlu0 %v1678_v1, %s1610_s30  ;;  %844 = vrot.lane.b32.xlu1 %v1686_v3, %s1610_s30 }
  0x50   : > { %846 = vrot.lane.b32.xlu0 %v1527_v4, %s1610_s30  ;;  %842 = vrot.lane.b32.xlu1 %v1693_v5, %s1610_s30 }
  0x54   : > { %840 = vrot.lane.b32.xlu0 %v1530_v6, %s1610_s30  ;;  %852 = vrot.lane.b32.xlu1 %v1700_v7, %s1610_s30 }
  0x58   : > { %854 = vrot.lane.b32.xlu0 %v1533_v8, %s1610_s30  ;;  %850 = vrot.lane.b32.xlu1 %v1707_v9, %s1610_s30 }
  0x5c   : > { %848 = vrot.lane.b32.xlu0 %v1536_v10, %s1610_s30  ;;  %860 = vrot.lane.b32.xlu1 %v1711_v11, %s1610_s30 }
  0x60   : > { %862 = vrot.lane.b32.xlu0 %v1539_v12, %s1610_s30  ;;  %858 = vrot.lane.b32.xlu1 %v1721_v13, %s1610_s30 }
  0x64   : > { %856 = vrot.lane.b32.xlu0 %v1542_v14, %s1610_s30  ;;  %868 = vrot.lane.b32.xlu1 %v1728_v15, %s1610_s30 }
  0x68   : > { %870 = vrot.lane.b32.xlu0 %v1545_v16, %s1610_s30  ;;  %866 = vrot.lane.b32.xlu1 %v1735_v17, %s1610_s30 }
  0x6c   : > { %864 = vrot.lane.b32.xlu0 %v1548_v18, %s1610_s30  ;;  %876 = vrot.lane.b32.xlu1 %v1739_v19, %s1610_s30 }
  0x70   : > { %878 = vrot.lane.b32.xlu0 %v1551_v22, %s1610_s30  ;;  %874 = vrot.lane.b32.xlu1 %v1764_v23, %s1610_s30  ;;  %v1557_v22 = vld [vmem:[%s1672_s25 + $0x8] ss:$16 sps:$4 sm:$0xff]  }
  0x74   : > { %872 = vrot.lane.b32.xlu0 %v1554_v24, %s1610_s30  ;;  %880 = vrot.lane.b32.xlu1 %v1555_v25, %s1610_s30  ;;  %v1558_v24 = vld [vmem:[%s1746_s29 + $0x18] sm:$0xff]  }
  0x78   : > { %1045 = vperm.xlu0 %1518, %v1039_v26   ;;  %1050 = vperm.xlu1 %1519, %v1040_v27  }
  0x7c   : > { %1060 = vperm.xlu0 %1518, %v1042_v28   ;;  %1055 = vperm.xlu1 %1519, %v1041_v29   ;;  %v1562_v29 = vld [vmem:[%s1672_s25 + $0x88] ss:$16 sps:$4 sm:$0xff]  }
  0x8a   : > { %v414_v30 = vpop.permute.xlu0 %413  ;;  %v412_v31 = vpop.permute.xlu1 %411 }
  0x8b   : > { %v460_v35 = vsel %vm459_vm1, %v412_v31, %v414_v30  ;;  %v1564_v31 = vld [vmem:[%s1672_s25 + $0xa8] ss:$16 sps:$4 sm:$0xff]  }
  0x8e   : > { %v416_v32 = vpop.permute.xlu0 %415  ;;  %v422_v33 = vpop.permute.xlu1 %421 }
  0x8f   : > { %v461_v34 = vsel %vm459_vm1, %v414_v30, %v416_v32 }
  0x90   : > { %503 = vmatprep.subr.bf16.mxu0 %v461_v34 }
  0x91   : > { %504 = vmatpush1.bf16.msra.mxu0 %v460_v35  ;;  %v1565_v35 = vld [vmem:[%s1746_s29 + $0x8] sm:$0xff]  }
  0x92   : > { %v424_v36 = vpop.permute.xlu0 %423  ;;  %v420_v37 = vpop.permute.xlu1 %419 }
  0x93   : > { %v464_v38 = vsel %vm459_vm1, %v422_v33, %v424_v36  ;;  %v463_v39 = vsel %vm459_vm1, %v420_v37, %v422_v33 }
  0x94   : > { %505 = vmatprep.subr.bf16.mxu0 %v464_v38 }
  0x95   : > { %506 = vmatpush1.bf16.msra.mxu0 %v463_v39 }
  0x96   : > { %v418_v40 = vpop.permute.xlu0 %417  ;;  %v430_v41 = vpop.permute.xlu1 %429 }
  0x97   : > { %v462_v42 = vsel %vm459_vm1, %v416_v32, %v418_v40 }
  0x98   : > { %1399 = vmatprep.subr.bf16.mxu1 %v462_v42 }
  0x99   : > { %1400 = vmatpush3.bf16.msra.mxu1 %v462_v42 }
  0x9a   : > { %v432_v43 = vpop.permute.xlu0 %431  ;;  %v428_v44 = vpop.permute.xlu1 %427 }
  0x9b   : > { %v467_v45 = vsel %vm459_vm1, %v430_v41, %v432_v43  ;;  %v466_v46 = vsel %vm459_vm1, %v428_v44, %v430_v41 }
  0x9c   : > { %507 = vmatprep.subr.bf16.mxu0 %v467_v45 }
  0x9d   : > { %508 = vmatpush1.bf16.msra.mxu0 %v466_v46 }
  0x9e   : > { %v426_v47 = vpop.permute.xlu0 %425  ;;  %v438_v48 = vpop.permute.xlu1 %437 }
  0x9f   : > { %v465_v49 = vsel %vm459_vm1, %v424_v36, %v426_v47 }
  0xa0   : > { %1401 = vmatprep.subr.bf16.mxu1 %v465_v49 }
  0xa1   : > { %1402 = vmatpush3.bf16.msra.mxu1 %v465_v49 }
  0xa2   : > { %v440_v50 = vpop.permute.xlu0 %439  ;;  %v436_v51 = vpop.permute.xlu1 %435 }
  0xa3   : > { %v470_v52 = vsel %vm459_vm1, %v438_v48, %v440_v50  ;;  %v469_v53 = vsel %vm459_vm1, %v436_v51, %v438_v48 }
  0xa4   : > { %509 = vmatprep.subr.bf16.mxu0 %v470_v52 }
  0xa5   : > { %510 = vmatpush1.bf16.msra.mxu0 %v469_v53 }
  0xa6   : > { %v434_v54 = vpop.permute.xlu0 %433  ;;  %v446_v55 = vpop.permute.xlu1 %445 }
  0xa7   : > { %v468_v56 = vsel %vm459_vm1, %v432_v43, %v434_v54  ;;  %v1566_v43 = vld [vmem:[%s1746_s29 + $0x20] sm:$0xff]  }
  0xa8   : > { %1403 = vmatprep.subr.bf16.mxu1 %v468_v56 }
  0xa9   : > { %1404 = vmatpush3.bf16.msra.mxu1 %v468_v56 }
  0xaa   : > { %v448_v57 = vpop.permute.xlu0 %447  ;;  %v444_v58 = vpop.permute.xlu1 %443 }
  0xab   : > { %v473_v59 = vsel %vm459_vm1, %v446_v55, %v448_v57  ;;  %v472_v60 = vsel %vm459_vm1, %v444_v58, %v446_v55 }
  0xac   : > { %511 = vmatprep.subr.bf16.mxu0 %v473_v59 }
  0xad   : > { %512 = vmatpush1.bf16.msra.mxu0 %v472_v60 }
  0xae   : > { %v442_v61 = vpop.permute.xlu0 %441  ;;  %v454_v62 = vpop.permute.xlu1 %453 }
  0xaf   : > { %v471_v63 = vsel %vm459_vm1, %v440_v50, %v442_v61  ;;  %v1567_v61 = vld [vmem:[%s1746_s29 + $0x28] sm:$0xff]  }
  0xb0   : > { %1405 = vmatprep.subr.bf16.mxu1 %v471_v63 }
  0xb1   : > { %1406 = vmatpush3.bf16.msra.mxu1 %v471_v63 }
  0xb2   : > { %v456_v2 = vpop.permute.xlu0 %455  ;;  %v452_v4 = vpop.permute.xlu1 %451 }
  0xb3   : > { %v476_v6 = vsel %vm459_vm1, %v454_v62, %v456_v2  ;;  %v475_v8 = vsel %vm459_vm1, %v452_v4, %v454_v62 }
  0xb4   : > { %513 = vmatprep.subr.bf16.mxu0 %v476_v6 }
  0xb5   : > { %514 = vmatpush1.bf16.msra.mxu0 %v475_v8 }
  0xb6   : > { %v450_v10 = vpop.permute.xlu0 %449  ;;  %717 = vmatprep.subr.bf16.mxu0 %v1675_v0  ;;  %v458_v12 = vpop.permute.xlu1 %457 }
  0xb7   : > { %v474_v14 = vsel %vm459_vm1, %v448_v57, %v450_v10  ;;  %v477_v16 = vsel %vm459_vm1, %v456_v2, %v458_v12 }
  0xb8   : > { %1407 = vmatprep.subr.bf16.mxu1 %v474_v14  ;;  %1318 = vmatmul.mubr.msk.bf16.vlgmr.msra.gmra.mrb[0].mxu0 %vm496_vm0, %v1751_v21 }
  0xb9   : > { %1408 = vmatpush3.bf16.msra.mxu1 %v474_v14  ;;  %718 = vmatpush1.bf16.msra.mxu0 %v1678_v1  ;;  %v1559_v1 = vld [vmem:[%s1672_s25 + $0x28] ss:$16 sps:$4 sm:$0xff]  }
  0xba   : > { %v837_v18 = vpop.permute.xlu0 %836  ;;  %1409 = vmatprep.subr.bf16.mxu1 %v477_v16  ;;  %719 = vmatprep.subr.bf16.mxu0 %v1686_v3  ;;  %v839_v0 = vpop.permute.xlu1 %838  ;;  %v1563_v3 = vld [vmem:[%s1746_s29] sm:$0xff]  }
  0xbb   : > { %545 = vmatprep.mubr.bf16.mxu0 %v1609_v20 }
  0xbd   : > { %1410 = vmatpush3.bf16.msra.mxu1 %v477_v16  ;;  %720 = vmatpush1.bf16.msra.mxu0 %v1693_v5  ;;  %v1560_v5 = vld [vmem:[%s1672_s25 + $0x48] ss:$16 sps:$4 sm:$0xff]  }
  0xbe   : > { %v835_v21 = vpop.permute.xlu0 %834  ;;  %721 = vmatprep.subr.bf16.mxu0 %v1700_v7  ;;  %1415 = vmatprep.subr.bf16.mxu1 %v1557_v22  ;;  %v845_v25 = vpop.permute.xlu1 %844 }
  0xc0   : > { %1412 = vmatmul.mubr.msk.bf16.vlgmr.msra.gmra.mrb[0].mxu1 %vm496_vm0, %v1558_v24  ;;  %1319 = vmatmul.mubr.msk.bf16.gmra.mrb[4].mxu0 %vm496_vm0, %v1558_v24 }
  0xc1   : > { %722 = vmatpush1.bf16.msra.mxu0 %v1707_v9  ;;  %1416 = vmatpush3.bf16.msra.mxu1 %v1557_v22  ;;  %v1561_v9 = vld [vmem:[%s1672_s25 + $0x68] ss:$16 sps:$4 sm:$0xff]  }
  0xc2   : > { %v847_v26 = vpop.permute.xlu0 %846  ;;  %723 = vmatprep.subr.bf16.mxu0 %v1711_v11  ;;  %1417 = vmatprep.subr.bf16.mxu1 %v1559_v1  ;;  %v843_v27 = vpop.permute.xlu1 %842 }
  0xc3   : > { %749 = vmatprep.mubr.bf16.mxu0 %v1609_v20  ;;  %1427 = vmatprep.mubr.msk.bf16.mxu1 %vm496_vm0, %v1563_v3  ;;  %v886_v34 = vsel %vm882_vm2, %v843_v27, %v845_v25 }
  0xc5   : > { %724 = vmatpush1.bf16.msra.mxu0 %v1721_v13  ;;  %1418 = vmatpush3.bf16.msra.mxu1 %v1559_v1  ;;  %v884_v13 = vsel %vm882_vm2, %v837_v18, %v839_v0 }
  0xc6   : > { %v841_v7 = vpop.permute.xlu0 %840  ;;  %725 = vmatprep.subr.bf16.mxu0 %v1728_v15  ;;  %1419 = vmatprep.subr.bf16.mxu1 %v1560_v5  ;;  %v853_v28 = vpop.permute.xlu1 %852 }
  0xc7   : > { %v885_v37 = vsel %vm882_vm2, %v839_v0, %v841_v7 }
  0xc9   : > { %726 = vmatpush1.bf16.msra.mxu0 %v1735_v17  ;;  %1420 = vmatpush3.bf16.msra.mxu1 %v1560_v5  ;;  %v883_v17 = vsel %vm882_vm2, %v835_v21, %v837_v18 }
  0xca   : > { %v855_v11 = vpop.permute.xlu0 %854  ;;  %727 = vmatprep.subr.bf16.mxu0 %v1739_v19  ;;  %1421 = vmatprep.subr.bf16.mxu1 %v1561_v9  ;;  %v851_v30 = vpop.permute.xlu1 %850  ;;  %v887_v19 = vsel %vm882_vm2, %v845_v25, %v847_v26 }
  0xcb   : > { %v890_v36 = vsel %vm882_vm2, %v853_v28, %v855_v11  ;;  %v889_v40 = vsel %vm882_vm2, %v851_v30, %v853_v28 }
  0xcd   : > { %728 = vmatpush1.bf16.msra.mxu0 %v1764_v23  ;;  %1422 = vmatpush3.bf16.msra.mxu1 %v1561_v9 }
  0xce   : > { %v849_v15 = vpop.permute.xlu0 %848  ;;  %925 = vmatprep.subr.bf16.mxu0 %v884_v13  ;;  %1423 = vmatprep.subr.bf16.mxu1 %v1562_v29  ;;  %v861_v32 = vpop.permute.xlu1 %860 }
  0xcf   : > { %v888_v42 = vsel %vm882_vm2, %v847_v26, %v849_v15 }
  0xd0   : > { %1342 = vmatmul.mubr.msk.bf16.vlgmr.msra.gmra.mrb[0].mxu0 %vm496_vm0, %v1563_v3 }
  0xd1   : > { %1424 = vmatpush3.bf16.msra.mxu1 %v1562_v29  ;;  %926 = vmatpush1.bf16.msra.mxu0 %v883_v17 }
  0xd2   : > { %v863_v33 = vpop.permute.xlu0 %862  ;;  %927 = vmatprep.subr.bf16.mxu0 %v887_v19  ;;  %1425 = vmatprep.subr.bf16.mxu1 %v1564_v31  ;;  %v859_v23 = vpop.permute.xlu1 %858 }
  0xd3   : > { %759 = vmatprep.mubr.bf16.mxu0 %v1609_v20  ;;  %v893_v41 = vsel %vm882_vm2, %v861_v32, %v863_v33  ;;  %v892_v46 = vsel %vm882_vm2, %v859_v23, %v861_v32 }
  0xd5   : > { %1426 = vmatpush3.bf16.msra.mxu1 %v1564_v31  ;;  %928 = vmatpush1.bf16.msra.mxu0 %v886_v34 }
  0xd6   : > { %v857_v38 = vpop.permute.xlu0 %856  ;;  %929 = vmatprep.subr.bf16.mxu0 %v890_v36  ;;  %1431 = vmatprep.subr.bf16.mxu1 %v885_v37  ;;  %v869_v39 = vpop.permute.xlu1 %868 }
  0xd7   : > { %v891_v48 = vsel %vm882_vm2, %v855_v11, %v857_v38 }
  0xd8   : > { %1428 = vmatmul.mubr.msk.bf16.vlgmr.msra.gmra.mrb[0].mxu1 %vm496_vm0, %v1565_v35  ;;  %1343 = vmatmul.mubr.msk.bf16.gmra.mrb[4].mxu0 %vm496_vm0, %v1565_v35 }
  0xd9   : > { %930 = vmatpush1.bf16.msra.mxu0 %v889_v40  ;;  %1432 = vmatpush3.bf16.msra.mxu1 %v885_v37 }
  0xda   : > { %v871_v44 = vpop.permute.xlu0 %870  ;;  %931 = vmatprep.subr.bf16.mxu0 %v893_v41  ;;  %1433 = vmatprep.subr.bf16.mxu1 %v888_v42  ;;  %v867_v45 = vpop.permute.xlu1 %866 }
  0xdb   : > { %957 = vmatprep.mubr.bf16.mxu0 %v1609_v20  ;;  %1443 = vmatprep.mubr.msk.bf16.mxu1 %vm496_vm0, %v1566_v43  ;;  %v896_v47 = vsel %vm882_vm2, %v869_v39, %v871_v44  ;;  %v895_v51 = vsel %vm882_vm2, %v867_v45, %v869_v39 }
  0xdd   : > { %932 = vmatpush1.bf16.msra.mxu0 %v892_v46  ;;  %1434 = vmatpush3.bf16.msra.mxu1 %v888_v42 }
  0xde   : > { %v865_v49 = vpop.permute.xlu0 %864  ;;  %933 = vmatprep.subr.bf16.mxu0 %v896_v47  ;;  %1435 = vmatprep.subr.bf16.mxu1 %v891_v48  ;;  %v877_v50 = vpop.permute.xlu1 %876 }
  0xdf   : > { %v894_v52 = vsel %vm882_vm2, %v863_v33, %v865_v49 }
  0xe1   : > { %934 = vmatpush1.bf16.msra.mxu0 %v895_v51  ;;  %1436 = vmatpush3.bf16.msra.mxu1 %v891_v48 }
  0xe2   : > { %v879_v53 = vpop.permute.xlu0 %878  ;;  %1437 = vmatprep.subr.bf16.mxu1 %v894_v52  ;;  %v875_v54 = vpop.permute.xlu1 %874 }
  0xe3   : > { %v899_v55 = vsel %vm882_vm2, %v877_v50, %v879_v53  ;;  %v898_v56 = vsel %vm882_vm2, %v875_v54, %v877_v50 }
  0xe4   : > { %935 = vmatprep.subr.bf16.mxu0 %v899_v55 }
  0xe5   : > { %936 = vmatpush1.bf16.msra.mxu0 %v898_v56  ;;  %1438 = vmatpush3.bf16.msra.mxu1 %v894_v52 }
  0xe6   : > { %v873_v57 = vpop.permute.xlu0 %872  ;;  %v881_v58 = vpop.permute.xlu1 %880 }
  0xe7   : > { %v897_v59 = vsel %vm882_vm2, %v871_v44, %v873_v57  ;;  %v900_v60 = vsel %vm882_vm2, %v879_v53, %v881_v58 }
  0xe8   : > { %1352 = vmatmul.mubr.msk.bf16.vlgmr.msra.gmra.mrb[0].mxu0 %vm496_vm0, %v1566_v43  ;;  %1439 = vmatprep.subr.bf16.mxu1 %v897_v59 }
  0xe9   : > { %1440 = vmatpush3.bf16.msra.mxu1 %v897_v59  ;;  %967 = vmatprep.mubr.bf16.mxu0 %v1609_v20 }
  0xea   : > { %1441 = vmatprep.subr.bf16.mxu1 %v900_v60 }
  0xed   : > { %1442 = vmatpush3.bf16.msra.mxu1 %v900_v60 }
  0xf0   : > { %1353 = vmatmul.mubr.msk.bf16.gmra.mrb[4].mxu0 %vm496_vm0, %v1567_v61  ;;  %1444 = vmatmul.mubr.msk.bf16.vlgmr.msra.gmra.mrb[0].mxu1 %vm496_vm0, %v1567_v61 }
  0xf7   : > { %v1046_v62 = vpop.permute.xlu0 %1045  ;;  %v1867_v2 = vpop.permute.xlu1 %1050 }
  0xfb   : > { %v1056_v1 = vpop.permute.xlu1 %1055  ;;  %v1061_v19 = vpop.permute.xlu0 %1060 }
 0x1bb   : > { %v959_v63 = vpop.f32.mrb[0].mxu0 }
 0x1bc   : > { %v1063_v4 = vadd.f32 %v1046_v62, %v959_v63  ;;  %v961_v6 = vpop.f32.mrb[1].mxu0 }
 0x1bd   : > { %v1064_v8 = vadd.f32 %v1046_v62, %v961_v6  ;;  %v963_v10 = vpop.f32.mrb[2].mxu0 }
 0x1be   : > { %vm1075_vm3 = vcmp.ge.f32.partialorder %v1063_v4, 0.0  ;;  %v1087_v20 = vmul.f32 0.1, %v1063_v4  ;;  %v1066_v12 = vadd.f32 %v1867_v2, %v963_v10  ;;  %v965_v14 = vpop.f32.mrb[3].mxu0 }
 0x1bf   : > { %vm1076_vm4 = vcmp.ge.f32.partialorder %v1064_v8, 0.0  ;;  %v1088_v16 = vmul.f32 0.1, %v1064_v8  ;;  %v1067_v18 = vadd.f32 %v1867_v2, %v965_v14 }
 0x1c0   : > { %v1099_v22 = vsel %vm1075_vm3, %v1063_v4, %v1087_v20  ;;  %vm1078_vm5 = vcmp.ge.f32.partialorder %v1066_v12, 0.0  ;;  %v1090_v0 = vmul.f32 0.1, %v1066_v12 }
 0x1c1   : > { %v1100_v24 = vsel %vm1076_vm4, %v1064_v8, %v1088_v16  ;;  %vm1079_vm6 = vcmp.ge.f32.partialorder %v1067_v18, 0.0  ;;  %v1091_v21 = vmul.f32 0.1, %v1067_v18 }
 0x1c2   : > { %v1367_v25 = vpack.c.bf16 %v1100_v24, %v1099_v22  ;;  %v1102_v3 = vsel %vm1078_vm5, %v1066_v12, %v1090_v0 }
 0x1c3   : > { %v1103_v26 = vsel %vm1079_vm6, %v1067_v18, %v1091_v21  ;;  %v969_v5 = vpop.f32.mrb[4].mxu0  ;;  %v1445_v27 = vpop.f32.mrb[0].mxu1 }
 0x1c4   : > { %1151 = vst [vmem:[%s1874_s19] sm:$0xff] %v1367_v25  ;;  %v1369_v7 = vpack.c.bf16 %v1103_v26, %v1102_v3  ;;  %v1069_v9 = vadd.f32 %v1056_v1, %v969_v5  ;;  %v1071_v28 = vadd.f32 %v1445_v27, %v1056_v1  ;;  %v971_v11 = vpop.f32.mrb[5].mxu0  ;;  %v1012_v29 = vpop.f32.mrb[1].mxu1 }
 0x1c5   : > { %v1070_v30 = vadd.f32 %v1056_v1, %v971_v11  ;;  %v1065_v13 = vadd.f32 %v1046_v62, %v1012_v29  ;;  %v973_v15 = vpop.f32.mrb[6].mxu0  ;;  %v1446_v31 = vpop.f32.mrb[2].mxu1 }
 0x1c6   : > { %1153 = vst [vmem:[%s1874_s19 + $0xc] sm:$0xff] %v1369_v7  ;;  %vm1081_vm7 = vcmp.ge.f32.partialorder %v1069_v9, 0.0  ;;  %v1093_v32 = vmul.f32 0.1, %v1069_v9  ;;  %vm1083_vm8 = vcmp.ge.f32.partialorder %v1071_v28, 0.0  ;;  %v1072_v36 = vadd.f32 %v1061_v19, %v973_v15  ;;  %v975_v38 = vpop.f32.mrb[7].mxu0 }
 0x1c7   : > { %v1095_v17 = vmul.f32 0.1, %v1071_v28  ;;  %vm1082_vm9 = vcmp.ge.f32.partialorder %v1070_v30, 0.0  ;;  %v1094_v33 = vmul.f32 0.1, %v1070_v30  ;;  %vm1077_vm10 = vcmp.ge.f32.partialorder %v1065_v13, 0.0 }
 0x1c8   : > { %v1089_v23 = vmul.f32 0.1, %v1065_v13  ;;  %v1105_v34 = vsel %vm1081_vm7, %v1069_v9, %v1093_v32  ;;  %v1074_v37 = vadd.f32 %v1446_v31, %v1061_v19  ;;  %v1015_v39 = vpop.f32.mrb[3].mxu1  ;;  %v1073_v43 = vadd.f32 %v1061_v19, %v975_v38 }
 0x1c9   : > { %v1107_v35 = vsel %vm1083_vm8, %v1071_v28, %v1095_v17  ;;  %v1106_v41 = vsel %vm1082_vm9, %v1070_v30, %v1094_v33  ;;  %vm1084_vm11 = vcmp.ge.f32.partialorder %v1072_v36, 0.0  ;;  %v1096_v46 = vmul.f32 0.1, %v1072_v36 }
 0x1ca   : > { %v1372_v40 = vpack.c.bf16 %v1107_v35, %v1107_v35  ;;  %v1101_v42 = vsel %vm1077_vm10, %v1065_v13, %v1089_v23  ;;  %v1371_v44 = vpack.c.bf16 %v1106_v41, %v1105_v34  ;;  %vm1086_vm12 = vcmp.ge.f32.partialorder %v1074_v37, 0.0 }
 0x1cb   : > { %v1368_v45 = vpack.c.bf16 %v1101_v42, %v1101_v42  ;;  %v1098_v47 = vmul.f32 0.1, %v1074_v37  ;;  %vm1085_vm13 = vcmp.ge.f32.partialorder %v1073_v43, 0.0  ;;  %v1097_v48 = vmul.f32 0.1, %v1073_v43 }
 0x1cc   : > { %1156 = vst [vmem:[%s1874_s19 + $0x20] sm:$0xf] %v1372_v40  ;;  %1155 = vst [vmem:[%s1874_s19 + $0x18] sm:$0xff] %v1371_v44  ;;  %v1108_v49 = vsel %vm1084_vm11, %v1072_v36, %v1096_v46  ;;  %v1068_v50 = vadd.f32 %v1867_v2, %v1015_v39 }
 0x1cd   : > { %1152 = vst [vmem:[%s1874_s19 + $0x8] sm:$0xf] %v1368_v45  ;;  %v1110_v51 = vsel %vm1086_vm12, %v1074_v37, %v1098_v47  ;;  %v1109_v52 = vsel %vm1085_vm13, %v1073_v43, %v1097_v48 }
 0x1ce   : > { %v1374_v53 = vpack.c.bf16 %v1110_v51, %v1110_v51  ;;  %v1373_v54 = vpack.c.bf16 %v1109_v52, %v1108_v49  ;;  %vm1080_vm14 = vcmp.ge.f32.partialorder %v1068_v50, 0.0  ;;  %v1092_v55 = vmul.f32 0.1, %v1068_v50 }
 0x1d0   : > { %1158 = vst [vmem:[%s1874_s19 + $0x2c] sm:$0xf] %v1374_v53  ;;  %1157 = vst [vmem:[%s1874_s19 + $0x24] sm:$0xff] %v1373_v54  ;;  %v1104_v56 = vsel %vm1080_vm14, %v1068_v50, %v1092_v55 }
 0x1d1   : > { %v1370_v57 = vpack.c.bf16 %v1104_v56, %v1104_v56 }
 0x1d3   : > { %1154 = vst [vmem:[%s1874_s19 + $0x14] sm:$0xf] %v1370_v57 }
 0x1d4 PF: > { %s13_s16 = sadd.s32 1, %s1606_s16   ;;  %s1904_s12 = smov %s1598_s14 }
 0x1d5   : > { %p10_p7 = scmp.ge.s32.totalorder %s13_s16, 12   ;;  %s1905_s13 = smov %s1602_s15 }
 0x1d6   : > { %s1906_s14 = smov %s1909_s17  ;;  %s1907_s15 = smov %s1913_s18 }
 0x1d7   :  { %12 = sbr.rel (!%p10_p7) target bundleno = 3 (0x3), region = 70 }

// kernel: squeeze.53
= control target key start
LH: loop header
LB: loop body
LE: loop exit
PB: predicated region body
PF: predicated region fallthrough
CT: control target
= control target key end

     0   :  { %vm107_vm0 = vcmask 1047556   ;;  %vm82_vm1 = vcmask 64512   ;;  %s579_s16 = smov 104   ;;  %s580_s17 = smov 112   ;;  %s712_s0 = inlined_call_operand.vmem [shape: bf16[2,520], index: 0, kind: input, shape index: {}]   ;;  %s713_s1 = inlined_call_operand.vmem [shape: bf16[2,1,65,8], index: 1, kind: output, shape index: {}]  }
   0x1   :  { %v490_v0 = vld [vmem:[%s712_s0 + $0x3] sm:$0x1]  ;;  %v491_v1 = vld [vmem:[%s712_s0 + $0x2] sm:$0x1]  ;;  %v492_v2 = vld [vmem:[%s712_s0 + $0x1] sm:$0x1] }
   0x2   :  { %v33_v3 = vunpack.c.l.bf16 %v490_v0  ;;  %v49_v4 = vunpack.c.l.bf16 %v491_v1  ;;  %v64_v5 = vunpack.c.l.bf16 %v492_v2  ;;  %v77_v6 = vld [vmem:[%s712_s0] sm:$0x1]  ;;  %v489_v8 = vld [vmem:[%s712_s0 + $0x4] sm:$0x1]  ;;  %s578_s0 = smov 120   ;;  %s581_s18 = smov 96  }
   0x3   :  { %v78_v7 = vunpack.c.l.bf16 %v77_v6  ;;  %v17_v9 = vunpack.c.l.bf16 %v489_v8  ;;  %s582_s19 = smov 88   ;;  %s583_s20 = smov 80  }
   0x4   :  { %36 = vst [vmem:[#allocation1 + $0x18] sm:$0x3] %v33_v3  ;;  %52 = vst [vmem:[#allocation1 + $0x10] sm:$0x3] %v49_v4  ;;  %s584_s21 = smov 72   ;;  %s585_s22 = smov 64  }
   0x5   :  { %67 = vst [vmem:[#allocation1 + $0x8] sm:$0x3] %v64_v5  ;;  %80 = vst [vmem:[#allocation1] sm:$0x3] %v78_v7  ;;  %s586_s23 = smov 56   ;;  %s587_s24 = smov 48  }
   0x6   :  { %20 = vst [vmem:[#allocation1 + $0x20] sm:$0x3] %v17_v9  ;;  %s588_s25 = smov 40   ;;  %s589_s26 = smov 32  }
   0x7   :  { %s590_s27 = smov 24   ;;  %s591_s28 = smov 16  }
   0x8   :  { %s592_s29 = smov 8  }
   0xb   :  { %v106_v10 = vld.sshfl [vmem:[#allocation1 + $0x10] sm:$0xff pattern:$0x98100000]  }
   0xc   :  { %v104_v11 = vld.sshfl [vmem:[#allocation1] sm:$0xff pattern:$0x99999810]   ;;  %v90_v16 = vld [vmem:[#allocation1 + $0x10] sm:$0x3]  }
   0xd   :  { %v108_v12 = vsel %vm107_vm0, %v106_v10, %v104_v11  ;;  %v100_v13 = vld [vmem:[#allocation1 + $0x20] sm:$0x3]   ;;  %v85_v15 = vld [vmem:[#allocation1 + $0x8] sm:$0x3]   ;;  %v95_v17 = vld [vmem:[#allocation1 + $0x18] sm:$0x3]  }
   0xe   :  { %v81_v14 = vld [vmem:[#allocation1] sm:$0x3]   ;;  %109 = vrot.lane.b32.xlu0 %v108_v12, %s578_s0  ;;  %141 = vrot.lane.b32.xlu1 %v108_v12, %s579_s16  ;;  %103 = vst.msk [vmem:[#allocation0 + $0x40] ss:$72 sm:$0x3] %vm82_vm1, %v100_v13  }
   0xf   :  { %83 = vst.msk [vmem:[#allocation0] ss:$72 sm:$0x3] %vm82_vm1, %v81_v14   ;;  %88 = vst.msk [vmem:[#allocation0 + $0x10] ss:$72 sm:$0x3] %vm82_vm1, %v85_v15  }
  0x10   :  { %93 = vst.msk [vmem:[#allocation0 + $0x20] ss:$72 sm:$0x3] %vm82_vm1, %v90_v16   ;;  %98 = vst.msk [vmem:[#allocation0 + $0x30] ss:$72 sm:$0x3] %vm82_vm1, %v95_v17  }
  0x11   :  { %v216_v18 = vld.sshfl [vmem:[#allocation1] sm:$0xff pattern:$0x88888109]   ;;  %v218_v19 = vld.sshfl [vmem:[#allocation1 + $0x10] sm:$0xff pattern:$0x81099999]  }
  0x12   :  { %125 = vrot.lane.b32.xlu0 %v108_v12, %s580_s17  ;;  %157 = vrot.lane.b32.xlu1 %v108_v12, %s581_s18  ;;  %v220_v20 = vsel %vm107_vm0, %v218_v19, %v216_v18 }
  0x15   :  { %v401_v31 = vld [vmem:[#allocation0 + $0x40] sm:$0xff]  ;;  %v464_v40 = vld [vmem:[#allocation0 + $0x88] sm:$0xff] }
  0x16   :  { %173 = vrot.lane.b32.xlu0 %v108_v12, %s582_s19  ;;  %189 = vrot.lane.b32.xlu1 %v108_v12, %s583_s20 }
  0x1a   :  { %205 = vrot.lane.b32.xlu0 %v108_v12, %s584_s21  ;;  %221 = vrot.lane.b32.xlu1 %v220_v20, %s585_s22 }
  0x1e   :  { %237 = vrot.lane.b32.xlu0 %v220_v20, %s586_s23  ;;  %253 = vrot.lane.b32.xlu1 %v220_v20, %s587_s24 }
  0x22   :  { %269 = vrot.lane.b32.xlu0 %v220_v20, %s588_s25  ;;  %285 = vrot.lane.b32.xlu1 %v220_v20, %s589_s26 }
  0x26   :  { %301 = vrot.lane.b32.xlu0 %v220_v20, %s590_s27  ;;  %317 = vrot.lane.b32.xlu1 %v220_v20, %s591_s28 }
  0x2a   :  { %333 = vrot.lane.b32.xlu0 %v220_v20, %s592_s29 }
  0x80   :  { %v110_v21 = vpop.permute.xlu0 %109   ;;  %v142_v22 = vpop.permute.xlu1 %141  }
  0x81   :  { %113 = vst.msk [vmem:[#allocation0 + $0x1] ss:$72 sm:$0x3] %vm82_vm1, %v110_v21   ;;  %115 = vst.msk [vmem:[#allocation0 - $0x7f] ss:$72 sm:$0xc] %vm82_vm1, %v110_v21  }
  0x82   :  { %117 = vst.msk [vmem:[#allocation0 - $0xff] ss:$72 sm:$0x30] %vm82_vm1, %v110_v21   ;;  %119 = vst.msk [vmem:[#allocation0 - $0x17f] ss:$72 sm:$0xc0] %vm82_vm1, %v110_v21  }
  0x83   :  { %145 = vst.msk [vmem:[#allocation0 + $0x3] ss:$72 sm:$0x3] %vm82_vm1, %v142_v22   ;;  %147 = vst.msk [vmem:[#allocation0 - $0x7d] ss:$72 sm:$0xc] %vm82_vm1, %v142_v22  }
  0x84   :  { %149 = vst.msk [vmem:[#allocation0 - $0xfd] ss:$72 sm:$0x30] %vm82_vm1, %v142_v22   ;;  %151 = vst.msk [vmem:[#allocation0 - $0x17d] ss:$72 sm:$0xc0] %vm82_vm1, %v142_v22   ;;  %v126_v23 = vpop.permute.xlu0 %125   ;;  %v158_v24 = vpop.permute.xlu1 %157  }
  0x85   :  { %129 = vst.msk [vmem:[#allocation0 + $0x2] ss:$72 sm:$0x3] %vm82_vm1, %v126_v23   ;;  %131 = vst.msk [vmem:[#allocation0 - $0x7e] ss:$72 sm:$0xc] %vm82_vm1, %v126_v23  }
  0x86   :  { %133 = vst.msk [vmem:[#allocation0 - $0xfe] ss:$72 sm:$0x30] %vm82_vm1, %v126_v23   ;;  %135 = vst.msk [vmem:[#allocation0 - $0x17e] ss:$72 sm:$0xc0] %vm82_vm1, %v126_v23  }
  0x87   :  { %161 = vst.msk [vmem:[#allocation0 + $0x4] ss:$72 sm:$0x3] %vm82_vm1, %v158_v24   ;;  %163 = vst.msk [vmem:[#allocation0 - $0x7c] ss:$72 sm:$0xc] %vm82_vm1, %v158_v24  }
  0x88   :  { %165 = vst.msk [vmem:[#allocation0 - $0xfc] ss:$72 sm:$0x30] %vm82_vm1, %v158_v24   ;;  %167 = vst.msk [vmem:[#allocation0 - $0x17c] ss:$72 sm:$0xc0] %vm82_vm1, %v158_v24   ;;  %v174_v25 = vpop.permute.xlu0 %173   ;;  %v190_v26 = vpop.permute.xlu1 %189  }
  0x89   :  { %177 = vst.msk [vmem:[#allocation0 + $0x5] ss:$72 sm:$0x3] %vm82_vm1, %v174_v25   ;;  %179 = vst.msk [vmem:[#allocation0 - $0x7b] ss:$72 sm:$0xc] %vm82_vm1, %v174_v25  }
  0x8a   :  { %181 = vst.msk [vmem:[#allocation0 - $0xfb] ss:$72 sm:$0x30] %vm82_vm1, %v174_v25   ;;  %183 = vst.msk [vmem:[#allocation0 - $0x17b] ss:$72 sm:$0xc0] %vm82_vm1, %v174_v25  }
  0x8b   :  { %193 = vst.msk [vmem:[#allocation0 + $0x6] ss:$72 sm:$0x3] %vm82_vm1, %v190_v26   ;;  %195 = vst.msk [vmem:[#allocation0 - $0x7a] ss:$72 sm:$0xc] %vm82_vm1, %v190_v26  }
  0x8c   :  { %197 = vst.msk [vmem:[#allocation0 - $0xfa] ss:$72 sm:$0x30] %vm82_vm1, %v190_v26   ;;  %199 = vst.msk [vmem:[#allocation0 - $0x17a] ss:$72 sm:$0xc0] %vm82_vm1, %v190_v26   ;;  %v206_v27 = vpop.permute.xlu0 %205   ;;  %v222_v28 = vpop.permute.xlu1 %221  }
  0x8d   :  { %209 = vst.msk [vmem:[#allocation0 + $0x7] ss:$72 sm:$0x3] %vm82_vm1, %v206_v27   ;;  %211 = vst.msk [vmem:[#allocation0 - $0x79] ss:$72 sm:$0xc] %vm82_vm1, %v206_v27  }
  0x8e   :  { %213 = vst.msk [vmem:[#allocation0 - $0xf9] ss:$72 sm:$0x30] %vm82_vm1, %v206_v27   ;;  %215 = vst.msk [vmem:[#allocation0 - $0x179] ss:$72 sm:$0xc0] %vm82_vm1, %v206_v27  }
  0x8f   :  { %225 = vst.msk [vmem:[#allocation0 + $0x60] ss:$-88 sm:$0x3] %vm82_vm1, %v222_v28   ;;  %227 = vst.msk [vmem:[#allocation0 + $0xc0] ss:$-56 sm:$0xc] %vm82_vm1, %v222_v28  }
  0x90   :  { %229 = vst.msk [vmem:[#allocation0 + $0x1e0] ss:$-88 sm:$0x30] %vm82_vm1, %v222_v28   ;;  %231 = vst.msk [vmem:[#allocation0 + $0x1c0] ss:$-56 sm:$0xc0] %vm82_vm1, %v222_v28   ;;  %v238_v29 = vpop.permute.xlu0 %237   ;;  %v254_v30 = vpop.permute.xlu1 %253  }
  0x91   :  { %241 = vst.msk [vmem:[#allocation0 + $0x61] ss:$-88 sm:$0x3] %vm82_vm1, %v238_v29   ;;  %243 = vst.msk [vmem:[#allocation0 + $0xc1] ss:$-56 sm:$0xc] %vm82_vm1, %v238_v29  }
  0x92   :  { %245 = vst.msk [vmem:[#allocation0 + $0x1e1] ss:$-88 sm:$0x30] %vm82_vm1, %v238_v29   ;;  %247 = vst.msk [vmem:[#allocation0 + $0x1c1] ss:$-56 sm:$0xc0] %vm82_vm1, %v238_v29  }
  0x93   :  { %257 = vst.msk [vmem:[#allocation0 + $0x62] ss:$-88 sm:$0x3] %vm82_vm1, %v254_v30   ;;  %259 = vst.msk [vmem:[#allocation0 + $0xc2] ss:$-56 sm:$0xc] %vm82_vm1, %v254_v30  }
  0x94   :  { %261 = vst.msk [vmem:[#allocation0 + $0x1e2] ss:$-88 sm:$0x30] %vm82_vm1, %v254_v30   ;;  %263 = vst.msk [vmem:[#allocation0 + $0x1c2] ss:$-56 sm:$0xc0] %vm82_vm1, %v254_v30   ;;  %v270_v32 = vpop.permute.xlu0 %269   ;;  %v286_v33 = vpop.permute.xlu1 %285  }
  0x95   :  { %273 = vst.msk [vmem:[#allocation0 + $0x63] ss:$-88 sm:$0x3] %vm82_vm1, %v270_v32   ;;  %275 = vst.msk [vmem:[#allocation0 + $0xc3] ss:$-56 sm:$0xc] %vm82_vm1, %v270_v32  }
  0x96   :  { %277 = vst.msk [vmem:[#allocation0 + $0x1e3] ss:$-88 sm:$0x30] %vm82_vm1, %v270_v32   ;;  %279 = vst.msk [vmem:[#allocation0 + $0x1c3] ss:$-56 sm:$0xc0] %vm82_vm1, %v270_v32  }
  0x97   :  { %289 = vst.msk [vmem:[#allocation0 + $0x64] ss:$-88 sm:$0x3] %vm82_vm1, %v286_v33   ;;  %291 = vst.msk [vmem:[#allocation0 + $0xc4] ss:$-56 sm:$0xc] %vm82_vm1, %v286_v33  }
  0x98   :  { %293 = vst.msk [vmem:[#allocation0 + $0x1e4] ss:$-88 sm:$0x30] %vm82_vm1, %v286_v33   ;;  %295 = vst.msk [vmem:[#allocation0 + $0x1c4] ss:$-56 sm:$0xc0] %vm82_vm1, %v286_v33   ;;  %v302_v36 = vpop.permute.xlu0 %301   ;;  %v318_v37 = vpop.permute.xlu1 %317  }
  0x99   :  { %v408_v34 = vld [vmem:[#allocation0 + $0x48] sm:$0xff]  ;;  %305 = vst.msk [vmem:[#allocation0 + $0x65] ss:$-88 sm:$0x3] %vm82_vm1, %v302_v36   ;;  %v348_v39 = vld [vmem:[#allocation0] sm:$0xff]  ;;  %v359_v41 = vld [vmem:[#allocation0 + $0x10] sm:$0xff] }
  0x9a   :  { %v533_v35 = vpack.c.bf16 %v408_v34, %v401_v31  ;;  %307 = vst.msk [vmem:[#allocation0 + $0xc5] ss:$-56 sm:$0xc] %vm82_vm1, %v302_v36   ;;  %309 = vst.msk [vmem:[#allocation0 + $0x1e5] ss:$-88 sm:$0x30] %vm82_vm1, %v302_v36  }
  0x9b   :  { %311 = vst.msk [vmem:[#allocation0 + $0x1c5] ss:$-56 sm:$0xc0] %vm82_vm1, %v302_v36   ;;  %321 = vst.msk [vmem:[#allocation0 + $0x66] ss:$-88 sm:$0x3] %vm82_vm1, %v318_v37  }
  0x9c   :  { %558 = vst [vmem:[%s713_s1 + $0x20] sm:$0xff] %v533_v35   ;;  %323 = vst.msk [vmem:[#allocation0 + $0xc6] ss:$-56 sm:$0xc] %vm82_vm1, %v318_v37   ;;  %v334_v38 = vpop.permute.xlu0 %333   ;;  %v373_v42 = vld [vmem:[#allocation0 + $0x20] sm:$0xff]  ;;  %v422_v43 = vld [vmem:[#allocation0 + $0x58] sm:$0xff] }
  0x9d   :  { %325 = vst.msk [vmem:[#allocation0 + $0x1e6] ss:$-88 sm:$0x30] %vm82_vm1, %v318_v37   ;;  %327 = vst.msk [vmem:[#allocation0 + $0x1c6] ss:$-56 sm:$0xc0] %vm82_vm1, %v318_v37  }
  0x9e   :  { %337 = vst.msk [vmem:[#allocation0 + $0x67] ss:$-88 sm:$0x3] %vm82_vm1, %v334_v38   ;;  %339 = vst.msk [vmem:[#allocation0 + $0xc7] ss:$-56 sm:$0xc] %vm82_vm1, %v334_v38  }
  0x9f   :  { %341 = vst.msk [vmem:[#allocation0 + $0x1e7] ss:$-88 sm:$0x30] %vm82_vm1, %v334_v38   ;;  %343 = vst.msk [vmem:[#allocation0 + $0x1c7] ss:$-56 sm:$0xc0] %vm82_vm1, %v334_v38  }
  0xa0   :  { %v387_v44 = vld [vmem:[#allocation0 + $0x30] sm:$0xff]  ;;  %v450_v45 = vld [vmem:[#allocation0 + $0x78] sm:$0xff]  ;;  %v436_v55 = vld [vmem:[#allocation0 + $0x68] sm:$0xff] }
  0xa5   :  { %v353_v48 = vld [vmem:[#allocation0 + $0x8] sm:$0xff]  ;;  %v366_v52 = vld [vmem:[#allocation0 + $0x18] sm:$0xff]  ;;  %v415_v54 = vld [vmem:[#allocation0 + $0x50] sm:$0xff] }
  0xa6   :  { %v394_v46 = vld [vmem:[#allocation0 + $0x38] sm:$0xff]  ;;  %v443_v47 = vld [vmem:[#allocation0 + $0x70] sm:$0xff]  ;;  %v513_v51 = vpack.c.bf16 %v353_v48, %v348_v39  ;;  %v380_v53 = vld [vmem:[#allocation0 + $0x28] sm:$0xff]  ;;  %v518_v56 = vpack.c.bf16 %v366_v52, %v359_v41  ;;  %v538_v58 = vpack.c.bf16 %v422_v43, %v415_v54 }
  0xa7   :  { %v528_v49 = vpack.c.bf16 %v394_v46, %v387_v44  ;;  %v548_v50 = vpack.c.bf16 %v450_v45, %v443_v47  ;;  %v523_v57 = vpack.c.bf16 %v380_v53, %v373_v42  ;;  %v429_v59 = vld [vmem:[#allocation0 + $0x60] sm:$0xff] }
  0xa8   :  { %v457_v60 = vld [vmem:[#allocation0 + $0x80] sm:$0xff]  ;;  %514 = vst [vmem:[%s713_s1] sm:$0xff] %v513_v51   ;;  %v543_v61 = vpack.c.bf16 %v436_v55, %v429_v59  ;;  %555 = vst [vmem:[%s713_s1 + $0x8] sm:$0xff] %v518_v56  }
  0xa9   :  { %557 = vst [vmem:[%s713_s1 + $0x18] sm:$0xff] %v528_v49   ;;  %561 = vst [vmem:[%s713_s1 + $0x38] sm:$0xff] %v548_v50   ;;  %v553_v62 = vpack.c.bf16 %v464_v40, %v457_v60 }
  0xaa   :  { %556 = vst [vmem:[%s713_s1 + $0x10] sm:$0xff] %v523_v57   ;;  %559 = vst [vmem:[%s713_s1 + $0x28] sm:$0xff] %v538_v58  }
  0xab   :  { %560 = vst [vmem:[%s713_s1 + $0x30] sm:$0xff] %v543_v61   ;;  %562 = vst [vmem:[%s713_s1 + $0x40] sm:$0xff] %v553_v62  }

// kernel: discriminator_b_forward.13
= control target key start
LH: loop header
LB: loop body
LE: loop exit
PB: predicated region body
PF: predicated region fallthrough
CT: control target
= control target key end

     0   :  { %s1768_s14 = smov 0   ;;  %s1770_s15 = smov 0   ;;  %s2247_s0 = inlined_call_operand.vmem [shape: bf16[2,1,1,96,768], index: 0, kind: input, shape index: {}]   ;;  %s2248_s1 = inlined_call_operand.vmem [shape: bf16[1,3,1,96], index: 1, kind: input, shape index: {}]   ;;  %s2249_s2 = inlined_call_operand.<no memory space> [shape: f32[1,1,1], index: 2, kind: input, shape index: {}]   ;;  %s2250_s3 = inlined_call_operand.vmem [shape: bf16[2,1,1,640], index: 3, kind: output, shape index: {}]  }
   0x1   :  { %v8_v0 = vstv %s2249_s2  ;;  %s1772_s16 = smov 0  }
   0x2   :  { %9 = vst [vmem:[#allocation2] sm:$0x1] %v8_v0 }
   0x3 LB: > { %s27_s2 = sadd.s32 1, %s1733_s15  ;;  %p1470_p0 = scmp.ge.s32.totalorder %s1737_s16, 1  ;;  %s1737_s16 = sphi %s1772_s16, %s15_s16   ;;  %s1733_s15 = sphi %s1770_s15, %s2258_s15   ;;  %s1729_s14 = sphi %s1768_s14, %s2257_s14  }
   0x4   : > { %p29_p1 = scmp.ge.s32.totalorder %s27_s2, 2  ;;  %p176_p2 = scmp.lt.s32.totalorder %s1737_s16, 3 }
   0x6   : > { %s2260_s2 = smov (%p29_p1, %s27_s2), 0  ;;  %p177_p3 = pnand %p1470_p0, %p176_p2 }
   0x7   : > { %p214_p4 = scmp.lt.s32.totalorder (!%p177_p3), %s1729_s14, 1  ;;  %s1739_s21 = smov (!%p177_p3), 127   ;;  %v1740_v18 = vmov (!%p177_p3), 0   ;;  %vm530_vm0 = vcmask (!%p177_p3), 1039360   ;;  %vm591_vm1 = vcmask (!%p177_p3), 785408   ;;  %vm1743_vm2 = vmmov (!%p177_p3), 0  }
   0x8   : > { %180 = sbr.rel (%p177_p3) target bundleno = 509 (0x1fd), region = 32  ;;  %627 = vmatprep.mubr.bf16.mxu0 (!%p177_p3), %v1740_v18  ;;  %668 = vmatprep.mubr.bf16.mxu1 (!%p177_p3), %v1740_v18  ;;  %s1741_s22 = smov (!%p177_p3), 126   ;;  %vm1072_vm3 = vcmask (!%p177_p3), 1031168   ;;  %vm1328_vm4 = vcmask (!%p177_p3), 1040384   ;;  %vm1329_vm5 = vsmask.f32 (!%p177_p3), 256 }
   0x9   : > { %1654 = vset.pattern.permute.xlu0 (!%p177_p3), %v1740_v18  ;;  %v1263_v61 = vld [vmem:[#allocation2] sm:$0x1] (!%p177_p3)  ;;  %vm1331_vm6 = vcmask (!%p177_p3), 1041409   ;;  %vm1332_vm7 = vsmask.f32 (!%p177_p3), 1280  ;;  %vm2211_vm8 = vmand (!%p177_p3), %vm1328_vm4, %vm1329_vm5  ;;  %vm1335_vm10 = vcmask (!%p177_p3), 1042434  }
   0xa   : > { %vm2215_vm9 = vmand (!%p177_p3), %vm1331_vm6, %vm1332_vm7  ;;  %vm1336_vm11 = vsmask.f32 (!%p177_p3), 2304  ;;  %vm1339_vm14 = vcmask (!%p177_p3), 1043459   ;;  %vm1340_vm15 = vsmask.f32 (!%p177_p3), 3328 }
   0xb   : > { %vm1334_vm12 = vmor (!%p177_p3), %vm2215_vm9, %vm2211_vm8 }
   0xc   : > { %vm1337_vm13 = vmand (!%p177_p3), %vm1335_vm10, %vm1336_vm11 }
   0xf   : > { %s2262_s14 = smov (!%p214_p4, %s1729_s14), 1 }
  0x10   : > { %s1622_s17 = smul.u32 288, %s2262_s14 }
  0x11   : > { %s1623_s29 = smul.u32 5, %s2262_s14 }
  0x12   : > { %s1792_s20 = scalar_lea.vmem %s2247_s0, %s1622_s17 }
  0x13   : > { %v1795_v1 = vld [vmem:[%s1792_s20 + $0x4] ss:$24 sps:$4 sm:$0xff]   ;;  %v1798_v2 = vld [vmem:[%s1792_s20] ss:$24 sps:$4 sm:$0xff]   ;;  %v1808_v4 = vld [vmem:[%s1792_s20 + $0x34] ss:$24 sps:$4 sm:$0xff]   ;;  %s237_s5 = scalar_lea.vmem %s2250_s3, %s1623_s29 }
  0x14   : > { %460 = vrot.lane.b32.xlu0 %v1795_v1, %s1739_s21  ;;  %v1803_v3 = vld [vmem:[%s1792_s20 + $0x8] ss:$24 sps:$4 sm:$0xff]   ;;  %458 = vrot.lane.b32.xlu1 %v1798_v2, %s1739_s21  ;;  %v1813_v5 = vld [vmem:[%s1792_s20 + $0x38] ss:$24 sps:$4 sm:$0xff]  }
  0x15   : > { %v1818_v6 = vld [vmem:[%s1792_s20 + $0x30] ss:$24 sps:$4 sm:$0xff]   ;;  %v1823_v7 = vld [vmem:[%s1792_s20 + $0x64] ss:$24 sps:$4 sm:$0xff]   ;;  %v1833_v9 = vld [vmem:[%s1792_s20 + $0x60] ss:$24 sps:$4 sm:$0xff]  }
  0x16   : > { %v1828_v8 = vld [vmem:[%s1792_s20 + $0x68] ss:$24 sps:$4 sm:$0xff]   ;;  %v1838_v10 = vld [vmem:[%s1792_s20 + $0x94] ss:$24 sps:$4 sm:$0xff]   ;;  %v1843_v11 = vld [vmem:[%s1792_s20 + $0x98] ss:$24 sps:$4 sm:$0xff]  }
  0x17   : > { %v1848_v12 = vld [vmem:[%s1792_s20 + $0x90] ss:$24 sps:$4 sm:$0xff]   ;;  %v1853_v13 = vld [vmem:[%s1792_s20 + $0xc4] ss:$24 sps:$4 sm:$0xff]   ;;  %v1861_v15 = vld [vmem:[%s1792_s20 + $0xc0] ss:$24 sps:$4 sm:$0xff]  }
  0x18   : > { %462 = vrot.lane.b32.xlu0 %v1803_v3, %s1739_s21  ;;  %472 = vrot.lane.b32.xlu1 %v1808_v4, %s1739_s21  ;;  %v1858_v14 = vld [vmem:[%s1792_s20 + $0xc8] ss:$24 sps:$4 sm:$0xff]   ;;  %v1864_v16 = vld [vmem:[%s1792_s20 + $0xf4] ss:$24 sps:$4 sm:$0xff]  }
  0x19   : > { %v1873_v17 = vld [vmem:[%s1792_s20 + $0xf8] ss:$24 sps:$4 sm:$0xff]   ;;  %v1879_v19 = vld [vmem:[%s1792_s20 + $0xc] ss:$24 sps:$4 sm:$0xff]   ;;  %v1896_v23 = vld [vmem:[%s1792_s20 + $0x3c] ss:$24 sps:$4 sm:$0xff]  }
  0x1a   : > { %v1685_v20 = vld [vmem:[%s1792_s20 + $0x10] ss:$24 sps:$4 sm:$0xff]   ;;  %v1688_v22 = vld [vmem:[%s1792_s20 + $0x14] ss:$24 sps:$4 sm:$0xff]   ;;  %v1690_v24 = vld [vmem:[%s1792_s20 + $0x40] ss:$24 sps:$4 sm:$0xff]  }
  0x1b   : > { %v1889_v21 = vld [vmem:[%s1792_s20 + $0xf0] ss:$24 sps:$4 sm:$0xff]   ;;  %v1692_v25 = vld [vmem:[%s1792_s20 + $0x44] ss:$24 sps:$4 sm:$0xff]   ;;  %v1696_v28 = vld [vmem:[%s1792_s20 + $0x74] ss:$24 sps:$4 sm:$0xff]  }
  0x1c   : > { %474 = vrot.lane.b32.xlu0 %v1813_v5, %s1739_s21  ;;  %470 = vrot.lane.b32.xlu1 %v1818_v6, %s1739_s21  ;;  %v1905_v26 = vld [vmem:[%s1792_s20 + $0x6c] ss:$24 sps:$4 sm:$0xff]   ;;  %v1694_v27 = vld [vmem:[%s1792_s20 + $0x70] ss:$24 sps:$4 sm:$0xff]  }
  0x1d   : > { %v1914_v29 = vld [vmem:[%s1792_s20 + $0x9c] ss:$24 sps:$4 sm:$0xff]   ;;  %v1698_v30 = vld [vmem:[%s1792_s20 + $0xa0] ss:$24 sps:$4 sm:$0xff]   ;;  %v1925_v32 = vld [vmem:[%s1792_s20 + $0xcc] ss:$24 sps:$4 sm:$0xff]  }
  0x1e   : > { %v1921_v31 = vld [vmem:[%s1792_s20 + $0xa4] ss:$24 sps:$4 sm:$0xff]   ;;  %v1930_v33 = vld [vmem:[%s1792_s20 + $0xd0] ss:$24 sps:$4 sm:$0xff]   ;;  %v1935_v34 = vld [vmem:[%s1792_s20 + $0xd4] ss:$24 sps:$4 sm:$0xff]  }
  0x1f   : > { %v1940_v35 = vld [vmem:[%s1792_s20 + $0xfc] ss:$24 sps:$4 sm:$0xff]   ;;  %v1945_v36 = vld [vmem:[%s1792_s20 + $0x100] ss:$24 sps:$4 sm:$0xff]  }
  0x20   : > { %484 = vrot.lane.b32.xlu0 %v1823_v7, %s1739_s21  ;;  %486 = vrot.lane.b32.xlu1 %v1828_v8, %s1739_s21  ;;  %v1950_v37 = vld [vmem:[%s1792_s20 + $0x104] ss:$24 sps:$4 sm:$0xff]  }
  0x24   : > { %482 = vrot.lane.b32.xlu0 %v1833_v9, %s1739_s21  ;;  %496 = vrot.lane.b32.xlu1 %v1838_v10, %s1739_s21 }
  0x28   : > { %498 = vrot.lane.b32.xlu0 %v1843_v11, %s1739_s21  ;;  %494 = vrot.lane.b32.xlu1 %v1848_v12, %s1739_s21 }
  0x2c   : > { %508 = vrot.lane.b32.xlu0 %v1853_v13, %s1739_s21  ;;  %510 = vrot.lane.b32.xlu1 %v1858_v14, %s1739_s21 }
  0x30   : > { %506 = vrot.lane.b32.xlu0 %v1861_v15, %s1739_s21  ;;  %520 = vrot.lane.b32.xlu1 %v1864_v16, %s1739_s21 }
  0x34   : > { %522 = vrot.lane.b32.xlu0 %v1873_v17, %s1739_s21  ;;  %464 = vrot.lane.b32.xlu1 %v1879_v19, %s1739_s21 }
  0x38   : > { %466 = vrot.lane.b32.xlu0 %v1685_v20, %s1739_s21  ;;  %518 = vrot.lane.b32.xlu1 %v1889_v21, %s1739_s21 }
  0x3c   : > { %468 = vrot.lane.b32.xlu0 %v1688_v22, %s1739_s21  ;;  %476 = vrot.lane.b32.xlu1 %v1896_v23, %s1739_s21 }
  0x40   : > { %478 = vrot.lane.b32.xlu0 %v1690_v24, %s1739_s21  ;;  %480 = vrot.lane.b32.xlu1 %v1692_v25, %s1739_s21 }
  0x44   : > { %488 = vrot.lane.b32.xlu0 %v1905_v26, %s1739_s21  ;;  %490 = vrot.lane.b32.xlu1 %v1694_v27, %s1739_s21 }
  0x48   : > { %492 = vrot.lane.b32.xlu0 %v1696_v28, %s1739_s21  ;;  %500 = vrot.lane.b32.xlu1 %v1914_v29, %s1739_s21 }
  0x4c   : > { %502 = vrot.lane.b32.xlu0 %v1698_v30, %s1739_s21  ;;  %504 = vrot.lane.b32.xlu1 %v1921_v31, %s1739_s21 }
  0x50   : > { %512 = vrot.lane.b32.xlu0 %v1925_v32, %s1739_s21  ;;  %514 = vrot.lane.b32.xlu1 %v1930_v33, %s1739_s21 }
  0x54   : > { %516 = vrot.lane.b32.xlu0 %v1935_v34, %s1739_s21  ;;  %524 = vrot.lane.b32.xlu1 %v1940_v35, %s1739_s21 }
  0x58   : > { %526 = vrot.lane.b32.xlu0 %v1945_v36, %s1739_s21  ;;  %528 = vrot.lane.b32.xlu1 %v1950_v37, %s1739_s21 }
  0x5c   : > { %1002 = vrot.lane.b32.xlu0 %v1795_v1, %s1741_s22  ;;  %1004 = vrot.lane.b32.xlu1 %v1803_v3, %s1741_s22 }
  0x60   : > { %1000 = vrot.lane.b32.xlu0 %v1798_v2, %s1741_s22  ;;  %1014 = vrot.lane.b32.xlu1 %v1808_v4, %s1741_s22 }
  0x64   : > { %1016 = vrot.lane.b32.xlu0 %v1813_v5, %s1741_s22  ;;  %1012 = vrot.lane.b32.xlu1 %v1818_v6, %s1741_s22 }
  0x68   : > { %1026 = vrot.lane.b32.xlu0 %v1823_v7, %s1741_s22  ;;  %1028 = vrot.lane.b32.xlu1 %v1828_v8, %s1741_s22 }
  0x6c   : > { %1024 = vrot.lane.b32.xlu0 %v1833_v9, %s1741_s22  ;;  %1038 = vrot.lane.b32.xlu1 %v1838_v10, %s1741_s22 }
  0x70   : > { %1040 = vrot.lane.b32.xlu0 %v1843_v11, %s1741_s22  ;;  %1036 = vrot.lane.b32.xlu1 %v1848_v12, %s1741_s22 }
  0x74   : > { %1050 = vrot.lane.b32.xlu0 %v1853_v13, %s1741_s22  ;;  %1052 = vrot.lane.b32.xlu1 %v1858_v14, %s1741_s22 }
  0x78   : > { %1048 = vrot.lane.b32.xlu0 %v1861_v15, %s1741_s22  ;;  %1062 = vrot.lane.b32.xlu1 %v1864_v16, %s1741_s22 }
  0x7c   : > { %1064 = vrot.lane.b32.xlu0 %v1873_v17, %s1741_s22  ;;  %1006 = vrot.lane.b32.xlu1 %v1879_v19, %s1741_s22 }
  0x80   : > { %1008 = vrot.lane.b32.xlu0 %v1685_v20, %s1741_s22  ;;  %1060 = vrot.lane.b32.xlu1 %v1889_v21, %s1741_s22 }
  0x84   : > { %1010 = vrot.lane.b32.xlu0 %v1688_v22, %s1741_s22  ;;  %1018 = vrot.lane.b32.xlu1 %v1896_v23, %s1741_s22 }
  0x86   : > { %v461_v38 = vpop.permute.xlu0 %460  ;;  %v459_v39 = vpop.permute.xlu1 %458 }
  0x87   : > { %v531_v43 = vsel %vm530_vm0, %v459_v39, %v461_v38 }
  0x88   : > { %1020 = vrot.lane.b32.xlu0 %v1690_v24, %s1741_s22  ;;  %1022 = vrot.lane.b32.xlu1 %v1692_v25, %s1741_s22 }
  0x8a   : > { %v463_v40 = vpop.permute.xlu0 %462  ;;  %v473_v41 = vpop.permute.xlu1 %472 }
  0x8b   : > { %v532_v42 = vsel %vm530_vm0, %v461_v38, %v463_v40 }
  0x8c   : > { %595 = vmatprep.subr.bf16.mxu0 %v532_v42  ;;  %1030 = vrot.lane.b32.xlu0 %v1905_v26, %s1741_s22 }
  0x8d   : > { %1032 = vrot.lane.b32.xlu1 %v1694_v27, %s1741_s22  ;;  %596 = vmatpush1.bf16.msra.mxu0 %v531_v43 }
  0x8e   : > { %v2005_v44 = vpop.permute.xlu0 %474  ;;  %v471_v45 = vpop.permute.xlu1 %470 }
  0x8f   : > { %v537_v46 = vsel %vm530_vm0, %v473_v41, %v2005_v44  ;;  %v536_v47 = vsel %vm530_vm0, %v471_v45, %v473_v41 }
  0x90   : > { %1034 = vrot.lane.b32.xlu0 %v1696_v28, %s1741_s22  ;;  %597 = vmatprep.subr.bf16.mxu0 %v537_v46 }
  0x91   : > { %1042 = vrot.lane.b32.xlu1 %v1914_v29, %s1741_s22  ;;  %598 = vmatpush1.bf16.msra.mxu0 %v536_v47 }
  0x92   : > { %v485_v48 = vpop.permute.xlu0 %484  ;;  %v2013_v49 = vpop.permute.xlu1 %486 }
  0x93   : > { %v542_v50 = vsel %vm530_vm0, %v485_v48, %v2013_v49 }
  0x94   : > { %1044 = vrot.lane.b32.xlu0 %v1698_v30, %s1741_s22  ;;  %599 = vmatprep.subr.bf16.mxu0 %v542_v50 }
  0x95   : > { %1046 = vrot.lane.b32.xlu1 %v1921_v31, %s1741_s22 }
  0x96   : > { %v483_v51 = vpop.permute.xlu0 %482  ;;  %v497_v52 = vpop.permute.xlu1 %496 }
  0x97   : > { %v541_v53 = vsel %vm530_vm0, %v483_v51, %v485_v48 }
  0x98   : > { %1054 = vrot.lane.b32.xlu0 %v1925_v32, %s1741_s22  ;;  %600 = vmatpush1.bf16.msra.mxu0 %v541_v53 }
  0x99   : > { %1056 = vrot.lane.b32.xlu1 %v1930_v33, %s1741_s22  ;;  %v2053_v33 = vld [vmem:[%s2248_s1 + $0x1] sm:$0x1] }
  0x9a   : > { %v2025_v54 = vpop.permute.xlu0 %498  ;;  %v495_v55 = vpop.permute.xlu1 %494 }
  0x9b   : > { %v547_v56 = vsel %vm530_vm0, %v497_v52, %v2025_v54  ;;  %v546_v57 = vsel %vm530_vm0, %v495_v55, %v497_v52 }
  0x9c   : > { %1058 = vrot.lane.b32.xlu0 %v1935_v34, %s1741_s22  ;;  %601 = vmatprep.subr.bf16.mxu0 %v547_v56 }
  0x9d   : > { %1066 = vrot.lane.b32.xlu1 %v1940_v35, %s1741_s22  ;;  %602 = vmatpush1.bf16.msra.mxu0 %v546_v57 }
  0x9e   : > { %v509_v58 = vpop.permute.xlu0 %508  ;;  %v2034_v59 = vpop.permute.xlu1 %510 }
  0x9f   : > { %v552_v60 = vsel %vm530_vm0, %v509_v58, %v2034_v59 }
  0xa0   : > { %1068 = vrot.lane.b32.xlu0 %v1945_v36, %s1741_s22  ;;  %603 = vmatprep.subr.bf16.mxu0 %v552_v60  ;;  %v1742_v36 = vmov 0.0  }
  0xa1   : > { %1070 = vrot.lane.b32.xlu1 %v1950_v37, %s1741_s22 }
  0xa2   : > { %v507_v62 = vpop.permute.xlu0 %506  ;;  %v521_v63 = vpop.permute.xlu1 %520 }
  0xa3   : > { %v551_v0 = vsel %vm530_vm0, %v507_v62, %v509_v58 }
  0xa4   : > { %604 = vmatpush1.bf16.msra.mxu0 %v551_v0  ;;  %1266 = vperm.xlu0 %1654, %v1263_v61  }
  0xa6   : > { %v2043_v20 = vpop.permute.xlu0 %522  ;;  %v465_v22 = vpop.permute.xlu1 %464 }
  0xa7   : > { %v557_v24 = vsel %vm530_vm0, %v521_v63, %v2043_v20  ;;  %v533_v31 = vsel %vm530_vm0, %v463_v40, %v465_v22 }
  0xa8   : > { %605 = vmatprep.subr.bf16.mxu0 %v557_v24 }
  0xaa   : > { %v467_v25 = vpop.permute.xlu0 %466  ;;  %v519_v27 = vpop.permute.xlu1 %518 }
  0xab   : > { %v534_v28 = vsel %vm530_vm0, %v465_v22, %v467_v25  ;;  %v556_v30 = vsel %vm530_vm0, %v519_v27, %v521_v63 }
  0xac   : > { %636 = vmatprep.subr.bf16.mxu1 %v534_v28  ;;  %606 = vmatpush1.bf16.msra.mxu0 %v556_v30 }
  0xad   : > { %637 = vmatpush1.bf16.msra.mxu1 %v533_v31  ;;  %1574 = vmatprep.subr.bf16.mxu0 %v1742_v36 }
  0xae   : > { %v469_v34 = vpop.permute.xlu0 %468  ;;  %v477_v38 = vpop.permute.xlu1 %476 }
  0xaf   : > { %v535_v37 = vsel %vm530_vm0, %v467_v25, %v469_v34  ;;  %1509 = vmatmul.mubr.msk.bf16.vlgmr.msra.gmra.mrb[0].mxu0 %vm591_vm1, %v2053_v33  ;;  %v538_v43 = vsel %vm530_vm0, %v2005_v44, %v477_v38 }
  0xb0   : > { %1575 = vmatpush3.bf16.msra.mxu0 %v535_v37  ;;  %1586 = vmatprep.mubr.msk.bf16.mxu0 %vm1743_vm2, %v1742_v36 }
  0xb1   : > { %1576 = vmatprep.subr.bf16.mxu0 %v1742_v36 }
  0xb2   : > { %v479_v39 = vpop.permute.xlu0 %478  ;;  %v481_v40 = vpop.permute.xlu1 %480 }
  0xb3   : > { %v539_v41 = vsel %vm530_vm0, %v477_v38, %v479_v39  ;;  %v540_v42 = vsel %vm530_vm0, %v479_v39, %v481_v40  ;;  %v1713_v40 = vld [vmem:[%s1792_s20 + $0xd0] ss:$24 sps:$4 sm:$0xff]  }
  0xb4   : > { %638 = vmatprep.subr.bf16.mxu1 %v539_v41  ;;  %1577 = vmatpush3.bf16.msra.mxu0 %v540_v42 }
  0xb5   : > { %639 = vmatpush1.bf16.msra.mxu1 %v538_v43  ;;  %1578 = vmatprep.subr.bf16.mxu0 %v1742_v36 }
  0xb6   : > { %v489_v45 = vpop.permute.xlu0 %488  ;;  %v491_v46 = vpop.permute.xlu1 %490 }
  0xb7   : > { %v543_v47 = vsel %vm530_vm0, %v2013_v49, %v489_v45  ;;  %v544_v48 = vsel %vm530_vm0, %v489_v45, %v491_v46 }
  0xb8   : > { %640 = vmatprep.subr.bf16.mxu1 %v544_v48 }
  0xb9   : > { %641 = vmatpush1.bf16.msra.mxu1 %v543_v47 }
  0xba   : > { %v493_v50 = vpop.permute.xlu0 %492  ;;  %v501_v52 = vpop.permute.xlu1 %500 }
  0xbb   : > { %v545_v51 = vsel %vm530_vm0, %v491_v46, %v493_v50  ;;  %v548_v49 = vsel %vm530_vm0, %v2025_v54, %v501_v52  ;;  %v1714_v46 = vld [vmem:[%s1792_s20 + $0x100] ss:$24 sps:$4 sm:$0xff]  }
  0xbc   : > { %1579 = vmatpush3.bf16.msra.mxu0 %v545_v51 }
  0xbd   : > { %1580 = vmatprep.subr.bf16.mxu0 %v1742_v36 }
  0xbe   : > { %v503_v44 = vpop.permute.xlu0 %502  ;;  %v505_v53 = vpop.permute.xlu1 %504 }
  0xbf   : > { %v549_v55 = vsel %vm530_vm0, %v501_v52, %v503_v44  ;;  %v550_v56 = vsel %vm530_vm0, %v503_v44, %v505_v53  ;;  %v1545_v52 = vld [vmem:[%s2248_s1 + $0x2] sm:$0x1] }
  0xc0   : > { %642 = vmatprep.subr.bf16.mxu1 %v549_v55  ;;  %1581 = vmatpush3.bf16.msra.mxu0 %v550_v56 }
  0xc1   : > { %643 = vmatpush1.bf16.msra.mxu1 %v548_v49  ;;  %1582 = vmatprep.subr.bf16.mxu0 %v1742_v36 }
  0xc2   : > { %v513_v57 = vpop.permute.xlu0 %512  ;;  %v515_v58 = vpop.permute.xlu1 %514 }
  0xc3   : > { %v553_v60 = vsel %vm530_vm0, %v2034_v59, %v513_v57  ;;  %v554_v61 = vsel %vm530_vm0, %v513_v57, %v515_v58 }
  0xc4   : > { %644 = vmatprep.subr.bf16.mxu1 %v554_v61 }
  0xc5   : > { %645 = vmatpush1.bf16.msra.mxu1 %v553_v60 }
  0xc6   : > { %v517_v62 = vpop.permute.xlu0 %516  ;;  %v525_v0 = vpop.permute.xlu1 %524 }
  0xc7   : > { %v555_v63 = vsel %vm530_vm0, %v515_v58, %v517_v62  ;;  %v558_v59 = vsel %vm530_vm0, %v2043_v20, %v525_v0 }
  0xc8   : > { %1583 = vmatpush3.bf16.msra.mxu0 %v555_v63 }
  0xc9   : > { %1584 = vmatprep.subr.bf16.mxu0 %v1742_v36 }
  0xca   : > { %v527_v54 = vpop.permute.xlu0 %526  ;;  %v529_v22 = vpop.permute.xlu1 %528 }
  0xcb   : > { %v559_v24 = vsel %vm530_vm0, %v525_v0, %v527_v54  ;;  %v560_v25 = vsel %vm530_vm0, %v527_v54, %v529_v22  ;;  %vm2228_vm0 = vmor %vm1337_vm13, %vm1334_vm12 }
  0xcc   : > { %646 = vmatprep.subr.bf16.mxu1 %v559_v24  ;;  %1585 = vmatpush3.bf16.msra.mxu0 %v560_v25 }
  0xcd   : > { %647 = vmatpush1.bf16.msra.mxu1 %v558_v59  ;;  %917 = vmatprep.subr.bf16.mxu0 %v1879_v19 }
  0xce   : > { %v1003_v27 = vpop.permute.xlu0 %1002  ;;  %876 = vmatprep.subr.bf16.mxu1 %v1795_v1  ;;  %v2088_v28 = vpop.permute.xlu1 %1004 }
  0xcf   : > { %1587 = vmatmul.mubr.msk.bf16.vlgmr.msra.gmra.mrb[4].mxu0 %vm591_vm1, %v2053_v33 }
  0xd0   : > { %1510 = vmatmul.mubr.msk.bf16.vlgmr.msra.gmra.mrb[0].mxu1 %vm591_vm1, %v2053_v33  ;;  %918 = vmatpush1.bf16.msra.mxu0 %v1803_v3  ;;  %v1712_v33 = vld [vmem:[%s1792_s20 + $0xa0] ss:$24 sps:$4 sm:$0xff]  }
  0xd1   : > { %877 = vmatpush1.bf16.msra.mxu1 %v1798_v2  ;;  %919 = vmatprep.subr.bf16.mxu0 %v1896_v23 }
  0xd2   : > { %v1001_v20 = vpop.permute.xlu0 %1000  ;;  %878 = vmatprep.subr.bf16.mxu1 %v1808_v4  ;;  %v1015_v19 = vpop.permute.xlu1 %1014  ;;  %949 = vmatprep.mubr.bf16.mxu0 %v1740_v18 }
  0xd3   : > { %908 = vmatprep.mubr.bf16.mxu1 %v1740_v18 }
  0xd4   : > { %920 = vmatpush1.bf16.msra.mxu0 %v1813_v5 }
  0xd5   : > { %879 = vmatpush1.bf16.msra.mxu1 %v1818_v6  ;;  %921 = vmatprep.subr.bf16.mxu0 %v1905_v26 }
  0xd6   : > { %v2102_v1 = vpop.permute.xlu0 %1016  ;;  %880 = vmatprep.subr.bf16.mxu1 %v1823_v7  ;;  %v1013_v2 = vpop.permute.xlu1 %1012 }
  0xd7   : > { %v1078_v23 = vsel %vm1072_vm3, %v1013_v2, %v1015_v19 }
  0xd8   : > { %922 = vmatpush1.bf16.msra.mxu0 %v1828_v8 }
  0xd9   : > { %881 = vmatpush1.bf16.msra.mxu1 %v1833_v9  ;;  %923 = vmatprep.subr.bf16.mxu0 %v1914_v29  ;;  %v1074_v9 = vsel %vm1072_vm3, %v1003_v27, %v2088_v28  ;;  %v1711_v29 = vld [vmem:[%s1792_s20 + $0x70] ss:$24 sps:$4 sm:$0xff]  }
  0xda   : > { %v1027_v3 = vpop.permute.xlu0 %1026  ;;  %882 = vmatprep.subr.bf16.mxu1 %v1838_v10  ;;  %v2110_v4 = vpop.permute.xlu1 %1028  ;;  %v2129_v10 = vld [vmem:[%s2248_s1] sm:$0x1] }
  0xdb   : > { %v1084_v26 = vsel %vm1072_vm3, %v1027_v3, %v2110_v4 }
  0xdc   : > { %924 = vmatpush1.bf16.msra.mxu0 %v1843_v11  ;;  %v1709_v11 = vld [vmem:[%s1792_s20 + $0x10] ss:$24 sps:$4 sm:$0xff]  }
  0xdd   : > { %883 = vmatpush1.bf16.msra.mxu1 %v1848_v12  ;;  %925 = vmatprep.subr.bf16.mxu0 %v1925_v32 }
  0xde   : > { %v1025_v5 = vpop.permute.xlu0 %1024  ;;  %884 = vmatprep.subr.bf16.mxu1 %v1853_v13  ;;  %v1039_v6 = vpop.permute.xlu1 %1038 }
  0xdf   : > { %v1083_v30 = vsel %vm1072_vm3, %v1025_v5, %v1027_v3 }
  0xe0   : > { %926 = vmatpush1.bf16.msra.mxu0 %v1858_v14  ;;  %v1073_v14 = vsel %vm1072_vm3, %v1001_v20, %v1003_v27 }
  0xe1   : > { %885 = vmatpush1.bf16.msra.mxu1 %v1861_v15  ;;  %927 = vmatprep.subr.bf16.mxu0 %v1940_v35  ;;  %v1079_v15 = vsel %vm1072_vm3, %v1015_v19, %v2102_v1 }
  0xe2   : > { %v2118_v7 = vpop.permute.xlu0 %1040  ;;  %886 = vmatprep.subr.bf16.mxu1 %v1864_v16  ;;  %v1037_v8 = vpop.permute.xlu1 %1036  ;;  %v1710_v16 = vld [vmem:[%s1792_s20 + $0x40] ss:$24 sps:$4 sm:$0xff]  }
  0xe3   : > { %v1089_v31 = vsel %vm1072_vm3, %v1039_v6, %v2118_v7  ;;  %v1088_v38 = vsel %vm1072_vm3, %v1037_v8, %v1039_v6 }
  0xe4   : > { %928 = vmatpush1.bf16.msra.mxu0 %v1873_v17 }
  0xe5   : > { %887 = vmatpush1.bf16.msra.mxu1 %v1889_v21  ;;  %1136 = vmatprep.subr.bf16.mxu0 %v1074_v9 }
  0xe6   : > { %v1051_v12 = vpop.permute.xlu0 %1050  ;;  %1590 = vmatprep.subr.bf16.mxu1 %v1742_v36  ;;  %v2133_v13 = vpop.permute.xlu1 %1052 }
  0xe7   : > { %1543 = vmatmul.mubr.msk.bf16.vlgmr.msra.gmra.mrb[8].mxu0 %vm591_vm1, %v2129_v10  ;;  %v1094_v39 = vsel %vm1072_vm3, %v1051_v12, %v2133_v13 }
  0xe8   : > { %1542 = vmatmul.mubr.msk.bf16.vlgmr.msra.gmra.mrb[4].mxu1 %vm591_vm1, %v2129_v10  ;;  %1137 = vmatpush1.bf16.msra.mxu0 %v1073_v14 }
  0xe9   : > { %1591 = vmatpush3.bf16.msra.mxu1 %v1709_v11  ;;  %1138 = vmatprep.subr.bf16.mxu0 %v1079_v15 }
  0xea   : > { %v1049_v17 = vpop.permute.xlu0 %1048  ;;  %1592 = vmatprep.subr.bf16.mxu1 %v1742_v36  ;;  %v1063_v21 = vpop.permute.xlu1 %1062  ;;  %1168 = vmatprep.mubr.bf16.mxu0 %v1740_v18 }
  0xeb   : > { %1602 = vmatprep.mubr.msk.bf16.mxu1 %vm1743_vm2, %v1742_v36  ;;  %v1093_v43 = vsel %vm1072_vm3, %v1049_v17, %v1051_v12 }
  0xec   : > { %1139 = vmatpush1.bf16.msra.mxu0 %v1078_v23 }
  0xed   : > { %1593 = vmatpush3.bf16.msra.mxu1 %v1710_v16  ;;  %1140 = vmatprep.subr.bf16.mxu0 %v1084_v26 }
  0xee   : > { %v2151_v32 = vpop.permute.xlu0 %1064  ;;  %1594 = vmatprep.subr.bf16.mxu1 %v1742_v36  ;;  %v1007_v35 = vpop.permute.xlu1 %1006 }
  0xef   : > { %v1099_v45 = vsel %vm1072_vm3, %v1063_v21, %v2151_v32  ;;  %v1075_v55 = vsel %vm1072_vm3, %v2088_v28, %v1007_v35 }
  0xf0   : > { %1141 = vmatpush1.bf16.msra.mxu0 %v1083_v30 }
  0xf1   : > { %1595 = vmatpush3.bf16.msra.mxu1 %v1711_v29  ;;  %1142 = vmatprep.subr.bf16.mxu0 %v1089_v31 }
  0xf2   : > { %v1009_v34 = vpop.permute.xlu0 %1008  ;;  %1596 = vmatprep.subr.bf16.mxu1 %v1742_v36  ;;  %v1061_v37 = vpop.permute.xlu1 %1060 }
  0xf3   : > { %v1098_v50 = vsel %vm1072_vm3, %v1061_v37, %v1063_v21  ;;  %v1076_v51 = vsel %vm1072_vm3, %v1007_v35, %v1009_v34 }
  0xf4   : > { %1143 = vmatpush1.bf16.msra.mxu0 %v1088_v38 }
  0xf5   : > { %1597 = vmatpush3.bf16.msra.mxu1 %v1712_v33  ;;  %1144 = vmatprep.subr.bf16.mxu0 %v1094_v39 }
  0xf6   : > { %v1011_v41 = vpop.permute.xlu0 %1010  ;;  %1598 = vmatprep.subr.bf16.mxu1 %v1742_v36  ;;  %v1019_v42 = vpop.permute.xlu1 %1018 }
  0xf7   : > { %v1077_v56 = vsel %vm1072_vm3, %v1009_v34, %v1011_v41  ;;  %v1080_v60 = vsel %vm1072_vm3, %v2102_v1, %v1019_v42 }
  0xf8   : > { %1145 = vmatpush1.bf16.msra.mxu0 %v1093_v43 }
  0xf9   : > { %1599 = vmatpush3.bf16.msra.mxu1 %v1713_v40  ;;  %1146 = vmatprep.subr.bf16.mxu0 %v1099_v45  ;;  %v1269_v40 = vlaneseq }
  0xfa   : > { %v1021_v47 = vpop.permute.xlu0 %1020  ;;  %1600 = vmatprep.subr.bf16.mxu1 %v1742_v36  ;;  %v1023_v48 = vpop.permute.xlu1 %1022 }
  0xfb   : > { %v1081_v49 = vsel %vm1072_vm3, %v1019_v42, %v1021_v47  ;;  %v1082_v61 = vsel %vm1072_vm3, %v1021_v47, %v1023_v48  ;;  %v1270_v41 = vshrl.u32 %v1269_v40, 7 }
  0xfc   : > { %1147 = vmatpush1.bf16.msra.mxu0 %v1098_v50 }
  0xfd   : > { %1601 = vmatpush3.bf16.msra.mxu1 %v1714_v46  ;;  %1606 = vmatprep.subr.bf16.mxu0 %v1742_v36  ;;  %v1271_v42 = vsub.s32 0, %v1270_v41 }
  0xfe   : > { %v1031_v44 = vpop.permute.xlu0 %1030  ;;  %1177 = vmatprep.subr.bf16.mxu1 %v1076_v51 }
  0xff   : > { %v1033_v53 = vpop.permute.xlu1 %1032  ;;  %1546 = vmatmul.mubr.msk.bf16.vlgmr.msra.gmra.mrb[12].mxu0 %vm591_vm1, %v1545_v52  ;;  %v1085_v54 = vsel %vm1072_vm3, %v2110_v4, %v1031_v44 }
 0x100   : > { %1603 = vmatmul.mubr.msk.bf16.vlgmr.msra.gmra.mrb[8].mxu1 %vm591_vm1, %v2129_v10  ;;  %1607 = vmatpush3.bf16.msra.mxu0 %v1077_v56  ;;  %v1086_v62 = vsel %vm1072_vm3, %v1031_v44, %v1033_v53 }
 0x101   : > { %1178 = vmatpush1.bf16.msra.mxu1 %v1075_v55  ;;  %1608 = vmatprep.subr.bf16.mxu0 %v1742_v36 }
 0x102   : > { %v1035_v57 = vpop.permute.xlu0 %1034  ;;  %1179 = vmatprep.subr.bf16.mxu1 %v1081_v49  ;;  %1618 = vmatprep.mubr.msk.bf16.mxu0 %vm1743_vm2, %v1742_v36  ;;  %vm1343_vm2 = vcmask 1044484  }
 0x103   : > { %v1043_v58 = vpop.permute.xlu1 %1042  ;;  %1209 = vmatprep.mubr.bf16.mxu1 %v1740_v18  ;;  %v1087_v22 = vsel %vm1072_vm3, %v1033_v53, %v1035_v57 }
 0x104   : > { %1609 = vmatpush3.bf16.msra.mxu0 %v1082_v61  ;;  %v1090_v59 = vsel %vm1072_vm3, %v2118_v7, %v1043_v58  ;;  %v1744_v61 = vmov 1966171168  }
 0x105   : > { %1180 = vmatpush1.bf16.msra.mxu1 %v1080_v60  ;;  %1610 = vmatprep.subr.bf16.mxu0 %v1742_v36 }
 0x106   : > { %v1045_v63 = vpop.permute.xlu0 %1044  ;;  %1181 = vmatprep.subr.bf16.mxu1 %v1086_v62  ;;  %v1291_v62 = vunpack.c.l.s4 %v1744_v61 }
 0x107   : > { %v1047_v0 = vpop.permute.xlu1 %1046  ;;  %v1091_v18 = vsel %vm1072_vm3, %v1043_v58, %v1045_v63 }
 0x108   : > { %1611 = vmatpush3.bf16.msra.mxu0 %v1087_v22  ;;  %v1092_v27 = vsel %vm1072_vm3, %v1045_v63, %v1047_v0 }
 0x109   : > { %1182 = vmatpush1.bf16.msra.mxu1 %v1085_v54  ;;  %1612 = vmatprep.subr.bf16.mxu0 %v1742_v36  ;;  %v1292_v54 = vunpack.c.0.s8 %v1291_v62 }
 0x10a   : > { %v1055_v24 = vpop.permute.xlu0 %1054  ;;  %1183 = vmatprep.subr.bf16.mxu1 %v1091_v18 }
 0x10b   : > { %v1057_v25 = vpop.permute.xlu1 %1056  ;;  %v1095_v2 = vsel %vm1072_vm3, %v2133_v13, %v1055_v24 }
 0x10c   : > { %1613 = vmatpush3.bf16.msra.mxu0 %v1092_v27  ;;  %v1096_v28 = vsel %vm1072_vm3, %v1055_v24, %v1057_v25 }
 0x10d   : > { %1184 = vmatpush1.bf16.msra.mxu1 %v1090_v59  ;;  %1614 = vmatprep.subr.bf16.mxu0 %v1742_v36 }
 0x10e   : > { %v1059_v20 = vpop.permute.xlu0 %1058  ;;  %1185 = vmatprep.subr.bf16.mxu1 %v1096_v28 }
 0x10f   : > { %v1097_v19 = vsel %vm1072_vm3, %v1057_v25, %v1059_v20  ;;  %v1067_v1 = vpop.permute.xlu1 %1066 }
 0x110   : > { %1615 = vmatpush3.bf16.msra.mxu0 %v1097_v19  ;;  %v1100_v6 = vsel %vm1072_vm3, %v2151_v32, %v1067_v1 }
 0x111   : > { %1186 = vmatpush1.bf16.msra.mxu1 %v1095_v2  ;;  %1616 = vmatprep.subr.bf16.mxu0 %v1742_v36 }
 0x112   : > { %v1069_v3 = vpop.permute.xlu0 %1068 }
 0x113   : > { %v1071_v4 = vpop.permute.xlu1 %1070  ;;  %v1101_v5 = vsel %vm1072_vm3, %v1067_v1, %v1069_v3 }
 0x114   : > { %v1102_v7 = vsel %vm1072_vm3, %v1069_v3, %v1071_v4  ;;  %1187 = vmatprep.subr.bf16.mxu1 %v1101_v5  ;;  %v1295_v5 = vsub.s32 %v1292_v54, %v1270_v41  ;;  %vm1344_vm3 = vsmask.f32 4352 }
 0x115   : > { %1617 = vmatpush3.bf16.msra.mxu0 %v1102_v7  ;;  %1188 = vmatpush1.bf16.msra.mxu1 %v1100_v6  ;;  %vm1345_vm5 = vmand %vm1343_vm2, %vm1344_vm3 }
 0x118   : > { %1619 = vmatmul.mubr.msk.bf16.vlgmr.msra.gmra.mrb[16].mxu0 %vm591_vm1, %v1545_v52  ;;  %1547 = vmatmul.mubr.msk.bf16.vlgmr.msra.gmra.mrb[12].mxu1 %vm591_vm1, %v1545_v52  ;;  %vm1341_vm1 = vmand %vm1339_vm14, %vm1340_vm15 }
 0x119   : > { %vm1342_vm4 = vmor %vm1341_vm1, %vm2228_vm0 }
 0x11a   : > { %vm1346_vm6 = vmor %vm1345_vm5, %vm1342_vm4 }
 0x123   : > { %v1267_v43 = vpop.permute.xlu0 %1266 }
 0x124   : > { %v1272_v45 = vrot.slane %v1267_v43, %v1271_v42 }
 0x182   : > { %v629_v8 = vpop.f32.mrb[0].mxu0 }
 0x183   : > { %v631_v9 = vpop.f32.mrb[1].mxu0 }
 0x184   : > { %v633_v10 = vpop.f32.mrb[2].mxu0 }
 0x185   : > { %v634_v11 = vpop.f32.mrb[3].mxu0 }
 0x1a2   : > { %v711_v12 = vpop.f32.mrb[4].mxu0 }
 0x1a3   : > { %v670_v36 = vpop.f32.mrb[0].mxu1  ;;  %v1588_v14 = vpop.f32.mrb[5].mxu0 }
 0x1a4   : > { %v672_v13 = vpop.f32.mrb[1].mxu1  ;;  %v714_v16 = vpop.f32.mrb[6].mxu0 }
 0x1a5   : > { %v674_v15 = vpop.f32.mrb[2].mxu1  ;;  %v1589_v21 = vpop.f32.mrb[7].mxu0 }
 0x1a6   : > { %v675_v17 = vpop.f32.mrb[3].mxu1  ;;  %v1347_v15 = vld [vmem:[%s237_s5] sm:$0x1f] }
 0x1ba   : > { %v951_v23 = vpop.f32.mrb[8].mxu0 }
 0x1bb   : > { %v910_v26 = vpop.f32.mrb[4].mxu1  ;;  %v952_v29 = vadd.f32 %v951_v23, %v670_v36  ;;  %v953_v35 = vpop.f32.mrb[9].mxu0 }
 0x1bc   : > { %v911_v32 = vadd.f32 %v910_v26, %v629_v8  ;;  %v912_v30 = vpop.f32.mrb[5].mxu1  ;;  %v954_v31 = vadd.f32 %v953_v35, %v672_v13  ;;  %v955_v37 = vpop.f32.mrb[10].mxu0 }
 0x1bd   : > { %v913_v33 = vadd.f32 %v912_v30, %v631_v9  ;;  %v914_v34 = vpop.f32.mrb[6].mxu1  ;;  %v956_v39 = vpop.f32.mrb[11].mxu0 }
 0x1be   : > { %v915_v38 = vpop.f32.mrb[7].mxu1 }
 0x1d2   : > { %v1170_v46 = vpop.f32.mrb[12].mxu0 }
 0x1d3   : > { %v992_v47 = vpop.f32.mrb[8].mxu1  ;;  %v1258_v48 = vadd.f32 %v1170_v46, %v911_v32  ;;  %v1172_v51 = vpop.f32.mrb[13].mxu0 }
 0x1d4   : > { %v993_v50 = vadd.f32 %v992_v47, %v711_v12  ;;  %v1604_v52 = vpop.f32.mrb[9].mxu1  ;;  %v1259_v44 = vadd.f32 %v1172_v51, %v913_v33  ;;  %v1174_v55 = vpop.f32.mrb[14].mxu0 }
 0x1d5   : > { %v995_v53 = vpop.f32.mrb[10].mxu1  ;;  %v1273_v56 = vadd.f32 %v1272_v45, %v1258_v48  ;;  %v1175_v57 = vpop.f32.mrb[15].mxu0 }
 0x1d6   : > { %v1605_v49 = vpop.f32.mrb[11].mxu1  ;;  %v1274_v58 = vadd.f32 %v1272_v45, %v1259_v44 }
 0x1d8   : > { %v1549_v60 = vpack.c.bf16 %v1274_v58, %v1273_v56 }
 0x1da   : > { %v1296_v10 = vrot.slane %v1549_v60, %v1295_v5 }
 0x1eb   : > { %v1252_v22 = vpop.f32.mrb[16].mxu0  ;;  %v1211_v18 = vpop.f32.mrb[12].mxu1 }
 0x1ec   : > { %v1262_v24 = vadd.f32 %v1252_v22, %v993_v50  ;;  %v1260_v25 = vadd.f32 %v1211_v18, %v952_v29  ;;  %v1213_v59 = vpop.f32.mrb[13].mxu1  ;;  %v1620_v27 = vpop.f32.mrb[17].mxu0 }
 0x1ed   : > { %v1261_v28 = vadd.f32 %v1213_v59, %v954_v31  ;;  %v1215_v20 = vpop.f32.mrb[14].mxu1  ;;  %v1255_v19 = vpop.f32.mrb[18].mxu0 }
 0x1ee   : > { %v1277_v1 = vadd.f32 %v1272_v45, %v1262_v24  ;;  %v1275_v2 = vadd.f32 %v1272_v45, %v1260_v25  ;;  %v1216_v3 = vpop.f32.mrb[15].mxu1  ;;  %v1621_v4 = vpop.f32.mrb[19].mxu0 }
 0x1ef   : > { %v1276_v6 = vadd.f32 %v1272_v45, %v1261_v28 }
 0x1f0   : > { %v1282_v7 = vpack.c.bf16 %v1277_v1, %v1277_v1 }
 0x1f1   : > { %v1550_v9 = vpack.c.bf16 %v1276_v6, %v1275_v2 }
 0x1f2   : > { %v1310_v11 = vrot.slane %v1282_v7, %v1295_v5 }
 0x1f3   : > { %v1303_v36 = vrot.slane %v1550_v9, %v1295_v5 }
 0x1f4   : > { %v1325_v13 = vrot.slane %v1310_v11, %v1295_v5 }
 0x1f5   : > { %v1311_v12 = vcombine.low %v1296_v10, %v1303_v36 }
 0x1f7   : > { %v1318_v14 = vrot.slane %v1311_v12, %v1295_v5 }
 0x1f9   : > { %v1326_v16 = vcombine.low %v1318_v14, %v1325_v13 }
 0x1fb   : > { %v1348_v17 = vsel %vm1346_vm6, %v1326_v16, %v1347_v15 }
 0x1fc   : > { %1349 = vst [vmem:[%s237_s5] sm:$0x1f] %v1348_v17 }
 0x1fd PF: > { %s15_s16 = sadd.s32 1, %s1737_s16   ;;  %s2257_s14 = smov %s1733_s15 }
 0x1fe   : > { %p12_p5 = scmp.ge.s32.totalorder %s15_s16, 4   ;;  %s2258_s15 = smov %s2260_s2 }
 0x200   :  { %14 = sbr.rel (!%p12_p5) target bundleno = 3 (0x3), region = 70 }

</bundles_post_ra>
